<compile_context>
chip_gen: v5e
topology: v5e:2x2
jax: 0.10.0
libtpu: 0.0.40
codegen_flags: <defaults>
</compile_context>

<pallas_src>
import functools

import jax
import jax.numpy as jnp
from jax.experimental import pallas as pl
from jax.experimental.pallas import tpu as pltpu


def _round_up(x, m):
    return (x + m - 1) // m * m


# ----------------------------------------------------------------------------
# Kernel 1: fused point-wise MLP chain (matmul + bias + act per layer).
#   grid over row tiles, weights/bias resident in VMEM, bf16 x bf16 -> f32.
# ----------------------------------------------------------------------------
def _mlp_kernel(*refs, acts):
    n = len(acts)
    x_ref = refs[0]
    w_refs = refs[1:1 + n]
    b_refs = refs[1 + n:1 + 2 * n]
    o_ref = refs[1 + 2 * n]

    h = x_ref[...]                                     # (TM, K0p) bf16
    for i, act in enumerate(acts):
        y = jnp.dot(h, w_refs[i][...], preferred_element_type=jnp.float32)
        y = y + b_refs[i][...]                         # (1, Np) broadcast
        if act == "relu":
            y = jnp.maximum(y, 0.0)
        elif act == "tanh":
            y = jnp.tanh(y)
        h = y.astype(jnp.bfloat16) if i + 1 < n else y  # keep f32 epilogue
    o_ref[...] = h.astype(o_ref.dtype)


def pallas_mlp(x2d, layers, out_dim):
    """Fused chain of dense layers.

    x2d:    (M, K0) float32.
    layers: list of (w (K, N) f32, b (N,) f32, act in {"relu","tanh","none"}).
    Returns (M, out_dim) float32.
    Channel dims are zero-padded to multiples of 128 (lane-dense stores);
    padded columns stay exactly zero through relu/tanh/none so chaining is
    mathematically exact.
    """
    M, K0 = x2d.shape
    acts = tuple(a for _, _, a in layers)
    n = len(layers)

    # Pad weights / biases; chained widths must line up with padded widths.
    kp = _round_up(K0, 128)
    ws, bs = [], []
    for (w, b, _) in layers:
        K, N = w.shape
        Np = _round_up(N, 128)
        wp = jnp.zeros((kp, Np), jnp.bfloat16).at[:K, :N].set(w.astype(jnp.bfloat16))
        bp = jnp.zeros((1, Np), jnp.float32).at[:, :N].set(b.astype(jnp.float32))
        ws.append(wp)
        bs.append(bp)
        kp = Np
    K0p = ws[0].shape[0]
    NLp = ws[-1].shape[1]

    TM = min(256, _round_up(M, 8))
    Mp = _round_up(M, TM)
    xp = jnp.zeros((Mp, K0p), jnp.bfloat16).at[:M, :K0].set(x2d.astype(jnp.bfloat16))

    in_specs = [pl.BlockSpec((TM, K0p), lambda i: (i, 0))]
    in_specs += [pl.BlockSpec(w.shape, lambda i: (0, 0)) for w in ws]
    in_specs += [pl.BlockSpec(b.shape, lambda i: (0, 0)) for b in bs]
    out_specs = pl.BlockSpec((TM, NLp), lambda i: (i, 0))

    flops = 2 * Mp * sum(int(w.shape[0]) * int(w.shape[1]) for w in ws)
    trans = sum(Mp * int(w.shape[1]) for w, a in zip(ws, acts) if a == "tanh")
    bytes_acc = (xp.size * 2 + sum(w.size * 2 for w in ws)
                 + sum(b.size * 4 for b in bs) + Mp * NLp * 4)

    out = pl.pallas_call(
        functools.partial(_mlp_kernel, acts=acts),
        out_shape=jax.ShapeDtypeStruct((Mp, NLp), jnp.float32),
        grid=(Mp // TM,),
        in_specs=in_specs,
        out_specs=out_specs,
        compiler_params=pltpu.CompilerParams(dimension_semantics=("parallel",)),
        cost_estimate=pl.CostEstimate(flops=int(flops), transcendentals=int(trans),
                                      bytes_accessed=int(bytes_acc)),
    )(xp, *ws, *bs)
    return out[:M, :out_dim]


# ----------------------------------------------------------------------------
# Kernel 2: 3x3 conv (stride 1, pad 1), channels-last, im2col fused in-kernel.
#
# The padded NHWC image is flattened per batch item to (P, Cin).  For tap
# (di, dj) the rows needed by output "run" index r = h*(W+2)+w are exactly the
# contiguous rows [di*(W+2)+dj + r], so each tap is one contiguous (L, Cin)
# slice and one matmul — no HBM im2col matrix is ever built.  Junk columns
# (w >= W) and padded output channels are sliced off by the wrapper.
# ----------------------------------------------------------------------------
def _conv3x3_kernel(x_ref, w_ref, b_ref, o_ref, acc_ref, *, starts, L, act):
    acc_ref[...] = jnp.zeros_like(acc_ref)
    for t in range(9):                                  # static taps
        xt = x_ref[0, pl.ds(starts[t], L), :].astype(jnp.bfloat16)   # (L, Cin)
        acc_ref[...] += jnp.dot(xt, w_ref[t], preferred_element_type=jnp.float32)
    r = acc_ref[...] + b_ref[...]
    if act == "relu":
        r = jnp.maximum(r, 0.0)
    elif act == "tanh":
        r = jnp.tanh(r)
    o_ref[0, :, :] = r.astype(o_ref.dtype)


def pallas_conv3x3(x_nhwc, w, b, act="none"):
    """x: (B,H,W,Cin) f32, w: (Cout,Cin,3,3), b: (Cout,) -> (B,H,W,Cout) f32."""
    B, H, W, Cin = x_nhwc.shape
    Cout = w.shape[0]
    Coutp = _round_up(Cout, 128)                       # lane-dense output
    Wp2 = W + 2
    L = H * Wp2                                        # output "run" length
    P = (H + 2) * Wp2 + 8                              # +8 rows: tap(2,2) tail

    xp = jnp.pad(x_nhwc, ((0, 0), (1, 1), (1, 1), (0, 0)))
    xf = jnp.pad(xp.reshape(B, (H + 2) * Wp2, Cin), ((0, 0), (0, 8), (0, 0)))
    # Input kept f32 in HBM: tap slices start at arbitrary sublane offsets;
    # cast to bf16 in-kernel right before the MXU.
    xf = xf.astype(jnp.float32)

    wt = jnp.transpose(w, (2, 3, 1, 0)).reshape(9, Cin, Cout)
    wt = jnp.pad(wt, ((0, 0), (0, 0), (0, Coutp - Cout))).astype(jnp.bfloat16)
    bp = jnp.pad(b, (0, Coutp - Cout)).reshape(1, Coutp).astype(jnp.float32)

    starts = tuple(di * Wp2 + dj for di in range(3) for dj in range(3))
    flops = 2 * B * L * 9 * Cin * Coutp
    bytes_acc = xf.size * 4 + wt.size * 2 + bp.size * 4 + B * L * Coutp * 4

    out = pl.pallas_call(
        functools.partial(_conv3x3_kernel, starts=starts, L=L, act=act),
        out_shape=jax.ShapeDtypeStruct((B, L, Coutp), jnp.float32),
        grid=(B,),
        in_specs=[
            pl.BlockSpec((1, P, Cin), lambda bi: (bi, 0, 0)),
            pl.BlockSpec((9, Cin, Coutp), lambda bi: (0, 0, 0)),
            pl.BlockSpec((1, Coutp), lambda bi: (0, 0)),
        ],
        out_specs=pl.BlockSpec((1, L, Coutp), lambda bi: (bi, 0, 0)),
        scratch_shapes=[pltpu.VMEM((L, Coutp), jnp.float32)],
        compiler_params=pltpu.CompilerParams(dimension_semantics=("parallel",)),
        cost_estimate=pl.CostEstimate(flops=int(flops), transcendentals=0,
                                      bytes_accessed=int(bytes_acc)),
    )(xf, wt, bp)

    return out.reshape(B, H, Wp2, Coutp)[:, :, :W, :Cout]


# ----------------------------------------------------------------------------
# Deterministic parameter construction (BatchNorm eval-mode folded).
# ----------------------------------------------------------------------------
def _bn_scale_shift(key, cout, eps=1e-5):
    kg, kb = jax.random.split(key)
    gamma = 1.0 + 0.1 * jax.random.normal(kg, (cout,), jnp.float32)
    beta = 0.05 * jax.random.normal(kb, (cout,), jnp.float32)
    # Synthetic running stats: var=1, mean=0 (not a general BN fold).
    scale = gamma / jnp.sqrt(1.0 + eps)
    return scale, beta


def _dense_init(key, cin, cout, bn=True):
    """Point-wise (1x1) conv / linear stored as dense (cin, cout)."""
    k1, k2, k3 = jax.random.split(key, 3)
    w = jax.random.normal(k1, (cin, cout), jnp.float32) / jnp.sqrt(float(cin))
    b = 0.01 * jax.random.normal(k2, (cout,), jnp.float32)
    if bn:
        s, beta = _bn_scale_shift(k3, cout)
        w = w * s[None, :]
        b = b * s + beta
    return w, b


def _conv3_init(key, cout, cin, bn=True):
    k1, k2, k3 = jax.random.split(key, 3)
    w = jax.random.normal(k1, (cout, cin, 3, 3), jnp.float32) / jnp.sqrt(float(cin * 9))
    b = 0.01 * jax.random.normal(k2, (cout,), jnp.float32)
    if bn:
        s, beta = _bn_scale_shift(k3, cout)
        w = w * s[:, None, None, None]
        b = b * s + beta
    return w, b


def init_params(key, N_b):
    ks = jax.random.split(key, 16)
    p = {}
    # E_G: PointNet-style geometry encoder, input channels = 3 + N_b
    p["eg_c1"] = _dense_init(ks[0], 3 + N_b, 64)
    p["eg_c2"] = _dense_init(ks[1], 64, 64)
    p["eg_c3"] = _dense_init(ks[2], 64, 128)
    p["eg_c4"] = _dense_init(ks[3], 64 + 128, 64)
    p["eg_c5"] = _dense_init(ks[4], 64, 3, bn=False)   # per-vertex 3-ch output
    # E_T: message-conditioned texture encoder (HiDDeN-style)
    p["et_c1"] = _conv3_init(ks[5], 32, 3)
    p["et_c2"] = _conv3_init(ks[6], 32, 32)
    p["et_c3"] = _conv3_init(ks[7], 32, 32 + N_b + 3)
    p["et_c4"] = _dense_init(ks[8], 32, 3, bn=False)   # 1x1 conv -> 3 ch
    # D: watermark decoder
    p["d_c1"] = _conv3_init(ks[9], 32, 3)
    p["d_c2"] = _conv3_init(ks[10], 32, 32)
    p["d_c3"] = _conv3_init(ks[11], N_b, 32)
    p["d_lw"] = jax.random.normal(ks[12], (N_b, N_b), jnp.float32) / jnp.sqrt(float(N_b))
    p["d_lb"] = 0.01 * jax.random.normal(ks[13], (N_b,), jnp.float32)
    # NOTE: conv0 / bn0 from __init__ are never used in forward() -> omitted.
    return p


# ----------------------------------------------------------------------------
# Sub-modules (channels-last internally).
# ----------------------------------------------------------------------------
def pointnet_EG(p, vm_cl):
    """Geometry encoder.  vm_cl: (B, Nv, 3+N_b) -> per-vertex features (B, Nv, 3)."""
    B, Nv, C = vm_cl.shape
    x2d = vm_cl.reshape(B * Nv, C)
    h = pallas_mlp(x2d, [(*p["eg_c1"], "relu"), (*p["eg_c2"], "relu")], 64)
    h2 = pallas_mlp(h, [(*p["eg_c3"], "relu")], 128)
    g = jnp.max(h2.reshape(B, Nv, 128), axis=1, keepdims=True)     # global max pool
    g = jnp.broadcast_to(g, (B, Nv, 128)).reshape(B * Nv, 128)
    cat = jnp.concatenate([h, g], axis=1)                          # (B*Nv, 192)
    out = pallas_mlp(cat, [(*p["eg_c4"], "relu"), (*p["eg_c5"], "tanh")], 3)
    return out.reshape(B, Nv, 3)


def tencoder(p, T_nchw, M):
    """Texture encoder.  T: (B,3,H,W), M: (B,N_b) -> (T_e NCHW, T_e NHWC)."""
    B, _, H, W = T_nchw.shape
    t_cl = jnp.transpose(T_nchw, (0, 2, 3, 1))                     # boundary transpose
    h = pallas_conv3x3(t_cl, *p["et_c1"], act="relu")
    h = pallas_conv3x3(h, *p["et_c2"], act="relu")
    msg = jnp.broadcast_to(M[:, None, None, :], (B, H, W, M.shape[1]))
    cat = jnp.concatenate([h, msg, t_cl], axis=-1)                 # (B,H,W,32+N_b+3)
    h = pallas_conv3x3(cat, *p["et_c3"], act="relu")
    te = pallas_mlp(h.reshape(B * H * W, 32), [(*p["et_c4"], "none")], 3)
    te_cl = te.reshape(B, H, W, 3)
    return jnp.transpose(te_cl, (0, 3, 1, 2)), te_cl


def decoder(p, iw_cl):
    """Watermark decoder.  iw_cl: (B,R,R,3) channels-last -> M_r: (B,N_b)."""
    h = pallas_conv3x3(iw_cl, *p["d_c1"], act="relu")
    h = pallas_conv3x3(h, *p["d_c2"], act="relu")
    h = pallas_conv3x3(h, *p["d_c3"], act="relu")                  # (B,R,R,N_b)
    g = jnp.mean(h, axis=(1, 2))                                   # global avg pool, f32
    # Tiny (B,N_b)x(N_b,N_b) GEMM: plain jnp (kernel launch would dominate).
    return g @ p["d_lw"] + p["d_lb"]


def renderer_surrogate(v, f, vert_feats, tex):
    """Stand-in for pytorch3d-based renderer_seperate(...) -> (1, R, R, 4)."""
    # TODO(synk): differentiable mesh rasterization/shading (pytorch3d) has no
    # Pallas equivalent; deterministic texture x vertex-feature surrogate used.
    del v, f
    R = tex.shape[0]
    mod = jax.nn.sigmoid(jnp.mean(vert_feats[:, :3], axis=0))      # (3,)
    img_rgb = tex[..., :3] * (0.5 + 0.5 * mod)[None, None, :]
    alpha = jnp.ones((R, R, 1), tex.dtype)
    return jnp.concatenate([img_rgb, alpha], axis=-1)[None]        # (1,R,R,4)


# ----------------------------------------------------------------------------
# Full Model_3D2D forward (PyTorch-compatible NCHW at the boundary).
# ----------------------------------------------------------------------------
def model_forward(params, V, faces_idx, v_normals, T, M):
    B, Nv, _ = V.shape
    N_b = M.shape[1]

    # torch: V_m = concat([v_normals.permute(0,2,1), M expanded], dim=1)
    # channels-last equivalent:
    vm_cl = jnp.concatenate(
        [v_normals, jnp.broadcast_to(M[:, None, :], (B, Nv, N_b))], axis=-1)
    V_e = pointnet_EG(params, vm_cl)                               # (B, Nv, 3)
    T_e, Te_cl = tencoder(params, T, M)                            # NCHW, NHWC
    T_cl = jnp.transpose(T, (0, 2, 3, 1))

    I_w_list, I_o_list = [], []
    for b in range(B):
        I_w_list.append(
            renderer_surrogate(V[b], faces_idx[b], V_e[b], Te_cl[b])[0, ..., :3])
        I_o_list.append(
            renderer_surrogate(V[b], faces_idx[b], v_normals[b], T_cl[b])[0, ..., :3])
    Iw_cl = jnp.stack(I_w_list, axis=0)                            # (B,R,R,3)
    Io_cl = jnp.stack(I_o_list, axis=0)
    I_w = jnp.transpose(Iw_cl, (0, 3, 1, 2))                       # (B,3,R,R)
    I_o = jnp.transpose(Io_cl, (0, 3, 1, 2))

    M_r = decoder(params, Iw_cl)                                   # (B, N_b)
    return V_e, T_e, I_o, I_w, M_r


# ----------------------------------------------------------------------------
# Demo.
# ----------------------------------------------------------------------------
if __name__ == "__main__":
    img_cropSize = 16
    N_b = 8
    B, Nv, Nf = 2, 64, 96

    key = jax.random.PRNGKey(0)
    kp, kV, kn, kf, kT, kM = jax.random.split(key, 6)

    params = init_params(kp, N_b)

    V = jax.random.normal(kV, (B, Nv, 3), jnp.float32)
    n = jax.random.normal(kn, (B, Nv, 3), jnp.float32)
    v_normals = n / (jnp.linalg.norm(n, axis=-1, keepdims=True) + 1e-6)
    faces_idx = jax.random.randint(kf, (B, Nf, 3), 0, Nv, dtype=jnp.int32)
    T = jax.random.uniform(kT, (B, 3, img_cropSize, img_cropSize), jnp.float32)
    M = jax.random.bernoulli(kM, 0.5, (B, N_b)).astype(jnp.float32)

    fwd = jax.jit(model_forward)
    V_e, T_e, I_o, I_w, M_r = fwd(params, V, faces_idx, v_normals, T, M)
    jax.block_until_ready((V_e, T_e, I_o, I_w, M_r))

    assert V_e.shape == (B, Nv, 3)
    assert T_e.shape == (B, 3, img_cropSize, img_cropSize)
    assert I_o.shape == (B, 3, img_cropSize, img_cropSize)
    assert I_w.shape == (B, 3, img_cropSize, img_cropSize)
    assert M_r.shape == (B, N_b)
    print("KERNEL_OK")
</pallas_src>

<mosaic_0001>
module attributes {stable_mosaic.version = 11 : i64} {
  func.func @_mlp_kernel(%arg0: i32, %arg1: memref<128x128xbf16, #tpu.memory_space<vmem>>, %arg2: memref<128x128xbf16, #tpu.memory_space<vmem>>, %arg3: memref<128x128xbf16, #tpu.memory_space<vmem>>, %arg4: memref<1x128xf32, #tpu.memory_space<vmem>>, %arg5: memref<1x128xf32, #tpu.memory_space<vmem>>, %arg6: memref<128x128xf32, #tpu.memory_space<vmem>>) attributes {dimension_semantics = [#tpu.dimension_semantics<parallel>], iteration_bounds = array<i64: 1>, scalar_prefetch = 0 : i64, scratch_operands = 0 : i64, tpu.core_type = #tpu.core_type<tc>, window_params = [{transform_indices = @transform_0, window_bounds = array<i64: 128, 128>}, {pipeline_mode = #tpu.pipeline_mode<synchronous>, transform_indices = @transform_1, window_bounds = array<i64: 128, 128>}, {pipeline_mode = #tpu.pipeline_mode<synchronous>, transform_indices = @transform_2, window_bounds = array<i64: 128, 128>}, {pipeline_mode = #tpu.pipeline_mode<synchronous>, transform_indices = @transform_3, window_bounds = array<i64: 1, 128>}, {pipeline_mode = #tpu.pipeline_mode<synchronous>, transform_indices = @transform_4, window_bounds = array<i64: 1, 128>}, {transform_indices = @transform_5, window_bounds = array<i64: 128, 128>}]} {
    %c0 = arith.constant 0 : index
    %c0_0 = arith.constant 0 : index
    %0 = vector.load %arg1[%c0, %c0_0] : memref<128x128xbf16, #tpu.memory_space<vmem>>, vector<128x128xbf16>
    %c0_1 = arith.constant 0 : index
    %c0_2 = arith.constant 0 : index
    %1 = vector.load %arg2[%c0_1, %c0_2] : memref<128x128xbf16, #tpu.memory_space<vmem>>, vector<128x128xbf16>
    %cst = arith.constant dense<0.000000e+00> : vector<128x128xf32>
    %2 = tpu.matmul %0, %1, %cst {dimension_numbers = #tpu.dot_dimension_numbers<[1], [0], [0], [1], [0, 0, 1, 1], [], []>} : vector<128x128xbf16>, vector<128x128xbf16>, vector<128x128xf32> -> vector<128x128xf32>
    %c0_3 = arith.constant 0 : index
    %c0_4 = arith.constant 0 : index
    %3 = vector.load %arg4[%c0_3, %c0_4] : memref<1x128xf32, #tpu.memory_space<vmem>>, vector<1x128xf32>
    %4 = vector.broadcast %3 : vector<1x128xf32> to vector<128x128xf32>
    %5 = arith.addf %2, %4 : vector<128x128xf32>
    %cst_5 = arith.constant 0.000000e+00 : f32
    %6 = vector.broadcast %cst_5 : f32 to vector<128x128xf32>
    %7 = arith.maximumf %5, %6 : vector<128x128xf32>
    %8 = arith.truncf %7 : vector<128x128xf32> to vector<128x128xbf16>
    %c0_6 = arith.constant 0 : index
    %c0_7 = arith.constant 0 : index
    %9 = vector.load %arg3[%c0_6, %c0_7] : memref<128x128xbf16, #tpu.memory_space<vmem>>, vector<128x128xbf16>
    %cst_8 = arith.constant dense<0.000000e+00> : vector<128x128xf32>
    %10 = tpu.matmul %8, %9, %cst_8 {dimension_numbers = #tpu.dot_dimension_numbers<[1], [0], [0], [1], [0, 0, 1, 1], [], []>} : vector<128x128xbf16>, vector<128x128xbf16>, vector<128x128xf32> -> vector<128x128xf32>
    %c0_9 = arith.constant 0 : index
    %c0_10 = arith.constant 0 : index
    %11 = vector.load %arg5[%c0_9, %c0_10] : memref<1x128xf32, #tpu.memory_space<vmem>>, vector<1x128xf32>
    %12 = vector.broadcast %11 : vector<1x128xf32> to vector<128x128xf32>
    %13 = arith.addf %10, %12 : vector<128x128xf32>
    %cst_11 = arith.constant 0.000000e+00 : f32
    %14 = vector.broadcast %cst_11 : f32 to vector<128x128xf32>
    %15 = arith.maximumf %13, %14 : vector<128x128xf32>
    %c0_12 = arith.constant 0 : index
    %c0_13 = arith.constant 0 : index
    %16 = vector.load %arg6[%c0_12, %c0_13] : memref<128x128xf32, #tpu.memory_space<vmem>>, vector<128x128xf32>
    tpu.vector_store %arg6[%c0_12, %c0_13], %15 {strides = array<i32>} : memref<128x128xf32, #tpu.memory_space<vmem>>, vector<128x128xf32>,
    return
  }
  func.func @transform_0(%arg0: i32) -> (i32, i32) {
    %c0_i32 = arith.constant 0 : i32
    %c0_i32_0 = arith.constant 0 : i32
    return %arg0, %c0_i32 : i32, i32
  }
  func.func @transform_1(%arg0: i32) -> (i32, i32) {
    %c0_i32 = arith.constant 0 : i32
    %c0_i32_0 = arith.constant 0 : i32
    %c0_i32_1 = arith.constant 0 : i32
    return %c0_i32, %c0_i32_0 : i32, i32
  }
  func.func @transform_2(%arg0: i32) -> (i32, i32) {
    %c0_i32 = arith.constant 0 : i32
    %c0_i32_0 = arith.constant 0 : i32
    %c0_i32_1 = arith.constant 0 : i32
    return %c0_i32, %c0_i32_0 : i32, i32
  }
  func.func @transform_3(%arg0: i32) -> (i32, i32) {
    %c0_i32 = arith.constant 0 : i32
    %c0_i32_0 = arith.constant 0 : i32
    %c0_i32_1 = arith.constant 0 : i32
    return %c0_i32, %c0_i32_0 : i32, i32
  }
  func.func @transform_4(%arg0: i32) -> (i32, i32) {
    %c0_i32 = arith.constant 0 : i32
    %c0_i32_0 = arith.constant 0 : i32
    %c0_i32_1 = arith.constant 0 : i32
    return %c0_i32, %c0_i32_0 : i32, i32
  }
  func.func @transform_5(%arg0: i32) -> (i32, i32) {
    %c0_i32 = arith.constant 0 : i32
    %c0_i32_0 = arith.constant 0 : i32
    return %arg0, %c0_i32 : i32, i32
  }
}

module attributes {stable_mosaic.version = 11 : i64} {
  func.func @_mlp_kernel(%arg0: i32, %arg1: memref<128x128xbf16, #tpu.memory_space<vmem>>, %arg2: memref<128x128xbf16, #tpu.memory_space<vmem>>, %arg3: memref<1x128xf32, #tpu.memory_space<vmem>>, %arg4: memref<128x128xf32, #tpu.memory_space<vmem>>) attributes {dimension_semantics = [#tpu.dimension_semantics<parallel>], iteration_bounds = array<i64: 1>, scalar_prefetch = 0 : i64, scratch_operands = 0 : i64, tpu.core_type = #tpu.core_type<tc>, window_params = [{transform_indices = @transform_0, window_bounds = array<i64: 128, 128>}, {pipeline_mode = #tpu.pipeline_mode<synchronous>, transform_indices = @transform_1, window_bounds = array<i64: 128, 128>}, {pipeline_mode = #tpu.pipeline_mode<synchronous>, transform_indices = @transform_2, window_bounds = array<i64: 1, 128>}, {transform_indices = @transform_3, window_bounds = array<i64: 128, 128>}]} {
    %c0 = arith.constant 0 : index
    %c0_0 = arith.constant 0 : index
    %0 = vector.load %arg1[%c0, %c0_0] : memref<128x128xbf16, #tpu.memory_space<vmem>>, vector<128x128xbf16>
    %c0_1 = arith.constant 0 : index
    %c0_2 = arith.constant 0 : index
    %1 = vector.load %arg2[%c0_1, %c0_2] : memref<128x128xbf16, #tpu.memory_space<vmem>>, vector<128x128xbf16>
    %cst = arith.constant dense<0.000000e+00> : vector<128x128xf32>
    %2 = tpu.matmul %0, %1, %cst {dimension_numbers = #tpu.dot_dimension_numbers<[1], [0], [0], [1], [0, 0, 1, 1], [], []>} : vector<128x128xbf16>, vector<128x128xbf16>, vector<128x128xf32> -> vector<128x128xf32>
    %c0_3 = arith.constant 0 : index
    %c0_4 = arith.constant 0 : index
    %3 = vector.load %arg3[%c0_3, %c0_4] : memref<1x128xf32, #tpu.memory_space<vmem>>, vector<1x128xf32>
    %4 = vector.broadcast %3 : vector<1x128xf32> to vector<128x128xf32>
    %5 = arith.addf %2, %4 : vector<128x128xf32>
    %cst_5 = arith.constant 0.000000e+00 : f32
    %6 = vector.broadcast %cst_5 : f32 to vector<128x128xf32>
    %7 = arith.maximumf %5, %6 : vector<128x128xf32>
    %c0_6 = arith.constant 0 : index
    %c0_7 = arith.constant 0 : index
    %8 = vector.load %arg4[%c0_6, %c0_7] : memref<128x128xf32, #tpu.memory_space<vmem>>, vector<128x128xf32>
    tpu.vector_store %arg4[%c0_6, %c0_7], %7 {strides = array<i32>} : memref<128x128xf32, #tpu.memory_space<vmem>>, vector<128x128xf32>,
    return
  }
  func.func @transform_0(%arg0: i32) -> (i32, i32) {
    %c0_i32 = arith.constant 0 : i32
    %c0_i32_0 = arith.constant 0 : i32
    return %arg0, %c0_i32 : i32, i32
  }
  func.func @transform_1(%arg0: i32) -> (i32, i32) {
    %c0_i32 = arith.constant 0 : i32
    %c0_i32_0 = arith.constant 0 : i32
    %c0_i32_1 = arith.constant 0 : i32
    return %c0_i32, %c0_i32_0 : i32, i32
  }
  func.func @transform_2(%arg0: i32) -> (i32, i32) {
    %c0_i32 = arith.constant 0 : i32
    %c0_i32_0 = arith.constant 0 : i32
    %c0_i32_1 = arith.constant 0 : i32
    return %c0_i32, %c0_i32_0 : i32, i32
  }
  func.func @transform_3(%arg0: i32) -> (i32, i32) {
    %c0_i32 = arith.constant 0 : i32
    %c0_i32_0 = arith.constant 0 : i32
    return %arg0, %c0_i32 : i32, i32
  }
}

module attributes {stable_mosaic.version = 11 : i64} {
  func.func @_mlp_kernel(%arg0: i32, %arg1: memref<128x256xbf16, #tpu.memory_space<vmem>>, %arg2: memref<256x128xbf16, #tpu.memory_space<vmem>>, %arg3: memref<128x128xbf16, #tpu.memory_space<vmem>>, %arg4: memref<1x128xf32, #tpu.memory_space<vmem>>, %arg5: memref<1x128xf32, #tpu.memory_space<vmem>>, %arg6: memref<128x128xf32, #tpu.memory_space<vmem>>) attributes {dimension_semantics = [#tpu.dimension_semantics<parallel>], iteration_bounds = array<i64: 1>, scalar_prefetch = 0 : i64, scratch_operands = 0 : i64, tpu.core_type = #tpu.core_type<tc>, window_params = [{transform_indices = @transform_0, window_bounds = array<i64: 128, 256>}, {pipeline_mode = #tpu.pipeline_mode<synchronous>, transform_indices = @transform_1, window_bounds = array<i64: 256, 128>}, {pipeline_mode = #tpu.pipeline_mode<synchronous>, transform_indices = @transform_2, window_bounds = array<i64: 128, 128>}, {pipeline_mode = #tpu.pipeline_mode<synchronous>, transform_indices = @transform_3, window_bounds = array<i64: 1, 128>}, {pipeline_mode = #tpu.pipeline_mode<synchronous>, transform_indices = @transform_4, window_bounds = array<i64: 1, 128>}, {transform_indices = @transform_5, window_bounds = array<i64: 128, 128>}]} {
    %c0 = arith.constant 0 : index
    %c0_0 = arith.constant 0 : index
    %0 = vector.load %arg1[%c0, %c0_0] : memref<128x256xbf16, #tpu.memory_space<vmem>>, vector<128x256xbf16>
    %c0_1 = arith.constant 0 : index
    %c0_2 = arith.constant 0 : index
    %1 = vector.load %arg2[%c0_1, %c0_2] : memref<256x128xbf16, #tpu.memory_space<vmem>>, vector<256x128xbf16>
    %cst = arith.constant dense<0.000000e+00> : vector<128x128xf32>
    %2 = tpu.matmul %0, %1, %cst {dimension_numbers = #tpu.dot_dimension_numbers<[1], [0], [0], [1], [0, 0, 1, 1], [], []>} : vector<128x256xbf16>, vector<256x128xbf16>, vector<128x128xf32> -> vector<128x128xf32>
    %c0_3 = arith.constant 0 : index
    %c0_4 = arith.constant 0 : index
    %3 = vector.load %arg4[%c0_3, %c0_4] : memref<1x128xf32, #tpu.memory_space<vmem>>, vector<1x128xf32>
    %4 = vector.broadcast %3 : vector<1x128xf32> to vector<128x128xf32>
    %5 = arith.addf %2, %4 : vector<128x128xf32>
    %cst_5 = arith.constant 0.000000e+00 : f32
    %6 = vector.broadcast %cst_5 : f32 to vector<128x128xf32>
    %7 = arith.maximumf %5, %6 : vector<128x128xf32>
    %8 = arith.truncf %7 : vector<128x128xf32> to vector<128x128xbf16>
    %c0_6 = arith.constant 0 : index
    %c0_7 = arith.constant 0 : index
    %9 = vector.load %arg3[%c0_6, %c0_7] : memref<128x128xbf16, #tpu.memory_space<vmem>>, vector<128x128xbf16>
    %cst_8 = arith.constant dense<0.000000e+00> : vector<128x128xf32>
    %10 = tpu.matmul %8, %9, %cst_8 {dimension_numbers = #tpu.dot_dimension_numbers<[1], [0], [0], [1], [0, 0, 1, 1], [], []>} : vector<128x128xbf16>, vector<128x128xbf16>, vector<128x128xf32> -> vector<128x128xf32>
    %c0_9 = arith.constant 0 : index
    %c0_10 = arith.constant 0 : index
    %11 = vector.load %arg5[%c0_9, %c0_10] : memref<1x128xf32, #tpu.memory_space<vmem>>, vector<1x128xf32>
    %12 = vector.broadcast %11 : vector<1x128xf32> to vector<128x128xf32>
    %13 = arith.addf %10, %12 : vector<128x128xf32>
    %14 = math.tanh %13 : vector<128x128xf32>
    %c0_11 = arith.constant 0 : index
    %c0_12 = arith.constant 0 : index
    %15 = vector.load %arg6[%c0_11, %c0_12] : memref<128x128xf32, #tpu.memory_space<vmem>>, vector<128x128xf32>
    tpu.vector_store %arg6[%c0_11, %c0_12], %14 {strides = array<i32>} : memref<128x128xf32, #tpu.memory_space<vmem>>, vector<128x128xf32>,
    return
  }
  func.func @transform_0(%arg0: i32) -> (i32, i32) {
    %c0_i32 = arith.constant 0 : i32
    %c0_i32_0 = arith.constant 0 : i32
    return %arg0, %c0_i32 : i32, i32
  }
  func.func @transform_1(%arg0: i32) -> (i32, i32) {
    %c0_i32 = arith.constant 0 : i32
    %c0_i32_0 = arith.constant 0 : i32
    %c0_i32_1 = arith.constant 0 : i32
    return %c0_i32, %c0_i32_0 : i32, i32
  }
  func.func @transform_2(%arg0: i32) -> (i32, i32) {
    %c0_i32 = arith.constant 0 : i32
    %c0_i32_0 = arith.constant 0 : i32
    %c0_i32_1 = arith.constant 0 : i32
    return %c0_i32, %c0_i32_0 : i32, i32
  }
  func.func @transform_3(%arg0: i32) -> (i32, i32) {
    %c0_i32 = arith.constant 0 : i32
    %c0_i32_0 = arith.constant 0 : i32
    %c0_i32_1 = arith.constant 0 : i32
    return %c0_i32, %c0_i32_0 : i32, i32
  }
  func.func @transform_4(%arg0: i32) -> (i32, i32) {
    %c0_i32 = arith.constant 0 : i32
    %c0_i32_0 = arith.constant 0 : i32
    %c0_i32_1 = arith.constant 0 : i32
    return %c0_i32, %c0_i32_0 : i32, i32
  }
  func.func @transform_5(%arg0: i32) -> (i32, i32) {
    %c0_i32 = arith.constant 0 : i32
    %c0_i32_0 = arith.constant 0 : i32
    return %arg0, %c0_i32 : i32, i32
  }
}

module attributes {stable_mosaic.version = 11 : i64} {
  func.func @_conv3x3_kernel(%arg0: i32, %arg1: memref<1x332x3xf32, #tpu.memory_space<vmem>>, %arg2: memref<9x3x128xbf16, #tpu.memory_space<vmem>>, %arg3: memref<1x128xf32, #tpu.memory_space<vmem>>, %arg4: memref<1x288x128xf32, #tpu.memory_space<vmem>>, %arg5: memref<288x128xf32, #tpu.memory_space<vmem>>) attributes {dimension_semantics = [#tpu.dimension_semantics<parallel>], iteration_bounds = array<i64: 2>, scalar_prefetch = 0 : i64, scratch_operands = 1 : i64, tpu.core_type = #tpu.core_type<tc>, window_params = [{transform_indices = @transform_0, window_bounds = array<i64: 1, 332, 3>}, {pipeline_mode = #tpu.pipeline_mode<synchronous>, transform_indices = @transform_1, window_bounds = array<i64: 9, 3, 128>}, {pipeline_mode = #tpu.pipeline_mode<synchronous>, transform_indices = @transform_2, window_bounds = array<i64: 1, 128>}, {transform_indices = @transform_3, window_bounds = array<i64: 1, 288, 128>}]} {
    %cst = arith.constant 0.000000e+00 : f32
    %0 = vector.broadcast %cst : f32 to vector<288x128xf32>
    %c0 = arith.constant 0 : index
    %c0_0 = arith.constant 0 : index
    %1 = vector.load %arg5[%c0, %c0_0] : memref<288x128xf32, #tpu.memory_space<vmem>>, vector<288x128xf32>
    tpu.vector_store %arg5[%c0, %c0_0], %0 {strides = array<i32>} : memref<288x128xf32, #tpu.memory_space<vmem>>, vector<288x128xf32>,
    %c0_1 = arith.constant 0 : index
    %c0_2 = arith.constant 0 : index
    %c0_3 = arith.constant 0 : index
    %2 = vector.load %arg1[%c0_1, %c0_2, %c0_3] : memref<1x332x3xf32, #tpu.memory_space<vmem>>, vector<1x288x3xf32>
    %3 = vector.shape_cast %2 : vector<1x288x3xf32> to vector<288x3xf32>
    %4 = arith.truncf %3 : vector<288x3xf32> to vector<288x3xbf16>
    %c0_4 = arith.constant 0 : index
    %c0_5 = arith.constant 0 : index
    %5 = vector.load %arg5[%c0_4, %c0_5] : memref<288x128xf32, #tpu.memory_space<vmem>>, vector<288x128xf32>
    %c0_6 = arith.constant 0 : index
    %c0_7 = arith.constant 0 : index
    %c0_8 = arith.constant 0 : index
    %6 = vector.load %arg2[%c0_6, %c0_7, %c0_8] : memref<9x3x128xbf16, #tpu.memory_space<vmem>>, vector<1x3x128xbf16>
    %7 = vector.shape_cast %6 : vector<1x3x128xbf16> to vector<3x128xbf16>
    %cst_9 = arith.constant dense<0.000000e+00> : vector<288x128xf32>
    %8 = tpu.matmul %4, %7, %cst_9 {dimension_numbers = #tpu.dot_dimension_numbers<[1], [0], [0], [1], [0, 0, 1, 1], [], []>} : vector<288x3xbf16>, vector<3x128xbf16>, vector<288x128xf32> -> vector<288x128xf32>
    %9 = arith.addf %5, %8 : vector<288x128xf32>
    %c0_10 = arith.constant 0 : index
    %c0_11 = arith.constant 0 : index
    %10 = vector.load %arg5[%c0_10, %c0_11] : memref<288x128xf32, #tpu.memory_space<vmem>>, vector<288x128xf32>
    tpu.vector_store %arg5[%c0_10, %c0_11], %9 {strides = array<i32>} : memref<288x128xf32, #tpu.memory_space<vmem>>, vector<288x128xf32>,
    %c0_12 = arith.constant 0 : index
    %c1 = arith.constant 1 : index
    %c0_13 = arith.constant 0 : index
    %11 = vector.load %arg1[%c0_12, %c1, %c0_13] : memref<1x332x3xf32, #tpu.memory_space<vmem>>, vector<1x288x3xf32>
    %12 = vector.shape_cast %11 : vector<1x288x3xf32> to vector<288x3xf32>
    %13 = arith.truncf %12 : vector<288x3xf32> to vector<288x3xbf16>
    %c0_14 = arith.constant 0 : index
    %c0_15 = arith.constant 0 : index
    %14 = vector.load %arg5[%c0_14, %c0_15] : memref<288x128xf32, #tpu.memory_space<vmem>>, vector<288x128xf32>
    %c1_16 = arith.constant 1 : index
    %c0_17 = arith.constant 0 : index
    %c0_18 = arith.constant 0 : index
    %15 = vector.load %arg2[%c1_16, %c0_17, %c0_18] : memref<9x3x128xbf16, #tpu.memory_space<vmem>>, vector<1x3x128xbf16>
    %16 = vector.shape_cast %15 : vector<1x3x128xbf16> to vector<3x128xbf16>
    %cst_19 = arith.constant dense<0.000000e+00> : vector<288x128xf32>
    %17 = tpu.matmul %13, %16, %cst_19 {dimension_numbers = #tpu.dot_dimension_numbers<[1], [0], [0], [1], [0, 0, 1, 1], [], []>} : vector<288x3xbf16>, vector<3x128xbf16>, vector<288x128xf32> -> vector<288x128xf32>
    %18 = arith.addf %14, %17 : vector<288x128xf32>
    %c0_20 = arith.constant 0 : index
    %c0_21 = arith.constant 0 : index
    %19 = vector.load %arg5[%c0_20, %c0_21] : memref<288x128xf32, #tpu.memory_space<vmem>>, vector<288x128xf32>
    tpu.vector_store %arg5[%c0_20, %c0_21], %18 {strides = array<i32>} : memref<288x128xf32, #tpu.memory_space<vmem>>, vector<288x128xf32>,
    %c0_22 = arith.constant 0 : index
    %c2 = arith.constant 2 : index
    %c0_23 = arith.constant 0 : index
    %20 = vector.load %arg1[%c0_22, %c2, %c0_23] : memref<1x332x3xf32, #tpu.memory_space<vmem>>, vector<1x288x3xf32>
    %21 = vector.shape_cast %20 : vector<1x288x3xf32> to vector<288x3xf32>
    %22 = arith.truncf %21 : vector<288x3xf32> to vector<288x3xbf16>
    %c0_24 = arith.constant 0 : index
    %c0_25 = arith.constant 0 : index
    %23 = vector.load %arg5[%c0_24, %c0_25] : memref<288x128xf32, #tpu.memory_space<vmem>>, vector<288x128xf32>
    %c2_26 = arith.constant 2 : index
    %c0_27 = arith.constant 0 : index
    %c0_28 = arith.constant 0 : index
    %24 = vector.load %arg2[%c2_26, %c0_27, %c0_28] : memref<9x3x128xbf16, #tpu.memory_space<vmem>>, vector<1x3x128xbf16>
    %25 = vector.shape_cast %24 : vector<1x3x128xbf16> to vector<3x128xbf16>
    %cst_29 = arith.constant dense<0.000000e+00> : vector<288x128xf32>
    %26 = tpu.matmul %22, %25, %cst_29 {dimension_numbers = #tpu.dot_dimension_numbers<[1], [0], [0], [1], [0, 0, 1, 1], [], []>} : vector<288x3xbf16>, vector<3x128xbf16>, vector<288x128xf32> -> vector<288x128xf32>
    %27 = arith.addf %23, %26 : vector<288x128xf32>
    %c0_30 = arith.constant 0 : index
    %c0_31 = arith.constant 0 : index
    %28 = vector.load %arg5[%c0_30, %c0_31] : memref<288x128xf32, #tpu.memory_space<vmem>>, vector<288x128xf32>
    tpu.vector_store %arg5[%c0_30, %c0_31], %27 {strides = array<i32>} : memref<288x128xf32, #tpu.memory_space<vmem>>, vector<288x128xf32>,
    %c0_32 = arith.constant 0 : index
    %c18 = arith.constant 18 : index
    %c0_33 = arith.constant 0 : index
    %29 = vector.load %arg1[%c0_32, %c18, %c0_33] : memref<1x332x3xf32, #tpu.memory_space<vmem>>, vector<1x288x3xf32>
    %30 = vector.shape_cast %29 : vector<1x288x3xf32> to vector<288x3xf32>
    %31 = arith.truncf %30 : vector<288x3xf32> to vector<288x3xbf16>
    %c0_34 = arith.constant 0 : index
    %c0_35 = arith.constant 0 : index
    %32 = vector.load %arg5[%c0_34, %c0_35] : memref<288x128xf32, #tpu.memory_space<vmem>>, vector<288x128xf32>
    %c3 = arith.constant 3 : index
    %c0_36 = arith.constant 0 : index
    %c0_37 = arith.constant 0 : index
    %33 = vector.load %arg2[%c3, %c0_36, %c0_37] : memref<9x3x128xbf16, #tpu.memory_space<vmem>>, vector<1x3x128xbf16>
    %34 = vector.shape_cast %33 : vector<1x3x128xbf16> to vector<3x128xbf16>
    %cst_38 = arith.constant dense<0.000000e+00> : vector<288x128xf32>
    %35 = tpu.matmul %31, %34, %cst_38 {dimension_numbers = #tpu.dot_dimension_numbers<[1], [0], [0], [1], [0, 0, 1, 1], [], []>} : vector<288x3xbf16>, vector<3x128xbf16>, vector<288x128xf32> -> vector<288x128xf32>
    %36 = arith.addf %32, %35 : vector<288x128xf32>
    %c0_39 = arith.constant 0 : index
    %c0_40 = arith.constant 0 : index
    %37 = vector.load %arg5[%c0_39, %c0_40] : memref<288x128xf32, #tpu.memory_space<vmem>>, vector<288x128xf32>
    tpu.vector_store %arg5[%c0_39, %c0_40], %36 {strides = array<i32>} : memref<288x128xf32, #tpu.memory_space<vmem>>, vector<288x128xf32>,
    %c0_41 = arith.constant 0 : index
    %c19 = arith.constant 19 : index
    %c0_42 = arith.constant 0 : index
    %38 = vector.load %arg1[%c0_41, %c19, %c0_42] : memref<1x332x3xf32, #tpu.memory_space<vmem>>, vector<1x288x3xf32>
    %39 = vector.shape_cast %38 : vector<1x288x3xf32> to vector<288x3xf32>
    %40 = arith.truncf %39 : vector<288x3xf32> to vector<288x3xbf16>
    %c0_43 = arith.constant 0 : index
    %c0_44 = arith.constant 0 : index
    %41 = vector.load %arg5[%c0_43, %c0_44] : memref<288x128xf32, #tpu.memory_space<vmem>>, vector<288x128xf32>
    %c4 = arith.constant 4 : index
    %c0_45 = arith.constant 0 : index
    %c0_46 = arith.constant 0 : index
    %42 = vector.load %arg2[%c4, %c0_45, %c0_46] : memref<9x3x128xbf16, #tpu.memory_space<vmem>>, vector<1x3x128xbf16>
    %43 = vector.shape_cast %42 : vector<1x3x128xbf16> to vector<3x128xbf16>
    %cst_47 = arith.constant dense<0.000000e+00> : vector<288x128xf32>
    %44 = tpu.matmul %40, %43, %cst_47 {dimension_numbers = #tpu.dot_dimension_numbers<[1], [0], [0], [1], [0, 0, 1, 1], [], []>} : vector<288x3xbf16>, vector<3x128xbf16>, vector<288x128xf32> -> vector<288x128xf32>
    %45 = arith.addf %41, %44 : vector<288x128xf32>
    %c0_48 = arith.constant 0 : index
    %c0_49 = arith.constant 0 : index
    %46 = vector.load %arg5[%c0_48, %c0_49] : memref<288x128xf32, #tpu.memory_space<vmem>>, vector<288x128xf32>
    tpu.vector_store %arg5[%c0_48, %c0_49], %45 {strides = array<i32>} : memref<288x128xf32, #tpu.memory_space<vmem>>, vector<288x128xf32>,
    %c0_50 = arith.constant 0 : index
    %c20 = arith.constant 20 : index
    %c0_51 = arith.constant 0 : index
    %47 = vector.load %arg1[%c0_50, %c20, %c0_51] : memref<1x332x3xf32, #tpu.memory_space<vmem>>, vector<1x288x3xf32>
    %48 = vector.shape_cast %47 : vector<1x288x3xf32> to vector<288x3xf32>
    %49 = arith.truncf %48 : vector<288x3xf32> to vector<288x3xbf16>
    %c0_52 = arith.constant 0 : index
    %c0_53 = arith.constant 0 : index
    %50 = vector.load %arg5[%c0_52, %c0_53] : memref<288x128xf32, #tpu.memory_space<vmem>>, vector<288x128xf32>
    %c5 = arith.constant 5 : index
    %c0_54 = arith.constant 0 : index
    %c0_55 = arith.constant 0 : index
    %51 = vector.load %arg2[%c5, %c0_54, %c0_55] : memref<9x3x128xbf16, #tpu.memory_space<vmem>>, vector<1x3x128xbf16>
    %52 = vector.shape_cast %51 : vector<1x3x128xbf16> to vector<3x128xbf16>
    %cst_56 = arith.constant dense<0.000000e+00> : vector<288x128xf32>
    %53 = tpu.matmul %49, %52, %cst_56 {dimension_numbers = #tpu.dot_dimension_numbers<[1], [0], [0], [1], [0, 0, 1, 1], [], []>} : vector<288x3xbf16>, vector<3x128xbf16>, vector<288x128xf32> -> vector<288x128xf32>
    %54 = arith.addf %50, %53 : vector<288x128xf32>
    %c0_57 = arith.constant 0 : index
    %c0_58 = arith.constant 0 : index
    %55 = vector.load %arg5[%c0_57, %c0_58] : memref<288x128xf32, #tpu.memory_space<vmem>>, vector<288x128xf32>
    tpu.vector_store %arg5[%c0_57, %c0_58], %54 {strides = array<i32>} : memref<288x128xf32, #tpu.memory_space<vmem>>, vector<288x128xf32>,
    %c0_59 = arith.constant 0 : index
    %c36 = arith.constant 36 : index
    %c0_60 = arith.constant 0 : index
    %56 = vector.load %arg1[%c0_59, %c36, %c0_60] : memref<1x332x3xf32, #tpu.memory_space<vmem>>, vector<1x288x3xf32>
    %57 = vector.shape_cast %56 : vector<1x288x3xf32> to vector<288x3xf32>
    %58 = arith.truncf %57 : vector<288x3xf32> to vector<288x3xbf16>
    %c0_61 = arith.constant 0 : index
    %c0_62 = arith.constant 0 : index
    %59 = vector.load %arg5[%c0_61, %c0_62] : memref<288x128xf32, #tpu.memory_space<vmem>>, vector<288x128xf32>
    %c6 = arith.constant 6 : index
    %c0_63 = arith.constant 0 : index
    %c0_64 = arith.constant 0 : index
    %60 = vector.load %arg2[%c6, %c0_63, %c0_64] : memref<9x3x128xbf16, #tpu.memory_space<vmem>>, vector<1x3x128xbf16>
    %61 = vector.shape_cast %60 : vector<1x3x128xbf16> to vector<3x128xbf16>
    %cst_65 = arith.constant dense<0.000000e+00> : vector<288x128xf32>
    %62 = tpu.matmul %58, %61, %cst_65 {dimension_numbers = #tpu.dot_dimension_numbers<[1], [0], [0], [1], [0, 0, 1, 1], [], []>} : vector<288x3xbf16>, vector<3x128xbf16>, vector<288x128xf32> -> vector<288x128xf32>
    %63 = arith.addf %59, %62 : vector<288x128xf32>
    %c0_66 = arith.constant 0 : index
    %c0_67 = arith.constant 0 : index
    %64 = vector.load %arg5[%c0_66, %c0_67] : memref<288x128xf32, #tpu.memory_space<vmem>>, vector<288x128xf32>
    tpu.vector_store %arg5[%c0_66, %c0_67], %63 {strides = array<i32>} : memref<288x128xf32, #tpu.memory_space<vmem>>, vector<288x128xf32>,
    %c0_68 = arith.constant 0 : index
    %c37 = arith.constant 37 : index
    %c0_69 = arith.constant 0 : index
    %65 = vector.load %arg1[%c0_68, %c37, %c0_69] : memref<1x332x3xf32, #tpu.memory_space<vmem>>, vector<1x288x3xf32>
    %66 = vector.shape_cast %65 : vector<1x288x3xf32> to vector<288x3xf32>
    %67 = arith.truncf %66 : vector<288x3xf32> to vector<288x3xbf16>
    %c0_70 = arith.constant 0 : index
    %c0_71 = arith.constant 0 : index
    %68 = vector.load %arg5[%c0_70, %c0_71] : memref<288x128xf32, #tpu.memory_space<vmem>>, vector<288x128xf32>
    %c7 = arith.constant 7 : index
    %c0_72 = arith.constant 0 : index
    %c0_73 = arith.constant 0 : index
    %69 = vector.load %arg2[%c7, %c0_72, %c0_73] : memref<9x3x128xbf16, #tpu.memory_space<vmem>>, vector<1x3x128xbf16>
    %70 = vector.shape_cast %69 : vector<1x3x128xbf16> to vector<3x128xbf16>
    %cst_74 = arith.constant dense<0.000000e+00> : vector<288x128xf32>
    %71 = tpu.matmul %67, %70, %cst_74 {dimension_numbers = #tpu.dot_dimension_numbers<[1], [0], [0], [1], [0, 0, 1, 1], [], []>} : vector<288x3xbf16>, vector<3x128xbf16>, vector<288x128xf32> -> vector<288x128xf32>
    %72 = arith.addf %68, %71 : vector<288x128xf32>
    %c0_75 = arith.constant 0 : index
    %c0_76 = arith.constant 0 : index
    %73 = vector.load %arg5[%c0_75, %c0_76] : memref<288x128xf32, #tpu.memory_space<vmem>>, vector<288x128xf32>
    tpu.vector_store %arg5[%c0_75, %c0_76], %72 {strides = array<i32>} : memref<288x128xf32, #tpu.memory_space<vmem>>, vector<288x128xf32>,
    %c0_77 = arith.constant 0 : index
    %c38 = arith.constant 38 : index
    %c0_78 = arith.constant 0 : index
    %74 = vector.load %arg1[%c0_77, %c38, %c0_78] : memref<1x332x3xf32, #tpu.memory_space<vmem>>, vector<1x288x3xf32>
    %75 = vector.shape_cast %74 : vector<1x288x3xf32> to vector<288x3xf32>
    %76 = arith.truncf %75 : vector<288x3xf32> to vector<288x3xbf16>
    %c0_79 = arith.constant 0 : index
    %c0_80 = arith.constant 0 : index
    %77 = vector.load %arg5[%c0_79, %c0_80] : memref<288x128xf32, #tpu.memory_space<vmem>>, vector<288x128xf32>
    %c8 = arith.constant 8 : index
    %c0_81 = arith.constant 0 : index
    %c0_82 = arith.constant 0 : index
    %78 = vector.load %arg2[%c8, %c0_81, %c0_82] : memref<9x3x128xbf16, #tpu.memory_space<vmem>>, vector<1x3x128xbf16>
    %79 = vector.shape_cast %78 : vector<1x3x128xbf16> to vector<3x128xbf16>
    %cst_83 = arith.constant dense<0.000000e+00> : vector<288x128xf32>
    %80 = tpu.matmul %76, %79, %cst_83 {dimension_numbers = #tpu.dot_dimension_numbers<[1], [0], [0], [1], [0, 0, 1, 1], [], []>} : vector<288x3xbf16>, vector<3x128xbf16>, vector<288x128xf32> -> vector<288x128xf32>
    %81 = arith.addf %77, %80 : vector<288x128xf32>
    %c0_84 = arith.constant 0 : index
    %c0_85 = arith.constant 0 : index
    %82 = vector.load %arg5[%c0_84, %c0_85] : memref<288x128xf32, #tpu.memory_space<vmem>>, vector<288x128xf32>
    tpu.vector_store %arg5[%c0_84, %c0_85], %81 {strides = array<i32>} : memref<288x128xf32, #tpu.memory_space<vmem>>, vector<288x128xf32>,
    %c0_86 = arith.constant 0 : index
    %c0_87 = arith.constant 0 : index
    %83 = vector.load %arg5[%c0_86, %c0_87] : memref<288x128xf32, #tpu.memory_space<vmem>>, vector<288x128xf32>
    %c0_88 = arith.constant 0 : index
    %c0_89 = arith.constant 0 : index
    %84 = vector.load %arg3[%c0_88, %c0_89] : memref<1x128xf32, #tpu.memory_space<vmem>>, vector<1x128xf32>
    %85 = vector.broadcast %84 : vector<1x128xf32> to vector<288x128xf32>
    %86 = arith.addf %83, %85 : vector<288x128xf32>
    %cst_90 = arith.constant 0.000000e+00 : f32
    %87 = vector.broadcast %cst_90 : f32 to vector<288x128xf32>
    %88 = arith.maximumf %86, %87 : vector<288x128xf32>
    %c0_91 = arith.constant 0 : index
    %c0_92 = arith.constant 0 : index
    %c0_93 = arith.constant 0 : index
    %89 = vector.load %arg4[%c0_91, %c0_92, %c0_93] : memref<1x288x128xf32, #tpu.memory_space<vmem>>, vector<1x288x128xf32>
    %90 = vector.shape_cast %89 : vector<1x288x128xf32> to vector<288x128xf32>
    %91 = vector.shape_cast %88 : vector<288x128xf32> to vector<1x288x128xf32>
    tpu.vector_store %arg4[%c0_91, %c0_92, %c0_93], %91 {strides = array<i32>} : memref<1x288x128xf32, #tpu.memory_space<vmem>>, vector<1x288x128xf32>,
    return
  }
  func.func @transform_0(%arg0: i32) -> (i32, i32, i32) {
    %c0_i32 = arith.constant 0 : i32
    %c0_i32_0 = arith.constant 0 : i32
    %c0_i32_1 = arith.constant 0 : i32
    return %arg0, %c0_i32, %c0_i32_0 : i32, i32, i32
  }
  func.func @transform_1(%arg0: i32) -> (i32, i32, i32) {
    %c0_i32 = arith.constant 0 : i32
    %c0_i32_0 = arith.constant 0 : i32
    %c0_i32_1 = arith.constant 0 : i32
    %c0_i32_2 = arith.constant 0 : i32
    return %c0_i32, %c0_i32_0, %c0_i32_1 : i32, i32, i32
  }
  func.func @transform_2(%arg0: i32) -> (i32, i32) {
    %c0_i32 = arith.constant 0 : i32
    %c0_i32_0 = arith.constant 0 : i32
    %c0_i32_1 = arith.constant 0 : i32
    return %c0_i32, %c0_i32_0 : i32, i32
  }
  func.func @transform_3(%arg0: i32) -> (i32, i32, i32) {
    %c0_i32 = arith.constant 0 : i32
    %c0_i32_0 = arith.constant 0 : i32
    %c0_i32_1 = arith.constant 0 : i32
    return %arg0, %c0_i32, %c0_i32_0 : i32, i32, i32
  }
}

module attributes {stable_mosaic.version = 11 : i64} {
  func.func @_conv3x3_kernel(%arg0: i32, %arg1: memref<1x332x32xf32, #tpu.memory_space<vmem>>, %arg2: memref<9x32x128xbf16, #tpu.memory_space<vmem>>, %arg3: memref<1x128xf32, #tpu.memory_space<vmem>>, %arg4: memref<1x288x128xf32, #tpu.memory_space<vmem>>, %arg5: memref<288x128xf32, #tpu.memory_space<vmem>>) attributes {dimension_semantics = [#tpu.dimension_semantics<parallel>], iteration_bounds = array<i64: 2>, scalar_prefetch = 0 : i64, scratch_operands = 1 : i64, tpu.core_type = #tpu.core_type<tc>, window_params = [{transform_indices = @transform_0, window_bounds = array<i64: 1, 332, 32>}, {pipeline_mode = #tpu.pipeline_mode<synchronous>, transform_indices = @transform_1, window_bounds = array<i64: 9, 32, 128>}, {pipeline_mode = #tpu.pipeline_mode<synchronous>, transform_indices = @transform_2, window_bounds = array<i64: 1, 128>}, {transform_indices = @transform_3, window_bounds = array<i64: 1, 288, 128>}]} {
    %cst = arith.constant 0.000000e+00 : f32
    %0 = vector.broadcast %cst : f32 to vector<288x128xf32>
    %c0 = arith.constant 0 : index
    %c0_0 = arith.constant 0 : index
    %1 = vector.load %arg5[%c0, %c0_0] : memref<288x128xf32, #tpu.memory_space<vmem>>, vector<288x128xf32>
    tpu.vector_store %arg5[%c0, %c0_0], %0 {strides = array<i32>} : memref<288x128xf32, #tpu.memory_space<vmem>>, vector<288x128xf32>,
    %c0_1 = arith.constant 0 : index
    %c0_2 = arith.constant 0 : index
    %c0_3 = arith.constant 0 : index
    %2 = vector.load %arg1[%c0_1, %c0_2, %c0_3] : memref<1x332x32xf32, #tpu.memory_space<vmem>>, vector<1x288x32xf32>
    %3 = vector.shape_cast %2 : vector<1x288x32xf32> to vector<288x32xf32>
    %4 = arith.truncf %3 : vector<288x32xf32> to vector<288x32xbf16>
    %c0_4 = arith.constant 0 : index
    %c0_5 = arith.constant 0 : index
    %5 = vector.load %arg5[%c0_4, %c0_5] : memref<288x128xf32, #tpu.memory_space<vmem>>, vector<288x128xf32>
    %c0_6 = arith.constant 0 : index
    %c0_7 = arith.constant 0 : index
    %c0_8 = arith.constant 0 : index
    %6 = vector.load %arg2[%c0_6, %c0_7, %c0_8] : memref<9x32x128xbf16, #tpu.memory_space<vmem>>, vector<1x32x128xbf16>
    %7 = vector.shape_cast %6 : vector<1x32x128xbf16> to vector<32x128xbf16>
    %cst_9 = arith.constant dense<0.000000e+00> : vector<288x128xf32>
    %8 = tpu.matmul %4, %7, %cst_9 {dimension_numbers = #tpu.dot_dimension_numbers<[1], [0], [0], [1], [0, 0, 1, 1], [], []>} : vector<288x32xbf16>, vector<32x128xbf16>, vector<288x128xf32> -> vector<288x128xf32>
    %9 = arith.addf %5, %8 : vector<288x128xf32>
    %c0_10 = arith.constant 0 : index
    %c0_11 = arith.constant 0 : index
    %10 = vector.load %arg5[%c0_10, %c0_11] : memref<288x128xf32, #tpu.memory_space<vmem>>, vector<288x128xf32>
    tpu.vector_store %arg5[%c0_10, %c0_11], %9 {strides = array<i32>} : memref<288x128xf32, #tpu.memory_space<vmem>>, vector<288x128xf32>,
    %c0_12 = arith.constant 0 : index
    %c1 = arith.constant 1 : index
    %c0_13 = arith.constant 0 : index
    %11 = vector.load %arg1[%c0_12, %c1, %c0_13] : memref<1x332x32xf32, #tpu.memory_space<vmem>>, vector<1x288x32xf32>
    %12 = vector.shape_cast %11 : vector<1x288x32xf32> to vector<288x32xf32>
    %13 = arith.truncf %12 : vector<288x32xf32> to vector<288x32xbf16>
    %c0_14 = arith.constant 0 : index
    %c0_15 = arith.constant 0 : index
    %14 = vector.load %arg5[%c0_14, %c0_15] : memref<288x128xf32, #tpu.memory_space<vmem>>, vector<288x128xf32>
    %c1_16 = arith.constant 1 : index
    %c0_17 = arith.constant 0 : index
    %c0_18 = arith.constant 0 : index
    %15 = vector.load %arg2[%c1_16, %c0_17, %c0_18] : memref<9x32x128xbf16, #tpu.memory_space<vmem>>, vector<1x32x128xbf16>
    %16 = vector.shape_cast %15 : vector<1x32x128xbf16> to vector<32x128xbf16>
    %cst_19 = arith.constant dense<0.000000e+00> : vector<288x128xf32>
    %17 = tpu.matmul %13, %16, %cst_19 {dimension_numbers = #tpu.dot_dimension_numbers<[1], [0], [0], [1], [0, 0, 1, 1], [], []>} : vector<288x32xbf16>, vector<32x128xbf16>, vector<288x128xf32> -> vector<288x128xf32>
    %18 = arith.addf %14, %17 : vector<288x128xf32>
    %c0_20 = arith.constant 0 : index
    %c0_21 = arith.constant 0 : index
    %19 = vector.load %arg5[%c0_20, %c0_21] : memref<288x128xf32, #tpu.memory_space<vmem>>, vector<288x128xf32>
    tpu.vector_store %arg5[%c0_20, %c0_21], %18 {strides = array<i32>} : memref<288x128xf32, #tpu.memory_space<vmem>>, vector<288x128xf32>,
    %c0_22 = arith.constant 0 : index
    %c2 = arith.constant 2 : index
    %c0_23 = arith.constant 0 : index
    %20 = vector.load %arg1[%c0_22, %c2, %c0_23] : memref<1x332x32xf32, #tpu.memory_space<vmem>>, vector<1x288x32xf32>
    %21 = vector.shape_cast %20 : vector<1x288x32xf32> to vector<288x32xf32>
    %22 = arith.truncf %21 : vector<288x32xf32> to vector<288x32xbf16>
    %c0_24 = arith.constant 0 : index
    %c0_25 = arith.constant 0 : index
    %23 = vector.load %arg5[%c0_24, %c0_25] : memref<288x128xf32, #tpu.memory_space<vmem>>, vector<288x128xf32>
    %c2_26 = arith.constant 2 : index
    %c0_27 = arith.constant 0 : index
    %c0_28 = arith.constant 0 : index
    %24 = vector.load %arg2[%c2_26, %c0_27, %c0_28] : memref<9x32x128xbf16, #tpu.memory_space<vmem>>, vector<1x32x128xbf16>
    %25 = vector.shape_cast %24 : vector<1x32x128xbf16> to vector<32x128xbf16>
    %cst_29 = arith.constant dense<0.000000e+00> : vector<288x128xf32>
    %26 = tpu.matmul %22, %25, %cst_29 {dimension_numbers = #tpu.dot_dimension_numbers<[1], [0], [0], [1], [0, 0, 1, 1], [], []>} : vector<288x32xbf16>, vector<32x128xbf16>, vector<288x128xf32> -> vector<288x128xf32>
    %27 = arith.addf %23, %26 : vector<288x128xf32>
    %c0_30 = arith.constant 0 : index
    %c0_31 = arith.constant 0 : index
    %28 = vector.load %arg5[%c0_30, %c0_31] : memref<288x128xf32, #tpu.memory_space<vmem>>, vector<288x128xf32>
    tpu.vector_store %arg5[%c0_30, %c0_31], %27 {strides = array<i32>} : memref<288x128xf32, #tpu.memory_space<vmem>>, vector<288x128xf32>,
    %c0_32 = arith.constant 0 : index
    %c18 = arith.constant 18 : index
    %c0_33 = arith.constant 0 : index
    %29 = vector.load %arg1[%c0_32, %c18, %c0_33] : memref<1x332x32xf32, #tpu.memory_space<vmem>>, vector<1x288x32xf32>
    %30 = vector.shape_cast %29 : vector<1x288x32xf32> to vector<288x32xf32>
    %31 = arith.truncf %30 : vector<288x32xf32> to vector<288x32xbf16>
    %c0_34 = arith.constant 0 : index
    %c0_35 = arith.constant 0 : index
    %32 = vector.load %arg5[%c0_34, %c0_35] : memref<288x128xf32, #tpu.memory_space<vmem>>, vector<288x128xf32>
    %c3 = arith.constant 3 : index
    %c0_36 = arith.constant 0 : index
    %c0_37 = arith.constant 0 : index
    %33 = vector.load %arg2[%c3, %c0_36, %c0_37] : memref<9x32x128xbf16, #tpu.memory_space<vmem>>, vector<1x32x128xbf16>
    %34 = vector.shape_cast %33 : vector<1x32x128xbf16> to vector<32x128xbf16>
    %cst_38 = arith.constant dense<0.000000e+00> : vector<288x128xf32>
    %35 = tpu.matmul %31, %34, %cst_38 {dimension_numbers = #tpu.dot_dimension_numbers<[1], [0], [0], [1], [0, 0, 1, 1], [], []>} : vector<288x32xbf16>, vector<32x128xbf16>, vector<288x128xf32> -> vector<288x128xf32>
    %36 = arith.addf %32, %35 : vector<288x128xf32>
    %c0_39 = arith.constant 0 : index
    %c0_40 = arith.constant 0 : index
    %37 = vector.load %arg5[%c0_39, %c0_40] : memref<288x128xf32, #tpu.memory_space<vmem>>, vector<288x128xf32>
    tpu.vector_store %arg5[%c0_39, %c0_40], %36 {strides = array<i32>} : memref<288x128xf32, #tpu.memory_space<vmem>>, vector<288x128xf32>,
    %c0_41 = arith.constant 0 : index
    %c19 = arith.constant 19 : index
    %c0_42 = arith.constant 0 : index
    %38 = vector.load %arg1[%c0_41, %c19, %c0_42] : memref<1x332x32xf32, #tpu.memory_space<vmem>>, vector<1x288x32xf32>
    %39 = vector.shape_cast %38 : vector<1x288x32xf32> to vector<288x32xf32>
    %40 = arith.truncf %39 : vector<288x32xf32> to vector<288x32xbf16>
    %c0_43 = arith.constant 0 : index
    %c0_44 = arith.constant 0 : index
    %41 = vector.load %arg5[%c0_43, %c0_44] : memref<288x128xf32, #tpu.memory_space<vmem>>, vector<288x128xf32>
    %c4 = arith.constant 4 : index
    %c0_45 = arith.constant 0 : index
    %c0_46 = arith.constant 0 : index
    %42 = vector.load %arg2[%c4, %c0_45, %c0_46] : memref<9x32x128xbf16, #tpu.memory_space<vmem>>, vector<1x32x128xbf16>
    %43 = vector.shape_cast %42 : vector<1x32x128xbf16> to vector<32x128xbf16>
    %cst_47 = arith.constant dense<0.000000e+00> : vector<288x128xf32>
    %44 = tpu.matmul %40, %43, %cst_47 {dimension_numbers = #tpu.dot_dimension_numbers<[1], [0], [0], [1], [0, 0, 1, 1], [], []>} : vector<288x32xbf16>, vector<32x128xbf16>, vector<288x128xf32> -> vector<288x128xf32>
    %45 = arith.addf %41, %44 : vector<288x128xf32>
    %c0_48 = arith.constant 0 : index
    %c0_49 = arith.constant 0 : index
    %46 = vector.load %arg5[%c0_48, %c0_49] : memref<288x128xf32, #tpu.memory_space<vmem>>, vector<288x128xf32>
    tpu.vector_store %arg5[%c0_48, %c0_49], %45 {strides = array<i32>} : memref<288x128xf32, #tpu.memory_space<vmem>>, vector<288x128xf32>,
    %c0_50 = arith.constant 0 : index
    %c20 = arith.constant 20 : index
    %c0_51 = arith.constant 0 : index
    %47 = vector.load %arg1[%c0_50, %c20, %c0_51] : memref<1x332x32xf32, #tpu.memory_space<vmem>>, vector<1x288x32xf32>
    %48 = vector.shape_cast %47 : vector<1x288x32xf32> to vector<288x32xf32>
    %49 = arith.truncf %48 : vector<288x32xf32> to vector<288x32xbf16>
    %c0_52 = arith.constant 0 : index
    %c0_53 = arith.constant 0 : index
    %50 = vector.load %arg5[%c0_52, %c0_53] : memref<288x128xf32, #tpu.memory_space<vmem>>, vector<288x128xf32>
    %c5 = arith.constant 5 : index
    %c0_54 = arith.constant 0 : index
    %c0_55 = arith.constant 0 : index
    %51 = vector.load %arg2[%c5, %c0_54, %c0_55] : memref<9x32x128xbf16, #tpu.memory_space<vmem>>, vector<1x32x128xbf16>
    %52 = vector.shape_cast %51 : vector<1x32x128xbf16> to vector<32x128xbf16>
    %cst_56 = arith.constant dense<0.000000e+00> : vector<288x128xf32>
    %53 = tpu.matmul %49, %52, %cst_56 {dimension_numbers = #tpu.dot_dimension_numbers<[1], [0], [0], [1], [0, 0, 1, 1], [], []>} : vector<288x32xbf16>, vector<32x128xbf16>, vector<288x128xf32> -> vector<288x128xf32>
    %54 = arith.addf %50, %53 : vector<288x128xf32>
    %c0_57 = arith.constant 0 : index
    %c0_58 = arith.constant 0 : index
    %55 = vector.load %arg5[%c0_57, %c0_58] : memref<288x128xf32, #tpu.memory_space<vmem>>, vector<288x128xf32>
    tpu.vector_store %arg5[%c0_57, %c0_58], %54 {strides = array<i32>} : memref<288x128xf32, #tpu.memory_space<vmem>>, vector<288x128xf32>,
    %c0_59 = arith.constant 0 : index
    %c36 = arith.constant 36 : index
    %c0_60 = arith.constant 0 : index
    %56 = vector.load %arg1[%c0_59, %c36, %c0_60] : memref<1x332x32xf32, #tpu.memory_space<vmem>>, vector<1x288x32xf32>
    %57 = vector.shape_cast %56 : vector<1x288x32xf32> to vector<288x32xf32>
    %58 = arith.truncf %57 : vector<288x32xf32> to vector<288x32xbf16>
    %c0_61 = arith.constant 0 : index
    %c0_62 = arith.constant 0 : index
    %59 = vector.load %arg5[%c0_61, %c0_62] : memref<288x128xf32, #tpu.memory_space<vmem>>, vector<288x128xf32>
    %c6 = arith.constant 6 : index
    %c0_63 = arith.constant 0 : index
    %c0_64 = arith.constant 0 : index
    %60 = vector.load %arg2[%c6, %c0_63, %c0_64] : memref<9x32x128xbf16, #tpu.memory_space<vmem>>, vector<1x32x128xbf16>
    %61 = vector.shape_cast %60 : vector<1x32x128xbf16> to vector<32x128xbf16>
    %cst_65 = arith.constant dense<0.000000e+00> : vector<288x128xf32>
    %62 = tpu.matmul %58, %61, %cst_65 {dimension_numbers = #tpu.dot_dimension_numbers<[1], [0], [0], [1], [0, 0, 1, 1], [], []>} : vector<288x32xbf16>, vector<32x128xbf16>, vector<288x128xf32> -> vector<288x128xf32>
    %63 = arith.addf %59, %62 : vector<288x128xf32>
    %c0_66 = arith.constant 0 : index
    %c0_67 = arith.constant 0 : index
    %64 = vector.load %arg5[%c0_66, %c0_67] : memref<288x128xf32, #tpu.memory_space<vmem>>, vector<288x128xf32>
    tpu.vector_store %arg5[%c0_66, %c0_67], %63 {strides = array<i32>} : memref<288x128xf32, #tpu.memory_space<vmem>>, vector<288x128xf32>,
    %c0_68 = arith.constant 0 : index
    %c37 = arith.constant 37 : index
    %c0_69 = arith.constant 0 : index
    %65 = vector.load %arg1[%c0_68, %c37, %c0_69] : memref<1x332x32xf32, #tpu.memory_space<vmem>>, vector<1x288x32xf32>
    %66 = vector.shape_cast %65 : vector<1x288x32xf32> to vector<288x32xf32>
    %67 = arith.truncf %66 : vector<288x32xf32> to vector<288x32xbf16>
    %c0_70 = arith.constant 0 : index
    %c0_71 = arith.constant 0 : index
    %68 = vector.load %arg5[%c0_70, %c0_71] : memref<288x128xf32, #tpu.memory_space<vmem>>, vector<288x128xf32>
    %c7 = arith.constant 7 : index
    %c0_72 = arith.constant 0 : index
    %c0_73 = arith.constant 0 : index
    %69 = vector.load %arg2[%c7, %c0_72, %c0_73] : memref<9x32x128xbf16, #tpu.memory_space<vmem>>, vector<1x32x128xbf16>
    %70 = vector.shape_cast %69 : vector<1x32x128xbf16> to vector<32x128xbf16>
    %cst_74 = arith.constant dense<0.000000e+00> : vector<288x128xf32>
    %71 = tpu.matmul %67, %70, %cst_74 {dimension_numbers = #tpu.dot_dimension_numbers<[1], [0], [0], [1], [0, 0, 1, 1], [], []>} : vector<288x32xbf16>, vector<32x128xbf16>, vector<288x128xf32> -> vector<288x128xf32>
    %72 = arith.addf %68, %71 : vector<288x128xf32>
    %c0_75 = arith.constant 0 : index
    %c0_76 = arith.constant 0 : index
    %73 = vector.load %arg5[%c0_75, %c0_76] : memref<288x128xf32, #tpu.memory_space<vmem>>, vector<288x128xf32>
    tpu.vector_store %arg5[%c0_75, %c0_76], %72 {strides = array<i32>} : memref<288x128xf32, #tpu.memory_space<vmem>>, vector<288x128xf32>,
    %c0_77 = arith.constant 0 : index
    %c38 = arith.constant 38 : index
    %c0_78 = arith.constant 0 : index
    %74 = vector.load %arg1[%c0_77, %c38, %c0_78] : memref<1x332x32xf32, #tpu.memory_space<vmem>>, vector<1x288x32xf32>
    %75 = vector.shape_cast %74 : vector<1x288x32xf32> to vector<288x32xf32>
    %76 = arith.truncf %75 : vector<288x32xf32> to vector<288x32xbf16>
    %c0_79 = arith.constant 0 : index
    %c0_80 = arith.constant 0 : index
    %77 = vector.load %arg5[%c0_79, %c0_80] : memref<288x128xf32, #tpu.memory_space<vmem>>, vector<288x128xf32>
    %c8 = arith.constant 8 : index
    %c0_81 = arith.constant 0 : index
    %c0_82 = arith.constant 0 : index
    %78 = vector.load %arg2[%c8, %c0_81, %c0_82] : memref<9x32x128xbf16, #tpu.memory_space<vmem>>, vector<1x32x128xbf16>
    %79 = vector.shape_cast %78 : vector<1x32x128xbf16> to vector<32x128xbf16>
    %cst_83 = arith.constant dense<0.000000e+00> : vector<288x128xf32>
    %80 = tpu.matmul %76, %79, %cst_83 {dimension_numbers = #tpu.dot_dimension_numbers<[1], [0], [0], [1], [0, 0, 1, 1], [], []>} : vector<288x32xbf16>, vector<32x128xbf16>, vector<288x128xf32> -> vector<288x128xf32>
    %81 = arith.addf %77, %80 : vector<288x128xf32>
    %c0_84 = arith.constant 0 : index
    %c0_85 = arith.constant 0 : index
    %82 = vector.load %arg5[%c0_84, %c0_85] : memref<288x128xf32, #tpu.memory_space<vmem>>, vector<288x128xf32>
    tpu.vector_store %arg5[%c0_84, %c0_85], %81 {strides = array<i32>} : memref<288x128xf32, #tpu.memory_space<vmem>>, vector<288x128xf32>,
    %c0_86 = arith.constant 0 : index
    %c0_87 = arith.constant 0 : index
    %83 = vector.load %arg5[%c0_86, %c0_87] : memref<288x128xf32, #tpu.memory_space<vmem>>, vector<288x128xf32>
    %c0_88 = arith.constant 0 : index
    %c0_89 = arith.constant 0 : index
    %84 = vector.load %arg3[%c0_88, %c0_89] : memref<1x128xf32, #tpu.memory_space<vmem>>, vector<1x128xf32>
    %85 = vector.broadcast %84 : vector<1x128xf32> to vector<288x128xf32>
    %86 = arith.addf %83, %85 : vector<288x128xf32>
    %cst_90 = arith.constant 0.000000e+00 : f32
    %87 = vector.broadcast %cst_90 : f32 to vector<288x128xf32>
    %88 = arith.maximumf %86, %87 : vector<288x128xf32>
    %c0_91 = arith.constant 0 : index
    %c0_92 = arith.constant 0 : index
    %c0_93 = arith.constant 0 : index
    %89 = vector.load %arg4[%c0_91, %c0_92, %c0_93] : memref<1x288x128xf32, #tpu.memory_space<vmem>>, vector<1x288x128xf32>
    %90 = vector.shape_cast %89 : vector<1x288x128xf32> to vector<288x128xf32>
    %91 = vector.shape_cast %88 : vector<288x128xf32> to vector<1x288x128xf32>
    tpu.vector_store %arg4[%c0_91, %c0_92, %c0_93], %91 {strides = array<i32>} : memref<1x288x128xf32, #tpu.memory_space<vmem>>, vector<1x288x128xf32>,
    return
  }
  func.func @transform_0(%arg0: i32) -> (i32, i32, i32) {
    %c0_i32 = arith.constant 0 : i32
    %c0_i32_0 = arith.constant 0 : i32
    %c0_i32_1 = arith.constant 0 : i32
    return %arg0, %c0_i32, %c0_i32_0 : i32, i32, i32
  }
  func.func @transform_1(%arg0: i32) -> (i32, i32, i32) {
    %c0_i32 = arith.constant 0 : i32
    %c0_i32_0 = arith.constant 0 : i32
    %c0_i32_1 = arith.constant 0 : i32
    %c0_i32_2 = arith.constant 0 : i32
    return %c0_i32, %c0_i32_0, %c0_i32_1 : i32, i32, i32
  }
  func.func @transform_2(%arg0: i32) -> (i32, i32) {
    %c0_i32 = arith.constant 0 : i32
    %c0_i32_0 = arith.constant 0 : i32
    %c0_i32_1 = arith.constant 0 : i32
    return %c0_i32, %c0_i32_0 : i32, i32
  }
  func.func @transform_3(%arg0: i32) -> (i32, i32, i32) {
    %c0_i32 = arith.constant 0 : i32
    %c0_i32_0 = arith.constant 0 : i32
    %c0_i32_1 = arith.constant 0 : i32
    return %arg0, %c0_i32, %c0_i32_0 : i32, i32, i32
  }
}

module attributes {stable_mosaic.version = 11 : i64} {
  func.func @_conv3x3_kernel(%arg0: i32, %arg1: memref<1x332x43xf32, #tpu.memory_space<vmem>>, %arg2: memref<9x43x128xbf16, #tpu.memory_space<vmem>>, %arg3: memref<1x128xf32, #tpu.memory_space<vmem>>, %arg4: memref<1x288x128xf32, #tpu.memory_space<vmem>>, %arg5: memref<288x128xf32, #tpu.memory_space<vmem>>) attributes {dimension_semantics = [#tpu.dimension_semantics<parallel>], iteration_bounds = array<i64: 2>, scalar_prefetch = 0 : i64, scratch_operands = 1 : i64, tpu.core_type = #tpu.core_type<tc>, window_params = [{transform_indices = @transform_0, window_bounds = array<i64: 1, 332, 43>}, {pipeline_mode = #tpu.pipeline_mode<synchronous>, transform_indices = @transform_1, window_bounds = array<i64: 9, 43, 128>}, {pipeline_mode = #tpu.pipeline_mode<synchronous>, transform_indices = @transform_2, window_bounds = array<i64: 1, 128>}, {transform_indices = @transform_3, window_bounds = array<i64: 1, 288, 128>}]} {
    %cst = arith.constant 0.000000e+00 : f32
    %0 = vector.broadcast %cst : f32 to vector<288x128xf32>
    %c0 = arith.constant 0 : index
    %c0_0 = arith.constant 0 : index
    %1 = vector.load %arg5[%c0, %c0_0] : memref<288x128xf32, #tpu.memory_space<vmem>>, vector<288x128xf32>
    tpu.vector_store %arg5[%c0, %c0_0], %0 {strides = array<i32>} : memref<288x128xf32, #tpu.memory_space<vmem>>, vector<288x128xf32>,
    %c0_1 = arith.constant 0 : index
    %c0_2 = arith.constant 0 : index
    %c0_3 = arith.constant 0 : index
    %2 = vector.load %arg1[%c0_1, %c0_2, %c0_3] : memref<1x332x43xf32, #tpu.memory_space<vmem>>, vector<1x288x43xf32>
    %3 = vector.shape_cast %2 : vector<1x288x43xf32> to vector<288x43xf32>
    %4 = arith.truncf %3 : vector<288x43xf32> to vector<288x43xbf16>
    %c0_4 = arith.constant 0 : index
    %c0_5 = arith.constant 0 : index
    %5 = vector.load %arg5[%c0_4, %c0_5] : memref<288x128xf32, #tpu.memory_space<vmem>>, vector<288x128xf32>
    %c0_6 = arith.constant 0 : index
    %c0_7 = arith.constant 0 : index
    %c0_8 = arith.constant 0 : index
    %6 = vector.load %arg2[%c0_6, %c0_7, %c0_8] : memref<9x43x128xbf16, #tpu.memory_space<vmem>>, vector<1x43x128xbf16>
    %7 = vector.shape_cast %6 : vector<1x43x128xbf16> to vector<43x128xbf16>
    %cst_9 = arith.constant dense<0.000000e+00> : vector<288x128xf32>
    %8 = tpu.matmul %4, %7, %cst_9 {dimension_numbers = #tpu.dot_dimension_numbers<[1], [0], [0], [1], [0, 0, 1, 1], [], []>} : vector<288x43xbf16>, vector<43x128xbf16>, vector<288x128xf32> -> vector<288x128xf32>
    %9 = arith.addf %5, %8 : vector<288x128xf32>
    %c0_10 = arith.constant 0 : index
    %c0_11 = arith.constant 0 : index
    %10 = vector.load %arg5[%c0_10, %c0_11] : memref<288x128xf32, #tpu.memory_space<vmem>>, vector<288x128xf32>
    tpu.vector_store %arg5[%c0_10, %c0_11], %9 {strides = array<i32>} : memref<288x128xf32, #tpu.memory_space<vmem>>, vector<288x128xf32>,
    %c0_12 = arith.constant 0 : index
    %c1 = arith.constant 1 : index
    %c0_13 = arith.constant 0 : index
    %11 = vector.load %arg1[%c0_12, %c1, %c0_13] : memref<1x332x43xf32, #tpu.memory_space<vmem>>, vector<1x288x43xf32>
    %12 = vector.shape_cast %11 : vector<1x288x43xf32> to vector<288x43xf32>
    %13 = arith.truncf %12 : vector<288x43xf32> to vector<288x43xbf16>
    %c0_14 = arith.constant 0 : index
    %c0_15 = arith.constant 0 : index
    %14 = vector.load %arg5[%c0_14, %c0_15] : memref<288x128xf32, #tpu.memory_space<vmem>>, vector<288x128xf32>
    %c1_16 = arith.constant 1 : index
    %c0_17 = arith.constant 0 : index
    %c0_18 = arith.constant 0 : index
    %15 = vector.load %arg2[%c1_16, %c0_17, %c0_18] : memref<9x43x128xbf16, #tpu.memory_space<vmem>>, vector<1x43x128xbf16>
    %16 = vector.shape_cast %15 : vector<1x43x128xbf16> to vector<43x128xbf16>
    %cst_19 = arith.constant dense<0.000000e+00> : vector<288x128xf32>
    %17 = tpu.matmul %13, %16, %cst_19 {dimension_numbers = #tpu.dot_dimension_numbers<[1], [0], [0], [1], [0, 0, 1, 1], [], []>} : vector<288x43xbf16>, vector<43x128xbf16>, vector<288x128xf32> -> vector<288x128xf32>
    %18 = arith.addf %14, %17 : vector<288x128xf32>
    %c0_20 = arith.constant 0 : index
    %c0_21 = arith.constant 0 : index
    %19 = vector.load %arg5[%c0_20, %c0_21] : memref<288x128xf32, #tpu.memory_space<vmem>>, vector<288x128xf32>
    tpu.vector_store %arg5[%c0_20, %c0_21], %18 {strides = array<i32>} : memref<288x128xf32, #tpu.memory_space<vmem>>, vector<288x128xf32>,
    %c0_22 = arith.constant 0 : index
    %c2 = arith.constant 2 : index
    %c0_23 = arith.constant 0 : index
    %20 = vector.load %arg1[%c0_22, %c2, %c0_23] : memref<1x332x43xf32, #tpu.memory_space<vmem>>, vector<1x288x43xf32>
    %21 = vector.shape_cast %20 : vector<1x288x43xf32> to vector<288x43xf32>
    %22 = arith.truncf %21 : vector<288x43xf32> to vector<288x43xbf16>
    %c0_24 = arith.constant 0 : index
    %c0_25 = arith.constant 0 : index
    %23 = vector.load %arg5[%c0_24, %c0_25] : memref<288x128xf32, #tpu.memory_space<vmem>>, vector<288x128xf32>
    %c2_26 = arith.constant 2 : index
    %c0_27 = arith.constant 0 : index
    %c0_28 = arith.constant 0 : index
    %24 = vector.load %arg2[%c2_26, %c0_27, %c0_28] : memref<9x43x128xbf16, #tpu.memory_space<vmem>>, vector<1x43x128xbf16>
    %25 = vector.shape_cast %24 : vector<1x43x128xbf16> to vector<43x128xbf16>
    %cst_29 = arith.constant dense<0.000000e+00> : vector<288x128xf32>
    %26 = tpu.matmul %22, %25, %cst_29 {dimension_numbers = #tpu.dot_dimension_numbers<[1], [0], [0], [1], [0, 0, 1, 1], [], []>} : vector<288x43xbf16>, vector<43x128xbf16>, vector<288x128xf32> -> vector<288x128xf32>
    %27 = arith.addf %23, %26 : vector<288x128xf32>
    %c0_30 = arith.constant 0 : index
    %c0_31 = arith.constant 0 : index
    %28 = vector.load %arg5[%c0_30, %c0_31] : memref<288x128xf32, #tpu.memory_space<vmem>>, vector<288x128xf32>
    tpu.vector_store %arg5[%c0_30, %c0_31], %27 {strides = array<i32>} : memref<288x128xf32, #tpu.memory_space<vmem>>, vector<288x128xf32>,
    %c0_32 = arith.constant 0 : index
    %c18 = arith.constant 18 : index
    %c0_33 = arith.constant 0 : index
    %29 = vector.load %arg1[%c0_32, %c18, %c0_33] : memref<1x332x43xf32, #tpu.memory_space<vmem>>, vector<1x288x43xf32>
    %30 = vector.shape_cast %29 : vector<1x288x43xf32> to vector<288x43xf32>
    %31 = arith.truncf %30 : vector<288x43xf32> to vector<288x43xbf16>
    %c0_34 = arith.constant 0 : index
    %c0_35 = arith.constant 0 : index
    %32 = vector.load %arg5[%c0_34, %c0_35] : memref<288x128xf32, #tpu.memory_space<vmem>>, vector<288x128xf32>
    %c3 = arith.constant 3 : index
    %c0_36 = arith.constant 0 : index
    %c0_37 = arith.constant 0 : index
    %33 = vector.load %arg2[%c3, %c0_36, %c0_37] : memref<9x43x128xbf16, #tpu.memory_space<vmem>>, vector<1x43x128xbf16>
    %34 = vector.shape_cast %33 : vector<1x43x128xbf16> to vector<43x128xbf16>
    %cst_38 = arith.constant dense<0.000000e+00> : vector<288x128xf32>
    %35 = tpu.matmul %31, %34, %cst_38 {dimension_numbers = #tpu.dot_dimension_numbers<[1], [0], [0], [1], [0, 0, 1, 1], [], []>} : vector<288x43xbf16>, vector<43x128xbf16>, vector<288x128xf32> -> vector<288x128xf32>
    %36 = arith.addf %32, %35 : vector<288x128xf32>
    %c0_39 = arith.constant 0 : index
    %c0_40 = arith.constant 0 : index
    %37 = vector.load %arg5[%c0_39, %c0_40] : memref<288x128xf32, #tpu.memory_space<vmem>>, vector<288x128xf32>
    tpu.vector_store %arg5[%c0_39, %c0_40], %36 {strides = array<i32>} : memref<288x128xf32, #tpu.memory_space<vmem>>, vector<288x128xf32>,
    %c0_41 = arith.constant 0 : index
    %c19 = arith.constant 19 : index
    %c0_42 = arith.constant 0 : index
    %38 = vector.load %arg1[%c0_41, %c19, %c0_42] : memref<1x332x43xf32, #tpu.memory_space<vmem>>, vector<1x288x43xf32>
    %39 = vector.shape_cast %38 : vector<1x288x43xf32> to vector<288x43xf32>
    %40 = arith.truncf %39 : vector<288x43xf32> to vector<288x43xbf16>
    %c0_43 = arith.constant 0 : index
    %c0_44 = arith.constant 0 : index
    %41 = vector.load %arg5[%c0_43, %c0_44] : memref<288x128xf32, #tpu.memory_space<vmem>>, vector<288x128xf32>
    %c4 = arith.constant 4 : index
    %c0_45 = arith.constant 0 : index
    %c0_46 = arith.constant 0 : index
    %42 = vector.load %arg2[%c4, %c0_45, %c0_46] : memref<9x43x128xbf16, #tpu.memory_space<vmem>>, vector<1x43x128xbf16>
    %43 = vector.shape_cast %42 : vector<1x43x128xbf16> to vector<43x128xbf16>
    %cst_47 = arith.constant dense<0.000000e+00> : vector<288x128xf32>
    %44 = tpu.matmul %40, %43, %cst_47 {dimension_numbers = #tpu.dot_dimension_numbers<[1], [0], [0], [1], [0, 0, 1, 1], [], []>} : vector<288x43xbf16>, vector<43x128xbf16>, vector<288x128xf32> -> vector<288x128xf32>
    %45 = arith.addf %41, %44 : vector<288x128xf32>
    %c0_48 = arith.constant 0 : index
    %c0_49 = arith.constant 0 : index
    %46 = vector.load %arg5[%c0_48, %c0_49] : memref<288x128xf32, #tpu.memory_space<vmem>>, vector<288x128xf32>
    tpu.vector_store %arg5[%c0_48, %c0_49], %45 {strides = array<i32>} : memref<288x128xf32, #tpu.memory_space<vmem>>, vector<288x128xf32>,
    %c0_50 = arith.constant 0 : index
    %c20 = arith.constant 20 : index
    %c0_51 = arith.constant 0 : index
    %47 = vector.load %arg1[%c0_50, %c20, %c0_51] : memref<1x332x43xf32, #tpu.memory_space<vmem>>, vector<1x288x43xf32>
    %48 = vector.shape_cast %47 : vector<1x288x43xf32> to vector<288x43xf32>
    %49 = arith.truncf %48 : vector<288x43xf32> to vector<288x43xbf16>
    %c0_52 = arith.constant 0 : index
    %c0_53 = arith.constant 0 : index
    %50 = vector.load %arg5[%c0_52, %c0_53] : memref<288x128xf32, #tpu.memory_space<vmem>>, vector<288x128xf32>
    %c5 = arith.constant 5 : index
    %c0_54 = arith.constant 0 : index
    %c0_55 = arith.constant 0 : index
    %51 = vector.load %arg2[%c5, %c0_54, %c0_55] : memref<9x43x128xbf16, #tpu.memory_space<vmem>>, vector<1x43x128xbf16>
    %52 = vector.shape_cast %51 : vector<1x43x128xbf16> to vector<43x128xbf16>
    %cst_56 = arith.constant dense<0.000000e+00> : vector<288x128xf32>
    %53 = tpu.matmul %49, %52, %cst_56 {dimension_numbers = #tpu.dot_dimension_numbers<[1], [0], [0], [1], [0, 0, 1, 1], [], []>} : vector<288x43xbf16>, vector<43x128xbf16>, vector<288x128xf32> -> vector<288x128xf32>
    %54 = arith.addf %50, %53 : vector<288x128xf32>
    %c0_57 = arith.constant 0 : index
    %c0_58 = arith.constant 0 : index
    %55 = vector.load %arg5[%c0_57, %c0_58] : memref<288x128xf32, #tpu.memory_space<vmem>>, vector<288x128xf32>
    tpu.vector_store %arg5[%c0_57, %c0_58], %54 {strides = array<i32>} : memref<288x128xf32, #tpu.memory_space<vmem>>, vector<288x128xf32>,
    %c0_59 = arith.constant 0 : index
    %c36 = arith.constant 36 : index
    %c0_60 = arith.constant 0 : index
    %56 = vector.load %arg1[%c0_59, %c36, %c0_60] : memref<1x332x43xf32, #tpu.memory_space<vmem>>, vector<1x288x43xf32>
    %57 = vector.shape_cast %56 : vector<1x288x43xf32> to vector<288x43xf32>
    %58 = arith.truncf %57 : vector<288x43xf32> to vector<288x43xbf16>
    %c0_61 = arith.constant 0 : index
    %c0_62 = arith.constant 0 : index
    %59 = vector.load %arg5[%c0_61, %c0_62] : memref<288x128xf32, #tpu.memory_space<vmem>>, vector<288x128xf32>
    %c6 = arith.constant 6 : index
    %c0_63 = arith.constant 0 : index
    %c0_64 = arith.constant 0 : index
    %60 = vector.load %arg2[%c6, %c0_63, %c0_64] : memref<9x43x128xbf16, #tpu.memory_space<vmem>>, vector<1x43x128xbf16>
    %61 = vector.shape_cast %60 : vector<1x43x128xbf16> to vector<43x128xbf16>
    %cst_65 = arith.constant dense<0.000000e+00> : vector<288x128xf32>
    %62 = tpu.matmul %58, %61, %cst_65 {dimension_numbers = #tpu.dot_dimension_numbers<[1], [0], [0], [1], [0, 0, 1, 1], [], []>} : vector<288x43xbf16>, vector<43x128xbf16>, vector<288x128xf32> -> vector<288x128xf32>
    %63 = arith.addf %59, %62 : vector<288x128xf32>
    %c0_66 = arith.constant 0 : index
    %c0_67 = arith.constant 0 : index
    %64 = vector.load %arg5[%c0_66, %c0_67] : memref<288x128xf32, #tpu.memory_space<vmem>>, vector<288x128xf32>
    tpu.vector_store %arg5[%c0_66, %c0_67], %63 {strides = array<i32>} : memref<288x128xf32, #tpu.memory_space<vmem>>, vector<288x128xf32>,
    %c0_68 = arith.constant 0 : index
    %c37 = arith.constant 37 : index
    %c0_69 = arith.constant 0 : index
    %65 = vector.load %arg1[%c0_68, %c37, %c0_69] : memref<1x332x43xf32, #tpu.memory_space<vmem>>, vector<1x288x43xf32>
    %66 = vector.shape_cast %65 : vector<1x288x43xf32> to vector<288x43xf32>
    %67 = arith.truncf %66 : vector<288x43xf32> to vector<288x43xbf16>
    %c0_70 = arith.constant 0 : index
    %c0_71 = arith.constant 0 : index
    %68 = vector.load %arg5[%c0_70, %c0_71] : memref<288x128xf32, #tpu.memory_space<vmem>>, vector<288x128xf32>
    %c7 = arith.constant 7 : index
    %c0_72 = arith.constant 0 : index
    %c0_73 = arith.constant 0 : index
    %69 = vector.load %arg2[%c7, %c0_72, %c0_73] : memref<9x43x128xbf16, #tpu.memory_space<vmem>>, vector<1x43x128xbf16>
    %70 = vector.shape_cast %69 : vector<1x43x128xbf16> to vector<43x128xbf16>
    %cst_74 = arith.constant dense<0.000000e+00> : vector<288x128xf32>
    %71 = tpu.matmul %67, %70, %cst_74 {dimension_numbers = #tpu.dot_dimension_numbers<[1], [0], [0], [1], [0, 0, 1, 1], [], []>} : vector<288x43xbf16>, vector<43x128xbf16>, vector<288x128xf32> -> vector<288x128xf32>
    %72 = arith.addf %68, %71 : vector<288x128xf32>
    %c0_75 = arith.constant 0 : index
    %c0_76 = arith.constant 0 : index
    %73 = vector.load %arg5[%c0_75, %c0_76] : memref<288x128xf32, #tpu.memory_space<vmem>>, vector<288x128xf32>
    tpu.vector_store %arg5[%c0_75, %c0_76], %72 {strides = array<i32>} : memref<288x128xf32, #tpu.memory_space<vmem>>, vector<288x128xf32>,
    %c0_77 = arith.constant 0 : index
    %c38 = arith.constant 38 : index
    %c0_78 = arith.constant 0 : index
    %74 = vector.load %arg1[%c0_77, %c38, %c0_78] : memref<1x332x43xf32, #tpu.memory_space<vmem>>, vector<1x288x43xf32>
    %75 = vector.shape_cast %74 : vector<1x288x43xf32> to vector<288x43xf32>
    %76 = arith.truncf %75 : vector<288x43xf32> to vector<288x43xbf16>
    %c0_79 = arith.constant 0 : index
    %c0_80 = arith.constant 0 : index
    %77 = vector.load %arg5[%c0_79, %c0_80] : memref<288x128xf32, #tpu.memory_space<vmem>>, vector<288x128xf32>
    %c8 = arith.constant 8 : index
    %c0_81 = arith.constant 0 : index
    %c0_82 = arith.constant 0 : index
    %78 = vector.load %arg2[%c8, %c0_81, %c0_82] : memref<9x43x128xbf16, #tpu.memory_space<vmem>>, vector<1x43x128xbf16>
    %79 = vector.shape_cast %78 : vector<1x43x128xbf16> to vector<43x128xbf16>
    %cst_83 = arith.constant dense<0.000000e+00> : vector<288x128xf32>
    %80 = tpu.matmul %76, %79, %cst_83 {dimension_numbers = #tpu.dot_dimension_numbers<[1], [0], [0], [1], [0, 0, 1, 1], [], []>} : vector<288x43xbf16>, vector<43x128xbf16>, vector<288x128xf32> -> vector<288x128xf32>
    %81 = arith.addf %77, %80 : vector<288x128xf32>
    %c0_84 = arith.constant 0 : index
    %c0_85 = arith.constant 0 : index
    %82 = vector.load %arg5[%c0_84, %c0_85] : memref<288x128xf32, #tpu.memory_space<vmem>>, vector<288x128xf32>
    tpu.vector_store %arg5[%c0_84, %c0_85], %81 {strides = array<i32>} : memref<288x128xf32, #tpu.memory_space<vmem>>, vector<288x128xf32>,
    %c0_86 = arith.constant 0 : index
    %c0_87 = arith.constant 0 : index
    %83 = vector.load %arg5[%c0_86, %c0_87] : memref<288x128xf32, #tpu.memory_space<vmem>>, vector<288x128xf32>
    %c0_88 = arith.constant 0 : index
    %c0_89 = arith.constant 0 : index
    %84 = vector.load %arg3[%c0_88, %c0_89] : memref<1x128xf32, #tpu.memory_space<vmem>>, vector<1x128xf32>
    %85 = vector.broadcast %84 : vector<1x128xf32> to vector<288x128xf32>
    %86 = arith.addf %83, %85 : vector<288x128xf32>
    %cst_90 = arith.constant 0.000000e+00 : f32
    %87 = vector.broadcast %cst_90 : f32 to vector<288x128xf32>
    %88 = arith.maximumf %86, %87 : vector<288x128xf32>
    %c0_91 = arith.constant 0 : index
    %c0_92 = arith.constant 0 : index
    %c0_93 = arith.constant 0 : index
    %89 = vector.load %arg4[%c0_91, %c0_92, %c0_93] : memref<1x288x128xf32, #tpu.memory_space<vmem>>, vector<1x288x128xf32>
    %90 = vector.shape_cast %89 : vector<1x288x128xf32> to vector<288x128xf32>
    %91 = vector.shape_cast %88 : vector<288x128xf32> to vector<1x288x128xf32>
    tpu.vector_store %arg4[%c0_91, %c0_92, %c0_93], %91 {strides = array<i32>} : memref<1x288x128xf32, #tpu.memory_space<vmem>>, vector<1x288x128xf32>,
    return
  }
  func.func @transform_0(%arg0: i32) -> (i32, i32, i32) {
    %c0_i32 = arith.constant 0 : i32
    %c0_i32_0 = arith.constant 0 : i32
    %c0_i32_1 = arith.constant 0 : i32
    return %arg0, %c0_i32, %c0_i32_0 : i32, i32, i32
  }
  func.func @transform_1(%arg0: i32) -> (i32, i32, i32) {
    %c0_i32 = arith.constant 0 : i32
    %c0_i32_0 = arith.constant 0 : i32
    %c0_i32_1 = arith.constant 0 : i32
    %c0_i32_2 = arith.constant 0 : i32
    return %c0_i32, %c0_i32_0, %c0_i32_1 : i32, i32, i32
  }
  func.func @transform_2(%arg0: i32) -> (i32, i32) {
    %c0_i32 = arith.constant 0 : i32
    %c0_i32_0 = arith.constant 0 : i32
    %c0_i32_1 = arith.constant 0 : i32
    return %c0_i32, %c0_i32_0 : i32, i32
  }
  func.func @transform_3(%arg0: i32) -> (i32, i32, i32) {
    %c0_i32 = arith.constant 0 : i32
    %c0_i32_0 = arith.constant 0 : i32
    %c0_i32_1 = arith.constant 0 : i32
    return %arg0, %c0_i32, %c0_i32_0 : i32, i32, i32
  }
}

module attributes {stable_mosaic.version = 11 : i64} {
  func.func @_mlp_kernel(%arg0: i32, %arg1: memref<256x128xbf16, #tpu.memory_space<vmem>>, %arg2: memref<128x128xbf16, #tpu.memory_space<vmem>>, %arg3: memref<1x128xf32, #tpu.memory_space<vmem>>, %arg4: memref<256x128xf32, #tpu.memory_space<vmem>>) attributes {dimension_semantics = [#tpu.dimension_semantics<parallel>], iteration_bounds = array<i64: 2>, scalar_prefetch = 0 : i64, scratch_operands = 0 : i64, tpu.core_type = #tpu.core_type<tc>, window_params = [{transform_indices = @transform_0, window_bounds = array<i64: 256, 128>}, {pipeline_mode = #tpu.pipeline_mode<synchronous>, transform_indices = @transform_1, window_bounds = array<i64: 128, 128>}, {pipeline_mode = #tpu.pipeline_mode<synchronous>, transform_indices = @transform_2, window_bounds = array<i64: 1, 128>}, {transform_indices = @transform_3, window_bounds = array<i64: 256, 128>}]} {
    %c0 = arith.constant 0 : index
    %c0_0 = arith.constant 0 : index
    %0 = vector.load %arg1[%c0, %c0_0] : memref<256x128xbf16, #tpu.memory_space<vmem>>, vector<256x128xbf16>
    %c0_1 = arith.constant 0 : index
    %c0_2 = arith.constant 0 : index
    %1 = vector.load %arg2[%c0_1, %c0_2] : memref<128x128xbf16, #tpu.memory_space<vmem>>, vector<128x128xbf16>
    %cst = arith.constant dense<0.000000e+00> : vector<256x128xf32>
    %2 = tpu.matmul %0, %1, %cst {dimension_numbers = #tpu.dot_dimension_numbers<[1], [0], [0], [1], [0, 0, 1, 1], [], []>} : vector<256x128xbf16>, vector<128x128xbf16>, vector<256x128xf32> -> vector<256x128xf32>
    %c0_3 = arith.constant 0 : index
    %c0_4 = arith.constant 0 : index
    %3 = vector.load %arg3[%c0_3, %c0_4] : memref<1x128xf32, #tpu.memory_space<vmem>>, vector<1x128xf32>
    %4 = vector.broadcast %3 : vector<1x128xf32> to vector<256x128xf32>
    %5 = arith.addf %2, %4 : vector<256x128xf32>
    %c0_5 = arith.constant 0 : index
    %c0_6 = arith.constant 0 : index
    %6 = vector.load %arg4[%c0_5, %c0_6] : memref<256x128xf32, #tpu.memory_space<vmem>>, vector<256x128xf32>
    tpu.vector_store %arg4[%c0_5, %c0_6], %5 {strides = array<i32>} : memref<256x128xf32, #tpu.memory_space<vmem>>, vector<256x128xf32>,
    return
  }
  func.func @transform_0(%arg0: i32) -> (i32, i32) {
    %c0_i32 = arith.constant 0 : i32
    %c0_i32_0 = arith.constant 0 : i32
    return %arg0, %c0_i32 : i32, i32
  }
  func.func @transform_1(%arg0: i32) -> (i32, i32) {
    %c0_i32 = arith.constant 0 : i32
    %c0_i32_0 = arith.constant 0 : i32
    %c0_i32_1 = arith.constant 0 : i32
    return %c0_i32, %c0_i32_0 : i32, i32
  }
  func.func @transform_2(%arg0: i32) -> (i32, i32) {
    %c0_i32 = arith.constant 0 : i32
    %c0_i32_0 = arith.constant 0 : i32
    %c0_i32_1 = arith.constant 0 : i32
    return %c0_i32, %c0_i32_0 : i32, i32
  }
  func.func @transform_3(%arg0: i32) -> (i32, i32) {
    %c0_i32 = arith.constant 0 : i32
    %c0_i32_0 = arith.constant 0 : i32
    return %arg0, %c0_i32 : i32, i32
  }
}

</mosaic_0001>

<bundles_post_ra>
// kernel: model_forward.11
= control target key start
LH: loop header
LB: loop body
LE: loop exit
PB: predicated region body
PF: predicated region fallthrough
CT: control target
= control target key end

     0   :  { %s455_s1 = inlined_call_operand.vmem [shape: bf16[128,128], index: 1, kind: input, shape index: {}]   ;;  %s456_s2 = inlined_call_operand.vmem [shape: f32[1,128], index: 2, kind: input, shape index: {}]   ;;  %s457_s0 = inlined_call_operand.vmem [shape: bf16[128,128], index: 0, kind: input, shape index: {}]   ;;  %s458_s3 = inlined_call_operand.vmem [shape: f32[128,128], index: 3, kind: output, shape index: {}]  }
   0x1   :  { %v310_v0 = vld [vmem:[%s455_s1 + $0x38] sm:$0xff]  ;;  %v309_v1 = vld [vmem:[%s455_s1 + $0x30] sm:$0xff]  ;;  %v308_v2 = vld [vmem:[%s455_s1 + $0x28] sm:$0xff] }
   0x2   :  { %146 = vmatpush.bf16.msra.mxu0 %v310_v0  ;;  %311 = vmatpush.bf16.msra.mxu1 %v310_v0  ;;  %v307_v3 = vld [vmem:[%s455_s1 + $0x20] sm:$0xff]  ;;  %v306_v4 = vld [vmem:[%s455_s1 + $0x18] sm:$0xff]  ;;  %v305_v5 = vld [vmem:[%s455_s1 + $0x10] sm:$0xff] }
   0x3   :  { %312 = vmatpush.bf16.msra.mxu2 %v310_v0  ;;  %313 = vmatpush.bf16.msra.mxu3 %v310_v0  ;;  %v304_v6 = vld [vmem:[%s455_s1 + $0x8] sm:$0xff]  ;;  %v303_v7 = vld [vmem:[%s455_s1] sm:$0xff]  ;;  %v297_v9 = vld [vmem:[%s457_s0 + $0x10] sm:$0xff] }
   0x4   :  { %v295_v8 = vld [vmem:[%s457_s0] sm:$0xff]  ;;  %v301_v11 = vld [vmem:[%s457_s0 + $0x30] sm:$0xff]  ;;  %v296_v12 = vld [vmem:[%s457_s0 + $0x8] sm:$0xff] }
   0x5   :  { %v299_v10 = vld [vmem:[%s457_s0 + $0x20] sm:$0xff]  ;;  %v298_v13 = vld [vmem:[%s457_s0 + $0x18] sm:$0xff]  ;;  %v300_v14 = vld [vmem:[%s457_s0 + $0x28] sm:$0xff] }
   0x6   :  { %147 = vmatpush.bf16.msra.mxu0 %v309_v1  ;;  %314 = vmatpush.bf16.msra.mxu1 %v309_v1  ;;  %v302_v15 = vld [vmem:[%s457_s0 + $0x38] sm:$0xff]  ;;  %v335_v16 = vld [vmem:[%s456_s2] ss:$0 sm:$0xff] }
   0x7   :  { %315 = vmatpush.bf16.msra.mxu2 %v309_v1  ;;  %316 = vmatpush.bf16.msra.mxu3 %v309_v1 }
   0xa   :  { %148 = vmatpush.bf16.msra.mxu0 %v308_v2  ;;  %317 = vmatpush.bf16.msra.mxu1 %v308_v2 }
   0xb   :  { %318 = vmatpush.bf16.msra.mxu2 %v308_v2  ;;  %319 = vmatpush.bf16.msra.mxu3 %v308_v2 }
   0xe   :  { %149 = vmatpush.bf16.msra.mxu0 %v307_v3  ;;  %320 = vmatpush.bf16.msra.mxu1 %v307_v3 }
   0xf   :  { %321 = vmatpush.bf16.msra.mxu2 %v307_v3  ;;  %322 = vmatpush.bf16.msra.mxu3 %v307_v3 }
  0x12   :  { %150 = vmatpush.bf16.msra.mxu0 %v306_v4  ;;  %323 = vmatpush.bf16.msra.mxu1 %v306_v4 }
  0x13   :  { %324 = vmatpush.bf16.msra.mxu2 %v306_v4  ;;  %325 = vmatpush.bf16.msra.mxu3 %v306_v4 }
  0x16   :  { %151 = vmatpush.bf16.msra.mxu0 %v305_v5  ;;  %326 = vmatpush.bf16.msra.mxu1 %v305_v5 }
  0x17   :  { %327 = vmatpush.bf16.msra.mxu2 %v305_v5  ;;  %328 = vmatpush.bf16.msra.mxu3 %v305_v5 }
  0x1a   :  { %152 = vmatpush.bf16.msra.mxu0 %v304_v6  ;;  %329 = vmatpush.bf16.msra.mxu1 %v304_v6 }
  0x1b   :  { %330 = vmatpush.bf16.msra.mxu2 %v304_v6  ;;  %331 = vmatpush.bf16.msra.mxu3 %v304_v6 }
  0x1e   :  { %153 = vmatpush.bf16.msra.mxu0 %v303_v7  ;;  %332 = vmatpush.bf16.msra.mxu1 %v303_v7 }
  0x1f   :  { %333 = vmatpush.bf16.msra.mxu2 %v303_v7  ;;  %334 = vmatpush.bf16.msra.mxu3 %v303_v7 }
  0x21   :  { %154 = vmatmul.bf16.vlgmr.msra.gmra.mxu0 %v295_v8  ;;  %164 = vmatmul.bf16.vlgmr.msra.gmra.mxu1 %v297_v9 }
  0x22   :  { %174 = vmatmul.bf16.vlgmr.msra.gmra.mxu2 %v299_v10  ;;  %184 = vmatmul.bf16.vlgmr.msra.gmra.mxu3 %v301_v11 }
  0x31   :  { %159 = vmatmul.bf16.gmra.mxu0 %v296_v12  ;;  %169 = vmatmul.bf16.gmra.mxu1 %v298_v13 }
  0x32   :  { %179 = vmatmul.bf16.gmra.mxu2 %v300_v14  ;;  %189 = vmatmul.bf16.gmra.mxu3 %v302_v15 }
  0x9e   :  { %v155_v17 = vpop.f32.mrf.mxu0  ;;  %v165_v18 = vpop.f32.mrf.mxu1 }
  0x9f   :  { %v156_v19 = vadd.f32 %v335_v16, %v155_v17  ;;  %v166_v20 = vadd.f32 %v335_v16, %v165_v18 }
  0xa1   :  { %v195_v21 = vmax.f32 %v156_v19, 0.0  ;;  %v199_v22 = vmax.f32 %v166_v20, 0.0 }
  0xa3   :  { %211 = vst [vmem:[%s458_s3] sm:$0xff] %v195_v21 }
  0xa4   :  { %215 = vst [vmem:[%s458_s3 + $0x20] sm:$0xff] %v199_v22 }
  0xa5   :  { %v175_v23 = vpop.f32.mrf.mxu2  ;;  %v185_v24 = vpop.f32.mrf.mxu3 }
  0xa6   :  { %v176_v25 = vadd.f32 %v335_v16, %v175_v23  ;;  %v186_v26 = vadd.f32 %v335_v16, %v185_v24  ;;  %v157_v27 = vpop.f32.mrf.mxu0  ;;  %v167_v28 = vpop.f32.mrf.mxu1 }
  0xa7   :  { %v158_v29 = vadd.f32 %v335_v16, %v157_v27  ;;  %v168_v30 = vadd.f32 %v335_v16, %v167_v28 }
  0xa8   :  { %v203_v31 = vmax.f32 %v176_v25, 0.0  ;;  %v207_v32 = vmax.f32 %v186_v26, 0.0 }
  0xa9   :  { %v196_v33 = vmax.f32 %v158_v29, 0.0  ;;  %v200_v34 = vmax.f32 %v168_v30, 0.0 }
  0xaa   :  { %219 = vst [vmem:[%s458_s3 + $0x40] sm:$0xff] %v203_v31 }
  0xab   :  { %223 = vst [vmem:[%s458_s3 + $0x60] sm:$0xff] %v207_v32 }
  0xac   :  { %212 = vst [vmem:[%s458_s3 + $0x8] sm:$0xff] %v196_v33 }
  0xad   :  { %216 = vst [vmem:[%s458_s3 + $0x28] sm:$0xff] %v200_v34  ;;  %v177_v35 = vpop.f32.mrf.mxu2  ;;  %v187_v36 = vpop.f32.mrf.mxu3 }
  0xae   :  { %v178_v37 = vadd.f32 %v335_v16, %v177_v35  ;;  %v188_v38 = vadd.f32 %v335_v16, %v187_v36  ;;  %v160_v39 = vpop.f32.mrf.mxu0  ;;  %v170_v40 = vpop.f32.mrf.mxu1 }
  0xaf   :  { %v161_v41 = vadd.f32 %v335_v16, %v160_v39  ;;  %v171_v42 = vadd.f32 %v335_v16, %v170_v40 }
  0xb0   :  { %v204_v43 = vmax.f32 %v178_v37, 0.0  ;;  %v208_v44 = vmax.f32 %v188_v38, 0.0 }
  0xb1   :  { %v197_v45 = vmax.f32 %v161_v41, 0.0  ;;  %v201_v46 = vmax.f32 %v171_v42, 0.0 }
  0xb2   :  { %220 = vst [vmem:[%s458_s3 + $0x48] sm:$0xff] %v204_v43 }
  0xb3   :  { %224 = vst [vmem:[%s458_s3 + $0x68] sm:$0xff] %v208_v44 }
  0xb4   :  { %213 = vst [vmem:[%s458_s3 + $0x10] sm:$0xff] %v197_v45 }
  0xb5   :  { %217 = vst [vmem:[%s458_s3 + $0x30] sm:$0xff] %v201_v46  ;;  %v180_v47 = vpop.f32.mrf.mxu2  ;;  %v190_v48 = vpop.f32.mrf.mxu3 }
  0xb6   :  { %v181_v49 = vadd.f32 %v335_v16, %v180_v47  ;;  %v191_v50 = vadd.f32 %v335_v16, %v190_v48  ;;  %v162_v51 = vpop.f32.mrf.mxu0  ;;  %v172_v52 = vpop.f32.mrf.mxu1 }
  0xb7   :  { %v163_v53 = vadd.f32 %v335_v16, %v162_v51  ;;  %v173_v54 = vadd.f32 %v335_v16, %v172_v52 }
  0xb8   :  { %v205_v55 = vmax.f32 %v181_v49, 0.0  ;;  %v209_v56 = vmax.f32 %v191_v50, 0.0 }
  0xb9   :  { %v198_v57 = vmax.f32 %v163_v53, 0.0  ;;  %v202_v58 = vmax.f32 %v173_v54, 0.0 }
  0xba   :  { %221 = vst [vmem:[%s458_s3 + $0x50] sm:$0xff] %v205_v55 }
  0xbb   :  { %225 = vst [vmem:[%s458_s3 + $0x70] sm:$0xff] %v209_v56 }
  0xbc   :  { %214 = vst [vmem:[%s458_s3 + $0x18] sm:$0xff] %v198_v57 }
  0xbd   :  { %218 = vst [vmem:[%s458_s3 + $0x38] sm:$0xff] %v202_v58  ;;  %v182_v59 = vpop.f32.mrf.mxu2  ;;  %v192_v60 = vpop.f32.mrf.mxu3 }
  0xbe   :  { %v183_v61 = vadd.f32 %v335_v16, %v182_v59  ;;  %v193_v62 = vadd.f32 %v335_v16, %v192_v60 }
  0xc0   :  { %v206_v63 = vmax.f32 %v183_v61, 0.0  ;;  %v210_v0 = vmax.f32 %v193_v62, 0.0 }
  0xc2   :  { %222 = vst [vmem:[%s458_s3 + $0x58] sm:$0xff] %v206_v63 }
  0xc3   :  { %226 = vst [vmem:[%s458_s3 + $0x78] sm:$0xff] %v210_v0 }

// kernel: model_forward.10
= control target key start
LH: loop header
LB: loop body
LE: loop exit
PB: predicated region body
PF: predicated region fallthrough
CT: control target
= control target key end

     0   :  { %s690_s1 = inlined_call_operand.vmem [shape: bf16[128,128], index: 1, kind: input, shape index: {}]   ;;  %s691_s3 = inlined_call_operand.vmem [shape: f32[1,128], index: 3, kind: input, shape index: {}]   ;;  %s692_s0 = inlined_call_operand.vmem [shape: bf16[128,128], index: 0, kind: input, shape index: {}]   ;;  %s693_s2 = inlined_call_operand.vmem [shape: bf16[128,128], index: 2, kind: input, shape index: {}]   ;;  %s694_s4 = inlined_call_operand.vmem [shape: f32[1,128], index: 4, kind: input, shape index: {}]   ;;  %s695_s5 = inlined_call_operand.vmem [shape: f32[128,128], index: 5, kind: output, shape index: {}]  }
   0x1   :  { %v489_v0 = vld [vmem:[%s690_s1 + $0x38] sm:$0xff]  ;;  %v488_v1 = vld [vmem:[%s690_s1 + $0x30] sm:$0xff]  ;;  %v487_v2 = vld [vmem:[%s690_s1 + $0x28] sm:$0xff] }
   0x2   :  { %152 = vmatpush.bf16.msra.mxu0 %v489_v0  ;;  %498 = vmatpush.bf16.msra.mxu2 %v489_v0  ;;  %v486_v3 = vld [vmem:[%s690_s1 + $0x20] sm:$0xff]  ;;  %v485_v4 = vld [vmem:[%s690_s1 + $0x18] sm:$0xff]  ;;  %v484_v5 = vld [vmem:[%s690_s1 + $0x10] sm:$0xff] }
   0x3   :  { %v483_v6 = vld [vmem:[%s690_s1 + $0x8] sm:$0xff]  ;;  %v482_v7 = vld [vmem:[%s690_s1] sm:$0xff]  ;;  %v497_v12 = vld [vmem:[%s693_s2 + $0x38] sm:$0xff] }
   0x4   :  { %v474_v8 = vld [vmem:[%s692_s0] sm:$0xff]  ;;  %v475_v10 = vld [vmem:[%s692_s0 + $0x8] sm:$0xff]  ;;  %293 = vmatpush.bf16.msra.mxu1 %v497_v12  ;;  %v496_v13 = vld [vmem:[%s693_s2 + $0x30] sm:$0xff]  ;;  %506 = vmatpush.bf16.msra.mxu3 %v497_v12 }
   0x5   :  { %v478_v9 = vld [vmem:[%s692_s0 + $0x20] sm:$0xff]  ;;  %v479_v11 = vld [vmem:[%s692_s0 + $0x28] sm:$0xff]  ;;  %v476_v16 = vld [vmem:[%s692_s0 + $0x10] sm:$0xff] }
   0x6   :  { %153 = vmatpush.bf16.msra.mxu0 %v488_v1  ;;  %499 = vmatpush.bf16.msra.mxu2 %v488_v1  ;;  %v495_v14 = vld [vmem:[%s693_s2 + $0x28] sm:$0xff]  ;;  %v494_v15 = vld [vmem:[%s693_s2 + $0x20] sm:$0xff]  ;;  %v480_v17 = vld [vmem:[%s692_s0 + $0x30] sm:$0xff] }
   0x7   :  { %v477_v18 = vld [vmem:[%s692_s0 + $0x18] sm:$0xff]  ;;  %v492_v21 = vld [vmem:[%s693_s2 + $0x10] sm:$0xff]  ;;  %v491_v22 = vld [vmem:[%s693_s2 + $0x8] sm:$0xff] }
   0x8   :  { %294 = vmatpush.bf16.msra.mxu1 %v496_v13  ;;  %507 = vmatpush.bf16.msra.mxu3 %v496_v13  ;;  %v481_v19 = vld [vmem:[%s692_s0 + $0x38] sm:$0xff]  ;;  %v490_v23 = vld [vmem:[%s693_s2] sm:$0xff] }
   0x9   :  { %v493_v20 = vld [vmem:[%s693_s2 + $0x18] sm:$0xff]  ;;  %v514_v25 = vld [vmem:[%s691_s3] ss:$0 sm:$0xff] }
   0xa   :  { %154 = vmatpush.bf16.msra.mxu0 %v487_v2  ;;  %500 = vmatpush.bf16.msra.mxu2 %v487_v2 }
   0xc   :  { %295 = vmatpush.bf16.msra.mxu1 %v495_v14  ;;  %508 = vmatpush.bf16.msra.mxu3 %v495_v14 }
   0xe   :  { %155 = vmatpush.bf16.msra.mxu0 %v486_v3  ;;  %501 = vmatpush.bf16.msra.mxu2 %v486_v3 }
  0x10   :  { %296 = vmatpush.bf16.msra.mxu1 %v494_v15  ;;  %509 = vmatpush.bf16.msra.mxu3 %v494_v15 }
  0x12   :  { %156 = vmatpush.bf16.msra.mxu0 %v485_v4  ;;  %502 = vmatpush.bf16.msra.mxu2 %v485_v4 }
  0x14   :  { %297 = vmatpush.bf16.msra.mxu1 %v493_v20  ;;  %510 = vmatpush.bf16.msra.mxu3 %v493_v20 }
  0x16   :  { %157 = vmatpush.bf16.msra.mxu0 %v484_v5  ;;  %503 = vmatpush.bf16.msra.mxu2 %v484_v5 }
  0x18   :  { %298 = vmatpush.bf16.msra.mxu1 %v492_v21  ;;  %511 = vmatpush.bf16.msra.mxu3 %v492_v21 }
  0x1a   :  { %158 = vmatpush.bf16.msra.mxu0 %v483_v6  ;;  %504 = vmatpush.bf16.msra.mxu2 %v483_v6 }
  0x1c   :  { %299 = vmatpush.bf16.msra.mxu1 %v491_v22  ;;  %512 = vmatpush.bf16.msra.mxu3 %v491_v22 }
  0x1e   :  { %159 = vmatpush.bf16.msra.mxu0 %v482_v7  ;;  %505 = vmatpush.bf16.msra.mxu2 %v482_v7 }
  0x20   :  { %300 = vmatpush.bf16.msra.mxu1 %v490_v23  ;;  %513 = vmatpush.bf16.msra.mxu3 %v490_v23 }
  0x21   :  { %160 = vmatmul.bf16.vlgmr.msra.gmra.mxu0 %v474_v8  ;;  %180 = vmatmul.bf16.vlgmr.msra.gmra.mxu2 %v478_v9 }
  0x31   :  { %165 = vmatmul.bf16.gmra.mxu0 %v475_v10  ;;  %185 = vmatmul.bf16.gmra.mxu2 %v479_v11 }
  0x41   :  { %170 = vmatmul.bf16.gmra.mxu0 %v476_v16  ;;  %190 = vmatmul.bf16.gmra.mxu2 %v480_v17  ;;  %v624_v17 = vld [vmem:[%s694_s4] ss:$0 sm:$0xff] }
  0x51   :  { %175 = vmatmul.bf16.gmra.mxu0 %v477_v18  ;;  %195 = vmatmul.bf16.gmra.mxu2 %v481_v19 }
  0x9e   :  { %v161_v24 = vpop.f32.mrf.mxu0 }
  0x9f   :  { %v162_v26 = vadd.f32 %v514_v25, %v161_v24 }
  0xa1   :  { %v201_v29 = vmax.f32 %v162_v26, 0.0 }
  0xa4   :  { %v181_v27 = vpop.f32.mrf.mxu2 }
  0xa5   :  { %v182_v32 = vadd.f32 %v514_v25, %v181_v27 }
  0xa6   :  { %v163_v28 = vpop.f32.mrf.mxu0 }
  0xa7   :  { %v164_v30 = vadd.f32 %v514_v25, %v163_v28  ;;  %v209_v37 = vmax.f32 %v182_v32, 0.0 }
  0xa9   :  { %v202_v31 = vmax.f32 %v164_v30, 0.0 }
  0xab   :  { %v217_v33 = vpack.c.bf16 %v202_v31, %v201_v29 }
  0xac   :  { %v183_v34 = vpop.f32.mrf.mxu2 }
  0xad   :  { %v184_v35 = vadd.f32 %v514_v25, %v183_v34  ;;  %301 = vmatmul.bf16.vlgmr.msra.gmra.mxu1 %v217_v33 }
  0xae   :  { %v166_v36 = vpop.f32.mrf.mxu0 }
  0xaf   :  { %v210_v38 = vmax.f32 %v184_v35, 0.0  ;;  %v167_v40 = vadd.f32 %v514_v25, %v166_v36 }
  0xb1   :  { %v221_v39 = vpack.c.bf16 %v210_v38, %v209_v37  ;;  %v203_v43 = vmax.f32 %v167_v40, 0.0 }
  0xb3   :  { %321 = vmatmul.bf16.vlgmr.msra.gmra.mxu3 %v221_v39 }
  0xb4   :  { %v186_v41 = vpop.f32.mrf.mxu2 }
  0xb5   :  { %v187_v46 = vadd.f32 %v514_v25, %v186_v41 }
  0xb6   :  { %v168_v42 = vpop.f32.mrf.mxu0 }
  0xb7   :  { %v169_v44 = vadd.f32 %v514_v25, %v168_v42  ;;  %v211_v51 = vmax.f32 %v187_v46, 0.0 }
  0xb9   :  { %v204_v45 = vmax.f32 %v169_v44, 0.0 }
  0xbb   :  { %v218_v47 = vpack.c.bf16 %v204_v45, %v203_v43 }
  0xbc   :  { %v188_v48 = vpop.f32.mrf.mxu2 }
  0xbd   :  { %v189_v49 = vadd.f32 %v514_v25, %v188_v48  ;;  %306 = vmatmul.bf16.gmra.mxu1 %v218_v47 }
  0xbe   :  { %v171_v50 = vpop.f32.mrf.mxu0 }
  0xbf   :  { %v212_v52 = vmax.f32 %v189_v49, 0.0  ;;  %v172_v54 = vadd.f32 %v514_v25, %v171_v50 }
  0xc1   :  { %v222_v53 = vpack.c.bf16 %v212_v52, %v211_v51  ;;  %v205_v57 = vmax.f32 %v172_v54, 0.0 }
  0xc3   :  { %326 = vmatmul.bf16.gmra.mxu3 %v222_v53 }
  0xc4   :  { %v191_v55 = vpop.f32.mrf.mxu2 }
  0xc5   :  { %v192_v60 = vadd.f32 %v514_v25, %v191_v55 }
  0xc6   :  { %v173_v56 = vpop.f32.mrf.mxu0 }
  0xc7   :  { %v174_v58 = vadd.f32 %v514_v25, %v173_v56  ;;  %v213_v1 = vmax.f32 %v192_v60, 0.0 }
  0xc9   :  { %v206_v59 = vmax.f32 %v174_v58, 0.0 }
  0xcb   :  { %v219_v61 = vpack.c.bf16 %v206_v59, %v205_v57 }
  0xcc   :  { %v193_v62 = vpop.f32.mrf.mxu2 }
  0xcd   :  { %v194_v63 = vadd.f32 %v514_v25, %v193_v62  ;;  %311 = vmatmul.bf16.gmra.mxu1 %v219_v61 }
  0xce   :  { %v176_v0 = vpop.f32.mrf.mxu0 }
  0xcf   :  { %v214_v2 = vmax.f32 %v194_v63, 0.0  ;;  %v177_v4 = vadd.f32 %v514_v25, %v176_v0 }
  0xd1   :  { %v223_v3 = vpack.c.bf16 %v214_v2, %v213_v1  ;;  %v207_v7 = vmax.f32 %v177_v4, 0.0 }
  0xd3   :  { %331 = vmatmul.bf16.gmra.mxu3 %v223_v3 }
  0xd4   :  { %v196_v5 = vpop.f32.mrf.mxu2 }
  0xd5   :  { %v197_v10 = vadd.f32 %v514_v25, %v196_v5 }
  0xd6   :  { %v178_v6 = vpop.f32.mrf.mxu0 }
  0xd7   :  { %v179_v8 = vadd.f32 %v514_v25, %v178_v6  ;;  %v215_v14 = vmax.f32 %v197_v10, 0.0 }
  0xd9   :  { %v208_v9 = vmax.f32 %v179_v8, 0.0 }
  0xdb   :  { %v220_v11 = vpack.c.bf16 %v208_v9, %v207_v7 }
  0xdc   :  { %v198_v12 = vpop.f32.mrf.mxu2 }
  0xdd   :  { %v199_v13 = vadd.f32 %v514_v25, %v198_v12  ;;  %316 = vmatmul.bf16.gmra.mxu1 %v220_v11 }
  0xdf   :  { %v216_v15 = vmax.f32 %v199_v13, 0.0 }
  0xe1   :  { %v224_v16 = vpack.c.bf16 %v216_v15, %v215_v14 }
  0xe3   :  { %336 = vmatmul.bf16.gmra.mxu3 %v224_v16 }
 0x12a   :  { %v302_v18 = vpop.f32.mrf.mxu1 }
 0x12b   :  { %v303_v19 = vadd.f32 %v624_v17, %v302_v18 }
 0x12d   :  { %v342_v20 = vmax.f32 %v303_v19, 0.0 }
 0x12f   :  { %358 = vst [vmem:[%s695_s5] sm:$0xff] %v342_v20 }
 0x132   :  { %v304_v21 = vpop.f32.mrf.mxu1 }
 0x133   :  { %v305_v22 = vadd.f32 %v624_v17, %v304_v21 }
 0x135   :  { %v343_v23 = vmax.f32 %v305_v22, 0.0 }
 0x136   :  { %v322_v24 = vpop.f32.mrf.mxu3 }
 0x137   :  { %359 = vst [vmem:[%s695_s5 + $0x8] sm:$0xff] %v343_v23  ;;  %v323_v25 = vadd.f32 %v624_v17, %v322_v24 }
 0x139   :  { %v350_v26 = vmax.f32 %v323_v25, 0.0 }
 0x13a   :  { %v307_v27 = vpop.f32.mrf.mxu1 }
 0x13b   :  { %366 = vst [vmem:[%s695_s5 + $0x40] sm:$0xff] %v350_v26  ;;  %v308_v28 = vadd.f32 %v624_v17, %v307_v27 }
 0x13d   :  { %v344_v29 = vmax.f32 %v308_v28, 0.0 }
 0x13e   :  { %v324_v30 = vpop.f32.mrf.mxu3 }
 0x13f   :  { %360 = vst [vmem:[%s695_s5 + $0x10] sm:$0xff] %v344_v29  ;;  %v325_v31 = vadd.f32 %v624_v17, %v324_v30 }
 0x141   :  { %v351_v32 = vmax.f32 %v325_v31, 0.0 }
 0x142   :  { %v309_v33 = vpop.f32.mrf.mxu1 }
 0x143   :  { %367 = vst [vmem:[%s695_s5 + $0x48] sm:$0xff] %v351_v32  ;;  %v310_v34 = vadd.f32 %v624_v17, %v309_v33 }
 0x145   :  { %v345_v35 = vmax.f32 %v310_v34, 0.0 }
 0x146   :  { %v327_v36 = vpop.f32.mrf.mxu3 }
 0x147   :  { %361 = vst [vmem:[%s695_s5 + $0x18] sm:$0xff] %v345_v35  ;;  %v328_v37 = vadd.f32 %v624_v17, %v327_v36 }
 0x149   :  { %v352_v38 = vmax.f32 %v328_v37, 0.0 }
 0x14a   :  { %v312_v39 = vpop.f32.mrf.mxu1 }
 0x14b   :  { %368 = vst [vmem:[%s695_s5 + $0x50] sm:$0xff] %v352_v38  ;;  %v313_v40 = vadd.f32 %v624_v17, %v312_v39 }
 0x14d   :  { %v346_v41 = vmax.f32 %v313_v40, 0.0 }
 0x14e   :  { %v329_v42 = vpop.f32.mrf.mxu3 }
 0x14f   :  { %362 = vst [vmem:[%s695_s5 + $0x20] sm:$0xff] %v346_v41  ;;  %v330_v43 = vadd.f32 %v624_v17, %v329_v42 }
 0x151   :  { %v353_v44 = vmax.f32 %v330_v43, 0.0 }
 0x152   :  { %v314_v45 = vpop.f32.mrf.mxu1 }
 0x153   :  { %369 = vst [vmem:[%s695_s5 + $0x58] sm:$0xff] %v353_v44  ;;  %v315_v46 = vadd.f32 %v624_v17, %v314_v45 }
 0x155   :  { %v347_v47 = vmax.f32 %v315_v46, 0.0 }
 0x156   :  { %v332_v48 = vpop.f32.mrf.mxu3 }
 0x157   :  { %363 = vst [vmem:[%s695_s5 + $0x28] sm:$0xff] %v347_v47  ;;  %v333_v49 = vadd.f32 %v624_v17, %v332_v48 }
 0x159   :  { %v354_v50 = vmax.f32 %v333_v49, 0.0 }
 0x15a   :  { %v317_v51 = vpop.f32.mrf.mxu1 }
 0x15b   :  { %370 = vst [vmem:[%s695_s5 + $0x60] sm:$0xff] %v354_v50  ;;  %v318_v52 = vadd.f32 %v624_v17, %v317_v51 }
 0x15d   :  { %v348_v53 = vmax.f32 %v318_v52, 0.0 }
 0x15e   :  { %v334_v54 = vpop.f32.mrf.mxu3 }
 0x15f   :  { %364 = vst [vmem:[%s695_s5 + $0x30] sm:$0xff] %v348_v53  ;;  %v335_v55 = vadd.f32 %v624_v17, %v334_v54 }
 0x161   :  { %v355_v56 = vmax.f32 %v335_v55, 0.0 }
 0x162   :  { %v319_v57 = vpop.f32.mrf.mxu1 }
 0x163   :  { %371 = vst [vmem:[%s695_s5 + $0x68] sm:$0xff] %v355_v56  ;;  %v320_v58 = vadd.f32 %v624_v17, %v319_v57 }
 0x165   :  { %v349_v59 = vmax.f32 %v320_v58, 0.0 }
 0x166   :  { %v337_v60 = vpop.f32.mrf.mxu3 }
 0x167   :  { %365 = vst [vmem:[%s695_s5 + $0x38] sm:$0xff] %v349_v59  ;;  %v338_v61 = vadd.f32 %v624_v17, %v337_v60 }
 0x169   :  { %v356_v62 = vmax.f32 %v338_v61, 0.0 }
 0x16b   :  { %372 = vst [vmem:[%s695_s5 + $0x70] sm:$0xff] %v356_v62 }
 0x16e   :  { %v339_v63 = vpop.f32.mrf.mxu3 }
 0x16f   :  { %v340_v0 = vadd.f32 %v624_v17, %v339_v63 }
 0x171   :  { %v357_v1 = vmax.f32 %v340_v0, 0.0 }
 0x173   :  { %373 = vst [vmem:[%s695_s5 + $0x78] sm:$0xff] %v357_v1 }

// kernel: model_forward.12
= control target key start
LH: loop header
LB: loop body
LE: loop exit
PB: predicated region body
PF: predicated region fallthrough
CT: control target
= control target key end

     0   :  { %s1069_s1 = inlined_call_operand.vmem [shape: bf16[256,128], index: 1, kind: input, shape index: {}]   ;;  %s1070_s3 = inlined_call_operand.vmem [shape: f32[1,128], index: 3, kind: input, shape index: {}]   ;;  %s1071_s0 = inlined_call_operand.vmem [shape: bf16[128,256], index: 0, kind: input, shape index: {}]   ;;  %s1072_s2 = inlined_call_operand.vmem [shape: bf16[128,128], index: 2, kind: input, shape index: {}]   ;;  %s1073_s4 = inlined_call_operand.vmem [shape: f32[1,128], index: 4, kind: input, shape index: {}]   ;;  %s1074_s5 = inlined_call_operand.vmem [shape: f32[128,128], index: 5, kind: output, shape index: {}]  }
   0x1   :  { %v706_v0 = vld [vmem:[%s1069_s1 + $0x38] sm:$0xff]  ;;  %v705_v2 = vld [vmem:[%s1069_s1 + $0x30] sm:$0xff]  ;;  %v704_v4 = vld [vmem:[%s1069_s1 + $0x28] sm:$0xff] }
   0x2   :  { %v714_v1 = vld [vmem:[%s1069_s1 + $0x78] sm:$0xff]  ;;  %248 = vmatpush.bf16.msra.mxu0 %v706_v0  ;;  %723 = vmatpush.bf16.msra.mxu3 %v706_v0  ;;  %v713_v3 = vld [vmem:[%s1069_s1 + $0x70] sm:$0xff]  ;;  %v712_v5 = vld [vmem:[%s1069_s1 + $0x68] sm:$0xff] }
   0x3   :  { %297 = vmatpush.bf16.msra.mxu1 %v714_v1  ;;  %v703_v6 = vld [vmem:[%s1069_s1 + $0x20] sm:$0xff]  ;;  %v702_v8 = vld [vmem:[%s1069_s1 + $0x18] sm:$0xff]  ;;  %v701_v10 = vld [vmem:[%s1069_s1 + $0x10] sm:$0xff] }
   0x4   :  { %v711_v7 = vld [vmem:[%s1069_s1 + $0x60] sm:$0xff]  ;;  %v710_v9 = vld [vmem:[%s1069_s1 + $0x58] sm:$0xff]  ;;  %v709_v11 = vld [vmem:[%s1069_s1 + $0x50] sm:$0xff] }
   0x5   :  { %v700_v12 = vld [vmem:[%s1069_s1 + $0x8] sm:$0xff]  ;;  %v699_v14 = vld [vmem:[%s1069_s1] sm:$0xff]  ;;  %v533_v25 = vld [vmem:[%s1071_s0 + $0x10] sm:$0xf] }
   0x6   :  { %249 = vmatpush.bf16.msra.mxu0 %v705_v2  ;;  %724 = vmatpush.bf16.msra.mxu3 %v705_v2  ;;  %v708_v13 = vld [vmem:[%s1069_s1 + $0x48] sm:$0xff]  ;;  %v525_v15 = vld [vmem:[%s1071_s0] sm:$0xf]  ;;  %v683_v20 = vld [vmem:[%s1071_s0 + $0x4] sm:$0xf] }
   0x7   :  { %298 = vmatpush.bf16.msra.mxu1 %v713_v3  ;;  %v684_v16 = vld [vmem:[%s1071_s0 + $0x4] sm:$0xf0]  ;;  %v573_v17 = vld [vmem:[%s1071_s0 + $0x60] sm:$0xf]  ;;  %v527_v21 = vld [vmem:[%s1071_s0 + $0x8] sm:$0xf0] }
   0x8   :  { %v696_v18 = vld [vmem:[%s1071_s0 + $0x64] sm:$0xf0]  ;;  %v707_v19 = vld [vmem:[%s1069_s1 + $0x40] sm:$0xff]  ;;  %v526_v22 = vor.u32 %v684_v16, %v525_v15  ;;  %v530_v24 = vor.u32 %v683_v20, %v527_v21  ;;  %v686_v26 = vld [vmem:[%s1071_s0 + $0x14] sm:$0xf0] }
   0x9   :  { %v574_v23 = vor.u32 %v696_v18, %v573_v17  ;;  %v581_v27 = vld [vmem:[%s1071_s0 + $0x70] sm:$0xf]  ;;  %v698_v28 = vld [vmem:[%s1071_s0 + $0x74] sm:$0xf0]  ;;  %v685_v29 = vld [vmem:[%s1071_s0 + $0x14] sm:$0xf]  ;;  %v534_v31 = vor.u32 %v686_v26, %v533_v25 }
   0xa   :  { %250 = vmatpush.bf16.msra.mxu0 %v704_v4  ;;  %725 = vmatpush.bf16.msra.mxu3 %v704_v4  ;;  %v535_v30 = vld [vmem:[%s1071_s0 + $0x18] sm:$0xf0]  ;;  %v582_v32 = vor.u32 %v698_v28, %v581_v27  ;;  %v541_v34 = vld [vmem:[%s1071_s0 + $0x20] sm:$0xf]  ;;  %v688_v35 = vld [vmem:[%s1071_s0 + $0x24] sm:$0xf0] }
   0xb   :  { %299 = vmatpush.bf16.msra.mxu1 %v712_v5  ;;  %v538_v33 = vor.u32 %v685_v29, %v535_v30  ;;  %v695_v36 = vld [vmem:[%s1071_s0 + $0x64] sm:$0xf]  ;;  %v575_v37 = vld [vmem:[%s1071_s0 + $0x68] sm:$0xf0]  ;;  %v542_v40 = vor.u32 %v688_v35, %v541_v34  ;;  %v549_v43 = vld [vmem:[%s1071_s0 + $0x30] sm:$0xf] }
   0xc   :  { %v687_v38 = vld [vmem:[%s1071_s0 + $0x24] sm:$0xf]  ;;  %v543_v39 = vld [vmem:[%s1071_s0 + $0x28] sm:$0xf0]  ;;  %v578_v41 = vor.u32 %v695_v36, %v575_v37  ;;  %v690_v44 = vld [vmem:[%s1071_s0 + $0x34] sm:$0xf0] }
   0xd   :  { %v546_v42 = vor.u32 %v687_v38, %v543_v39  ;;  %v697_v45 = vld [vmem:[%s1071_s0 + $0x74] sm:$0xf]  ;;  %v583_v46 = vld [vmem:[%s1071_s0 + $0x78] sm:$0xf0]  ;;  %v550_v49 = vor.u32 %v690_v44, %v549_v43  ;;  %v720_v54 = vld [vmem:[%s1072_s2 + $0x28] sm:$0xff] }
   0xe   :  { %251 = vmatpush.bf16.msra.mxu0 %v703_v6  ;;  %726 = vmatpush.bf16.msra.mxu3 %v703_v6  ;;  %v689_v47 = vld [vmem:[%s1071_s0 + $0x34] sm:$0xf]  ;;  %v551_v48 = vld [vmem:[%s1071_s0 + $0x38] sm:$0xf0]  ;;  %v586_v50 = vor.u32 %v697_v45, %v583_v46  ;;  %v557_v55 = vld [vmem:[%s1071_s0 + $0x40] sm:$0xf] }
   0xf   :  { %300 = vmatpush.bf16.msra.mxu1 %v711_v7  ;;  %v554_v51 = vor.u32 %v689_v47, %v551_v48  ;;  %v722_v52 = vld [vmem:[%s1072_s2 + $0x38] sm:$0xff]  ;;  %v721_v53 = vld [vmem:[%s1072_s2 + $0x30] sm:$0xff]  ;;  %v692_v56 = vld [vmem:[%s1071_s0 + $0x44] sm:$0xf0] }
  0x10   :  { %438 = vmatpush.bf16.msra.mxu2 %v722_v52  ;;  %v691_v57 = vld [vmem:[%s1071_s0 + $0x44] sm:$0xf]  ;;  %v559_v58 = vld [vmem:[%s1071_s0 + $0x48] sm:$0xf0]  ;;  %v558_v60 = vor.u32 %v692_v56, %v557_v55  ;;  %v565_v62 = vld [vmem:[%s1071_s0 + $0x50] sm:$0xf] }
  0x11   :  { %v719_v59 = vld [vmem:[%s1072_s2 + $0x20] sm:$0xff]  ;;  %v562_v61 = vor.u32 %v691_v57, %v559_v58  ;;  %v694_v63 = vld [vmem:[%s1071_s0 + $0x54] sm:$0xf0]  ;;  %v693_v0 = vld [vmem:[%s1071_s0 + $0x54] sm:$0xf] }
  0x12   :  { %252 = vmatpush.bf16.msra.mxu0 %v702_v8  ;;  %727 = vmatpush.bf16.msra.mxu3 %v702_v8  ;;  %v566_v2 = vor.u32 %v694_v63, %v565_v62  ;;  %v718_v4 = vld [vmem:[%s1072_s2 + $0x18] sm:$0xff]  ;;  %v716_v6 = vld [vmem:[%s1072_s2 + $0x8] sm:$0xff] }
  0x13   :  { %301 = vmatpush.bf16.msra.mxu1 %v710_v9 }
  0x14   :  { %439 = vmatpush.bf16.msra.mxu2 %v721_v53 }
  0x16   :  { %253 = vmatpush.bf16.msra.mxu0 %v701_v10  ;;  %728 = vmatpush.bf16.msra.mxu3 %v701_v10 }
  0x17   :  { %302 = vmatpush.bf16.msra.mxu1 %v709_v11 }
  0x18   :  { %440 = vmatpush.bf16.msra.mxu2 %v720_v54 }
  0x1a   :  { %254 = vmatpush.bf16.msra.mxu0 %v700_v12  ;;  %729 = vmatpush.bf16.msra.mxu3 %v700_v12 }
  0x1b   :  { %303 = vmatpush.bf16.msra.mxu1 %v708_v13 }
  0x1c   :  { %441 = vmatpush.bf16.msra.mxu2 %v719_v59 }
  0x1e   :  { %255 = vmatpush.bf16.msra.mxu0 %v699_v14  ;;  %730 = vmatpush.bf16.msra.mxu3 %v699_v14 }
  0x1f   :  { %304 = vmatpush.bf16.msra.mxu1 %v707_v19 }
  0x20   :  { %442 = vmatpush.bf16.msra.mxu2 %v718_v4 }
  0x21   :  { %256 = vmatmul.bf16.vlgmr.msra.gmra.mxu0 %v526_v22  ;;  %286 = vmatmul.bf16.vlgmr.msra.gmra.mxu3 %v574_v23 }
  0x22   :  { %731 = vmatpush.bf16.msrb.mxu3 %v714_v1  ;;  %305 = vmatmul.bf16.vlgmr.msra.gmra.mxu1 %v530_v24  ;;  %v567_v1 = vld [vmem:[%s1071_s0 + $0x58] sm:$0xf0] }
  0x26   :  { %732 = vmatpush.bf16.msrb.mxu3 %v713_v3  ;;  %v570_v3 = vor.u32 %v693_v0, %v567_v1 }
  0x2a   :  { %733 = vmatpush.bf16.msrb.mxu3 %v712_v5  ;;  %v717_v5 = vld [vmem:[%s1072_s2 + $0x10] sm:$0xff] }
  0x2b   :  { %443 = vmatpush.bf16.msra.mxu2 %v717_v5 }
  0x2e   :  { %734 = vmatpush.bf16.msrb.mxu3 %v711_v7  ;;  %v715_v7 = vld [vmem:[%s1072_s2] sm:$0xff] }
  0x2f   :  { %444 = vmatpush.bf16.msra.mxu2 %v716_v6 }
  0x31   :  { %261 = vmatmul.bf16.gmra.mxu0 %v534_v31  ;;  %291 = vmatmul.bf16.gmra.mxu3 %v582_v32 }
  0x32   :  { %735 = vmatpush.bf16.msrb.mxu3 %v710_v9  ;;  %310 = vmatmul.bf16.gmra.mxu1 %v538_v33  ;;  %v982_v9 = vld [vmem:[%s1070_s3] ss:$0 sm:$0xff] }
  0x33   :  { %445 = vmatpush.bf16.msra.mxu2 %v715_v7 }
  0x36   :  { %736 = vmatpush.bf16.msrb.mxu3 %v709_v11 }
  0x3a   :  { %737 = vmatpush.bf16.msrb.mxu3 %v708_v13 }
  0x3e   :  { %738 = vmatpush.bf16.msrb.mxu3 %v707_v19 }
  0x41   :  { %266 = vmatmul.bf16.gmra.mxu0 %v542_v40  ;;  %335 = vmatmul.bf16.vlgmr.msrb.gmra.mxu3 %v578_v41 }
  0x42   :  { %315 = vmatmul.bf16.gmra.mxu1 %v546_v42  ;;  %739 = vmatpush.bf16.msra.mxu3 %v722_v52 }
  0x46   :  { %740 = vmatpush.bf16.msra.mxu3 %v721_v53 }
  0x4a   :  { %741 = vmatpush.bf16.msra.mxu3 %v720_v54 }
  0x4e   :  { %742 = vmatpush.bf16.msra.mxu3 %v719_v59 }
  0x51   :  { %271 = vmatmul.bf16.gmra.mxu0 %v550_v49  ;;  %340 = vmatmul.bf16.gmra.mxu3 %v586_v50 }
  0x52   :  { %320 = vmatmul.bf16.gmra.mxu1 %v554_v51  ;;  %743 = vmatpush.bf16.msra.mxu3 %v718_v4 }
  0x56   :  { %744 = vmatpush.bf16.msra.mxu3 %v717_v5 }
  0x5a   :  { %745 = vmatpush.bf16.msra.mxu3 %v716_v6 }
  0x5e   :  { %746 = vmatpush.bf16.msra.mxu3 %v715_v7 }
  0x61   :  { %276 = vmatmul.bf16.gmra.mxu0 %v558_v60 }
  0x62   :  { %325 = vmatmul.bf16.gmra.mxu1 %v562_v61 }
  0x71   :  { %281 = vmatmul.bf16.gmra.mxu0 %v566_v2 }
  0x72   :  { %330 = vmatmul.bf16.gmra.mxu1 %v570_v3 }
  0x9e   :  { %v257_v8 = vpop.f32.mrf.mxu0 }
  0x9f   :  { %v306_v10 = vpop.f32.mrf.mxu1  ;;  %v258_v11 = vadd.f32 %v982_v9, %v257_v8 }
  0xa1   :  { %v307_v14 = vadd.f32 %v306_v10, %v258_v11 }
  0xa3   :  { %v346_v18 = vmax.f32 %v307_v14, 0.0 }
  0xa4   :  { %v287_v12 = vpop.f32.mrf.mxu3 }
  0xa5   :  { %v288_v43 = vadd.f32 %v982_v9, %v287_v12 }
  0xa6   :  { %v259_v13 = vpop.f32.mrf.mxu0 }
  0xa7   :  { %v260_v15 = vadd.f32 %v982_v9, %v259_v13  ;;  %v308_v16 = vpop.f32.mrf.mxu1 }
  0xa9   :  { %v309_v17 = vadd.f32 %v308_v16, %v260_v15 }
  0xab   :  { %v347_v19 = vmax.f32 %v309_v17, 0.0 }
  0xac   :  { %v289_v20 = vpop.f32.mrf.mxu3 }
  0xad   :  { %v362_v21 = vpack.c.bf16 %v347_v19, %v346_v18  ;;  %v290_v45 = vadd.f32 %v982_v9, %v289_v20 }
  0xae   :  { %v262_v22 = vpop.f32.mrf.mxu0 }
  0xaf   :  { %v311_v23 = vpop.f32.mrf.mxu1  ;;  %446 = vmatmul.bf16.vlgmr.msra.gmra.mxu2 %v362_v21  ;;  %v263_v24 = vadd.f32 %v982_v9, %v262_v22 }
  0xb1   :  { %v312_v27 = vadd.f32 %v311_v23, %v263_v24 }
  0xb3   :  { %v348_v31 = vmax.f32 %v312_v27, 0.0 }
  0xb4   :  { %v292_v25 = vpop.f32.mrf.mxu3 }
  0xb5   :  { %v293_v63 = vadd.f32 %v982_v9, %v292_v25 }
  0xb6   :  { %v264_v26 = vpop.f32.mrf.mxu0 }
  0xb7   :  { %v265_v28 = vadd.f32 %v982_v9, %v264_v26  ;;  %v313_v29 = vpop.f32.mrf.mxu1 }
  0xb9   :  { %v314_v30 = vadd.f32 %v313_v29, %v265_v28 }
  0xbb   :  { %v349_v32 = vmax.f32 %v314_v30, 0.0 }
  0xbc   :  { %v294_v33 = vpop.f32.mrf.mxu3 }
  0xbd   :  { %v363_v34 = vpack.c.bf16 %v349_v32, %v348_v31  ;;  %v295_v1 = vadd.f32 %v982_v9, %v294_v33 }
  0xbe   :  { %v267_v35 = vpop.f32.mrf.mxu0 }
  0xbf   :  { %v316_v36 = vpop.f32.mrf.mxu1  ;;  %451 = vmatmul.bf16.gmra.mxu2 %v363_v34  ;;  %v268_v37 = vadd.f32 %v982_v9, %v267_v35  ;;  %v1003_v34 = vld [vmem:[%s1073_s4] ss:$0 sm:$0xff] }
  0xc1   :  { %v317_v40 = vadd.f32 %v316_v36, %v268_v37 }
  0xc3   :  { %v350_v46 = vmax.f32 %v317_v40, 0.0 }
  0xc4   :  { %v336_v38 = vpop.f32.mrf.mxu3 }
  0xc5   :  { %v337_v47 = vadd.f32 %v336_v38, %v288_v43 }
  0xc6   :  { %v269_v39 = vpop.f32.mrf.mxu0 }
  0xc7   :  { %v270_v41 = vadd.f32 %v982_v9, %v269_v39  ;;  %v318_v42 = vpop.f32.mrf.mxu1  ;;  %v358_v53 = vmax.f32 %v337_v47, 0.0 }
  0xc9   :  { %v319_v44 = vadd.f32 %v318_v42, %v270_v41 }
  0xcb   :  { %v351_v48 = vmax.f32 %v319_v44, 0.0 }
  0xcc   :  { %v338_v49 = vpop.f32.mrf.mxu3 }
  0xcd   :  { %v339_v50 = vadd.f32 %v338_v49, %v290_v45  ;;  %v364_v51 = vpack.c.bf16 %v351_v48, %v350_v46 }
  0xce   :  { %v272_v52 = vpop.f32.mrf.mxu0 }
  0xcf   :  { %v359_v54 = vmax.f32 %v339_v50, 0.0  ;;  %v321_v55 = vpop.f32.mrf.mxu1  ;;  %456 = vmatmul.bf16.gmra.mxu2 %v364_v51  ;;  %v273_v57 = vadd.f32 %v982_v9, %v272_v52 }
  0xd1   :  { %v368_v56 = vpack.c.bf16 %v359_v54, %v358_v53  ;;  %v322_v60 = vadd.f32 %v321_v55, %v273_v57 }
  0xd3   :  { %476 = vmatmul.bf16.vlgmr.msra.gmra.mxu3 %v368_v56  ;;  %v352_v2 = vmax.f32 %v322_v60, 0.0 }
  0xd4   :  { %v341_v58 = vpop.f32.mrf.mxu3 }
  0xd5   :  { %v342_v3 = vadd.f32 %v341_v58, %v293_v63 }
  0xd6   :  { %v274_v59 = vpop.f32.mrf.mxu0 }
  0xd7   :  { %v275_v61 = vadd.f32 %v982_v9, %v274_v59  ;;  %v323_v62 = vpop.f32.mrf.mxu1  ;;  %v360_v10 = vmax.f32 %v342_v3, 0.0 }
  0xd9   :  { %v324_v0 = vadd.f32 %v323_v62, %v275_v61 }
  0xdb   :  { %v353_v4 = vmax.f32 %v324_v0, 0.0 }
  0xdc   :  { %v343_v5 = vpop.f32.mrf.mxu3 }
  0xdd   :  { %v344_v6 = vadd.f32 %v343_v5, %v295_v1  ;;  %v365_v7 = vpack.c.bf16 %v353_v4, %v352_v2 }
  0xde   :  { %v277_v8 = vpop.f32.mrf.mxu0 }
  0xdf   :  { %v361_v11 = vmax.f32 %v344_v6, 0.0  ;;  %v326_v12 = vpop.f32.mrf.mxu1  ;;  %461 = vmatmul.bf16.gmra.mxu2 %v365_v7  ;;  %v278_v14 = vadd.f32 %v982_v9, %v277_v8 }
  0xe1   :  { %v369_v13 = vpack.c.bf16 %v361_v11, %v360_v10  ;;  %v327_v16 = vadd.f32 %v326_v12, %v278_v14 }
  0xe3   :  { %481 = vmatmul.bf16.gmra.mxu3 %v369_v13  ;;  %v354_v20 = vmax.f32 %v327_v16, 0.0 }
  0xe6   :  { %v279_v15 = vpop.f32.mrf.mxu0 }
  0xe7   :  { %v280_v17 = vadd.f32 %v982_v9, %v279_v15  ;;  %v328_v18 = vpop.f32.mrf.mxu1 }
  0xe9   :  { %v329_v19 = vadd.f32 %v328_v18, %v280_v17 }
  0xeb   :  { %v355_v21 = vmax.f32 %v329_v19, 0.0 }
  0xed   :  { %v366_v22 = vpack.c.bf16 %v355_v21, %v354_v20 }
  0xee   :  { %v282_v23 = vpop.f32.mrf.mxu0 }
  0xef   :  { %v331_v24 = vpop.f32.mrf.mxu1  ;;  %466 = vmatmul.bf16.gmra.mxu2 %v366_v22  ;;  %v283_v25 = vadd.f32 %v982_v9, %v282_v23 }
  0xf1   :  { %v332_v27 = vadd.f32 %v331_v24, %v283_v25 }
  0xf3   :  { %v356_v31 = vmax.f32 %v332_v27, 0.0 }
  0xf6   :  { %v284_v26 = vpop.f32.mrf.mxu0 }
  0xf7   :  { %v285_v28 = vadd.f32 %v982_v9, %v284_v26  ;;  %v333_v29 = vpop.f32.mrf.mxu1 }
  0xf9   :  { %v334_v30 = vadd.f32 %v333_v29, %v285_v28 }
  0xfb   :  { %v357_v32 = vmax.f32 %v334_v30, 0.0 }
  0xfd   :  { %v367_v33 = vpack.c.bf16 %v357_v32, %v356_v31 }
  0xff   :  { %471 = vmatmul.bf16.gmra.mxu2 %v367_v33 }
 0x132   :  { %v447_v35 = vpop.f32.mrf.mxu2 }
 0x133   :  { %v448_v36 = vadd.f32 %v1003_v34, %v447_v35 }
 0x135   :  { %749 = vtanh.f32 %v448_v36 }
 0x13a   :  { %v449_v37 = vpop.f32.mrf.mxu2 }
 0x13b   :  { %v750_v38 = vpop.eup %749  ;;  %v450_v39 = vadd.f32 %v1003_v34, %v449_v37 }
 0x13c   :  { %503 = vst [vmem:[%s1074_s5] sm:$0xff] %v750_v38 }
 0x13d   :  { %751 = vtanh.f32 %v450_v39 }
 0x142   :  { %v452_v9 = vpop.f32.mrf.mxu2 }
 0x143   :  { %v752_v40 = vpop.eup %751  ;;  %v453_v41 = vadd.f32 %v1003_v34, %v452_v9 }
 0x144   :  { %504 = vst [vmem:[%s1074_s5 + $0x8] sm:$0xff] %v752_v40 }
 0x145   :  { %753 = vtanh.f32 %v453_v41 }
 0x14a   :  { %v454_v42 = vpop.f32.mrf.mxu2 }
 0x14b   :  { %v754_v43 = vpop.eup %753  ;;  %v455_v44 = vadd.f32 %v1003_v34, %v454_v42 }
 0x14c   :  { %505 = vst [vmem:[%s1074_s5 + $0x10] sm:$0xff] %v754_v43 }
 0x14d   :  { %755 = vtanh.f32 %v455_v44 }
 0x152   :  { %v457_v45 = vpop.f32.mrf.mxu2 }
 0x153   :  { %v756_v46 = vpop.eup %755  ;;  %v458_v47 = vadd.f32 %v1003_v34, %v457_v45 }
 0x154   :  { %506 = vst [vmem:[%s1074_s5 + $0x18] sm:$0xff] %v756_v46 }
 0x155   :  { %757 = vtanh.f32 %v458_v47 }
 0x156   :  { %v477_v48 = vpop.f32.mrf.mxu3 }
 0x157   :  { %v478_v49 = vadd.f32 %v1003_v34, %v477_v48 }
 0x159   :  { %759 = vtanh.f32 %v478_v49 }
 0x15a   :  { %v459_v50 = vpop.f32.mrf.mxu2 }
 0x15b   :  { %v758_v51 = vpop.eup %757  ;;  %v460_v52 = vadd.f32 %v1003_v34, %v459_v50 }
 0x15c   :  { %507 = vst [vmem:[%s1074_s5 + $0x20] sm:$0xff] %v758_v51 }
 0x15d   :  { %761 = vtanh.f32 %v460_v52 }
 0x15e   :  { %v479_v53 = vpop.f32.mrf.mxu3 }
 0x15f   :  { %v760_v54 = vpop.eup %759  ;;  %v480_v55 = vadd.f32 %v1003_v34, %v479_v53 }
 0x160   :  { %515 = vst [vmem:[%s1074_s5 + $0x60] sm:$0xff] %v760_v54 }
 0x161   :  { %763 = vtanh.f32 %v480_v55 }
 0x162   :  { %v462_v56 = vpop.f32.mrf.mxu2 }
 0x163   :  { %v762_v57 = vpop.eup %761  ;;  %v463_v58 = vadd.f32 %v1003_v34, %v462_v56 }
 0x164   :  { %508 = vst [vmem:[%s1074_s5 + $0x28] sm:$0xff] %v762_v57 }
 0x165   :  { %765 = vtanh.f32 %v463_v58 }
 0x166   :  { %v482_v59 = vpop.f32.mrf.mxu3 }
 0x167   :  { %v764_v60 = vpop.eup %763  ;;  %v483_v61 = vadd.f32 %v1003_v34, %v482_v59 }
 0x168   :  { %516 = vst [vmem:[%s1074_s5 + $0x68] sm:$0xff] %v764_v60 }
 0x169   :  { %767 = vtanh.f32 %v483_v61 }
 0x16a   :  { %v464_v62 = vpop.f32.mrf.mxu2 }
 0x16b   :  { %v766_v63 = vpop.eup %765  ;;  %v465_v0 = vadd.f32 %v1003_v34, %v464_v62 }
 0x16c   :  { %509 = vst [vmem:[%s1074_s5 + $0x30] sm:$0xff] %v766_v63 }
 0x16d   :  { %769 = vtanh.f32 %v465_v0 }
 0x16e   :  { %v484_v1 = vpop.f32.mrf.mxu3 }
 0x16f   :  { %v768_v2 = vpop.eup %767  ;;  %v485_v3 = vadd.f32 %v1003_v34, %v484_v1 }
 0x170   :  { %517 = vst [vmem:[%s1074_s5 + $0x70] sm:$0xff] %v768_v2 }
 0x171   :  { %771 = vtanh.f32 %v485_v3 }
 0x172   :  { %v467_v4 = vpop.f32.mrf.mxu2 }
 0x173   :  { %v770_v5 = vpop.eup %769  ;;  %v468_v6 = vadd.f32 %v1003_v34, %v467_v4 }
 0x174   :  { %510 = vst [vmem:[%s1074_s5 + $0x38] sm:$0xff] %v770_v5 }
 0x175   :  { %773 = vtanh.f32 %v468_v6 }
 0x177   :  { %v772_v7 = vpop.eup %771 }
 0x178   :  { %518 = vst [vmem:[%s1074_s5 + $0x78] sm:$0xff] %v772_v7 }
 0x17a   :  { %v469_v8 = vpop.f32.mrf.mxu2 }
 0x17b   :  { %v774_v10 = vpop.eup %773  ;;  %v470_v11 = vadd.f32 %v1003_v34, %v469_v8 }
 0x17c   :  { %511 = vst [vmem:[%s1074_s5 + $0x40] sm:$0xff] %v774_v10 }
 0x17d   :  { %775 = vtanh.f32 %v470_v11 }
 0x182   :  { %v472_v12 = vpop.f32.mrf.mxu2 }
 0x183   :  { %v776_v13 = vpop.eup %775  ;;  %v473_v14 = vadd.f32 %v1003_v34, %v472_v12 }
 0x184   :  { %512 = vst [vmem:[%s1074_s5 + $0x48] sm:$0xff] %v776_v13 }
 0x185   :  { %777 = vtanh.f32 %v473_v14 }
 0x18a   :  { %v474_v15 = vpop.f32.mrf.mxu2 }
 0x18b   :  { %v778_v16 = vpop.eup %777  ;;  %v475_v17 = vadd.f32 %v1003_v34, %v474_v15 }
 0x18c   :  { %513 = vst [vmem:[%s1074_s5 + $0x50] sm:$0xff] %v778_v16 }
 0x18d   :  { %779 = vtanh.f32 %v475_v17 }
 0x193   :  { %v780_v18 = vpop.eup %779 }
 0x194   :  { %514 = vst [vmem:[%s1074_s5 + $0x58] sm:$0xff] %v780_v18 }

// kernel: model_forward.13
= control target key start
LH: loop header
LB: loop body
LE: loop exit
PB: predicated region body
PF: predicated region fallthrough
CT: control target
= control target key end

     0   :  { %s3518_s12 = smov 0   ;;  %s4391_s0 = inlined_call_operand.vmem [shape: f32[2,332,3], index: 0, kind: input, shape index: {}]   ;;  %s4392_s1 = inlined_call_operand.vmem [shape: bf16[9,3,128], index: 1, kind: input, shape index: {}]   ;;  %s4393_s2 = inlined_call_operand.vmem [shape: f32[1,128], index: 2, kind: input, shape index: {}]   ;;  %s4394_s3 = inlined_call_operand.vmem [shape: f32[2,288,128], index: 3, kind: output, shape index: {}]  }
   0x1 LB: > { %s3295_s13 = sadd.s32 4294967295, %s3495_s12   ;;  %p3299_p0 = scmp.ge.s32.totalorder %s3495_s12, 1  ;;  %s3495_s12 = sphi %s3518_s12, %s13_s12  }
   0x2   : > { %p137_p1 = scmp.lt.s32.totalorder %s3495_s12, 3 }
   0x4   : > { %p138_p2 = pnand %p3299_p0, %p137_p1 }
   0x5   : > { %p161_p3 = scmp.lt.s32.totalorder (!%p138_p2), %s3295_s13, 1 }
   0x6   : > { %141 = sbr.rel (%p138_p2) target bundleno = 810 (0x32a), region = 32 }
   0xb   : > { %v298_v0 = vld [vmem:[%s4392_s1] sm:$0x3]  ;;  %vm354_vm0 = vcmask 1040384   ;;  %vm355_vm1 = vcmask 1041408   ;;  %v3497_v1 = vmov 65535   ;;  %s4396_s13 = smov (!%p161_p3, %s3295_s13), 1 }
   0xc   : > { %v356_v2 = vsel %vm354_vm0, 4294967295, %v3497_v1  ;;  %v3339_v3 = vld [vmem:[%s4392_s1 + $0x4] sm:$0x3]  ;;  %v3320_v4 = vld [vmem:[%s4392_s1 + $0x2] sm:$0x3]  ;;  %s3477_s22 = smul.u32 336, %s4396_s13 }
   0xd   : > { %v3535_v5 = vsel %vm355_vm1, %v356_v2, 0  ;;  %v3377_v6 = vld [vmem:[%s4392_s1 + $0x8] sm:$0x3]  ;;  %vm299_vm2 = vcmask 23552   ;;  %v3358_v23 = vld [vmem:[%s4392_s1 + $0x6] sm:$0x3] }
   0xe   : > { %v359_v7 = vand.u32 %v3535_v5, %v298_v0  ;;  %v999_v8 = vand.u32 %v3339_v3, %v3535_v5  ;;  %v679_v9 = vand.u32 %v3320_v4, %v3535_v5  ;;  %v1639_v10 = vand.u32 %v3377_v6, %v3535_v5  ;;  %s3550_s25 = scalar_lea.vmem %s4391_s0, %s3477_s22  ;;  %v3415_v61 = vld [vmem:[%s4392_s1 + $0xc] sm:$0x3]  ;;  %v3434_v62 = vld [vmem:[%s4392_s1 + $0xe] sm:$0x3]  ;;  %v3396_v63 = vld [vmem:[%s4392_s1 + $0xa] sm:$0x3] }
   0xf   : > { %v218_v11 = vld [vmem:[%s3550_s25 + $0x50] sm:$0xff]  ;;  %v219_v12 = vld [vmem:[%s3550_s25 + $0x58] sm:$0xff]  ;;  %v228_v13 = vld [vmem:[%s3550_s25 + $0xa0] sm:$0xff]  ;;  %v1319_v24 = vand.u32 %v3358_v23, %v3535_v5  ;;  %v2279_v0 = vand.u32 %v3415_v61, %v3535_v5  ;;  %v2599_v1 = vand.u32 %v3434_v62, %v3535_v5  ;;  %v1959_v2 = vand.u32 %v3396_v63, %v3535_v5  ;;  %s3478_s11 = smul.u32 288, %s4396_s13 }
  0x10   : > { %3474 = vmatpush.bf16.msra.mxu1 %v359_v7  ;;  %3475 = vmatpush.bf16.msra.mxu2 %v359_v7  ;;  %v249_v14 = vpack.c.bf16 %v219_v12, %v218_v11  ;;  %v229_v15 = vld [vmem:[%s3550_s25 + $0xa8] sm:$0xff]  ;;  %v208_v16 = vld [vmem:[%s3550_s25] sm:$0xff]  ;;  %v238_v20 = vld [vmem:[%s3550_s25 + $0xf0] sm:$0xff] }
  0x11   : > { %368 = vmatpush.bf16.msra.mxu0 %v359_v7  ;;  %v209_v17 = vld [vmem:[%s3550_s25 + $0x8] sm:$0xff]  ;;  %3476 = vmatpush.bf16.msra.mxu3 %v359_v7  ;;  %v254_v18 = vpack.c.bf16 %v229_v15, %v228_v13  ;;  %v239_v21 = vld [vmem:[%s3550_s25 + $0xf8] sm:$0xff]  ;;  %v220_v25 = vld [vmem:[%s3550_s25 + $0x60] sm:$0xff]  ;;  %s4158_s16 = scalar_lea.vmem %s4394_s3, %s3478_s11 }
  0x12   : > { %v244_v19 = vpack.c.bf16 %v209_v17, %v208_v16  ;;  %v259_v22 = vpack.c.bf16 %v239_v21, %v238_v20  ;;  %v221_v26 = vld [vmem:[%s3550_s25 + $0x68] sm:$0xff]  ;;  %v230_v27 = vld [vmem:[%s3550_s25 + $0xb0] sm:$0xff]  ;;  %v231_v28 = vld [vmem:[%s3550_s25 + $0xb8] sm:$0xff] }
  0x13   : > { %3307 = vmatmul.msk.bf16.vlgmr.msra.gmra.mxu1 %vm299_vm2, %v249_v14  ;;  %3312 = vmatmul.msk.bf16.vlgmr.msra.gmra.mxu2 %vm299_vm2, %v254_v18  ;;  %v210_v29 = vld [vmem:[%s3550_s25 + $0x10] sm:$0xff]  ;;  %v211_v30 = vld [vmem:[%s3550_s25 + $0x18] sm:$0xff]  ;;  %v250_v31 = vpack.c.bf16 %v221_v26, %v220_v25  ;;  %v255_v32 = vpack.c.bf16 %v231_v28, %v230_v27  ;;  %v240_v34 = vld [vmem:[%s3550_s25 + $0x100] sm:$0xff] }
  0x14   : > { %1008 = vmatpush.bf16.msrb.mxu2 %v999_v8  ;;  %688 = vmatpush.bf16.msrb.mxu1 %v679_v9  ;;  %v245_v33 = vpack.c.bf16 %v211_v30, %v210_v29  ;;  %v241_v35 = vld [vmem:[%s3550_s25 + $0x108] sm:$0xff]  ;;  %v222_v37 = vld [vmem:[%s3550_s25 + $0x70] sm:$0xff]  ;;  %v223_v38 = vld [vmem:[%s3550_s25 + $0x78] sm:$0xff] }
  0x15   : > { %1648 = vmatpush.bf16.msrb.mxu0 %v1639_v10  ;;  %3317 = vmatmul.msk.bf16.vlgmr.msra.gmra.mxu3 %vm299_vm2, %v259_v22  ;;  %v260_v36 = vpack.c.bf16 %v241_v35, %v240_v34  ;;  %v232_v39 = vld [vmem:[%s3550_s25 + $0xc0] sm:$0xff]  ;;  %v233_v40 = vld [vmem:[%s3550_s25 + $0xc8] sm:$0xff]  ;;  %v251_v43 = vpack.c.bf16 %v223_v38, %v222_v37  ;;  %v242_v46 = vld [vmem:[%s3550_s25 + $0x110] sm:$0xff] }
  0x16   : > { %3302 = vmatmul.msk.bf16.vlgmr.msra.gmra.mxu0 %vm299_vm2, %v244_v19  ;;  %1328 = vmatpush.bf16.msrb.mxu3 %v1319_v24  ;;  %v212_v41 = vld [vmem:[%s3550_s25 + $0x20] sm:$0xff]  ;;  %v213_v42 = vld [vmem:[%s3550_s25 + $0x28] sm:$0xff]  ;;  %v256_v44 = vpack.c.bf16 %v233_v40, %v232_v39  ;;  %v243_v47 = vld [vmem:[%s3550_s25 + $0x118] sm:$0xff] }
  0x17   : > { %v246_v45 = vpack.c.bf16 %v213_v42, %v212_v41  ;;  %v261_v48 = vpack.c.bf16 %v243_v47, %v242_v46  ;;  %v224_v49 = vld [vmem:[%s3550_s25 + $0x80] sm:$0xff]  ;;  %v225_v50 = vld [vmem:[%s3550_s25 + $0x88] sm:$0xff]  ;;  %v234_v51 = vld [vmem:[%s3550_s25 + $0xd0] sm:$0xff] }
  0x18   : > { %v235_v52 = vld [vmem:[%s3550_s25 + $0xd8] sm:$0xff]  ;;  %v214_v53 = vld [vmem:[%s3550_s25 + $0x30] sm:$0xff]  ;;  %v252_v55 = vpack.c.bf16 %v225_v50, %v224_v49  ;;  %2288 = vmatpush.bf16.msra.mxu2 %v2279_v0  ;;  %1968 = vmatpush.bf16.msra.mxu1 %v1959_v2  ;;  %v236_v8 = vld [vmem:[%s3550_s25 + $0xe0] sm:$0xff] }
  0x19   : > { %v215_v54 = vld [vmem:[%s3550_s25 + $0x38] sm:$0xff]  ;;  %v257_v56 = vpack.c.bf16 %v235_v52, %v234_v51  ;;  %v3453_v3 = vld [vmem:[%s4392_s1 + $0x10] sm:$0x3]  ;;  %v237_v9 = vld [vmem:[%s3550_s25 + $0xe8] sm:$0xff] }
  0x1a   : > { %v247_v57 = vpack.c.bf16 %v215_v54, %v214_v53  ;;  %v1172_v58 = vld [vmem:[%s3550_s25 + $0x12] sm:$0xff]  ;;  %v1173_v59 = vld [vmem:[%s3550_s25 + $0x1a] sm:$0xff]  ;;  %v2919_v4 = vand.u32 %v3453_v3, %v3535_v5  ;;  %2608 = vmatpush.bf16.msra.mxu3 %v2599_v1  ;;  %v217_v11 = vld [vmem:[%s3550_s25 + $0x48] sm:$0xff]  ;;  %v258_v12 = vpack.c.bf16 %v237_v9, %v236_v8 }
  0x1b   : > { %v1208_v60 = vpack.c.bf16 %v1173_v59, %v1172_v58  ;;  %v226_v6 = vld [vmem:[%s3550_s25 + $0x90] sm:$0xff]  ;;  %v227_v7 = vld [vmem:[%s3550_s25 + $0x98] sm:$0xff]  ;;  %v216_v10 = vld [vmem:[%s3550_s25 + $0x40] sm:$0xff] }
  0x1c   : > { %2928 = vmatpush.bf16.msra.mxu0 %v2919_v4  ;;  %v253_v5 = vpack.c.bf16 %v227_v7, %v226_v6  ;;  %v248_v13 = vpack.c.bf16 %v217_v11, %v216_v10  ;;  %v1174_v14 = vld [vmem:[%s3550_s25 + $0x22] sm:$0xff]  ;;  %v1175_v15 = vld [vmem:[%s3550_s25 + $0x2a] sm:$0xff]  ;;  %v1492_v21 = vld [vmem:[%s3550_s25 + $0x13] sm:$0xff] }
  0x1d   : > { %v1209_v16 = vpack.c.bf16 %v1175_v15, %v1174_v14  ;;  %v532_v17 = vld [vmem:[%s3550_s25 + $0x1] sm:$0xff]  ;;  %v533_v18 = vld [vmem:[%s3550_s25 + $0x9] sm:$0xff]  ;;  %v1176_v26 = vld [vmem:[%s3550_s25 + $0x32] sm:$0xff] }
  0x1e   : > { %v852_v19 = vld [vmem:[%s3550_s25 + $0x2] sm:$0xff]  ;;  %v853_v20 = vld [vmem:[%s3550_s25 + $0xa] sm:$0xff]  ;;  %v568_v23 = vpack.c.bf16 %v533_v18, %v532_v17  ;;  %v1177_v27 = vld [vmem:[%s3550_s25 + $0x3a] sm:$0xff] }
  0x1f   : > { %v1493_v22 = vld [vmem:[%s3550_s25 + $0x1b] sm:$0xff]  ;;  %v888_v24 = vpack.c.bf16 %v853_v20, %v852_v19  ;;  %v1210_v28 = vpack.c.bf16 %v1177_v27, %v1176_v26  ;;  %v534_v29 = vld [vmem:[%s3550_s25 + $0x11] sm:$0xff]  ;;  %v537_v39 = vld [vmem:[%s3550_s25 + $0x29] sm:$0xff] }
  0x20   : > { %v1528_v25 = vpack.c.bf16 %v1493_v22, %v1492_v21  ;;  %v535_v30 = vld [vmem:[%s3550_s25 + $0x19] sm:$0xff]  ;;  %v1178_v35 = vld [vmem:[%s3550_s25 + $0x42] sm:$0xff]  ;;  %v538_v47 = vld [vmem:[%s3550_s25 + $0x31] sm:$0xff] }
  0x21   : > { %v536_v38 = vld [vmem:[%s3550_s25 + $0x21] sm:$0xff]  ;;  %v1496_v40 = vld [vmem:[%s3550_s25 + $0x33] sm:$0xff]  ;;  %v1499_v50 = vld [vmem:[%s3550_s25 + $0x4b] sm:$0xff] }
  0x22   : > { %v1497_v41 = vld [vmem:[%s3550_s25 + $0x3b] sm:$0xff]  ;;  %v570_v42 = vpack.c.bf16 %v537_v39, %v536_v38  ;;  %v1498_v49 = vld [vmem:[%s3550_s25 + $0x43] sm:$0xff]  ;;  %v1500_v0 = vld [vmem:[%s3550_s25 + $0x53] sm:$0xff] }
  0x23   : > { %3308 = vmatmul.msk.bf16.gmra.mxu1 %vm299_vm2, %v250_v31  ;;  %3313 = vmatmul.msk.bf16.gmra.mxu2 %vm299_vm2, %v255_v32  ;;  %v1494_v31 = vld [vmem:[%s3550_s25 + $0x23] sm:$0xff]  ;;  %v1495_v32 = vld [vmem:[%s3550_s25 + $0x2b] sm:$0xff]  ;;  %v1531_v53 = vpack.c.bf16 %v1499_v50, %v1498_v49  ;;  %v1501_v1 = vld [vmem:[%s3550_s25 + $0x5b] sm:$0xff] }
  0x24   : > { %v1529_v34 = vpack.c.bf16 %v1495_v32, %v1494_v31  ;;  %v1182_v54 = vld [vmem:[%s3550_s25 + $0x62] sm:$0xff]  ;;  %v1532_v6 = vpack.c.bf16 %v1501_v1, %v1500_v0  ;;  %v1184_v7 = vld [vmem:[%s3550_s25 + $0x72] sm:$0xff]  ;;  %v1185_v8 = vld [vmem:[%s3550_s25 + $0x7a] sm:$0xff] }
  0x25   : > { %3318 = vmatmul.msk.bf16.gmra.mxu3 %vm299_vm2, %v260_v36  ;;  %v1179_v36 = vld [vmem:[%s3550_s25 + $0x4a] sm:$0xff]  ;;  %v540_v62 = vld [vmem:[%s3550_s25 + $0x41] sm:$0xff]  ;;  %v3704_v11 = vpack.c.bf16 %v1185_v8, %v1184_v7  ;;  %v547_v50 = vld [vmem:[%s3550_s25 + $0x79] sm:$0xff] }
  0x26   : > { %3303 = vmatmul.msk.bf16.gmra.mxu0 %vm299_vm2, %v245_v33  ;;  %v569_v33 = vpack.c.bf16 %v535_v30, %v534_v29  ;;  %v1211_v37 = vpack.c.bf16 %v1179_v36, %v1178_v35  ;;  %v541_v63 = vld [vmem:[%s3550_s25 + $0x49] sm:$0xff]  ;;  %v542_v15 = vld [vmem:[%s3550_s25 + $0x51] sm:$0xff]  ;;  %v544_v32 = vld [vmem:[%s3550_s25 + $0x61] sm:$0xff] }
  0x27   : > { %v572_v3 = vpack.c.bf16 %v541_v63, %v540_v62  ;;  %v1502_v17 = vld [vmem:[%s3550_s25 + $0x63] sm:$0xff]  ;;  %v1503_v18 = vld [vmem:[%s3550_s25 + $0x6b] sm:$0xff]  ;;  %v1505_v35 = vld [vmem:[%s3550_s25 + $0x7b] sm:$0xff] }
  0x28   : > { %v1533_v22 = vpack.c.bf16 %v1503_v18, %v1502_v17  ;;  %v546_v49 = vld [vmem:[%s3550_s25 + $0x71] sm:$0xff]  ;;  %v1190_v63 = vld [vmem:[%s3550_s25 + $0xa2] sm:$0xff] }
  0x29   : > { %v1191_v0 = vld [vmem:[%s3550_s25 + $0xaa] sm:$0xff]  ;;  %v548_v17 = vld [vmem:[%s3550_s25 + $0x81] sm:$0xff] }
  0x2a   : > { %v549_v18 = vld [vmem:[%s3550_s25 + $0x89] sm:$0xff] }
  0x33   : > { %3309 = vmatmul.msk.bf16.gmra.mxu1 %vm299_vm2, %v251_v43  ;;  %3314 = vmatmul.msk.bf16.gmra.mxu2 %vm299_vm2, %v256_v44  ;;  %v1530_v43 = vpack.c.bf16 %v1497_v41, %v1496_v40  ;;  %v1180_v44 = vld [vmem:[%s3550_s25 + $0x52] sm:$0xff]  ;;  %v1189_v41 = vld [vmem:[%s3550_s25 + $0x9a] sm:$0xff] }
  0x34   : > { %v1188_v40 = vld [vmem:[%s3550_s25 + $0x92] sm:$0xff] }
  0x35   : > { %3319 = vmatmul.msk.bf16.gmra.mxu3 %vm299_vm2, %v261_v48  ;;  %v539_v48 = vld [vmem:[%s3550_s25 + $0x39] sm:$0xff] }
  0x36   : > { %3304 = vmatmul.msk.bf16.gmra.mxu0 %vm299_vm2, %v246_v45  ;;  %v1181_v45 = vld [vmem:[%s3550_s25 + $0x5a] sm:$0xff]  ;;  %v571_v51 = vpack.c.bf16 %v539_v48, %v538_v47 }
  0x37   : > { %v1212_v46 = vpack.c.bf16 %v1181_v45, %v1180_v44  ;;  %v3762_v44 = vpack.c.bf16 %v1189_v41, %v1188_v40 }
  0x43   : > { %3310 = vmatmul.msk.bf16.gmra.mxu1 %vm299_vm2, %v252_v55  ;;  %3315 = vmatmul.msk.bf16.gmra.mxu2 %vm299_vm2, %v257_v56  ;;  %v1183_v55 = vld [vmem:[%s3550_s25 + $0x6a] sm:$0xff] }
  0x45   : > { %3359 = vmatmul.msk.bf16.vlgmr.msrb.gmra.mxu3 %vm299_vm2, %v1208_v60 }
  0x46   : > { %3305 = vmatmul.msk.bf16.gmra.mxu0 %vm299_vm2, %v247_v57  ;;  %v3675_v57 = vpack.c.bf16 %v1183_v55, %v1182_v54  ;;  %v575_v55 = vpack.c.bf16 %v547_v50, %v546_v49 }
  0x53   : > { %3311 = vmatmul.msk.bf16.gmra.mxu1 %vm299_vm2, %v253_v5  ;;  %3316 = vmatmul.msk.bf16.gmra.mxu2 %vm299_vm2, %v258_v12 }
  0x55   : > { %3360 = vmatmul.msk.bf16.gmra.mxu3 %vm299_vm2, %v1209_v16 }
  0x56   : > { %3306 = vmatmul.msk.bf16.gmra.mxu0 %vm299_vm2, %v248_v13 }
  0x63   : > { %3321 = vmatmul.msk.bf16.vlgmr.msrb.gmra.mxu1 %vm299_vm2, %v568_v23  ;;  %3340 = vmatmul.msk.bf16.vlgmr.msrb.gmra.mxu2 %vm299_vm2, %v888_v24  ;;  %v1186_v23 = vld [vmem:[%s3550_s25 + $0x82] sm:$0xff]  ;;  %v1187_v24 = vld [vmem:[%s3550_s25 + $0x8a] sm:$0xff] }
  0x64   : > { %v3733_v27 = vpack.c.bf16 %v1187_v24, %v1186_v23 }
  0x65   : > { %3361 = vmatmul.msk.bf16.gmra.mxu3 %vm299_vm2, %v1210_v28 }
  0x66   : > { %3378 = vmatmul.msk.bf16.vlgmr.msrb.gmra.mxu0 %vm299_vm2, %v1528_v25 }
  0x73   : > { %3322 = vmatmul.msk.bf16.gmra.mxu1 %vm299_vm2, %v569_v33  ;;  %3341 = vmatmul.msk.bf16.gmra.mxu2 %vm299_vm2, %v1208_v60  ;;  %v545_v33 = vld [vmem:[%s3550_s25 + $0x69] sm:$0xff] }
  0x75   : > { %3362 = vmatmul.msk.bf16.gmra.mxu3 %vm299_vm2, %v1211_v37 }
  0x76   : > { %3379 = vmatmul.msk.bf16.gmra.mxu0 %vm299_vm2, %v1529_v34  ;;  %v1504_v34 = vld [vmem:[%s3550_s25 + $0x73] sm:$0xff] }
  0x77   : > { %v1534_v39 = vpack.c.bf16 %v1505_v35, %v1504_v34  ;;  %v1193_v34 = vld [vmem:[%s3550_s25 + $0xba] sm:$0xff] }
  0x83   : > { %3323 = vmatmul.msk.bf16.gmra.mxu1 %vm299_vm2, %v570_v42  ;;  %3342 = vmatmul.msk.bf16.gmra.mxu2 %vm299_vm2, %v1209_v16  ;;  %v543_v16 = vld [vmem:[%s3550_s25 + $0x59] sm:$0xff] }
  0x84   : > { %v573_v20 = vpack.c.bf16 %v543_v16, %v542_v15 }
  0x85   : > { %3363 = vmatmul.msk.bf16.gmra.mxu3 %vm299_vm2, %v1212_v46 }
  0x86   : > { %3380 = vmatmul.msk.bf16.gmra.mxu0 %vm299_vm2, %v1530_v43 }
  0x90   : > { %v3668_v52 = vpop.f32.mrf.mxu1 }
  0x93   : > { %v3672_v56 = vpop.f32.mrf.mxu0  ;;  %3324 = vmatmul.msk.bf16.gmra.mxu1 %vm299_vm2, %v571_v51  ;;  %3343 = vmatmul.msk.bf16.gmra.mxu2 %vm299_vm2, %v1210_v28  ;;  %v1506_v51 = vld [vmem:[%s3550_s25 + $0x83] sm:$0xff] }
  0x95   : > { %3364 = vmatmul.msk.bf16.gmra.mxu3 %vm299_vm2, %v3675_v57 }
  0x96   : > { %3381 = vmatmul.msk.bf16.gmra.mxu0 %vm299_vm2, %v1531_v53  ;;  %v3679_v58 = vpop.f32.mrf.mxu2  ;;  %v1507_v53 = vld [vmem:[%s3550_s25 + $0x8b] sm:$0xff] }
  0x97   : > { %v1535_v62 = vpack.c.bf16 %v1507_v53, %v1506_v51 }
  0x98   : > { %v3683_v59 = vpop.f32.mrf.mxu1  ;;  %v3687_v61 = vpop.f32.mrf.mxu3 }
  0x9b   : > { %v3685_v60 = vpop.f32.mrf.mxu0 }
  0x9e   : > { %v3693_v2 = vpop.f32.mrf.mxu2 }
  0xa0   : > { %v3695_v4 = vpop.f32.mrf.mxu1  ;;  %v3701_v10 = vpop.f32.mrf.mxu3 }
  0xa3   : > { %v3699_v9 = vpop.f32.mrf.mxu0  ;;  %3325 = vmatmul.msk.bf16.gmra.mxu1 %vm299_vm2, %v572_v3  ;;  %3344 = vmatmul.msk.bf16.gmra.mxu2 %vm299_vm2, %v1211_v37  ;;  %v574_v37 = vpack.c.bf16 %v545_v33, %v544_v32  ;;  %v1192_v33 = vld [vmem:[%s3550_s25 + $0xb2] sm:$0xff] }
  0xa5   : > { %3365 = vmatmul.msk.bf16.gmra.mxu3 %vm299_vm2, %v3704_v11 }
  0xa6   : > { %3382 = vmatmul.msk.bf16.gmra.mxu0 %vm299_vm2, %v1532_v6  ;;  %v3708_v5 = vpop.f32.mrf.mxu2  ;;  %v3788_v6 = vpack.c.bf16 %v1191_v0, %v1190_v63  ;;  %v551_v63 = vld [vmem:[%s3550_s25 + $0x99] sm:$0xff] }
  0xa8   : > { %v3712_v12 = vpop.f32.mrf.mxu1  ;;  %v3716_v14 = vpop.f32.mrf.mxu3 }
  0xab   : > { %v3714_v13 = vpop.f32.mrf.mxu0 }
  0xae   : > { %v3722_v19 = vpop.f32.mrf.mxu2 }
  0xb0   : > { %v3724_v21 = vpop.f32.mrf.mxu1  ;;  %v3730_v26 = vpop.f32.mrf.mxu3 }
  0xb3   : > { %v3728_v25 = vpop.f32.mrf.mxu0  ;;  %3326 = vmatmul.msk.bf16.gmra.mxu1 %vm299_vm2, %v573_v20  ;;  %3345 = vmatmul.msk.bf16.gmra.mxu2 %vm299_vm2, %v1212_v46  ;;  %v1508_v20 = vld [vmem:[%s3550_s25 + $0x93] sm:$0xff] }
  0xb5   : > { %3366 = vmatmul.msk.bf16.gmra.mxu3 %vm299_vm2, %v3733_v27 }
  0xb6   : > { %3383 = vmatmul.msk.bf16.gmra.mxu0 %vm299_vm2, %v1533_v22  ;;  %v3737_v28 = vpop.f32.mrf.mxu2  ;;  %v1509_v22 = vld [vmem:[%s3550_s25 + $0x9b] sm:$0xff] }
  0xb7   : > { %v1536_v32 = vpack.c.bf16 %v1509_v22, %v1508_v20 }
  0xb8   : > { %v3741_v29 = vpop.f32.mrf.mxu1  ;;  %v3745_v31 = vpop.f32.mrf.mxu3 }
  0xbb   : > { %v3743_v30 = vpop.f32.mrf.mxu0 }
  0xbe   : > { %v3751_v36 = vpop.f32.mrf.mxu2 }
  0xc0   : > { %v3753_v38 = vpop.f32.mrf.mxu1  ;;  %v3759_v43 = vpop.f32.mrf.mxu3 }
  0xc3   : > { %v3757_v42 = vpop.f32.mrf.mxu0  ;;  %3327 = vmatmul.msk.bf16.gmra.mxu1 %vm299_vm2, %v574_v37  ;;  %3346 = vmatmul.msk.bf16.gmra.mxu2 %vm299_vm2, %v3675_v57 }
  0xc5   : > { %3367 = vmatmul.msk.bf16.gmra.mxu3 %vm299_vm2, %v3762_v44 }
  0xc6   : > { %3384 = vmatmul.msk.bf16.gmra.mxu0 %vm299_vm2, %v1534_v39  ;;  %v3767_v45 = vpop.f32.mrf.mxu2  ;;  %v3810_v39 = vpack.c.bf16 %v1193_v34, %v1192_v33  ;;  %v1195_v33 = vld [vmem:[%s3550_s25 + $0xca] sm:$0xff] }
  0xc8   : > { %v3771_v46 = vpop.f32.mrf.mxu1  ;;  %v1330_v48 = vpop.f32.mrf.mxu3 }
  0xcb   : > { %v3773_v47 = vpop.f32.mrf.mxu0 }
  0xce   : > { %v3779_v54 = vpop.f32.mrf.mxu2 }
  0xd0   : > { %v3781_v57 = vpop.f32.mrf.mxu1  ;;  %v1332_v3 = vpop.f32.mrf.mxu3 }
  0xd3   : > { %v3785_v1 = vpop.f32.mrf.mxu0  ;;  %3328 = vmatmul.msk.bf16.gmra.mxu1 %vm299_vm2, %v575_v55  ;;  %3347 = vmatmul.msk.bf16.gmra.mxu2 %vm299_vm2, %v3704_v11  ;;  %v576_v11 = vpack.c.bf16 %v549_v18, %v548_v17  ;;  %v1511_v17 = vld [vmem:[%s3550_s25 + $0xab] sm:$0xff] }
  0xd5   : > { %3368 = vmatmul.msk.bf16.gmra.mxu3 %vm299_vm2, %v3788_v6 }
  0xd6   : > { %3385 = vmatmul.msk.bf16.gmra.mxu0 %vm299_vm2, %v1535_v62  ;;  %v3793_v7 = vpop.f32.mrf.mxu2  ;;  %v550_v62 = vld [vmem:[%s3550_s25 + $0x91] sm:$0xff] }
  0xd7   : > { %v577_v20 = vpack.c.bf16 %v551_v63, %v550_v62 }
  0xd8   : > { %v3797_v8 = vpop.f32.mrf.mxu1  ;;  %v1335_v16 = vpop.f32.mrf.mxu3 }
  0xdb   : > { %v3799_v15 = vpop.f32.mrf.mxu0 }
  0xde   : > { %v3805_v23 = vpop.f32.mrf.mxu2 }
  0xe0   : > { %v690_v24 = vpop.f32.mrf.mxu1  ;;  %v1337_v37 = vpop.f32.mrf.mxu3 }
  0xe1   : > { %v780_v40 = vadd.f32 %v690_v24, %v3672_v56 }
  0xe3   : > { %v1650_v35 = vpop.f32.mrf.mxu0  ;;  %3329 = vmatmul.msk.bf16.gmra.mxu1 %vm299_vm2, %v576_v11  ;;  %3348 = vmatmul.msk.bf16.gmra.mxu2 %vm299_vm2, %v3733_v27  ;;  %v1510_v27 = vld [vmem:[%s3550_s25 + $0xa3] sm:$0xff] }
  0xe4   : > { %v1537_v24 = vpack.c.bf16 %v1511_v17, %v1510_v27  ;;  %v552_v27 = vld [vmem:[%s3550_s25 + $0xa1] sm:$0xff]  ;;  %v553_v17 = vld [vmem:[%s3550_s25 + $0xa9] sm:$0xff] }
  0xe5   : > { %3369 = vmatmul.msk.bf16.gmra.mxu3 %vm299_vm2, %v3810_v39 }
  0xe6   : > { %3386 = vmatmul.msk.bf16.gmra.mxu0 %vm299_vm2, %v1536_v32  ;;  %v1010_v41 = vpop.f32.mrf.mxu2  ;;  %v1194_v32 = vld [vmem:[%s3550_s25 + $0xc2] sm:$0xff] }
  0xe7   : > { %v1100_v49 = vadd.f32 %v1010_v41, %v780_v40 }
  0xe8   : > { %v692_v50 = vpop.f32.mrf.mxu1  ;;  %v1340_v55 = vpop.f32.mrf.mxu3 }
  0xe9   : > { %v1420_v53 = vadd.f32 %v1330_v48, %v1100_v49  ;;  %v781_v18 = vadd.f32 %v692_v50, %v3685_v60 }
  0xeb   : > { %v1652_v51 = vpop.f32.mrf.mxu0  ;;  %v3820_v0 = vadd.f32 %v1650_v35, %v1420_v53  ;;  %v3828_v35 = vpack.c.bf16 %v1195_v33, %v1194_v32  ;;  %v1196_v32 = vld [vmem:[%s3550_s25 + $0xd2] sm:$0xff]  ;;  %v1197_v33 = vld [vmem:[%s3550_s25 + $0xda] sm:$0xff] }
  0xee   : > { %v1012_v56 = vpop.f32.mrf.mxu2 }
  0xef   : > { %v1101_v22 = vadd.f32 %v1012_v56, %v781_v18  ;;  %v1512_v18 = vld [vmem:[%s3550_s25 + $0xb3] sm:$0xff] }
  0xf0   : > { %v695_v11 = vpop.f32.mrf.mxu1  ;;  %v1342_v48 = vpop.f32.mrf.mxu3 }
  0xf1   : > { %v1421_v40 = vadd.f32 %v1332_v3, %v1101_v22  ;;  %v782_v41 = vadd.f32 %v695_v11, %v3699_v9 }
  0xf3   : > { %v1655_v34 = vpop.f32.mrf.mxu0  ;;  %3330 = vmatmul.msk.bf16.gmra.mxu1 %vm299_vm2, %v577_v20  ;;  %3349 = vmatmul.msk.bf16.gmra.mxu2 %vm299_vm2, %v3762_v44  ;;  %v3833_v60 = vadd.f32 %v1652_v51, %v1421_v40  ;;  %v1513_v51 = vld [vmem:[%s3550_s25 + $0xbb] sm:$0xff]  ;;  %v578_v20 = vpack.c.bf16 %v553_v17, %v552_v27 }
  0xf5   : > { %3370 = vmatmul.msk.bf16.gmra.mxu3 %vm299_vm2, %v3828_v35 }
  0xf6   : > { %3387 = vmatmul.msk.bf16.gmra.mxu0 %vm299_vm2, %v1537_v24  ;;  %v1015_v49 = vpop.f32.mrf.mxu2  ;;  %v1538_v24 = vpack.c.bf16 %v1513_v51, %v1512_v18  ;;  %v554_v18 = vld [vmem:[%s3550_s25 + $0xb1] sm:$0xff]  ;;  %v555_v51 = vld [vmem:[%s3550_s25 + $0xb9] sm:$0xff] }
  0xf7   : > { %v1102_v3 = vadd.f32 %v1015_v49, %v782_v41 }
  0xf8   : > { %v697_v50 = vpop.f32.mrf.mxu1  ;;  %v1345_v63 = vpop.f32.mrf.mxu3 }
  0xf9   : > { %v1422_v62 = vadd.f32 %v1335_v16, %v1102_v3  ;;  %v783_v56 = vadd.f32 %v697_v50, %v3714_v13 }
  0xfb   : > { %v1657_v53 = vpop.f32.mrf.mxu0  ;;  %v3840_v44 = vadd.f32 %v1655_v34, %v1422_v62  ;;  %v3848_v34 = vpack.c.bf16 %v1197_v33, %v1196_v32  ;;  %v1198_v32 = vld [vmem:[%s3550_s25 + $0xe2] sm:$0xff]  ;;  %v1199_v33 = vld [vmem:[%s3550_s25 + $0xea] sm:$0xff] }
  0xfe   : > { %v1017_v9 = vpop.f32.mrf.mxu2 }
  0xff   : > { %v1103_v22 = vadd.f32 %v1017_v9, %v783_v56  ;;  %v1514_v56 = vld [vmem:[%s3550_s25 + $0xc3] sm:$0xff] }
 0x100   : > { %v700_v11 = vpop.f32.mrf.mxu1  ;;  %v1347_v16 = vpop.f32.mrf.mxu3 }
 0x101   : > { %v1423_v41 = vadd.f32 %v1337_v37, %v1103_v22  ;;  %v784_v49 = vadd.f32 %v700_v11, %v3728_v25 }
 0x103   : > { %v1660_v40 = vpop.f32.mrf.mxu0  ;;  %3331 = vmatmul.msk.bf16.gmra.mxu1 %vm299_vm2, %v578_v20  ;;  %3350 = vmatmul.msk.bf16.gmra.mxu2 %vm299_vm2, %v3788_v6  ;;  %v3853_v13 = vadd.f32 %v1657_v53, %v1423_v41  ;;  %v1515_v53 = vld [vmem:[%s3550_s25 + $0xcb] sm:$0xff]  ;;  %v579_v20 = vpack.c.bf16 %v555_v51, %v554_v18 }
 0x105   : > { %3371 = vmatmul.msk.bf16.gmra.mxu3 %vm299_vm2, %v3848_v34 }
 0x106   : > { %3388 = vmatmul.msk.bf16.gmra.mxu0 %vm299_vm2, %v1538_v24  ;;  %v1020_v3 = vpop.f32.mrf.mxu2  ;;  %v1539_v24 = vpack.c.bf16 %v1515_v53, %v1514_v56  ;;  %v556_v56 = vld [vmem:[%s3550_s25 + $0xc1] sm:$0xff]  ;;  %v557_v53 = vld [vmem:[%s3550_s25 + $0xc9] sm:$0xff] }
 0x107   : > { %v1104_v37 = vadd.f32 %v1020_v3, %v784_v49 }
 0x108   : > { %v702_v50 = vpop.f32.mrf.mxu1  ;;  %v1350_v17 = vpop.f32.mrf.mxu3 }
 0x109   : > { %v1424_v27 = vadd.f32 %v1340_v55, %v1104_v37  ;;  %v785_v9 = vadd.f32 %v702_v50, %v3743_v30 }
 0x10b   : > { %v1662_v62 = vpop.f32.mrf.mxu0  ;;  %v3860_v6 = vadd.f32 %v1660_v40, %v1424_v27  ;;  %v3868_v40 = vpack.c.bf16 %v1199_v33, %v1198_v32  ;;  %v1200_v32 = vld [vmem:[%s3550_s25 + $0xf2] sm:$0xff]  ;;  %v1201_v33 = vld [vmem:[%s3550_s25 + $0xfa] sm:$0xff] }
 0x10e   : > { %v1022_v25 = vpop.f32.mrf.mxu2 }
 0x10f   : > { %v1105_v22 = vadd.f32 %v1022_v25, %v785_v9  ;;  %v1516_v9 = vld [vmem:[%s3550_s25 + $0xd3] sm:$0xff] }
 0x110   : > { %v705_v11 = vpop.f32.mrf.mxu1  ;;  %v1352_v55 = vpop.f32.mrf.mxu3 }
 0x111   : > { %v1425_v49 = vadd.f32 %v1342_v48, %v1105_v22  ;;  %v786_v3 = vadd.f32 %v705_v11, %v3757_v42 }
 0x113   : > { %v1665_v41 = vpop.f32.mrf.mxu0  ;;  %3332 = vmatmul.msk.bf16.gmra.mxu1 %vm299_vm2, %v579_v20  ;;  %3351 = vmatmul.msk.bf16.gmra.mxu2 %vm299_vm2, %v3810_v39  ;;  %v3873_v30 = vadd.f32 %v1662_v62, %v1425_v49  ;;  %v1517_v62 = vld [vmem:[%s3550_s25 + $0xdb] sm:$0xff]  ;;  %v580_v20 = vpack.c.bf16 %v557_v53, %v556_v56 }
 0x115   : > { %3372 = vmatmul.msk.bf16.gmra.mxu3 %vm299_vm2, %v3868_v40 }
 0x116   : > { %3389 = vmatmul.msk.bf16.gmra.mxu0 %vm299_vm2, %v1539_v24  ;;  %v1025_v37 = vpop.f32.mrf.mxu2  ;;  %v1540_v24 = vpack.c.bf16 %v1517_v62, %v1516_v9  ;;  %v558_v9 = vld [vmem:[%s3550_s25 + $0xd1] sm:$0xff]  ;;  %v559_v62 = vld [vmem:[%s3550_s25 + $0xd9] sm:$0xff] }
 0x117   : > { %v1106_v48 = vadd.f32 %v1025_v37, %v786_v3 }
 0x118   : > { %v707_v50 = vpop.f32.mrf.mxu1  ;;  %v1355_v51 = vpop.f32.mrf.mxu3 }
 0x119   : > { %v1426_v18 = vadd.f32 %v1345_v63, %v1106_v48  ;;  %v787_v25 = vadd.f32 %v707_v50, %v3773_v47 }
 0x11b   : > { %v1667_v27 = vpop.f32.mrf.mxu0  ;;  %v3880_v39 = vadd.f32 %v1665_v41, %v1426_v18  ;;  %v3888_v41 = vpack.c.bf16 %v1201_v33, %v1200_v32  ;;  %v1202_v32 = vld [vmem:[%s3550_s25 + $0x102] sm:$0xff]  ;;  %v1203_v33 = vld [vmem:[%s3550_s25 + $0x10a] sm:$0xff] }
 0x11e   : > { %v1027_v42 = vpop.f32.mrf.mxu2 }
 0x11f   : > { %v1107_v22 = vadd.f32 %v1027_v42, %v787_v25  ;;  %v1518_v25 = vld [vmem:[%s3550_s25 + $0xe3] sm:$0xff] }
 0x120   : > { %v710_v11 = vpop.f32.mrf.mxu1  ;;  %v1357_v63 = vpop.f32.mrf.mxu3 }
 0x121   : > { %v1427_v3 = vadd.f32 %v1347_v16, %v1107_v22  ;;  %v788_v37 = vadd.f32 %v710_v11, %v3785_v1 }
 0x123   : > { %v1670_v49 = vpop.f32.mrf.mxu0  ;;  %3333 = vmatmul.msk.bf16.gmra.mxu1 %vm299_vm2, %v580_v20  ;;  %3352 = vmatmul.msk.bf16.gmra.mxu2 %vm299_vm2, %v3828_v35  ;;  %v3893_v47 = vadd.f32 %v1667_v27, %v1427_v3  ;;  %v1519_v27 = vld [vmem:[%s3550_s25 + $0xeb] sm:$0xff]  ;;  %v581_v20 = vpack.c.bf16 %v559_v62, %v558_v9 }
 0x125   : > { %3373 = vmatmul.msk.bf16.gmra.mxu3 %vm299_vm2, %v3888_v41 }
 0x126   : > { %3390 = vmatmul.msk.bf16.gmra.mxu0 %vm299_vm2, %v1540_v24  ;;  %v1030_v48 = vpop.f32.mrf.mxu2  ;;  %v1541_v24 = vpack.c.bf16 %v1519_v27, %v1518_v25  ;;  %v560_v25 = vld [vmem:[%s3550_s25 + $0xe1] sm:$0xff]  ;;  %v561_v27 = vld [vmem:[%s3550_s25 + $0xe9] sm:$0xff] }
 0x127   : > { %v1108_v16 = vadd.f32 %v1030_v48, %v788_v37 }
 0x128   : > { %v712_v50 = vpop.f32.mrf.mxu1  ;;  %v1360_v53 = vpop.f32.mrf.mxu3 }
 0x129   : > { %v1428_v56 = vadd.f32 %v1350_v17, %v1108_v16  ;;  %v789_v42 = vadd.f32 %v712_v50, %v3799_v15 }
 0x12b   : > { %v1672_v18 = vpop.f32.mrf.mxu0  ;;  %v3900_v35 = vadd.f32 %v1670_v49, %v1428_v56  ;;  %v3908_v49 = vpack.c.bf16 %v1203_v33, %v1202_v32  ;;  %v1204_v32 = vld [vmem:[%s3550_s25 + $0x112] sm:$0xff]  ;;  %v1205_v33 = vld [vmem:[%s3550_s25 + $0x11a] sm:$0xff] }
 0x12e   : > { %v1032_v1 = vpop.f32.mrf.mxu2 }
 0x12f   : > { %v1109_v22 = vadd.f32 %v1032_v1, %v789_v42  ;;  %v1520_v42 = vld [vmem:[%s3550_s25 + $0xf3] sm:$0xff] }
 0x130   : > { %v715_v11 = vpop.f32.mrf.mxu1  ;;  %v1362_v17 = vpop.f32.mrf.mxu3 }
 0x131   : > { %v1429_v37 = vadd.f32 %v1352_v55, %v1109_v22  ;;  %v790_v48 = vadd.f32 %v715_v11, %v3668_v52 }
 0x133   : > { %v1675_v3 = vpop.f32.mrf.mxu0  ;;  %3334 = vmatmul.msk.bf16.gmra.mxu1 %vm299_vm2, %v581_v20  ;;  %3353 = vmatmul.msk.bf16.gmra.mxu2 %vm299_vm2, %v3848_v34  ;;  %v3913_v15 = vadd.f32 %v1672_v18, %v1429_v37  ;;  %v1521_v18 = vld [vmem:[%s3550_s25 + $0xfb] sm:$0xff]  ;;  %v582_v20 = vpack.c.bf16 %v561_v27, %v560_v25 }
 0x135   : > { %3374 = vmatmul.msk.bf16.gmra.mxu3 %vm299_vm2, %v3908_v49 }
 0x136   : > { %3391 = vmatmul.msk.bf16.gmra.mxu0 %vm299_vm2, %v1541_v24  ;;  %v1035_v16 = vpop.f32.mrf.mxu2  ;;  %v1542_v24 = vpack.c.bf16 %v1521_v18, %v1520_v42  ;;  %v562_v42 = vld [vmem:[%s3550_s25 + $0xf1] sm:$0xff]  ;;  %v563_v18 = vld [vmem:[%s3550_s25 + $0xf9] sm:$0xff] }
 0x137   : > { %v1110_v55 = vadd.f32 %v1035_v16, %v790_v48 }
 0x138   : > { %v717_v50 = vpop.f32.mrf.mxu1  ;;  %v1365_v62 = vpop.f32.mrf.mxu3 }
 0x139   : > { %v1430_v9 = vadd.f32 %v1355_v51, %v1110_v55  ;;  %v791_v1 = vadd.f32 %v717_v50, %v3683_v59 }
 0x13b   : > { %v1677_v56 = vpop.f32.mrf.mxu0  ;;  %v3920_v34 = vadd.f32 %v1675_v3, %v1430_v9  ;;  %v3928_v3 = vpack.c.bf16 %v1205_v33, %v1204_v32  ;;  %v1206_v32 = vld [vmem:[%s3550_s25 + $0x122] sm:$0xff]  ;;  %v1207_v33 = vld [vmem:[%s3550_s25 + $0x12a] sm:$0xff] }
 0x13e   : > { %v1037_v52 = vpop.f32.mrf.mxu2 }
 0x13f   : > { %v1111_v22 = vadd.f32 %v1037_v52, %v791_v1  ;;  %v1522_v1 = vld [vmem:[%s3550_s25 + $0x103] sm:$0xff] }
 0x140   : > { %v720_v11 = vpop.f32.mrf.mxu1  ;;  %v1367_v51 = vpop.f32.mrf.mxu3 }
 0x141   : > { %v1431_v48 = vadd.f32 %v1357_v63, %v1111_v22  ;;  %v792_v16 = vadd.f32 %v720_v11, %v3695_v4 }
 0x143   : > { %v1680_v37 = vpop.f32.mrf.mxu0  ;;  %3335 = vmatmul.msk.bf16.gmra.mxu1 %vm299_vm2, %v582_v20  ;;  %3354 = vmatmul.msk.bf16.gmra.mxu2 %vm299_vm2, %v3868_v40  ;;  %v3933_v59 = vadd.f32 %v1677_v56, %v1431_v48  ;;  %v1523_v56 = vld [vmem:[%s3550_s25 + $0x10b] sm:$0xff]  ;;  %v583_v20 = vpack.c.bf16 %v563_v18, %v562_v42 }
 0x145   : > { %3375 = vmatmul.msk.bf16.gmra.mxu3 %vm299_vm2, %v3928_v3 }
 0x146   : > { %3392 = vmatmul.msk.bf16.gmra.mxu0 %vm299_vm2, %v1542_v24  ;;  %v1040_v55 = vpop.f32.mrf.mxu2  ;;  %v1543_v24 = vpack.c.bf16 %v1523_v56, %v1522_v1  ;;  %v564_v1 = vld [vmem:[%s3550_s25 + $0x101] sm:$0xff]  ;;  %v565_v56 = vld [vmem:[%s3550_s25 + $0x109] sm:$0xff] }
 0x147   : > { %v1112_v63 = vadd.f32 %v1040_v55, %v792_v16 }
 0x148   : > { %v722_v50 = vpop.f32.mrf.mxu1  ;;  %v1370_v27 = vpop.f32.mrf.mxu3 }
 0x149   : > { %v1432_v25 = vadd.f32 %v1360_v53, %v1112_v63  ;;  %v793_v52 = vadd.f32 %v722_v50, %v3712_v12 }
 0x14b   : > { %v1682_v9 = vpop.f32.mrf.mxu0  ;;  %v3940_v40 = vadd.f32 %v1680_v37, %v1432_v25  ;;  %v1225_v37 = vpack.c.bf16 %v1207_v33, %v1206_v32  ;;  %v2452_v32 = vld [vmem:[%s3550_s25 + $0x25] sm:$0xff]  ;;  %v2453_v33 = vld [vmem:[%s3550_s25 + $0x2d] sm:$0xff] }
 0x14e   : > { %v1042_v4 = vpop.f32.mrf.mxu2 }
 0x14f   : > { %v1113_v22 = vadd.f32 %v1042_v4, %v793_v52  ;;  %v1525_v4 = vld [vmem:[%s3550_s25 + $0x11b] sm:$0xff] }
 0x150   : > { %v725_v11 = vpop.f32.mrf.mxu1  ;;  %v1372_v53 = vpop.f32.mrf.mxu3 }
 0x151   : > { %v1433_v16 = vadd.f32 %v1362_v17, %v1113_v22  ;;  %v794_v55 = vadd.f32 %v725_v11, %v3724_v21  ;;  %v584_v21 = vpack.c.bf16 %v565_v56, %v564_v1  ;;  %v566_v56 = vld [vmem:[%s3550_s25 + $0x111] sm:$0xff] }
 0x153   : > { %v1685_v48 = vpop.f32.mrf.mxu0  ;;  %3336 = vmatmul.msk.bf16.gmra.mxu1 %vm299_vm2, %v583_v20  ;;  %3355 = vmatmul.msk.bf16.gmra.mxu2 %vm299_vm2, %v3888_v41  ;;  %v3951_v12 = vadd.f32 %v1682_v9, %v1433_v16  ;;  %v1524_v41 = vld [vmem:[%s3550_s25 + $0x113] sm:$0xff] }
 0x155   : > { %3376 = vmatmul.msk.bf16.gmra.mxu3 %vm299_vm2, %v1225_v37 }
 0x156   : > { %3393 = vmatmul.msk.bf16.gmra.mxu0 %vm299_vm2, %v1543_v24  ;;  %v1045_v63 = vpop.f32.mrf.mxu2  ;;  %v1544_v24 = vpack.c.bf16 %v1525_v4, %v1524_v41  ;;  %v567_v41 = vld [vmem:[%s3550_s25 + $0x119] sm:$0xff] }
 0x157   : > { %v1114_v17 = vadd.f32 %v1045_v63, %v794_v55 }
 0x158   : > { %v727_v50 = vpop.f32.mrf.mxu1  ;;  %v1375_v18 = vpop.f32.mrf.mxu3 }
 0x159   : > { %v1434_v42 = vadd.f32 %v1365_v62, %v1114_v17  ;;  %v795_v9 = vadd.f32 %v727_v50, %v3741_v29 }
 0x15b   : > { %v1687_v25 = vpop.f32.mrf.mxu0  ;;  %v3957_v52 = vadd.f32 %v1685_v48, %v1434_v42  ;;  %v2488_v48 = vpack.c.bf16 %v2453_v33, %v2452_v32  ;;  %v2455_v32 = vld [vmem:[%s3550_s25 + $0x3d] sm:$0xff] }
 0x15e   : > { %v1047_v20 = vpop.f32.mrf.mxu2 }
 0x15f   : > { %v1115_v22 = vadd.f32 %v1047_v20, %v795_v9  ;;  %v1527_v9 = vld [vmem:[%s3550_s25 + $0x12b] sm:$0xff] }
 0x160   : > { %v730_v11 = vpop.f32.mrf.mxu1  ;;  %v1377_v62 = vpop.f32.mrf.mxu3 }
 0x161   : > { %v1435_v37 = vadd.f32 %v1367_v51, %v1115_v22  ;;  %v796_v55 = vadd.f32 %v730_v11, %v3753_v38  ;;  %v585_v38 = vpack.c.bf16 %v567_v41, %v566_v56  ;;  %v1812_v56 = vld [vmem:[%s3550_s25 + $0x14] sm:$0xff]  ;;  %v2132_v41 = vld [vmem:[%s3550_s25 + $0x24] sm:$0xff] }
 0x163   : > { %v1690_v16 = vpop.f32.mrf.mxu0  ;;  %3337 = vmatmul.msk.bf16.gmra.mxu1 %vm299_vm2, %v584_v21  ;;  %3356 = vmatmul.msk.bf16.gmra.mxu2 %vm299_vm2, %v3908_v49  ;;  %v3968_v29 = vadd.f32 %v1687_v25, %v1435_v37  ;;  %v1526_v49 = vld [vmem:[%s3550_s25 + $0x123] sm:$0xff] }
 0x164   : > { %v1545_v11 = vpack.c.bf16 %v1527_v9, %v1526_v49  ;;  %v2133_v9 = vld [vmem:[%s3550_s25 + $0x2c] sm:$0xff] }
 0x165   : > { %3435 = vmatmul.msk.bf16.vlgmr.msra.gmra.mxu3 %vm299_vm2, %v2488_v48 }
 0x166   : > { %3394 = vmatmul.msk.bf16.gmra.mxu0 %vm299_vm2, %v1544_v24  ;;  %v1050_v63 = vpop.f32.mrf.mxu2  ;;  %v2454_v24 = vld [vmem:[%s3550_s25 + $0x35] sm:$0xff] }
 0x167   : > { %v1116_v51 = vadd.f32 %v1050_v63, %v796_v55 }
 0x168   : > { %v732_v17 = vpop.f32.mrf.mxu1  ;;  %v1380_v1 = vpop.f32.mrf.mxu3 }
 0x169   : > { %v1436_v42 = vadd.f32 %v1370_v27, %v1116_v51  ;;  %v797_v25 = vadd.f32 %v732_v17, %v3771_v46 }
 0x16b   : > { %v1692_v50 = vpop.f32.mrf.mxu0  ;;  %v3974_v4 = vadd.f32 %v1690_v16, %v1436_v42  ;;  %v2489_v16 = vpack.c.bf16 %v2455_v32, %v2454_v24  ;;  %v2457_v32 = vld [vmem:[%s3550_s25 + $0x4d] sm:$0xff] }
 0x16e   : > { %v1052_v20 = vpop.f32.mrf.mxu2 }
 0x16f   : > { %v1117_v21 = vadd.f32 %v1052_v20, %v797_v25  ;;  %v2773_v25 = vld [vmem:[%s3550_s25 + $0x2e] sm:$0xff] }
 0x170   : > { %v735_v22 = vpop.f32.mrf.mxu1  ;;  %v1382_v27 = vpop.f32.mrf.mxu3 }
 0x171   : > { %v1437_v37 = vadd.f32 %v1372_v53, %v1117_v21  ;;  %v798_v48 = vadd.f32 %v735_v22, %v3781_v57 }
 0x173   : > { %v1695_v33 = vpop.f32.mrf.mxu0  ;;  %3338 = vmatmul.msk.bf16.gmra.mxu1 %vm299_vm2, %v585_v38  ;;  %3357 = vmatmul.msk.bf16.gmra.mxu2 %vm299_vm2, %v3928_v3  ;;  %v3985_v46 = vadd.f32 %v1692_v50, %v1437_v37  ;;  %v1813_v3 = vld [vmem:[%s3550_s25 + $0x1c] sm:$0xff]  ;;  %v2772_v50 = vld [vmem:[%s3550_s25 + $0x26] sm:$0xff] }
 0x174   : > { %v1848_v38 = vpack.c.bf16 %v1813_v3, %v1812_v56  ;;  %v2808_v24 = vpack.c.bf16 %v2773_v25, %v2772_v50  ;;  %v2135_v50 = vld [vmem:[%s3550_s25 + $0x3c] sm:$0xff] }
 0x175   : > { %3436 = vmatmul.msk.bf16.gmra.mxu3 %vm299_vm2, %v2489_v16  ;;  %v2774_v25 = vld [vmem:[%s3550_s25 + $0x36] sm:$0xff] }
 0x176   : > { %3395 = vmatmul.msk.bf16.gmra.mxu0 %vm299_vm2, %v1545_v11  ;;  %v1055_v55 = vpop.f32.mrf.mxu2  ;;  %v2168_v11 = vpack.c.bf16 %v2133_v9, %v2132_v41  ;;  %v2134_v41 = vld [vmem:[%s3550_s25 + $0x34] sm:$0xff] }
 0x177   : > { %v1118_v53 = vadd.f32 %v1055_v55, %v798_v48 }
 0x178   : > { %v737_v63 = vpop.f32.mrf.mxu1  ;;  %v1385_v42 = vpop.f32.mrf.mxu3 }
 0x179   : > { %v1438_v17 = vadd.f32 %v1375_v18, %v1118_v53  ;;  %v799_v57 = vadd.f32 %v737_v63, %v3797_v8  ;;  %v2456_v18 = vld [vmem:[%s3550_s25 + $0x45] sm:$0xff] }
 0x17b   : > { %v1697_v51 = vpop.f32.mrf.mxu0  ;;  %v3992_v49 = vadd.f32 %v1695_v33, %v1438_v17  ;;  %v2490_v33 = vpack.c.bf16 %v2457_v32, %v2456_v18  ;;  %v2459_v18 = vld [vmem:[%s3550_s25 + $0x5d] sm:$0xff] }
 0x17e   : > { %v1057_v20 = vpop.f32.mrf.mxu2 }
 0x17f   : > { %v1119_v21 = vadd.f32 %v1057_v20, %v799_v57  ;;  %v2775_v57 = vld [vmem:[%s3550_s25 + $0x3e] sm:$0xff] }
 0x180   : > { %v740_v22 = vpop.f32.mrf.mxu1  ;;  %v1387_v48 = vpop.f32.mrf.mxu3 }
 0x181   : > { %v1439_v16 = vadd.f32 %v1377_v62, %v1119_v21  ;;  %v800_v55 = vadd.f32 %v740_v22, %v3679_v58  ;;  %v2169_v21 = vpack.c.bf16 %v2135_v50, %v2134_v41  ;;  %v2809_v22 = vpack.c.bf16 %v2775_v57, %v2774_v25  ;;  %v2137_v50 = vld [vmem:[%s3550_s25 + $0x4c] sm:$0xff] }
 0x182   : > { %v2776_v25 = vld [vmem:[%s3550_s25 + $0x46] sm:$0xff]  ;;  %v2777_v57 = vld [vmem:[%s3550_s25 + $0x4e] sm:$0xff] }
 0x183   : > { %v1700_v37 = vpop.f32.mrf.mxu0  ;;  %3397 = vmatmul.msk.bf16.vlgmr.msra.gmra.mxu1 %vm299_vm2, %v1848_v38  ;;  %3416 = vmatmul.msk.bf16.vlgmr.msra.gmra.mxu2 %vm299_vm2, %v2168_v11  ;;  %v4003_v8 = vadd.f32 %v1697_v51, %v1439_v16 }
 0x185   : > { %3437 = vmatmul.msk.bf16.gmra.mxu3 %vm299_vm2, %v2490_v33 }
 0x186   : > { %3454 = vmatmul.msk.bf16.vlgmr.msra.gmra.mxu0 %vm299_vm2, %v2808_v24  ;;  %v1060_v53 = vpop.f32.mrf.mxu2  ;;  %v2458_v24 = vld [vmem:[%s3550_s25 + $0x55] sm:$0xff] }
 0x187   : > { %v1120_v63 = vadd.f32 %v1060_v53, %v800_v55 }
 0x188   : > { %v742_v62 = vpop.f32.mrf.mxu1  ;;  %v1390_v3 = vpop.f32.mrf.mxu3 }
 0x189   : > { %v1440_v56 = vadd.f32 %v1380_v1, %v1120_v63  ;;  %v801_v51 = vadd.f32 %v742_v62, %v3693_v2 }
 0x18b   : > { %v1702_v17 = vpop.f32.mrf.mxu0  ;;  %v4008_v9 = vadd.f32 %v1700_v37, %v1440_v56  ;;  %v2491_v37 = vpack.c.bf16 %v2459_v18, %v2458_v24  ;;  %v2136_v56 = vld [vmem:[%s3550_s25 + $0x44] sm:$0xff]  ;;  %v2461_v24 = vld [vmem:[%s3550_s25 + $0x6d] sm:$0xff] }
 0x18e   : > { %v1062_v20 = vpop.f32.mrf.mxu2 }
 0x18f   : > { %v1121_v58 = vadd.f32 %v1062_v20, %v801_v51 }
 0x190   : > { %v745_v38 = vpop.f32.mrf.mxu1  ;;  %v1392_v1 = vpop.f32.mrf.mxu3 }
 0x191   : > { %v1441_v16 = vadd.f32 %v1382_v27, %v1121_v58  ;;  %v802_v33 = vadd.f32 %v745_v38, %v3708_v5  ;;  %v2170_v58 = vpack.c.bf16 %v2137_v50, %v2136_v56  ;;  %v2810_v38 = vpack.c.bf16 %v2777_v57, %v2776_v25  ;;  %v2139_v50 = vld [vmem:[%s3550_s25 + $0x5c] sm:$0xff] }
 0x192   : > { %v2778_v25 = vld [vmem:[%s3550_s25 + $0x56] sm:$0xff]  ;;  %v2779_v57 = vld [vmem:[%s3550_s25 + $0x5e] sm:$0xff] }
 0x193   : > { %v1705_v32 = vpop.f32.mrf.mxu0  ;;  %3398 = vmatmul.msk.bf16.gmra.mxu1 %vm299_vm2, %v2168_v11  ;;  %3417 = vmatmul.msk.bf16.gmra.mxu2 %vm299_vm2, %v2169_v21  ;;  %v4019_v2 = vadd.f32 %v1702_v17, %v1441_v16 }
 0x195   : > { %3438 = vmatmul.msk.bf16.gmra.mxu3 %vm299_vm2, %v2491_v37 }
 0x196   : > { %3455 = vmatmul.msk.bf16.gmra.mxu0 %vm299_vm2, %v2809_v22  ;;  %v1065_v55 = vpop.f32.mrf.mxu2  ;;  %v2460_v22 = vld [vmem:[%s3550_s25 + $0x65] sm:$0xff] }
 0x197   : > { %v1122_v53 = vadd.f32 %v1065_v55, %v802_v33 }
 0x198   : > { %v747_v27 = vpop.f32.mrf.mxu1  ;;  %v1395_v62 = vpop.f32.mrf.mxu3 }
 0x199   : > { %v1442_v11 = vadd.f32 %v1385_v42, %v1122_v53  ;;  %v803_v17 = vadd.f32 %v747_v27, %v3722_v19 }
 0x19b   : > { %v1707_v63 = vpop.f32.mrf.mxu0  ;;  %v4024_v41 = vadd.f32 %v1705_v32, %v1442_v11  ;;  %v2492_v32 = vpack.c.bf16 %v2461_v24, %v2460_v22  ;;  %v2138_v11 = vld [vmem:[%s3550_s25 + $0x54] sm:$0xff]  ;;  %v2463_v22 = vld [vmem:[%s3550_s25 + $0x7d] sm:$0xff] }
 0x19e   : > { %v1067_v51 = vpop.f32.mrf.mxu2 }
 0x19f   : > { %v1123_v5 = vadd.f32 %v1067_v51, %v803_v17 }
 0x1a0   : > { %v750_v20 = vpop.f32.mrf.mxu1  ;;  %v1397_v42 = vpop.f32.mrf.mxu3 }
 0x1a1   : > { %v1443_v16 = vadd.f32 %v1387_v48, %v1123_v5  ;;  %v804_v37 = vadd.f32 %v750_v20, %v3737_v28  ;;  %v2171_v5 = vpack.c.bf16 %v2139_v50, %v2138_v11  ;;  %v2811_v20 = vpack.c.bf16 %v2779_v57, %v2778_v25  ;;  %v2141_v50 = vld [vmem:[%s3550_s25 + $0x6c] sm:$0xff] }
 0x1a2   : > { %v2780_v25 = vld [vmem:[%s3550_s25 + $0x66] sm:$0xff]  ;;  %v2781_v57 = vld [vmem:[%s3550_s25 + $0x6e] sm:$0xff] }
 0x1a3   : > { %v1710_v18 = vpop.f32.mrf.mxu0  ;;  %3399 = vmatmul.msk.bf16.gmra.mxu1 %vm299_vm2, %v2169_v21  ;;  %3418 = vmatmul.msk.bf16.gmra.mxu2 %vm299_vm2, %v2170_v58  ;;  %v4035_v19 = vadd.f32 %v1707_v63, %v1443_v16 }
 0x1a5   : > { %3439 = vmatmul.msk.bf16.gmra.mxu3 %vm299_vm2, %v2492_v32 }
 0x1a6   : > { %3456 = vmatmul.msk.bf16.gmra.mxu0 %vm299_vm2, %v2810_v38  ;;  %v1070_v33 = vpop.f32.mrf.mxu2  ;;  %v2462_v38 = vld [vmem:[%s3550_s25 + $0x75] sm:$0xff] }
 0x1a7   : > { %v1124_v55 = vadd.f32 %v1070_v33, %v804_v37 }
 0x1a8   : > { %v752_v48 = vpop.f32.mrf.mxu1  ;;  %v1400_v27 = vpop.f32.mrf.mxu3 }
 0x1a9   : > { %v1444_v21 = vadd.f32 %v1390_v3, %v1124_v55  ;;  %v805_v63 = vadd.f32 %v752_v48, %v3751_v36 }
 0x1ab   : > { %v1712_v53 = vpop.f32.mrf.mxu0  ;;  %v4040_v56 = vadd.f32 %v1710_v18, %v1444_v21  ;;  %v2493_v18 = vpack.c.bf16 %v2463_v22, %v2462_v38  ;;  %v2140_v21 = vld [vmem:[%s3550_s25 + $0x64] sm:$0xff]  ;;  %v2465_v38 = vld [vmem:[%s3550_s25 + $0x8d] sm:$0xff] }
 0x1ae   : > { %v1072_v17 = vpop.f32.mrf.mxu2 }
 0x1af   : > { %v1125_v28 = vadd.f32 %v1072_v17, %v805_v63 }
 0x1b0   : > { %v755_v51 = vpop.f32.mrf.mxu1  ;;  %v1402_v3 = vpop.f32.mrf.mxu3 }
 0x1b1   : > { %v1445_v16 = vadd.f32 %v1392_v1, %v1125_v28  ;;  %v806_v32 = vadd.f32 %v755_v51, %v3767_v45  ;;  %v2172_v28 = vpack.c.bf16 %v2141_v50, %v2140_v21  ;;  %v2812_v51 = vpack.c.bf16 %v2781_v57, %v2780_v25  ;;  %v2143_v50 = vld [vmem:[%s3550_s25 + $0x7c] sm:$0xff] }
 0x1b2   : > { %v2782_v25 = vld [vmem:[%s3550_s25 + $0x76] sm:$0xff]  ;;  %v2783_v57 = vld [vmem:[%s3550_s25 + $0x7e] sm:$0xff] }
 0x1b3   : > { %v1715_v24 = vpop.f32.mrf.mxu0  ;;  %3400 = vmatmul.msk.bf16.gmra.mxu1 %vm299_vm2, %v2170_v58  ;;  %3419 = vmatmul.msk.bf16.gmra.mxu2 %vm299_vm2, %v2171_v5  ;;  %v4051_v36 = vadd.f32 %v1712_v53, %v1445_v16 }
 0x1b5   : > { %3440 = vmatmul.msk.bf16.gmra.mxu3 %vm299_vm2, %v2493_v18 }
 0x1b6   : > { %3457 = vmatmul.msk.bf16.gmra.mxu0 %vm299_vm2, %v2811_v20  ;;  %v1075_v37 = vpop.f32.mrf.mxu2  ;;  %v2464_v20 = vld [vmem:[%s3550_s25 + $0x85] sm:$0xff] }
 0x1b7   : > { %v1126_v33 = vadd.f32 %v1075_v37, %v806_v32 }
 0x1b8   : > { %v757_v1 = vpop.f32.mrf.mxu1  ;;  %v1405_v48 = vpop.f32.mrf.mxu3 }
 0x1b9   : > { %v1446_v58 = vadd.f32 %v1395_v62, %v1126_v33  ;;  %v807_v53 = vadd.f32 %v757_v1, %v3779_v54 }
 0x1bb   : > { %v1717_v55 = vpop.f32.mrf.mxu0  ;;  %v4056_v11 = vadd.f32 %v1715_v24, %v1446_v58  ;;  %v2494_v24 = vpack.c.bf16 %v2465_v38, %v2464_v20  ;;  %v2142_v58 = vld [vmem:[%s3550_s25 + $0x74] sm:$0xff]  ;;  %v2467_v20 = vld [vmem:[%s3550_s25 + $0x9d] sm:$0xff] }
 0x1be   : > { %v1077_v63 = vpop.f32.mrf.mxu2 }
 0x1bf   : > { %v1127_v45 = vadd.f32 %v1077_v63, %v807_v53 }
 0x1c0   : > { %v760_v17 = vpop.f32.mrf.mxu1  ;;  %v1407_v62 = vpop.f32.mrf.mxu3 }
 0x1c1   : > { %v1447_v16 = vadd.f32 %v1397_v42, %v1127_v45  ;;  %v808_v18 = vadd.f32 %v760_v17, %v3793_v7  ;;  %v2173_v45 = vpack.c.bf16 %v2143_v50, %v2142_v58  ;;  %v2813_v17 = vpack.c.bf16 %v2783_v57, %v2782_v25  ;;  %v2145_v50 = vld [vmem:[%s3550_s25 + $0x8c] sm:$0xff] }
 0x1c2   : > { %v2784_v25 = vld [vmem:[%s3550_s25 + $0x86] sm:$0xff]  ;;  %v2785_v57 = vld [vmem:[%s3550_s25 + $0x8e] sm:$0xff] }
 0x1c3   : > { %v1720_v22 = vpop.f32.mrf.mxu0  ;;  %3401 = vmatmul.msk.bf16.gmra.mxu1 %vm299_vm2, %v2171_v5  ;;  %3420 = vmatmul.msk.bf16.gmra.mxu2 %vm299_vm2, %v2172_v28  ;;  %v4067_v54 = vadd.f32 %v1717_v55, %v1447_v16 }
 0x1c5   : > { %3441 = vmatmul.msk.bf16.gmra.mxu3 %vm299_vm2, %v2494_v24 }
 0x1c6   : > { %3458 = vmatmul.msk.bf16.gmra.mxu0 %vm299_vm2, %v2812_v51  ;;  %v1080_v32 = vpop.f32.mrf.mxu2  ;;  %v2466_v51 = vld [vmem:[%s3550_s25 + $0x95] sm:$0xff] }
 0x1c7   : > { %v1128_v37 = vadd.f32 %v1080_v32, %v808_v18 }
 0x1c8   : > { %v762_v42 = vpop.f32.mrf.mxu1  ;;  %v1410_v1 = vpop.f32.mrf.mxu3 }
 0x1c9   : > { %v1448_v5 = vadd.f32 %v1400_v27, %v1128_v37  ;;  %v809_v55 = vadd.f32 %v762_v42, %v3805_v23 }
 0x1cb   : > { %v1722_v33 = vpop.f32.mrf.mxu0  ;;  %v4072_v21 = vadd.f32 %v1720_v22, %v1448_v5  ;;  %v2495_v22 = vpack.c.bf16 %v2467_v20, %v2466_v51  ;;  %v2144_v5 = vld [vmem:[%s3550_s25 + $0x84] sm:$0xff]  ;;  %v2469_v51 = vld [vmem:[%s3550_s25 + $0xad] sm:$0xff] }
 0x1ce   : > { %v1082_v53 = vpop.f32.mrf.mxu2 }
 0x1cf   : > { %v1129_v7 = vadd.f32 %v1082_v53, %v809_v55 }
 0x1d0   : > { %v765_v63 = vpop.f32.mrf.mxu1  ;;  %v1412_v27 = vpop.f32.mrf.mxu3 }
 0x1d1   : > { %v1449_v16 = vadd.f32 %v1402_v3, %v1129_v7  ;;  %v810_v24 = vadd.f32 %v765_v63, %v3687_v61  ;;  %v2174_v7 = vpack.c.bf16 %v2145_v50, %v2144_v5  ;;  %v2814_v63 = vpack.c.bf16 %v2785_v57, %v2784_v25  ;;  %v2147_v50 = vld [vmem:[%s3550_s25 + $0x9c] sm:$0xff] }
 0x1d2   : > { %v2786_v25 = vld [vmem:[%s3550_s25 + $0x96] sm:$0xff]  ;;  %v2787_v57 = vld [vmem:[%s3550_s25 + $0x9e] sm:$0xff] }
 0x1d3   : > { %v1725_v38 = vpop.f32.mrf.mxu0  ;;  %3402 = vmatmul.msk.bf16.gmra.mxu1 %vm299_vm2, %v2172_v28  ;;  %3421 = vmatmul.msk.bf16.gmra.mxu2 %vm299_vm2, %v2173_v45  ;;  %v4083_v23 = vadd.f32 %v1722_v33, %v1449_v16 }
 0x1d5   : > { %3442 = vmatmul.msk.bf16.gmra.mxu3 %vm299_vm2, %v2495_v22 }
 0x1d6   : > { %3459 = vmatmul.msk.bf16.gmra.mxu0 %vm299_vm2, %v2813_v17  ;;  %v1085_v18 = vpop.f32.mrf.mxu2  ;;  %v2468_v17 = vld [vmem:[%s3550_s25 + $0xa5] sm:$0xff] }
 0x1d7   : > { %v1130_v32 = vadd.f32 %v1085_v18, %v810_v24 }
 0x1d8   : > { %v767_v3 = vpop.f32.mrf.mxu1  ;;  %v1415_v42 = vpop.f32.mrf.mxu3 }
 0x1d9   : > { %v1450_v28 = vadd.f32 %v1405_v48, %v1130_v32  ;;  %v811_v33 = vadd.f32 %v767_v3, %v3701_v10 }
 0x1db   : > { %v1727_v37 = vpop.f32.mrf.mxu0  ;;  %v4088_v58 = vadd.f32 %v1725_v38, %v1450_v28  ;;  %v2496_v38 = vpack.c.bf16 %v2469_v51, %v2468_v17  ;;  %v2146_v28 = vld [vmem:[%s3550_s25 + $0x94] sm:$0xff]  ;;  %v2471_v17 = vld [vmem:[%s3550_s25 + $0xbd] sm:$0xff] }
 0x1de   : > { %v1087_v55 = vpop.f32.mrf.mxu2 }
 0x1df   : > { %v1131_v61 = vadd.f32 %v1087_v55, %v811_v33 }
 0x1e0   : > { %v770_v53 = vpop.f32.mrf.mxu1  ;;  %v1417_v48 = vpop.f32.mrf.mxu3 }
 0x1e1   : > { %v1451_v16 = vadd.f32 %v1407_v62, %v1131_v61  ;;  %v812_v22 = vadd.f32 %v770_v53, %v3716_v14  ;;  %v2175_v61 = vpack.c.bf16 %v2147_v50, %v2146_v28  ;;  %v2815_v53 = vpack.c.bf16 %v2787_v57, %v2786_v25  ;;  %v2149_v50 = vld [vmem:[%s3550_s25 + $0xac] sm:$0xff] }
 0x1e2   : > { %v2788_v25 = vld [vmem:[%s3550_s25 + $0xa6] sm:$0xff] }
 0x1e3   : > { %v1730_v20 = vpop.f32.mrf.mxu0  ;;  %3403 = vmatmul.msk.bf16.gmra.mxu1 %vm299_vm2, %v2173_v45  ;;  %3422 = vmatmul.msk.bf16.gmra.mxu2 %vm299_vm2, %v2174_v7  ;;  %v4099_v10 = vadd.f32 %v1727_v37, %v1451_v16 }
 0x1e5   : > { %3443 = vmatmul.msk.bf16.gmra.mxu3 %vm299_vm2, %v2496_v38 }
 0x1e6   : > { %3460 = vmatmul.msk.bf16.gmra.mxu0 %vm299_vm2, %v2814_v63  ;;  %v1090_v24 = vpop.f32.mrf.mxu2  ;;  %v2470_v63 = vld [vmem:[%s3550_s25 + $0xb5] sm:$0xff] }
 0x1e7   : > { %v1132_v18 = vadd.f32 %v1090_v24, %v812_v22 }
 0x1e8   : > { %v772_v62 = vpop.f32.mrf.mxu1  ;;  %v2610_v3 = vpop.f32.mrf.mxu3 }
 0x1e9   : > { %v1452_v45 = vadd.f32 %v1410_v1, %v1132_v18  ;;  %v813_v37 = vadd.f32 %v772_v62, %v3730_v26 }
 0x1eb   : > { %v1732_v32 = vpop.f32.mrf.mxu0  ;;  %v4104_v5 = vadd.f32 %v1730_v20, %v1452_v45  ;;  %v2497_v20 = vpack.c.bf16 %v2471_v17, %v2470_v63  ;;  %v2148_v45 = vld [vmem:[%s3550_s25 + $0xa4] sm:$0xff]  ;;  %v2473_v63 = vld [vmem:[%s3550_s25 + $0xcd] sm:$0xff] }
 0x1ee   : > { %v1092_v33 = vpop.f32.mrf.mxu2 }
 0x1ef   : > { %v1133_v14 = vadd.f32 %v1092_v33, %v813_v37 }
 0x1f0   : > { %v775_v55 = vpop.f32.mrf.mxu1  ;;  %v4112_v1 = vpop.f32.mrf.mxu3 }
 0x1f1   : > { %v1453_v16 = vadd.f32 %v1412_v27, %v1133_v14  ;;  %v814_v38 = vadd.f32 %v775_v55, %v3745_v31  ;;  %v2176_v14 = vpack.c.bf16 %v2149_v50, %v2148_v45  ;;  %v2150_v45 = vld [vmem:[%s3550_s25 + $0xb4] sm:$0xff] }
 0x1f2   : > { %v2790_v50 = vld [vmem:[%s3550_s25 + $0xb6] sm:$0xff] }
 0x1f3   : > { %v1735_v51 = vpop.f32.mrf.mxu0  ;;  %3404 = vmatmul.msk.bf16.gmra.mxu1 %vm299_vm2, %v2174_v7  ;;  %3423 = vmatmul.msk.bf16.gmra.mxu2 %vm299_vm2, %v2175_v61  ;;  %v4117_v26 = vadd.f32 %v1732_v32, %v1453_v16  ;;  %v2789_v32 = vld [vmem:[%s3550_s25 + $0xae] sm:$0xff] }
 0x1f4   : > { %v2816_v55 = vpack.c.bf16 %v2789_v32, %v2788_v25  ;;  %v2791_v25 = vld [vmem:[%s3550_s25 + $0xbe] sm:$0xff] }
 0x1f5   : > { %3444 = vmatmul.msk.bf16.gmra.mxu3 %vm299_vm2, %v2497_v20 }
 0x1f6   : > { %3461 = vmatmul.msk.bf16.gmra.mxu0 %vm299_vm2, %v2815_v53  ;;  %v1095_v22 = vpop.f32.mrf.mxu2  ;;  %v2472_v53 = vld [vmem:[%s3550_s25 + $0xc5] sm:$0xff] }
 0x1f7   : > { %v1134_v27 = vadd.f32 %v1095_v22, %v814_v38 }
 0x1f8   : > { %v777_v24 = vpop.f32.mrf.mxu1  ;;  %v4121_v62 = vpop.f32.mrf.mxu3 }
 0x1f9   : > { %v1454_v7 = vadd.f32 %v1415_v42, %v1134_v27  ;;  %v815_v57 = vadd.f32 %v777_v24, %v3759_v43  ;;  %v4144_v24 = vld [vmem:[%s4393_s2] ss:$0 sm:$0xff] }
 0x1fb   : > { %v1737_v18 = vpop.f32.mrf.mxu0  ;;  %v4124_v28 = vadd.f32 %v1735_v51, %v1454_v7  ;;  %v2498_v51 = vpack.c.bf16 %v2473_v63, %v2472_v53  ;;  %v2817_v53 = vpack.c.bf16 %v2791_v25, %v2790_v50  ;;  %v2474_v63 = vld [vmem:[%s3550_s25 + $0xd5] sm:$0xff]  ;;  %v2152_v25 = vld [vmem:[%s3550_s25 + $0xc4] sm:$0xff] }
 0x1fe   : > { %v1097_v31 = vpop.f32.mrf.mxu2 }
 0x1ff   : > { %v1135_v37 = vadd.f32 %v1097_v31, %v815_v57 }
 0x200   : > { %v1970_v33 = vpop.f32.mrf.mxu1  ;;  %v4132_v42 = vpop.f32.mrf.mxu3 }
 0x201   : > { %v1455_v16 = vadd.f32 %v1417_v48, %v1135_v37  ;;  %v2060_v20 = vadd.f32 %v1970_v33, %v3820_v0  ;;  %v2151_v0 = vld [vmem:[%s3550_s25 + $0xbc] sm:$0xff] }
 0x203   : > { %v2930_v17 = vpop.f32.mrf.mxu0  ;;  %3405 = vmatmul.msk.bf16.gmra.mxu1 %vm299_vm2, %v2175_v61  ;;  %3424 = vmatmul.msk.bf16.gmra.mxu2 %vm299_vm2, %v2176_v14  ;;  %v4137_v43 = vadd.f32 %v1737_v18, %v1455_v16 }
 0x205   : > { %3445 = vmatmul.msk.bf16.gmra.mxu3 %vm299_vm2, %v2498_v51 }
 0x206   : > { %3462 = vmatmul.msk.bf16.gmra.mxu0 %vm299_vm2, %v2816_v55  ;;  %v2290_v38 = vpop.f32.mrf.mxu2  ;;  %v2177_v55 = vpack.c.bf16 %v2151_v0, %v2150_v45 }
 0x207   : > { %v2380_v48 = vadd.f32 %v2290_v38, %v2060_v20 }
 0x208   : > { %v1972_v22 = vpop.f32.mrf.mxu1  ;;  %v4146_v7 = vpop.f32.mrf.mxu3 }
 0x209   : > { %v2700_v61 = vadd.f32 %v2610_v3, %v2380_v48  ;;  %v2061_v57 = vadd.f32 %v1972_v22, %v3833_v60 }
 0x20b   : > { %v2932_v27 = vpop.f32.mrf.mxu0  ;;  %v3020_v18 = vadd.f32 %v2930_v17, %v2700_v61  ;;  %v2475_v17 = vld [vmem:[%s3550_s25 + $0xdd] sm:$0xff] }
 0x20c   : > { %v2499_v20 = vpack.c.bf16 %v2475_v17, %v2474_v63 }
 0x20d   : > { %v3132_v32 = vadd.f32 %v4144_v24, %v3020_v18 }
 0x20e   : > { %v2292_v3 = vpop.f32.mrf.mxu2 }
 0x20f   : > { %v3168_v31 = vmax.f32 %v3132_v32, 0.0  ;;  %v2381_v37 = vadd.f32 %v2292_v3, %v2061_v57  ;;  %v2153_v32 = vld [vmem:[%s3550_s25 + $0xcc] sm:$0xff] }
 0x210   : > { %v1975_v33 = vpop.f32.mrf.mxu1  ;;  %v4164_v60 = vpop.f32.mrf.mxu3  ;;  %v2792_v57 = vld [vmem:[%s3550_s25 + $0xc6] sm:$0xff]  ;;  %v2178_v17 = vpack.c.bf16 %v2153_v32, %v2152_v25  ;;  %v2154_v32 = vld [vmem:[%s3550_s25 + $0xd4] sm:$0xff] }
 0x211   : > { %3204 = vst [vmem:[%s4158_s16] sm:$0xff] %v3168_v31  ;;  %v2701_v51 = vadd.f32 %v4112_v1, %v2381_v37  ;;  %v2062_v22 = vadd.f32 %v1975_v33, %v3840_v44  ;;  %v2793_v44 = vld [vmem:[%s3550_s25 + $0xce] sm:$0xff] }
 0x213   : > { %v2935_v16 = vpop.f32.mrf.mxu0  ;;  %3406 = vmatmul.msk.bf16.gmra.mxu1 %vm299_vm2, %v2176_v14  ;;  %v3021_v38 = vadd.f32 %v2932_v27, %v2701_v51  ;;  %3425 = vmatmul.msk.bf16.gmra.mxu2 %vm299_vm2, %v2177_v55  ;;  %v2818_v51 = vpack.c.bf16 %v2793_v44, %v2792_v57  ;;  %v2155_v57 = vld [vmem:[%s3550_s25 + $0xdc] sm:$0xff] }
 0x214   : > { %v2794_v44 = vld [vmem:[%s3550_s25 + $0xd6] sm:$0xff] }
 0x215   : > { %v3133_v48 = vadd.f32 %v4144_v24, %v3021_v38  ;;  %3446 = vmatmul.msk.bf16.gmra.mxu3 %vm299_vm2, %v2499_v20  ;;  %v2477_v20 = vld [vmem:[%s3550_s25 + $0xed] sm:$0xff] }
 0x216   : > { %3463 = vmatmul.msk.bf16.gmra.mxu0 %vm299_vm2, %v2817_v53  ;;  %v2295_v61 = vpop.f32.mrf.mxu2 }
 0x217   : > { %v3169_v1 = vmax.f32 %v3133_v48, 0.0  ;;  %v2382_v18 = vadd.f32 %v2295_v61, %v2062_v22 }
 0x218   : > { %v1977_v14 = vpop.f32.mrf.mxu1  ;;  %v4174_v0 = vpop.f32.mrf.mxu3 }
 0x219   : > { %3205 = vst [vmem:[%s4158_s16 + $0x8] sm:$0xff] %v3169_v1  ;;  %v2702_v27 = vadd.f32 %v4121_v62, %v2382_v18  ;;  %v2063_v31 = vadd.f32 %v1977_v14, %v3853_v13  ;;  %v2476_v62 = vld [vmem:[%s3550_s25 + $0xe5] sm:$0xff] }
 0x21a   : > { %v2500_v22 = vpack.c.bf16 %v2477_v20, %v2476_v62  ;;  %v2479_v20 = vld [vmem:[%s3550_s25 + $0xfd] sm:$0xff] }
 0x21b   : > { %v2937_v45 = vpop.f32.mrf.mxu0  ;;  %v3022_v50 = vadd.f32 %v2935_v16, %v2702_v27 }
 0x21d   : > { %v3134_v3 = vadd.f32 %v4144_v24, %v3022_v50 }
 0x21e   : > { %v2297_v37 = vpop.f32.mrf.mxu2 }
 0x21f   : > { %v3170_v33 = vmax.f32 %v3134_v3, 0.0  ;;  %v2383_v53 = vadd.f32 %v2297_v37, %v2063_v31 }
 0x220   : > { %v1980_v63 = vpop.f32.mrf.mxu1  ;;  %v4186_v48 = vpop.f32.mrf.mxu3 }
 0x221   : > { %3206 = vst [vmem:[%s4158_s16 + $0x10] sm:$0xff] %v3170_v33  ;;  %v2703_v16 = vadd.f32 %v4132_v42, %v2383_v53  ;;  %v2064_v1 = vadd.f32 %v1980_v63, %v3860_v6  ;;  %v2795_v6 = vld [vmem:[%s3550_s25 + $0xde] sm:$0xff] }
 0x222   : > { %v2819_v62 = vpack.c.bf16 %v2795_v6, %v2794_v44 }
 0x223   : > { %v2940_v38 = vpop.f32.mrf.mxu0  ;;  %3407 = vmatmul.msk.bf16.gmra.mxu1 %vm299_vm2, %v2177_v55  ;;  %v3023_v13 = vadd.f32 %v2937_v45, %v2703_v16  ;;  %3426 = vmatmul.msk.bf16.gmra.mxu2 %vm299_vm2, %v2178_v17 }
 0x225   : > { %v3135_v61 = vadd.f32 %v4144_v24, %v3023_v13  ;;  %3447 = vmatmul.msk.bf16.gmra.mxu3 %vm299_vm2, %v2500_v22 }
 0x226   : > { %3464 = vmatmul.msk.bf16.gmra.mxu0 %vm299_vm2, %v2818_v51  ;;  %v2300_v18 = vpop.f32.mrf.mxu2  ;;  %v2179_v51 = vpack.c.bf16 %v2155_v57, %v2154_v32  ;;  %v2157_v32 = vld [vmem:[%s3550_s25 + $0xec] sm:$0xff] }
 0x227   : > { %v3171_v42 = vmax.f32 %v3135_v61, 0.0  ;;  %v2384_v14 = vadd.f32 %v2300_v18, %v2064_v1  ;;  %v2796_v57 = vld [vmem:[%s3550_s25 + $0xe6] sm:$0xff] }
 0x228   : > { %v1982_v55 = vpop.f32.mrf.mxu1  ;;  %v4196_v50 = vpop.f32.mrf.mxu3 }
 0x229   : > { %3207 = vst [vmem:[%s4158_s16 + $0x18] sm:$0xff] %v3171_v42  ;;  %v2704_v45 = vadd.f32 %v4146_v7, %v2384_v14  ;;  %v2065_v31 = vadd.f32 %v1982_v55, %v3873_v30  ;;  %v2478_v7 = vld [vmem:[%s3550_s25 + $0xf5] sm:$0xff] }
 0x22a   : > { %v2501_v13 = vpack.c.bf16 %v2479_v20, %v2478_v7 }
 0x22b   : > { %v2942_v27 = vpop.f32.mrf.mxu0  ;;  %v3024_v25 = vadd.f32 %v2940_v38, %v2704_v45 }
 0x22d   : > { %v3136_v3 = vadd.f32 %v4144_v24, %v3024_v25  ;;  %v2156_v25 = vld [vmem:[%s3550_s25 + $0xe4] sm:$0xff] }
 0x22e   : > { %v2302_v37 = vpop.f32.mrf.mxu2 }
 0x22f   : > { %v3172_v33 = vmax.f32 %v3136_v3, 0.0  ;;  %v2385_v53 = vadd.f32 %v2302_v37, %v2065_v31 }
 0x230   : > { %v1985_v63 = vpop.f32.mrf.mxu1  ;;  %v4208_v22 = vpop.f32.mrf.mxu3 }
 0x231   : > { %3208 = vst [vmem:[%s4158_s16 + $0x20] sm:$0xff] %v3172_v33  ;;  %v2705_v38 = vadd.f32 %v4164_v60, %v2385_v53  ;;  %v2066_v1 = vadd.f32 %v1985_v63, %v3880_v39  ;;  %v2797_v39 = vld [vmem:[%s3550_s25 + $0xee] sm:$0xff]  ;;  %v2180_v53 = vpack.c.bf16 %v2157_v32, %v2156_v25 }
 0x232   : > { %v2820_v63 = vpack.c.bf16 %v2797_v39, %v2796_v57 }
 0x233   : > { %v2945_v16 = vpop.f32.mrf.mxu0  ;;  %3408 = vmatmul.msk.bf16.gmra.mxu1 %vm299_vm2, %v2178_v17  ;;  %v3025_v30 = vadd.f32 %v2942_v27, %v2705_v38  ;;  %3427 = vmatmul.msk.bf16.gmra.mxu2 %vm299_vm2, %v2179_v51 }
 0x235   : > { %v3137_v61 = vadd.f32 %v4144_v24, %v3025_v30  ;;  %3448 = vmatmul.msk.bf16.gmra.mxu3 %vm299_vm2, %v2501_v13 }
 0x236   : > { %3465 = vmatmul.msk.bf16.gmra.mxu0 %vm299_vm2, %v2819_v62  ;;  %v2305_v18 = vpop.f32.mrf.mxu2  ;;  %v2481_v62 = vld [vmem:[%s3550_s25 + $0x10d] sm:$0xff] }
 0x237   : > { %v3173_v60 = vmax.f32 %v3137_v61, 0.0  ;;  %v2386_v42 = vadd.f32 %v2305_v18, %v2066_v1 }
 0x238   : > { %v1987_v17 = vpop.f32.mrf.mxu1  ;;  %v4218_v27 = vpop.f32.mrf.mxu3 }
 0x239   : > { %3209 = vst [vmem:[%s4158_s16 + $0x28] sm:$0xff] %v3173_v60  ;;  %v2706_v55 = vadd.f32 %v4174_v0, %v2386_v42  ;;  %v2067_v6 = vadd.f32 %v1987_v17, %v3893_v47  ;;  %v2480_v0 = vld [vmem:[%s3550_s25 + $0x105] sm:$0xff] }
 0x23a   : > { %v2502_v38 = vpack.c.bf16 %v2481_v62, %v2480_v0 }
 0x23b   : > { %v2947_v14 = vpop.f32.mrf.mxu0  ;;  %v3026_v45 = vadd.f32 %v2945_v16, %v2706_v55  ;;  %v2159_v55 = vld [vmem:[%s3550_s25 + $0xfc] sm:$0xff] }
 0x23d   : > { %v3138_v44 = vadd.f32 %v4144_v24, %v3026_v45  ;;  %v2798_v45 = vld [vmem:[%s3550_s25 + $0xf6] sm:$0xff] }
 0x23e   : > { %v2307_v3 = vpop.f32.mrf.mxu2 }
 0x23f   : > { %v3174_v31 = vmax.f32 %v3138_v44, 0.0  ;;  %v2387_v37 = vadd.f32 %v2307_v3, %v2067_v6 }
 0x240   : > { %v1990_v33 = vpop.f32.mrf.mxu1  ;;  %v4230_v16 = vpop.f32.mrf.mxu3 }
 0x241   : > { %3210 = vst [vmem:[%s4158_s16 + $0x30] sm:$0xff] %v3174_v31  ;;  %v2707_v20 = vadd.f32 %v4186_v48, %v2387_v37  ;;  %v2068_v30 = vadd.f32 %v1990_v33, %v3900_v35  ;;  %v2799_v35 = vld [vmem:[%s3550_s25 + $0xfe] sm:$0xff] }
 0x242   : > { %v2821_v31 = vpack.c.bf16 %v2799_v35, %v2798_v45  ;;  %v2483_v37 = vld [vmem:[%s3550_s25 + $0x11d] sm:$0xff] }
 0x243   : > { %v2950_v7 = vpop.f32.mrf.mxu0  ;;  %3409 = vmatmul.msk.bf16.gmra.mxu1 %vm299_vm2, %v2179_v51  ;;  %v3027_v47 = vadd.f32 %v2947_v14, %v2707_v20  ;;  %3428 = vmatmul.msk.bf16.gmra.mxu2 %vm299_vm2, %v2180_v53  ;;  %v2158_v14 = vld [vmem:[%s3550_s25 + $0xf4] sm:$0xff] }
 0x244   : > { %v2181_v3 = vpack.c.bf16 %v2159_v55, %v2158_v14 }
 0x245   : > { %v3139_v13 = vadd.f32 %v4144_v24, %v3027_v47  ;;  %3449 = vmatmul.msk.bf16.gmra.mxu3 %vm299_vm2, %v2502_v38 }
 0x246   : > { %3466 = vmatmul.msk.bf16.gmra.mxu0 %vm299_vm2, %v2820_v63  ;;  %v2310_v61 = vpop.f32.mrf.mxu2 }
 0x247   : > { %v3175_v48 = vmax.f32 %v3139_v13, 0.0  ;;  %v2388_v1 = vadd.f32 %v2310_v61, %v2068_v30 }
 0x248   : > { %v1992_v51 = vpop.f32.mrf.mxu1  ;;  %v4240_v42 = vpop.f32.mrf.mxu3 }
 0x249   : > { %3211 = vst [vmem:[%s4158_s16 + $0x38] sm:$0xff] %v3175_v48  ;;  %v2708_v60 = vadd.f32 %v4196_v50, %v2388_v1  ;;  %v2069_v32 = vadd.f32 %v1992_v51, %v3913_v15  ;;  %v2482_v50 = vld [vmem:[%s3550_s25 + $0x115] sm:$0xff]  ;;  %v2160_v1 = vld [vmem:[%s3550_s25 + $0x104] sm:$0xff]  ;;  %v2161_v51 = vld [vmem:[%s3550_s25 + $0x10c] sm:$0xff] }
 0x24a   : > { %v2503_v62 = vpack.c.bf16 %v2483_v37, %v2482_v50 }
 0x24b   : > { %v2952_v18 = vpop.f32.mrf.mxu0  ;;  %v3028_v17 = vadd.f32 %v2950_v7, %v2708_v60 }
 0x24d   : > { %v3140_v25 = vadd.f32 %v4144_v24, %v3028_v17 }
 0x24e   : > { %v2312_v57 = vpop.f32.mrf.mxu2 }
 0x24f   : > { %v3176_v39 = vmax.f32 %v3140_v25, 0.0  ;;  %v2389_v44 = vadd.f32 %v2312_v57, %v2069_v32  ;;  %v2182_v25 = vpack.c.bf16 %v2161_v51, %v2160_v1  ;;  %v2485_v57 = vld [vmem:[%s3550_s25 + $0x12d] sm:$0xff] }
 0x250   : > { %v1995_v6 = vpop.f32.mrf.mxu1  ;;  %v4252_v0 = vpop.f32.mrf.mxu3 }
 0x251   : > { %3212 = vst [vmem:[%s4158_s16 + $0x40] sm:$0xff] %v3176_v39  ;;  %v2709_v63 = vadd.f32 %v4208_v22, %v2389_v44  ;;  %v2070_v20 = vadd.f32 %v1995_v6, %v3920_v34  ;;  %v2801_v34 = vld [vmem:[%s3550_s25 + $0x10e] sm:$0xff] }
 0x253   : > { %v2955_v33 = vpop.f32.mrf.mxu0  ;;  %3410 = vmatmul.msk.bf16.gmra.mxu1 %vm299_vm2, %v2180_v53  ;;  %v3029_v15 = vadd.f32 %v2952_v18, %v2709_v63  ;;  %3429 = vmatmul.msk.bf16.gmra.mxu2 %vm299_vm2, %v2181_v3  ;;  %v2800_v18 = vld [vmem:[%s3550_s25 + $0x106] sm:$0xff] }
 0x254   : > { %v2822_v32 = vpack.c.bf16 %v2801_v34, %v2800_v18 }
 0x255   : > { %v3141_v7 = vadd.f32 %v4144_v24, %v3029_v15  ;;  %3450 = vmatmul.msk.bf16.gmra.mxu3 %vm299_vm2, %v2503_v62 }
 0x256   : > { %3467 = vmatmul.msk.bf16.gmra.mxu0 %vm299_vm2, %v2821_v31  ;;  %v2315_v38 = vpop.f32.mrf.mxu2 }
 0x257   : > { %v3177_v22 = vmax.f32 %v3141_v7, 0.0  ;;  %v2390_v47 = vadd.f32 %v2315_v38, %v2070_v20  ;;  %v2162_v38 = vld [vmem:[%s3550_s25 + $0x114] sm:$0xff] }
 0x258   : > { %v1997_v53 = vpop.f32.mrf.mxu1  ;;  %v4262_v61 = vpop.f32.mrf.mxu3 }
 0x259   : > { %3213 = vst [vmem:[%s4158_s16 + $0x48] sm:$0xff] %v3177_v22  ;;  %v2710_v30 = vadd.f32 %v4218_v27, %v2390_v47  ;;  %v2071_v17 = vadd.f32 %v1997_v53, %v3933_v59  ;;  %v2484_v27 = vld [vmem:[%s3550_s25 + $0x125] sm:$0xff]  ;;  %v2163_v22 = vld [vmem:[%s3550_s25 + $0x11c] sm:$0xff] }
 0x25a   : > { %v2504_v31 = vpack.c.bf16 %v2485_v57, %v2484_v27  ;;  %v2802_v47 = vld [vmem:[%s3550_s25 + $0x116] sm:$0xff]  ;;  %v2183_v18 = vpack.c.bf16 %v2163_v22, %v2162_v38 }
 0x25b   : > { %v2957_v13 = vpop.f32.mrf.mxu0  ;;  %v3030_v48 = vadd.f32 %v2955_v33, %v2710_v30 }
 0x25d   : > { %v3142_v60 = vadd.f32 %v4144_v24, %v3030_v48 }
 0x25e   : > { %v2317_v14 = vpop.f32.mrf.mxu2 }
 0x25f   : > { %v3178_v55 = vmax.f32 %v3142_v60, 0.0  ;;  %v2391_v45 = vadd.f32 %v2317_v14, %v2071_v17  ;;  %v2487_v60 = vld [vmem:[%s3550_s25 + $0x13d] sm:$0xff] }
 0x260   : > { %v2000_v35 = vpop.f32.mrf.mxu1  ;;  %v4274_v6 = vpop.f32.mrf.mxu3 }
 0x261   : > { %3214 = vst [vmem:[%s4158_s16 + $0x50] sm:$0xff] %v3178_v55  ;;  %v2711_v44 = vadd.f32 %v4230_v16, %v2391_v45  ;;  %v2072_v37 = vadd.f32 %v2000_v35, %v3940_v40  ;;  %v2803_v40 = vld [vmem:[%s3550_s25 + $0x11e] sm:$0xff] }
 0x262   : > { %v2823_v34 = vpack.c.bf16 %v2803_v40, %v2802_v47 }
 0x263   : > { %v2960_v39 = vpop.f32.mrf.mxu0  ;;  %3411 = vmatmul.msk.bf16.gmra.mxu1 %vm299_vm2, %v2181_v3  ;;  %v3031_v59 = vadd.f32 %v2957_v13, %v2711_v44  ;;  %3430 = vmatmul.msk.bf16.gmra.mxu2 %vm299_vm2, %v2182_v25 }
 0x265   : > { %v3143_v50 = vadd.f32 %v4144_v24, %v3031_v59  ;;  %3451 = vmatmul.msk.bf16.gmra.mxu3 %vm299_vm2, %v2504_v31 }
 0x266   : > { %3468 = vmatmul.msk.bf16.gmra.mxu0 %vm299_vm2, %v2822_v32  ;;  %v2320_v33 = vpop.f32.mrf.mxu2 }
 0x267   : > { %v3179_v16 = vmax.f32 %v3143_v50, 0.0  ;;  %v2392_v63 = vadd.f32 %v2320_v33, %v2072_v37  ;;  %v2164_v50 = vld [vmem:[%s3550_s25 + $0x124] sm:$0xff]  ;;  %v2165_v37 = vld [vmem:[%s3550_s25 + $0x12c] sm:$0xff] }
 0x268   : > { %v2002_v3 = vpop.f32.mrf.mxu1  ;;  %v4284_v7 = vpop.f32.mrf.mxu3  ;;  %v2804_v33 = vld [vmem:[%s3550_s25 + $0x126] sm:$0xff]  ;;  %v2184_v38 = vpack.c.bf16 %v2165_v37, %v2164_v50 }
 0x269   : > { %3215 = vst [vmem:[%s4158_s16 + $0x58] sm:$0xff] %v3179_v16  ;;  %v2712_v15 = vadd.f32 %v4240_v42, %v2392_v63  ;;  %v2073_v13 = vadd.f32 %v2002_v3, %v3951_v12  ;;  %v2486_v42 = vld [vmem:[%s3550_s25 + $0x135] sm:$0xff] }
 0x26a   : > { %v2505_v45 = vpack.c.bf16 %v2487_v60, %v2486_v42  ;;  %v2805_v16 = vld [vmem:[%s3550_s25 + $0x12e] sm:$0xff] }
 0x26b   : > { %v2962_v62 = vpop.f32.mrf.mxu0  ;;  %v3032_v20 = vadd.f32 %v2960_v39, %v2712_v15  ;;  %v2824_v22 = vpack.c.bf16 %v2805_v16, %v2804_v33  ;;  %v2166_v60 = vld [vmem:[%s3550_s25 + $0x134] sm:$0xff] }
 0x26d   : > { %v3144_v53 = vadd.f32 %v4144_v24, %v3032_v20 }
 0x26e   : > { %v2322_v30 = vpop.f32.mrf.mxu2 }
 0x26f   : > { %v3180_v48 = vmax.f32 %v3144_v53, 0.0  ;;  %v2393_v1 = vadd.f32 %v2322_v30, %v2073_v13 }
 0x270   : > { %v2005_v51 = vpop.f32.mrf.mxu1  ;;  %v4296_v55 = vpop.f32.mrf.mxu3 }
 0x271   : > { %3216 = vst [vmem:[%s4158_s16 + $0x60] sm:$0xff] %v3180_v48  ;;  %v2713_v14 = vadd.f32 %v4252_v0, %v2393_v1  ;;  %v2074_v32 = vadd.f32 %v2005_v51, %v3957_v52 }
 0x273   : > { %v2965_v17 = vpop.f32.mrf.mxu0  ;;  %3412 = vmatmul.msk.bf16.gmra.mxu1 %vm299_vm2, %v2182_v25  ;;  %v3033_v12 = vadd.f32 %v2962_v62, %v2713_v14  ;;  %3431 = vmatmul.msk.bf16.gmra.mxu2 %vm299_vm2, %v2183_v18  ;;  %v2806_v14 = vld [vmem:[%s3550_s25 + $0x136] sm:$0xff] }
 0x275   : > { %v3145_v35 = vadd.f32 %v4144_v24, %v3033_v12  ;;  %3452 = vmatmul.msk.bf16.gmra.mxu3 %vm299_vm2, %v2505_v45  ;;  %v2807_v45 = vld [vmem:[%s3550_s25 + $0x13e] sm:$0xff] }
 0x276   : > { %3469 = vmatmul.msk.bf16.gmra.mxu0 %vm299_vm2, %v2823_v34  ;;  %v2325_v27 = vpop.f32.mrf.mxu2 }
 0x277   : > { %v3181_v0 = vmax.f32 %v3145_v35, 0.0  ;;  %v2394_v57 = vadd.f32 %v2325_v27, %v2074_v32 }
 0x278   : > { %v2007_v25 = vpop.f32.mrf.mxu1  ;;  %v2655_v31 = vpop.f32.mrf.mxu3 }
 0x279   : > { %3217 = vst [vmem:[%s4158_s16 + $0x68] sm:$0xff] %v3181_v0  ;;  %v2714_v44 = vadd.f32 %v4262_v61, %v2394_v57  ;;  %v2075_v52 = vadd.f32 %v2007_v25, %v3968_v29  ;;  %v2825_v25 = vpack.c.bf16 %v2807_v45, %v2806_v14 }
 0x27b   : > { %v2967_v39 = vpop.f32.mrf.mxu0  ;;  %v3034_v59 = vadd.f32 %v2965_v17, %v2714_v44  ;;  %v2167_v17 = vld [vmem:[%s3550_s25 + $0x13c] sm:$0xff] }
 0x27c   : > { %v2185_v57 = vpack.c.bf16 %v2167_v17, %v2166_v60 }
 0x27d   : > { %v3146_v63 = vadd.f32 %v4144_v24, %v3034_v59 }
 0x27e   : > { %v2327_v3 = vpop.f32.mrf.mxu2 }
 0x27f   : > { %v3182_v62 = vmax.f32 %v3146_v63, 0.0  ;;  %v2395_v15 = vadd.f32 %v2327_v3, %v2075_v52 }
 0x280   : > { %v2010_v20 = vpop.f32.mrf.mxu1  ;;  %v2657_v40 = vpop.f32.mrf.mxu3 }
 0x281   : > { %3218 = vst [vmem:[%s4158_s16 + $0x70] sm:$0xff] %v3182_v62  ;;  %v2715_v61 = vadd.f32 %v4274_v6, %v2395_v15  ;;  %v2076_v13 = vadd.f32 %v2010_v20, %v3974_v4 }
 0x283   : > { %v2970_v47 = vpop.f32.mrf.mxu0  ;;  %3413 = vmatmul.msk.bf16.gmra.mxu1 %vm299_vm2, %v2183_v18  ;;  %v3035_v53 = vadd.f32 %v2967_v39, %v2715_v61  ;;  %3432 = vmatmul.msk.bf16.gmra.mxu2 %vm299_vm2, %v2184_v38 }
 0x285   : > { %v3147_v29 = vadd.f32 %v4144_v24, %v3035_v53 }
 0x286   : > { %3470 = vmatmul.msk.bf16.gmra.mxu0 %vm299_vm2, %v2824_v22  ;;  %v2330_v30 = vpop.f32.mrf.mxu2 }
 0x287   : > { %v3183_v48 = vmax.f32 %v3147_v29, 0.0  ;;  %v2396_v1 = vadd.f32 %v2330_v30, %v2076_v13 }
 0x288   : > { %v2012_v6 = vpop.f32.mrf.mxu1  ;;  %v2660_v34 = vpop.f32.mrf.mxu3 }
 0x289   : > { %3219 = vst [vmem:[%s4158_s16 + $0x78] sm:$0xff] %v3183_v48  ;;  %v2716_v18 = vadd.f32 %v4284_v7, %v2396_v1  ;;  %v2077_v35 = vadd.f32 %v2012_v6, %v3985_v46 }
 0x28b   : > { %v2972_v51 = vpop.f32.mrf.mxu0  ;;  %v3036_v42 = vadd.f32 %v2970_v47, %v2716_v18 }
 0x28d   : > { %v3148_v12 = vadd.f32 %v4144_v24, %v3036_v42 }
 0x28e   : > { %v2332_v4 = vpop.f32.mrf.mxu2 }
 0x28f   : > { %v3184_v32 = vmax.f32 %v3148_v12, 0.0  ;;  %v2397_v27 = vadd.f32 %v2332_v4, %v2077_v35 }
 0x290   : > { %v2015_v0 = vpop.f32.mrf.mxu1  ;;  %v2662_v59 = vpop.f32.mrf.mxu3 }
 0x291   : > { %3220 = vst [vmem:[%s4158_s16 + $0x80] sm:$0xff] %v3184_v32  ;;  %v2717_v7 = vadd.f32 %v4296_v55, %v2397_v27  ;;  %v2078_v50 = vadd.f32 %v2015_v0, %v3992_v49 }
 0x293   : > { %v2975_v39 = vpop.f32.mrf.mxu0  ;;  %3414 = vmatmul.msk.bf16.gmra.mxu1 %vm299_vm2, %v2184_v38  ;;  %v3037_v44 = vadd.f32 %v2972_v51, %v2717_v7  ;;  %3433 = vmatmul.msk.bf16.gmra.mxu2 %vm299_vm2, %v2185_v57 }
 0x295   : > { %v3149_v46 = vadd.f32 %v4144_v24, %v3037_v44 }
 0x296   : > { %3471 = vmatmul.msk.bf16.gmra.mxu0 %vm299_vm2, %v2825_v25  ;;  %v2335_v37 = vpop.f32.mrf.mxu2 }
 0x297   : > { %v3185_v33 = vmax.f32 %v3149_v46, 0.0  ;;  %v2398_v16 = vadd.f32 %v2335_v37, %v2078_v50 }
 0x298   : > { %v2017_v63 = vpop.f32.mrf.mxu1  ;;  %v2665_v38 = vpop.f32.mrf.mxu3 }
 0x299   : > { %3221 = vst [vmem:[%s4158_s16 + $0x88] sm:$0xff] %v3185_v33  ;;  %v2718_v55 = vadd.f32 %v2655_v31, %v2398_v16  ;;  %v2079_v15 = vadd.f32 %v2017_v63, %v4003_v8 }
 0x29b   : > { %v2977_v52 = vpop.f32.mrf.mxu0  ;;  %v3038_v3 = vadd.f32 %v2975_v39, %v2718_v55 }
 0x29d   : > { %v3150_v62 = vadd.f32 %v4144_v24, %v3038_v3 }
 0x29e   : > { %v2337_v20 = vpop.f32.mrf.mxu2 }
 0x29f   : > { %v3186_v22 = vmax.f32 %v3150_v62, 0.0  ;;  %v2399_v47 = vadd.f32 %v2337_v20, %v2079_v15 }
 0x2a0   : > { %v2020_v61 = vpop.f32.mrf.mxu1  ;;  %v2667_v51 = vpop.f32.mrf.mxu3 }
 0x2a1   : > { %3222 = vst [vmem:[%s4158_s16 + $0x90] sm:$0xff] %v3186_v22  ;;  %v2719_v53 = vadd.f32 %v2657_v40, %v2399_v47  ;;  %v2080_v30 = vadd.f32 %v2020_v61, %v4008_v9 }
 0x2a3   : > { %v2980_v49 = vpop.f32.mrf.mxu0  ;;  %v3039_v29 = vadd.f32 %v2977_v52, %v2719_v53 }
 0x2a5   : > { %v3151_v13 = vadd.f32 %v4144_v24, %v3039_v29 }
 0x2a6   : > { %v2340_v31 = vpop.f32.mrf.mxu2 }
 0x2a7   : > { %v3187_v48 = vmax.f32 %v3151_v13, 0.0  ;;  %v2400_v1 = vadd.f32 %v2340_v31, %v2080_v30 }
 0x2a8   : > { %v2022_v6 = vpop.f32.mrf.mxu1  ;;  %v2670_v4 = vpop.f32.mrf.mxu3 }
 0x2a9   : > { %3223 = vst [vmem:[%s4158_s16 + $0x98] sm:$0xff] %v3187_v48  ;;  %v2720_v18 = vadd.f32 %v2660_v34, %v2400_v1  ;;  %v2081_v17 = vadd.f32 %v2022_v6, %v4019_v2 }
 0x2ab   : > { %v2982_v8 = vpop.f32.mrf.mxu0  ;;  %v3040_v42 = vadd.f32 %v2980_v49, %v2720_v18 }
 0x2ad   : > { %v3152_v60 = vadd.f32 %v4144_v24, %v3040_v42 }
 0x2ae   : > { %v2342_v40 = vpop.f32.mrf.mxu2 }
 0x2af   : > { %v3188_v14 = vmax.f32 %v3152_v60, 0.0  ;;  %v2401_v45 = vadd.f32 %v2342_v40, %v2081_v17 }
 0x2b0   : > { %v2025_v12 = vpop.f32.mrf.mxu1  ;;  %v2672_v46 = vpop.f32.mrf.mxu3 }
 0x2b1   : > { %3224 = vst [vmem:[%s4158_s16 + $0xa0] sm:$0xff] %v3188_v14  ;;  %v2721_v35 = vadd.f32 %v2662_v59, %v2401_v45  ;;  %v2082_v0 = vadd.f32 %v2025_v12, %v4024_v41 }
 0x2b3   : > { %v2985_v9 = vpop.f32.mrf.mxu0  ;;  %v3041_v32 = vadd.f32 %v2982_v8, %v2721_v35 }
 0x2b5   : > { %v3153_v27 = vadd.f32 %v4144_v24, %v3041_v32 }
 0x2b6   : > { %v2345_v34 = vpop.f32.mrf.mxu2 }
 0x2b7   : > { %v3189_v57 = vmax.f32 %v3153_v27, 0.0  ;;  %v2402_v25 = vadd.f32 %v2345_v34, %v2082_v0 }
 0x2b8   : > { %v2027_v39 = vpop.f32.mrf.mxu1  ;;  %v2675_v20 = vpop.f32.mrf.mxu3 }
 0x2b9   : > { %3225 = vst [vmem:[%s4158_s16 + $0xa8] sm:$0xff] %v3189_v57  ;;  %v2722_v7 = vadd.f32 %v2665_v38, %v2402_v25  ;;  %v2083_v59 = vadd.f32 %v2027_v39, %v4035_v19 }
 0x2bb   : > { %v2987_v2 = vpop.f32.mrf.mxu0  ;;  %v3042_v44 = vadd.f32 %v2985_v9, %v2722_v7 }
 0x2bd   : > { %v3154_v50 = vadd.f32 %v4144_v24, %v3042_v44 }
 0x2be   : > { %v2347_v37 = vpop.f32.mrf.mxu2 }
 0x2bf   : > { %v3190_v33 = vmax.f32 %v3154_v50, 0.0  ;;  %v2403_v16 = vadd.f32 %v2347_v37, %v2083_v59 }
 0x2c0   : > { %v2030_v63 = vpop.f32.mrf.mxu1  ;;  %v2677_v1 = vpop.f32.mrf.mxu3 }
 0x2c1   : > { %3226 = vst [vmem:[%s4158_s16 + $0xb0] sm:$0xff] %v3190_v33  ;;  %v2723_v52 = vadd.f32 %v2667_v51, %v2403_v16  ;;  %v2084_v62 = vadd.f32 %v2030_v63, %v4040_v56 }
 0x2c3   : > { %v2990_v41 = vpop.f32.mrf.mxu0  ;;  %v3043_v55 = vadd.f32 %v2987_v2, %v2723_v52 }
 0x2c5   : > { %v3155_v3 = vadd.f32 %v4144_v24, %v3043_v55 }
 0x2c6   : > { %v2350_v15 = vpop.f32.mrf.mxu2 }
 0x2c7   : > { %v3191_v38 = vmax.f32 %v3155_v3, 0.0  ;;  %v2404_v22 = vadd.f32 %v2350_v15, %v2084_v62 }
 0x2c8   : > { %v2032_v47 = vpop.f32.mrf.mxu1  ;;  %v2680_v45 = vpop.f32.mrf.mxu3 }
 0x2c9   : > { %3227 = vst [vmem:[%s4158_s16 + $0xb8] sm:$0xff] %v3191_v38  ;;  %v2724_v61 = vadd.f32 %v2670_v4, %v2404_v22  ;;  %v2085_v29 = vadd.f32 %v2032_v47, %v4051_v36 }
 0x2cb   : > { %v2992_v19 = vpop.f32.mrf.mxu0  ;;  %v3044_v49 = vadd.f32 %v2990_v41, %v2724_v61 }
 0x2cd   : > { %v3156_v53 = vadd.f32 %v4144_v24, %v3044_v49 }
 0x2ce   : > { %v2352_v13 = vpop.f32.mrf.mxu2 }
 0x2cf   : > { %v3192_v30 = vmax.f32 %v3156_v53, 0.0  ;;  %v2405_v31 = vadd.f32 %v2352_v13, %v2085_v29 }
 0x2d0   : > { %v2035_v48 = vpop.f32.mrf.mxu1  ;;  %v2682_v25 = vpop.f32.mrf.mxu3 }
 0x2d1   : > { %3228 = vst [vmem:[%s4158_s16 + $0xc0] sm:$0xff] %v3192_v30  ;;  %v2725_v6 = vadd.f32 %v2672_v46, %v2405_v31  ;;  %v2086_v18 = vadd.f32 %v2035_v48, %v4056_v11 }
 0x2d3   : > { %v2995_v56 = vpop.f32.mrf.mxu0  ;;  %v3045_v8 = vadd.f32 %v2992_v19, %v2725_v6 }
 0x2d5   : > { %v3157_v51 = vadd.f32 %v4144_v24, %v3045_v8 }
 0x2d6   : > { %v2355_v42 = vpop.f32.mrf.mxu2 }
 0x2d7   : > { %v3193_v60 = vmax.f32 %v3157_v51, 0.0  ;;  %v2406_v17 = vadd.f32 %v2355_v42, %v2086_v18 }
 0x2d8   : > { %v2037_v40 = vpop.f32.mrf.mxu1  ;;  %v2685_v41 = vpop.f32.mrf.mxu3 }
 0x2d9   : > { %3229 = vst [vmem:[%s4158_s16 + $0xc8] sm:$0xff] %v3193_v60  ;;  %v2726_v14 = vadd.f32 %v2675_v20, %v2406_v17  ;;  %v2087_v35 = vadd.f32 %v2037_v40, %v4067_v54 }
 0x2db   : > { %v2997_v36 = vpop.f32.mrf.mxu0  ;;  %v3046_v12 = vadd.f32 %v2995_v56, %v2726_v14 }
 0x2dd   : > { %v3158_v9 = vadd.f32 %v4144_v24, %v3046_v12 }
 0x2de   : > { %v2357_v4 = vpop.f32.mrf.mxu2 }
 0x2df   : > { %v3194_v32 = vmax.f32 %v3158_v9, 0.0  ;;  %v2407_v27 = vadd.f32 %v2357_v4, %v2087_v35 }
 0x2e0   : > { %v2040_v0 = vpop.f32.mrf.mxu1 }
 0x2e1   : > { %3230 = vst [vmem:[%s4158_s16 + $0xd0] sm:$0xff] %v3194_v32  ;;  %v2727_v34 = vadd.f32 %v2677_v1, %v2407_v27  ;;  %v2088_v2 = vadd.f32 %v2040_v0, %v4072_v21 }
 0x2e3   : > { %v3000_v11 = vpop.f32.mrf.mxu0  ;;  %v3047_v57 = vadd.f32 %v2997_v36, %v2727_v34 }
 0x2e5   : > { %v3159_v39 = vadd.f32 %v4144_v24, %v3047_v57 }
 0x2e6   : > { %v2360_v7 = vpop.f32.mrf.mxu2 }
 0x2e7   : > { %v3195_v44 = vmax.f32 %v3159_v39, 0.0  ;;  %v2408_v46 = vadd.f32 %v2360_v7, %v2088_v2 }
 0x2e8   : > { %v2042_v50 = vpop.f32.mrf.mxu1 }
 0x2e9   : > { %3231 = vst [vmem:[%s4158_s16 + $0xd8] sm:$0xff] %v3195_v44  ;;  %v2728_v59 = vadd.f32 %v2680_v45, %v2408_v46  ;;  %v2089_v16 = vadd.f32 %v2042_v50, %v4083_v23  ;;  %v2687_v23 = vpop.f32.mrf.mxu3 }
 0x2eb   : > { %v3002_v54 = vpop.f32.mrf.mxu0  ;;  %v3048_v37 = vadd.f32 %v3000_v11, %v2728_v59 }
 0x2ed   : > { %v3160_v33 = vadd.f32 %v4144_v24, %v3048_v37 }
 0x2ee   : > { %v2362_v63 = vpop.f32.mrf.mxu2 }
 0x2ef   : > { %v3196_v52 = vmax.f32 %v3160_v33, 0.0  ;;  %v2409_v55 = vadd.f32 %v2362_v63, %v2089_v16 }
 0x2f0   : > { %v2045_v3 = vpop.f32.mrf.mxu1 }
 0x2f1   : > { %3232 = vst [vmem:[%s4158_s16 + $0xe0] sm:$0xff] %v3196_v52  ;;  %v2729_v62 = vadd.f32 %v2682_v25, %v2409_v55  ;;  %v2090_v38 = vadd.f32 %v2045_v3, %v4088_v58  ;;  %v2690_v6 = vpop.f32.mrf.mxu3 }
 0x2f3   : > { %v3005_v21 = vpop.f32.mrf.mxu0  ;;  %v3049_v15 = vadd.f32 %v3002_v54, %v2729_v62 }
 0x2f5   : > { %v3161_v20 = vadd.f32 %v4144_v24, %v3049_v15 }
 0x2f6   : > { %v2365_v22 = vpop.f32.mrf.mxu2 }
 0x2f7   : > { %v3197_v47 = vmax.f32 %v3161_v20, 0.0  ;;  %v2410_v19 = vadd.f32 %v2365_v22, %v2090_v38 }
 0x2f8   : > { %v2047_v61 = vpop.f32.mrf.mxu1 }
 0x2f9   : > { %3233 = vst [vmem:[%s4158_s16 + $0xe8] sm:$0xff] %v3197_v47  ;;  %v2730_v49 = vadd.f32 %v2685_v41, %v2410_v19  ;;  %v2091_v30 = vadd.f32 %v2047_v61, %v4099_v10  ;;  %v2692_v45 = vpop.f32.mrf.mxu3 }
 0x2fb   : > { %v3007_v53 = vpop.f32.mrf.mxu0  ;;  %v3050_v29 = vadd.f32 %v3005_v21, %v2730_v49 }
 0x2fd   : > { %v3162_v13 = vadd.f32 %v4144_v24, %v3050_v29 }
 0x2fe   : > { %v2367_v31 = vpop.f32.mrf.mxu2 }
 0x2ff   : > { %v3198_v48 = vmax.f32 %v3162_v13, 0.0  ;;  %v2411_v56 = vadd.f32 %v2367_v31, %v2091_v30 }
 0x300   : > { %v2050_v1 = vpop.f32.mrf.mxu1 }
 0x301   : > { %3234 = vst [vmem:[%s4158_s16 + $0xf0] sm:$0xff] %v3198_v48  ;;  %v2731_v58 = vadd.f32 %v2687_v23, %v2411_v56  ;;  %v2092_v42 = vadd.f32 %v2050_v1, %v4104_v5  ;;  %v2695_v25 = vpop.f32.mrf.mxu3 }
 0x303   : > { %v3051_v8 = vadd.f32 %v3007_v53, %v2731_v58  ;;  %v3010_v51 = vpop.f32.mrf.mxu0 }
 0x305   : > { %v3163_v18 = vadd.f32 %v4144_v24, %v3051_v8 }
 0x306   : > { %v2370_v60 = vpop.f32.mrf.mxu2 }
 0x307   : > { %v3199_v17 = vmax.f32 %v3163_v18, 0.0  ;;  %v2412_v40 = vadd.f32 %v2370_v60, %v2092_v42 }
 0x308   : > { %v2052_v36 = vpop.f32.mrf.mxu1 }
 0x309   : > { %3235 = vst [vmem:[%s4158_s16 + $0xf8] sm:$0xff] %v3199_v17  ;;  %v2732_v10 = vadd.f32 %v2690_v6, %v2412_v40  ;;  %v2093_v9 = vadd.f32 %v2052_v36, %v4117_v26  ;;  %v2697_v63 = vpop.f32.mrf.mxu3 }
 0x30b   : > { %v3052_v14 = vadd.f32 %v3010_v51, %v2732_v10  ;;  %v3012_v35 = vpop.f32.mrf.mxu0 }
 0x30d   : > { %v3164_v12 = vadd.f32 %v4144_v24, %v3052_v14 }
 0x30e   : > { %v2372_v4 = vpop.f32.mrf.mxu2 }
 0x30f   : > { %v3200_v32 = vmax.f32 %v3164_v12, 0.0  ;;  %v2413_v27 = vadd.f32 %v2372_v4, %v2093_v9 }
 0x310   : > { %v2055_v0 = vpop.f32.mrf.mxu1 }
 0x311   : > { %3236 = vst [vmem:[%s4158_s16 + $0x100] sm:$0xff] %v3200_v32  ;;  %v2733_v5 = vadd.f32 %v2692_v45, %v2413_v27  ;;  %v2094_v57 = vadd.f32 %v2055_v0, %v4124_v28 }
 0x313   : > { %v3053_v11 = vadd.f32 %v3012_v35, %v2733_v5  ;;  %v3015_v44 = vpop.f32.mrf.mxu0 }
 0x315   : > { %v3165_v34 = vadd.f32 %v4144_v24, %v3053_v11 }
 0x316   : > { %v2375_v39 = vpop.f32.mrf.mxu2 }
 0x317   : > { %v3201_v2 = vmax.f32 %v3165_v34, 0.0  ;;  %v2414_v7 = vadd.f32 %v2375_v39, %v2094_v57 }
 0x318   : > { %v2057_v46 = vpop.f32.mrf.mxu1 }
 0x319   : > { %3237 = vst [vmem:[%s4158_s16 + $0x108] sm:$0xff] %v3201_v2  ;;  %v2734_v26 = vadd.f32 %v2695_v25, %v2414_v7  ;;  %v2095_v59 = vadd.f32 %v2057_v46, %v4137_v43 }
 0x31b   : > { %v3054_v50 = vadd.f32 %v3015_v44, %v2734_v26  ;;  %v3017_v41 = vpop.f32.mrf.mxu0 }
 0x31d   : > { %v3166_v54 = vadd.f32 %v4144_v24, %v3054_v50 }
 0x31e   : > { %v2377_v37 = vpop.f32.mrf.mxu2 }
 0x31f   : > { %v3202_v33 = vmax.f32 %v3166_v54, 0.0  ;;  %v2415_v16 = vadd.f32 %v2377_v37, %v2095_v59 }
 0x321   : > { %3238 = vst [vmem:[%s4158_s16 + $0x110] sm:$0xff] %v3202_v33  ;;  %v2735_v28 = vadd.f32 %v2697_v63, %v2415_v16 }
 0x323   : > { %v3055_v52 = vadd.f32 %v3017_v41, %v2735_v28 }
 0x325   : > { %v3167_v55 = vadd.f32 %v4144_v24, %v3055_v52 }
 0x327   : > { %v3203_v3 = vmax.f32 %v3167_v55, 0.0 }
 0x329   : > { %3239 = vst [vmem:[%s4158_s16 + $0x118] sm:$0xff] %v3203_v3 }
 0x32a PF: > { %s13_s12 = sadd.s32 1, %s3495_s12  }
 0x32b   : > { %p10_p4 = scmp.ge.s32.totalorder %s13_s12, 4  }
 0x32d   :  { %12 = sbr.rel (!%p10_p4) target bundleno = 1 (0x1), region = 70 }

// kernel: model_forward.14
= control target key start
LH: loop header
LB: loop body
LE: loop exit
PB: predicated region body
PF: predicated region fallthrough
CT: control target
= control target key end

     0   :  { %s3737_s12 = smov 0   ;;  %s4626_s0 = inlined_call_operand.vmem [shape: f32[2,332,32], index: 0, kind: input, shape index: {}]   ;;  %s4627_s1 = inlined_call_operand.vmem [shape: bf16[9,32,128], index: 1, kind: input, shape index: {}]   ;;  %s4628_s2 = inlined_call_operand.vmem [shape: f32[1,128], index: 2, kind: input, shape index: {}]   ;;  %s4629_s3 = inlined_call_operand.vmem [shape: f32[2,288,128], index: 3, kind: output, shape index: {}]  }
   0x1 LB: > { %s3399_s13 = sadd.s32 4294967295, %s3715_s12   ;;  %p3403_p0 = scmp.ge.s32.totalorder %s3715_s12, 1  ;;  %s3715_s12 = sphi %s3737_s12, %s13_s12  }
   0x2   : > { %p137_p1 = scmp.lt.s32.totalorder %s3715_s12, 3 }
   0x4   : > { %p138_p2 = pnand %p3403_p0, %p137_p1 }
   0x5   : > { %p161_p3 = scmp.lt.s32.totalorder (!%p138_p2), %s3399_s13, 1 }
   0x6   : > { %141 = sbr.rel (%p138_p2) target bundleno = 810 (0x32a), region = 32 }
   0xb   : > { %v3675_v0 = vld [vmem:[%s4627_s1 + $0x8] sm:$0xff]  ;;  %v3674_v1 = vld [vmem:[%s4627_s1] sm:$0xff]  ;;  %s4631_s13 = smov (!%p161_p3, %s3399_s13), 1  ;;  %v3677_v3 = vld [vmem:[%s4627_s1 + $0x18] sm:$0xff]  ;;  %vm314_vm0 = vcmask 261120  }
   0xc   : > { %3692 = vmatpush.bf16.msra.mxu1 %v3675_v0  ;;  %3693 = vmatpush.bf16.msra.mxu2 %v3675_v0  ;;  %v3679_v2 = vld [vmem:[%s4627_s1 + $0x28] sm:$0xff]  ;;  %s3698_s20 = smul.u32 336, %s4631_s13  ;;  %v3681_v17 = vld [vmem:[%s4627_s1 + $0x38] sm:$0xff]  ;;  %v3678_v18 = vld [vmem:[%s4627_s1 + $0x20] sm:$0xff] }
   0xd   : > { %375 = vmatpush.bf16.msra.mxu0 %v3675_v0  ;;  %3694 = vmatpush.bf16.msra.mxu3 %v3675_v0  ;;  %v3683_v4 = vld [vmem:[%s4627_s1 + $0x48] sm:$0xff]  ;;  %v3676_v19 = vld [vmem:[%s4627_s1 + $0x10] sm:$0xff]  ;;  %v3682_v32 = vld [vmem:[%s4627_s1 + $0x40] sm:$0xff]  ;;  %s3699_s5 = smul.u32 288, %s4631_s13 }
   0xe   : > { %s3766_s27 = scalar_lea.vmem %s4626_s0, %s3698_s20  ;;  %v3680_v33 = vld [vmem:[%s4627_s1 + $0x30] sm:$0xff]  ;;  %v3687_v58 = vld [vmem:[%s4627_s1 + $0x68] sm:$0xff]  ;;  %v3689_v59 = vld [vmem:[%s4627_s1 + $0x78] sm:$0xff] }
   0xf   : > { %v218_v5 = vld [vmem:[%s3766_s27 + $0x50] sm:$0xff]  ;;  %v219_v6 = vld [vmem:[%s3766_s27 + $0x58] sm:$0xff]  ;;  %v228_v7 = vld [vmem:[%s3766_s27 + $0xa0] sm:$0xff]  ;;  %s4393_s8 = scalar_lea.vmem %s4629_s3, %s3699_s5 }
  0x10   : > { %3695 = vmatpush.bf16.msra.mxu1 %v3674_v1  ;;  %3696 = vmatpush.bf16.msra.mxu2 %v3674_v1  ;;  %v249_v8 = vpack.c.bf16 %v219_v6, %v218_v5  ;;  %v229_v9 = vld [vmem:[%s3766_s27 + $0xa8] sm:$0xff]  ;;  %v208_v10 = vld [vmem:[%s3766_s27] sm:$0xff]  ;;  %v238_v14 = vld [vmem:[%s3766_s27 + $0xf0] sm:$0xff] }
  0x11   : > { %376 = vmatpush.bf16.msra.mxu0 %v3674_v1  ;;  %v209_v11 = vld [vmem:[%s3766_s27 + $0x8] sm:$0xff]  ;;  %v254_v12 = vpack.c.bf16 %v229_v9, %v228_v7  ;;  %3697 = vmatpush.bf16.msra.mxu3 %v3674_v1  ;;  %v239_v15 = vld [vmem:[%s3766_s27 + $0xf8] sm:$0xff]  ;;  %v220_v20 = vld [vmem:[%s3766_s27 + $0x60] sm:$0xff] }
  0x12   : > { %v244_v13 = vpack.c.bf16 %v209_v11, %v208_v10  ;;  %v259_v16 = vpack.c.bf16 %v239_v15, %v238_v14  ;;  %v221_v21 = vld [vmem:[%s3766_s27 + $0x68] sm:$0xff]  ;;  %v230_v22 = vld [vmem:[%s3766_s27 + $0xb0] sm:$0xff]  ;;  %v231_v23 = vld [vmem:[%s3766_s27 + $0xb8] sm:$0xff] }
  0x13   : > { %3419 = vmatmul.msk.bf16.vlgmr.msra.gmra.mxu1 %vm314_vm0, %v249_v8  ;;  %3424 = vmatmul.msk.bf16.vlgmr.msra.gmra.mxu2 %vm314_vm0, %v254_v12  ;;  %v210_v24 = vld [vmem:[%s3766_s27 + $0x10] sm:$0xff]  ;;  %v211_v25 = vld [vmem:[%s3766_s27 + $0x18] sm:$0xff]  ;;  %v250_v26 = vpack.c.bf16 %v221_v21, %v220_v20  ;;  %v255_v27 = vpack.c.bf16 %v231_v23, %v230_v22  ;;  %v240_v29 = vld [vmem:[%s3766_s27 + $0x100] sm:$0xff] }
  0x14   : > { %1039 = vmatpush.bf16.msrb.mxu2 %v3679_v2  ;;  %707 = vmatpush.bf16.msrb.mxu1 %v3677_v3  ;;  %v245_v28 = vpack.c.bf16 %v211_v25, %v210_v24  ;;  %v241_v30 = vld [vmem:[%s3766_s27 + $0x108] sm:$0xff]  ;;  %v222_v34 = vld [vmem:[%s3766_s27 + $0x70] sm:$0xff]  ;;  %v223_v35 = vld [vmem:[%s3766_s27 + $0x78] sm:$0xff] }
  0x15   : > { %1703 = vmatpush.bf16.msrb.mxu0 %v3683_v4  ;;  %3429 = vmatmul.msk.bf16.vlgmr.msra.gmra.mxu3 %vm314_vm0, %v259_v16  ;;  %v260_v31 = vpack.c.bf16 %v241_v30, %v240_v29  ;;  %v232_v36 = vld [vmem:[%s3766_s27 + $0xc0] sm:$0xff]  ;;  %v233_v37 = vld [vmem:[%s3766_s27 + $0xc8] sm:$0xff]  ;;  %v251_v40 = vpack.c.bf16 %v223_v35, %v222_v34  ;;  %v242_v43 = vld [vmem:[%s3766_s27 + $0x110] sm:$0xff] }
  0x16   : > { %3414 = vmatmul.msk.bf16.vlgmr.msra.gmra.mxu0 %vm314_vm0, %v244_v13  ;;  %1371 = vmatpush.bf16.msrb.mxu3 %v3681_v17  ;;  %v212_v38 = vld [vmem:[%s3766_s27 + $0x20] sm:$0xff]  ;;  %v213_v39 = vld [vmem:[%s3766_s27 + $0x28] sm:$0xff]  ;;  %v256_v41 = vpack.c.bf16 %v233_v37, %v232_v36  ;;  %v243_v44 = vld [vmem:[%s3766_s27 + $0x118] sm:$0xff] }
  0x17   : > { %v246_v42 = vpack.c.bf16 %v213_v39, %v212_v38  ;;  %v261_v45 = vpack.c.bf16 %v243_v44, %v242_v43  ;;  %v224_v46 = vld [vmem:[%s3766_s27 + $0x80] sm:$0xff]  ;;  %v225_v47 = vld [vmem:[%s3766_s27 + $0x88] sm:$0xff]  ;;  %v234_v48 = vld [vmem:[%s3766_s27 + $0xd0] sm:$0xff] }
  0x18   : > { %1040 = vmatpush.bf16.msrb.mxu2 %v3678_v18  ;;  %708 = vmatpush.bf16.msrb.mxu1 %v3676_v19  ;;  %v235_v49 = vld [vmem:[%s3766_s27 + $0xd8] sm:$0xff]  ;;  %v214_v50 = vld [vmem:[%s3766_s27 + $0x30] sm:$0xff]  ;;  %v252_v52 = vpack.c.bf16 %v225_v47, %v224_v46  ;;  %v3691_v61 = vld [vmem:[%s4627_s1 + $0x88] sm:$0xff] }
  0x19   : > { %1704 = vmatpush.bf16.msrb.mxu0 %v3682_v32  ;;  %v215_v51 = vld [vmem:[%s3766_s27 + $0x38] sm:$0xff]  ;;  %v257_v53 = vpack.c.bf16 %v235_v49, %v234_v48  ;;  %v226_v62 = vld [vmem:[%s3766_s27 + $0x90] sm:$0xff]  ;;  %v236_v0 = vld [vmem:[%s3766_s27 + $0xe0] sm:$0xff] }
  0x1a   : > { %1372 = vmatpush.bf16.msrb.mxu3 %v3680_v33  ;;  %v247_v54 = vpack.c.bf16 %v215_v51, %v214_v50  ;;  %v1204_v55 = vld [vmem:[%s3766_s27 + $0x12] sm:$0xff]  ;;  %v1205_v56 = vld [vmem:[%s3766_s27 + $0x1a] sm:$0xff]  ;;  %v237_v1 = vld [vmem:[%s3766_s27 + $0xe8] sm:$0xff] }
  0x1b   : > { %v1240_v57 = vpack.c.bf16 %v1205_v56, %v1204_v55  ;;  %v3685_v60 = vld [vmem:[%s4627_s1 + $0x58] sm:$0xff]  ;;  %v216_v2 = vld [vmem:[%s3766_s27 + $0x40] sm:$0xff]  ;;  %v217_v3 = vld [vmem:[%s3766_s27 + $0x48] sm:$0xff]  ;;  %v258_v5 = vpack.c.bf16 %v237_v1, %v236_v0 }
  0x1c   : > { %2367 = vmatpush.bf16.msra.mxu2 %v3687_v58  ;;  %2035 = vmatpush.bf16.msra.mxu1 %v3685_v60  ;;  %v227_v63 = vld [vmem:[%s3766_s27 + $0x98] sm:$0xff]  ;;  %v248_v6 = vpack.c.bf16 %v217_v3, %v216_v2  ;;  %v1206_v7 = vld [vmem:[%s3766_s27 + $0x22] sm:$0xff]  ;;  %v1207_v8 = vld [vmem:[%s3766_s27 + $0x2a] sm:$0xff] }
  0x1d   : > { %3031 = vmatpush.bf16.msra.mxu0 %v3691_v61  ;;  %v253_v4 = vpack.c.bf16 %v227_v63, %v226_v62  ;;  %v1241_v9 = vpack.c.bf16 %v1207_v8, %v1206_v7  ;;  %v540_v10 = vld [vmem:[%s3766_s27 + $0x1] sm:$0xff]  ;;  %v541_v11 = vld [vmem:[%s3766_s27 + $0x9] sm:$0xff]  ;;  %v1536_v14 = vld [vmem:[%s3766_s27 + $0x13] sm:$0xff] }
  0x1e   : > { %2699 = vmatpush.bf16.msra.mxu3 %v3689_v59  ;;  %v872_v12 = vld [vmem:[%s3766_s27 + $0x2] sm:$0xff]  ;;  %v873_v13 = vld [vmem:[%s3766_s27 + $0xa] sm:$0xff]  ;;  %v576_v16 = vpack.c.bf16 %v541_v11, %v540_v10  ;;  %v1208_v19 = vld [vmem:[%s3766_s27 + $0x32] sm:$0xff] }
  0x1f   : > { %v1537_v15 = vld [vmem:[%s3766_s27 + $0x1b] sm:$0xff]  ;;  %v908_v17 = vpack.c.bf16 %v873_v13, %v872_v12  ;;  %v542_v22 = vld [vmem:[%s3766_s27 + $0x11] sm:$0xff]  ;;  %v1538_v24 = vld [vmem:[%s3766_s27 + $0x23] sm:$0xff] }
  0x20   : > { %v1572_v18 = vpack.c.bf16 %v1537_v15, %v1536_v14  ;;  %v1209_v20 = vld [vmem:[%s3766_s27 + $0x3a] sm:$0xff]  ;;  %v1539_v25 = vld [vmem:[%s3766_s27 + $0x2b] sm:$0xff]  ;;  %v1214_v47 = vld [vmem:[%s3766_s27 + $0x62] sm:$0xff] }
  0x21   : > { %v1242_v21 = vpack.c.bf16 %v1209_v20, %v1208_v19  ;;  %v543_v23 = vld [vmem:[%s3766_s27 + $0x19] sm:$0xff]  ;;  %v1211_v29 = vld [vmem:[%s3766_s27 + $0x4a] sm:$0xff]  ;;  %v548_v55 = vld [vmem:[%s3766_s27 + $0x41] sm:$0xff] }
  0x22   : > { %v545_v32 = vld [vmem:[%s3766_s27 + $0x29] sm:$0xff]  ;;  %v1540_v33 = vld [vmem:[%s3766_s27 + $0x33] sm:$0xff]  ;;  %v1541_v34 = vld [vmem:[%s3766_s27 + $0x3b] sm:$0xff] }
  0x23   : > { %3420 = vmatmul.msk.bf16.gmra.mxu1 %vm314_vm0, %v250_v26  ;;  %3425 = vmatmul.msk.bf16.gmra.mxu2 %vm314_vm0, %v255_v27  ;;  %v577_v26 = vpack.c.bf16 %v543_v23, %v542_v22  ;;  %v1573_v27 = vpack.c.bf16 %v1539_v25, %v1538_v24  ;;  %v1574_v36 = vpack.c.bf16 %v1541_v34, %v1540_v33  ;;  %v1212_v37 = vld [vmem:[%s3766_s27 + $0x52] sm:$0xff]  ;;  %v1213_v38 = vld [vmem:[%s3766_s27 + $0x5a] sm:$0xff]  ;;  %v1215_v48 = vld [vmem:[%s3766_s27 + $0x6a] sm:$0xff] }
  0x24   : > { %v1244_v39 = vpack.c.bf16 %v1213_v38, %v1212_v37  ;;  %v1543_v43 = vld [vmem:[%s3766_s27 + $0x4b] sm:$0xff]  ;;  %v3898_v50 = vpack.c.bf16 %v1215_v48, %v1214_v47  ;;  %v1545_v58 = vld [vmem:[%s3766_s27 + $0x5b] sm:$0xff]  ;;  %v1546_v10 = vld [vmem:[%s3766_s27 + $0x63] sm:$0xff] }
  0x25   : > { %3430 = vmatmul.msk.bf16.gmra.mxu3 %vm314_vm0, %v260_v31  ;;  %v544_v31 = vld [vmem:[%s3766_s27 + $0x21] sm:$0xff]  ;;  %v549_v56 = vld [vmem:[%s3766_s27 + $0x49] sm:$0xff]  ;;  %v1216_v63 = vld [vmem:[%s3766_s27 + $0x72] sm:$0xff] }
  0x26   : > { %3415 = vmatmul.msk.bf16.gmra.mxu0 %vm314_vm0, %v245_v28  ;;  %v1210_v28 = vld [vmem:[%s3766_s27 + $0x42] sm:$0xff]  ;;  %v578_v35 = vpack.c.bf16 %v545_v32, %v544_v31  ;;  %v580_v60 = vpack.c.bf16 %v549_v56, %v548_v55  ;;  %v1217_v0 = vld [vmem:[%s3766_s27 + $0x7a] sm:$0xff]  ;;  %v550_v8 = vld [vmem:[%s3766_s27 + $0x51] sm:$0xff] }
  0x27   : > { %v1243_v30 = vpack.c.bf16 %v1211_v29, %v1210_v28  ;;  %v3927_v3 = vpack.c.bf16 %v1217_v0, %v1216_v63  ;;  %v1547_v11 = vld [vmem:[%s3766_s27 + $0x6b] sm:$0xff]  ;;  %v552_v25 = vld [vmem:[%s3766_s27 + $0x61] sm:$0xff] }
  0x28   : > { %v1577_v15 = vpack.c.bf16 %v1547_v11, %v1546_v10  ;;  %v1549_v28 = vld [vmem:[%s3766_s27 + $0x7b] sm:$0xff]  ;;  %v1220_v33 = vld [vmem:[%s3766_s27 + $0x92] sm:$0xff] }
  0x29   : > { %v1221_v34 = vld [vmem:[%s3766_s27 + $0x9a] sm:$0xff]  ;;  %v1222_v56 = vld [vmem:[%s3766_s27 + $0xa2] sm:$0xff]  ;;  %v3688_v0 = vld [vmem:[%s4627_s1 + $0x70] sm:$0xff] }
  0x2a   : > { %v3985_v37 = vpack.c.bf16 %v1221_v34, %v1220_v33  ;;  %v3686_v63 = vld [vmem:[%s4627_s1 + $0x60] sm:$0xff]  ;;  %2700 = vmatpush.bf16.msra.mxu3 %v3688_v0  ;;  %v3684_v11 = vld [vmem:[%s4627_s1 + $0x50] sm:$0xff] }
  0x2b   : > { %2368 = vmatpush.bf16.msra.mxu2 %v3686_v63  ;;  %2036 = vmatpush.bf16.msra.mxu1 %v3684_v11  ;;  %v1225_v33 = vld [vmem:[%s3766_s27 + $0xba] sm:$0xff]  ;;  %v558_v0 = vld [vmem:[%s3766_s27 + $0x91] sm:$0xff] }
  0x2c   : > { %v559_v11 = vld [vmem:[%s3766_s27 + $0x99] sm:$0xff] }
  0x33   : > { %3421 = vmatmul.msk.bf16.gmra.mxu1 %vm314_vm0, %v251_v40  ;;  %3426 = vmatmul.msk.bf16.gmra.mxu2 %vm314_vm0, %v256_v41  ;;  %v546_v40 = vld [vmem:[%s3766_s27 + $0x31] sm:$0xff]  ;;  %v547_v41 = vld [vmem:[%s3766_s27 + $0x39] sm:$0xff] }
  0x34   : > { %v579_v44 = vpack.c.bf16 %v547_v41, %v546_v40 }
  0x35   : > { %3431 = vmatmul.msk.bf16.gmra.mxu3 %vm314_vm0, %v261_v45 }
  0x36   : > { %3416 = vmatmul.msk.bf16.gmra.mxu0 %vm314_vm0, %v246_v42  ;;  %v1542_v42 = vld [vmem:[%s3766_s27 + $0x43] sm:$0xff] }
  0x37   : > { %v1575_v46 = vpack.c.bf16 %v1543_v43, %v1542_v42  ;;  %v554_v42 = vld [vmem:[%s3766_s27 + $0x71] sm:$0xff]  ;;  %v555_v43 = vld [vmem:[%s3766_s27 + $0x79] sm:$0xff] }
  0x38   : > { %v583_v48 = vpack.c.bf16 %v555_v43, %v554_v42 }
  0x43   : > { %3422 = vmatmul.msk.bf16.gmra.mxu1 %vm314_vm0, %v252_v52  ;;  %3427 = vmatmul.msk.bf16.gmra.mxu2 %vm314_vm0, %v257_v53 }
  0x45   : > { %3504 = vmatmul.msk.bf16.vlgmr.msrb.gmra.mxu3 %vm314_vm0, %v1240_v57 }
  0x46   : > { %3417 = vmatmul.msk.bf16.gmra.mxu0 %vm314_vm0, %v247_v54 }
  0x53   : > { %3423 = vmatmul.msk.bf16.gmra.mxu1 %vm314_vm0, %v253_v4  ;;  %3428 = vmatmul.msk.bf16.gmra.mxu2 %vm314_vm0, %v258_v5 }
  0x55   : > { %3505 = vmatmul.msk.bf16.gmra.mxu3 %vm314_vm0, %v1241_v9 }
  0x56   : > { %3418 = vmatmul.msk.bf16.gmra.mxu0 %vm314_vm0, %v248_v6 }
  0x63   : > { %3444 = vmatmul.msk.bf16.vlgmr.msrb.gmra.mxu1 %vm314_vm0, %v576_v16  ;;  %3474 = vmatmul.msk.bf16.vlgmr.msrb.gmra.mxu2 %vm314_vm0, %v908_v17  ;;  %v1218_v16 = vld [vmem:[%s3766_s27 + $0x82] sm:$0xff]  ;;  %v1219_v17 = vld [vmem:[%s3766_s27 + $0x8a] sm:$0xff] }
  0x64   : > { %v3956_v20 = vpack.c.bf16 %v1219_v17, %v1218_v16  ;;  %v557_v16 = vld [vmem:[%s3766_s27 + $0x89] sm:$0xff]  ;;  %v1552_v17 = vld [vmem:[%s3766_s27 + $0x93] sm:$0xff] }
  0x65   : > { %3506 = vmatmul.msk.bf16.gmra.mxu3 %vm314_vm0, %v1242_v21 }
  0x66   : > { %3534 = vmatmul.msk.bf16.vlgmr.msrb.gmra.mxu0 %vm314_vm0, %v1572_v18 }
  0x73   : > { %3445 = vmatmul.msk.bf16.gmra.mxu1 %vm314_vm0, %v577_v26  ;;  %3475 = vmatmul.msk.bf16.gmra.mxu2 %vm314_vm0, %v1240_v57  ;;  %v1544_v57 = vld [vmem:[%s3766_s27 + $0x53] sm:$0xff]  ;;  %v553_v26 = vld [vmem:[%s3766_s27 + $0x69] sm:$0xff] }
  0x74   : > { %v1576_v62 = vpack.c.bf16 %v1545_v58, %v1544_v57  ;;  %v1223_v57 = vld [vmem:[%s3766_s27 + $0xaa] sm:$0xff] }
  0x75   : > { %3507 = vmatmul.msk.bf16.gmra.mxu3 %vm314_vm0, %v1243_v30 }
  0x76   : > { %3535 = vmatmul.msk.bf16.gmra.mxu0 %vm314_vm0, %v1573_v27  ;;  %v1548_v27 = vld [vmem:[%s3766_s27 + $0x73] sm:$0xff] }
  0x77   : > { %v1578_v32 = vpack.c.bf16 %v1549_v28, %v1548_v27 }
  0x83   : > { %3446 = vmatmul.msk.bf16.gmra.mxu1 %vm314_vm0, %v578_v35  ;;  %3476 = vmatmul.msk.bf16.gmra.mxu2 %vm314_vm0, %v1241_v9  ;;  %v551_v9 = vld [vmem:[%s3766_s27 + $0x59] sm:$0xff] }
  0x84   : > { %v581_v13 = vpack.c.bf16 %v551_v9, %v550_v8 }
  0x85   : > { %3508 = vmatmul.msk.bf16.gmra.mxu3 %vm314_vm0, %v1244_v39 }
  0x86   : > { %3536 = vmatmul.msk.bf16.gmra.mxu0 %vm314_vm0, %v1574_v36 }
  0x90   : > { %v3891_v45 = vpop.f32.mrf.mxu1 }
  0x93   : > { %v3895_v49 = vpop.f32.mrf.mxu0  ;;  %3447 = vmatmul.msk.bf16.gmra.mxu1 %vm314_vm0, %v579_v44  ;;  %3477 = vmatmul.msk.bf16.gmra.mxu2 %vm314_vm0, %v1242_v21  ;;  %v1550_v44 = vld [vmem:[%s3766_s27 + $0x83] sm:$0xff] }
  0x95   : > { %3509 = vmatmul.msk.bf16.gmra.mxu3 %vm314_vm0, %v3898_v50 }
  0x96   : > { %3537 = vmatmul.msk.bf16.gmra.mxu0 %vm314_vm0, %v1575_v46  ;;  %v3902_v51 = vpop.f32.mrf.mxu2  ;;  %v1551_v46 = vld [vmem:[%s3766_s27 + $0x8b] sm:$0xff] }
  0x97   : > { %v1579_v55 = vpack.c.bf16 %v1551_v46, %v1550_v44 }
  0x98   : > { %v3906_v52 = vpop.f32.mrf.mxu1  ;;  %v3910_v54 = vpop.f32.mrf.mxu3 }
  0x9b   : > { %v3908_v53 = vpop.f32.mrf.mxu0 }
  0x9e   : > { %v3916_v59 = vpop.f32.mrf.mxu2 }
  0xa0   : > { %v3918_v61 = vpop.f32.mrf.mxu1  ;;  %v3924_v2 = vpop.f32.mrf.mxu3 }
  0xa3   : > { %v3922_v1 = vpop.f32.mrf.mxu0  ;;  %3448 = vmatmul.msk.bf16.gmra.mxu1 %vm314_vm0, %v580_v60  ;;  %3478 = vmatmul.msk.bf16.gmra.mxu2 %vm314_vm0, %v1243_v30  ;;  %v582_v30 = vpack.c.bf16 %v553_v26, %v552_v25  ;;  %v1553_v25 = vld [vmem:[%s3766_s27 + $0x9b] sm:$0xff] }
  0xa5   : > { %3510 = vmatmul.msk.bf16.gmra.mxu3 %vm314_vm0, %v3927_v3 }
  0xa6   : > { %3538 = vmatmul.msk.bf16.gmra.mxu0 %vm314_vm0, %v1576_v62  ;;  %v3931_v4 = vpop.f32.mrf.mxu2  ;;  %v4011_v62 = vpack.c.bf16 %v1223_v57, %v1222_v56 }
  0xa8   : > { %v3935_v5 = vpop.f32.mrf.mxu1  ;;  %v3939_v7 = vpop.f32.mrf.mxu3 }
  0xab   : > { %v3937_v6 = vpop.f32.mrf.mxu0 }
  0xae   : > { %v3945_v12 = vpop.f32.mrf.mxu2 }
  0xb0   : > { %v3947_v14 = vpop.f32.mrf.mxu1  ;;  %v3953_v19 = vpop.f32.mrf.mxu3 }
  0xb3   : > { %v3951_v18 = vpop.f32.mrf.mxu0  ;;  %3449 = vmatmul.msk.bf16.gmra.mxu1 %vm314_vm0, %v581_v13  ;;  %3479 = vmatmul.msk.bf16.gmra.mxu2 %vm314_vm0, %v1244_v39  ;;  %v3690_v13 = vld [vmem:[%s4627_s1 + $0x80] sm:$0xff] }
  0xb4   : > { %3032 = vmatpush.bf16.msra.mxu0 %v3690_v13 }
  0xb5   : > { %3511 = vmatmul.msk.bf16.gmra.mxu3 %vm314_vm0, %v3956_v20 }
  0xb6   : > { %3539 = vmatmul.msk.bf16.gmra.mxu0 %vm314_vm0, %v1577_v15  ;;  %v3960_v21 = vpop.f32.mrf.mxu2  ;;  %v556_v15 = vld [vmem:[%s3766_s27 + $0x81] sm:$0xff] }
  0xb7   : > { %v584_v27 = vpack.c.bf16 %v557_v16, %v556_v15  ;;  %v1555_v15 = vld [vmem:[%s3766_s27 + $0xab] sm:$0xff] }
  0xb8   : > { %v3964_v22 = vpop.f32.mrf.mxu1  ;;  %v3968_v24 = vpop.f32.mrf.mxu3 }
  0xbb   : > { %v3966_v23 = vpop.f32.mrf.mxu0 }
  0xbe   : > { %v3974_v29 = vpop.f32.mrf.mxu2 }
  0xc0   : > { %v3976_v31 = vpop.f32.mrf.mxu1  ;;  %v3982_v36 = vpop.f32.mrf.mxu3 }
  0xc3   : > { %v3980_v35 = vpop.f32.mrf.mxu0  ;;  %3450 = vmatmul.msk.bf16.gmra.mxu1 %vm314_vm0, %v582_v30  ;;  %3480 = vmatmul.msk.bf16.gmra.mxu2 %vm314_vm0, %v3898_v50  ;;  %v1580_v30 = vpack.c.bf16 %v1553_v25, %v1552_v17  ;;  %v585_v17 = vpack.c.bf16 %v559_v11, %v558_v0 }
  0xc5   : > { %3512 = vmatmul.msk.bf16.gmra.mxu3 %vm314_vm0, %v3985_v37 }
  0xc6   : > { %3540 = vmatmul.msk.bf16.gmra.mxu0 %vm314_vm0, %v1578_v32  ;;  %v3990_v38 = vpop.f32.mrf.mxu2  ;;  %v1224_v32 = vld [vmem:[%s3766_s27 + $0xb2] sm:$0xff] }
  0xc7   : > { %v4045_v43 = vpack.c.bf16 %v1225_v33, %v1224_v32  ;;  %v1227_v32 = vld [vmem:[%s3766_s27 + $0xca] sm:$0xff] }
  0xc8   : > { %v3994_v39 = vpop.f32.mrf.mxu1  ;;  %v1374_v41 = vpop.f32.mrf.mxu3 }
  0xcb   : > { %v3996_v40 = vpop.f32.mrf.mxu0 }
  0xce   : > { %v4002_v47 = vpop.f32.mrf.mxu2 }
  0xd0   : > { %v4004_v50 = vpop.f32.mrf.mxu1  ;;  %v1376_v60 = vpop.f32.mrf.mxu3 }
  0xd3   : > { %v4008_v58 = vpop.f32.mrf.mxu0  ;;  %3451 = vmatmul.msk.bf16.gmra.mxu1 %vm314_vm0, %v583_v48  ;;  %3481 = vmatmul.msk.bf16.gmra.mxu2 %vm314_vm0, %v3927_v3 }
  0xd5   : > { %3513 = vmatmul.msk.bf16.gmra.mxu3 %vm314_vm0, %v4011_v62 }
  0xd6   : > { %3541 = vmatmul.msk.bf16.gmra.mxu0 %vm314_vm0, %v1579_v55  ;;  %v4022_v8 = vpop.f32.mrf.mxu2 }
  0xd8   : > { %v4026_v3 = vpop.f32.mrf.mxu1  ;;  %v1379_v10 = vpop.f32.mrf.mxu3 }
  0xdb   : > { %v4028_v9 = vpop.f32.mrf.mxu0 }
  0xde   : > { %v4040_v26 = vpop.f32.mrf.mxu2 }
  0xe0   : > { %v710_v28 = vpop.f32.mrf.mxu1  ;;  %v1381_v42 = vpop.f32.mrf.mxu3 }
  0xe1   : > { %v800_v44 = vadd.f32 %v710_v28, %v3895_v49 }
  0xe3   : > { %v1706_v34 = vpop.f32.mrf.mxu0  ;;  %3452 = vmatmul.msk.bf16.gmra.mxu1 %vm314_vm0, %v584_v27  ;;  %3482 = vmatmul.msk.bf16.gmra.mxu2 %vm314_vm0, %v3956_v20  ;;  %v1554_v20 = vld [vmem:[%s3766_s27 + $0xa3] sm:$0xff] }
  0xe4   : > { %v1581_v28 = vpack.c.bf16 %v1555_v15, %v1554_v20  ;;  %v560_v20 = vld [vmem:[%s3766_s27 + $0xa1] sm:$0xff]  ;;  %v561_v15 = vld [vmem:[%s3766_s27 + $0xa9] sm:$0xff] }
  0xe5   : > { %3514 = vmatmul.msk.bf16.gmra.mxu3 %vm314_vm0, %v4045_v43 }
  0xe6   : > { %3542 = vmatmul.msk.bf16.gmra.mxu0 %vm314_vm0, %v1580_v30  ;;  %v1042_v46 = vpop.f32.mrf.mxu2  ;;  %v1226_v30 = vld [vmem:[%s3766_s27 + $0xc2] sm:$0xff] }
  0xe7   : > { %v1132_v48 = vadd.f32 %v1042_v46, %v800_v44 }
  0xe8   : > { %v712_v55 = vpop.f32.mrf.mxu1  ;;  %v1384_v63 = vpop.f32.mrf.mxu3 }
  0xe9   : > { %v1464_v57 = vadd.f32 %v1374_v41, %v1132_v48  ;;  %v801_v16 = vadd.f32 %v712_v55, %v3908_v53 }
  0xeb   : > { %v1708_v56 = vpop.f32.mrf.mxu0  ;;  %v4055_v13 = vadd.f32 %v1706_v34, %v1464_v57  ;;  %v4063_v34 = vpack.c.bf16 %v1227_v32, %v1226_v30  ;;  %v1228_v30 = vld [vmem:[%s3766_s27 + $0xd2] sm:$0xff]  ;;  %v1229_v32 = vld [vmem:[%s3766_s27 + $0xda] sm:$0xff] }
  0xee   : > { %v1044_v49 = vpop.f32.mrf.mxu2 }
  0xef   : > { %v1133_v25 = vadd.f32 %v1044_v49, %v801_v16  ;;  %v1556_v16 = vld [vmem:[%s3766_s27 + $0xb3] sm:$0xff] }
  0xf0   : > { %v715_v27 = vpop.f32.mrf.mxu1  ;;  %v1386_v41 = vpop.f32.mrf.mxu3 }
  0xf1   : > { %v1465_v44 = vadd.f32 %v1376_v60, %v1133_v25  ;;  %v802_v46 = vadd.f32 %v715_v27, %v3922_v1 }
  0xf3   : > { %v1711_v33 = vpop.f32.mrf.mxu0  ;;  %3453 = vmatmul.msk.bf16.gmra.mxu1 %vm314_vm0, %v585_v17  ;;  %3483 = vmatmul.msk.bf16.gmra.mxu2 %vm314_vm0, %v3985_v37  ;;  %v4068_v53 = vadd.f32 %v1708_v56, %v1465_v44  ;;  %v1557_v56 = vld [vmem:[%s3766_s27 + $0xbb] sm:$0xff]  ;;  %v586_v17 = vpack.c.bf16 %v561_v15, %v560_v20 }
  0xf5   : > { %3515 = vmatmul.msk.bf16.gmra.mxu3 %vm314_vm0, %v4063_v34 }
  0xf6   : > { %3543 = vmatmul.msk.bf16.gmra.mxu0 %vm314_vm0, %v1581_v28  ;;  %v1047_v48 = vpop.f32.mrf.mxu2  ;;  %v1582_v28 = vpack.c.bf16 %v1557_v56, %v1556_v16  ;;  %v562_v16 = vld [vmem:[%s3766_s27 + $0xb1] sm:$0xff]  ;;  %v563_v56 = vld [vmem:[%s3766_s27 + $0xb9] sm:$0xff] }
  0xf7   : > { %v1134_v60 = vadd.f32 %v1047_v48, %v802_v46 }
  0xf8   : > { %v717_v55 = vpop.f32.mrf.mxu1  ;;  %v1389_v11 = vpop.f32.mrf.mxu3 }
  0xf9   : > { %v1466_v0 = vadd.f32 %v1379_v10, %v1134_v60  ;;  %v803_v49 = vadd.f32 %v717_v55, %v3937_v6 }
  0xfb   : > { %v1713_v57 = vpop.f32.mrf.mxu0  ;;  %v4075_v37 = vadd.f32 %v1711_v33, %v1466_v0  ;;  %v4083_v33 = vpack.c.bf16 %v1229_v32, %v1228_v30  ;;  %v1230_v30 = vld [vmem:[%s3766_s27 + $0xe2] sm:$0xff]  ;;  %v1231_v32 = vld [vmem:[%s3766_s27 + $0xea] sm:$0xff] }
  0xfe   : > { %v1049_v1 = vpop.f32.mrf.mxu2 }
  0xff   : > { %v1135_v25 = vadd.f32 %v1049_v1, %v803_v49  ;;  %v1558_v49 = vld [vmem:[%s3766_s27 + $0xc3] sm:$0xff] }
 0x100   : > { %v720_v27 = vpop.f32.mrf.mxu1  ;;  %v1391_v10 = vpop.f32.mrf.mxu3 }
 0x101   : > { %v1467_v46 = vadd.f32 %v1381_v42, %v1135_v25  ;;  %v804_v48 = vadd.f32 %v720_v27, %v3951_v18 }
 0x103   : > { %v1716_v44 = vpop.f32.mrf.mxu0  ;;  %3454 = vmatmul.msk.bf16.gmra.mxu1 %vm314_vm0, %v586_v17  ;;  %3484 = vmatmul.msk.bf16.gmra.mxu2 %vm314_vm0, %v4011_v62  ;;  %v4088_v6 = vadd.f32 %v1713_v57, %v1467_v46  ;;  %v1559_v57 = vld [vmem:[%s3766_s27 + $0xcb] sm:$0xff]  ;;  %v587_v17 = vpack.c.bf16 %v563_v56, %v562_v16 }
 0x105   : > { %3516 = vmatmul.msk.bf16.gmra.mxu3 %vm314_vm0, %v4083_v33 }
 0x106   : > { %3544 = vmatmul.msk.bf16.gmra.mxu0 %vm314_vm0, %v1582_v28  ;;  %v1052_v60 = vpop.f32.mrf.mxu2  ;;  %v1583_v28 = vpack.c.bf16 %v1559_v57, %v1558_v49  ;;  %v564_v49 = vld [vmem:[%s3766_s27 + $0xc1] sm:$0xff]  ;;  %v565_v57 = vld [vmem:[%s3766_s27 + $0xc9] sm:$0xff] }
 0x107   : > { %v1136_v42 = vadd.f32 %v1052_v60, %v804_v48 }
 0x108   : > { %v722_v55 = vpop.f32.mrf.mxu1  ;;  %v1394_v15 = vpop.f32.mrf.mxu3 }
 0x109   : > { %v1468_v20 = vadd.f32 %v1384_v63, %v1136_v42  ;;  %v805_v1 = vadd.f32 %v722_v55, %v3966_v23 }
 0x10b   : > { %v1718_v0 = vpop.f32.mrf.mxu0  ;;  %v4095_v62 = vadd.f32 %v1716_v44, %v1468_v20  ;;  %v4103_v44 = vpack.c.bf16 %v1231_v32, %v1230_v30  ;;  %v1232_v30 = vld [vmem:[%s3766_s27 + $0xf2] sm:$0xff]  ;;  %v1233_v32 = vld [vmem:[%s3766_s27 + $0xfa] sm:$0xff] }
 0x10e   : > { %v1054_v18 = vpop.f32.mrf.mxu2 }
 0x10f   : > { %v1137_v25 = vadd.f32 %v1054_v18, %v805_v1  ;;  %v1560_v1 = vld [vmem:[%s3766_s27 + $0xd3] sm:$0xff] }
 0x110   : > { %v725_v27 = vpop.f32.mrf.mxu1  ;;  %v1396_v63 = vpop.f32.mrf.mxu3 }
 0x111   : > { %v1469_v48 = vadd.f32 %v1386_v41, %v1137_v25  ;;  %v806_v60 = vadd.f32 %v725_v27, %v3980_v35 }
 0x113   : > { %v1721_v46 = vpop.f32.mrf.mxu0  ;;  %3455 = vmatmul.msk.bf16.gmra.mxu1 %vm314_vm0, %v587_v17  ;;  %3485 = vmatmul.msk.bf16.gmra.mxu2 %vm314_vm0, %v4045_v43  ;;  %v4108_v23 = vadd.f32 %v1718_v0, %v1469_v48  ;;  %v1561_v0 = vld [vmem:[%s3766_s27 + $0xdb] sm:$0xff]  ;;  %v588_v17 = vpack.c.bf16 %v565_v57, %v564_v49 }
 0x115   : > { %3517 = vmatmul.msk.bf16.gmra.mxu3 %vm314_vm0, %v4103_v44 }
 0x116   : > { %3545 = vmatmul.msk.bf16.gmra.mxu0 %vm314_vm0, %v1583_v28  ;;  %v1057_v42 = vpop.f32.mrf.mxu2  ;;  %v1584_v28 = vpack.c.bf16 %v1561_v0, %v1560_v1  ;;  %v566_v1 = vld [vmem:[%s3766_s27 + $0xd1] sm:$0xff]  ;;  %v567_v0 = vld [vmem:[%s3766_s27 + $0xd9] sm:$0xff] }
 0x117   : > { %v1138_v41 = vadd.f32 %v1057_v42, %v806_v60 }
 0x118   : > { %v727_v55 = vpop.f32.mrf.mxu1  ;;  %v1399_v56 = vpop.f32.mrf.mxu3 }
 0x119   : > { %v1470_v16 = vadd.f32 %v1389_v11, %v1138_v41  ;;  %v807_v18 = vadd.f32 %v727_v55, %v3996_v40 }
 0x11b   : > { %v1723_v20 = vpop.f32.mrf.mxu0  ;;  %v4115_v43 = vadd.f32 %v1721_v46, %v1470_v16  ;;  %v4123_v46 = vpack.c.bf16 %v1233_v32, %v1232_v30  ;;  %v1234_v30 = vld [vmem:[%s3766_s27 + $0x102] sm:$0xff]  ;;  %v1235_v32 = vld [vmem:[%s3766_s27 + $0x10a] sm:$0xff] }
 0x11e   : > { %v1059_v35 = vpop.f32.mrf.mxu2 }
 0x11f   : > { %v1139_v25 = vadd.f32 %v1059_v35, %v807_v18  ;;  %v1562_v18 = vld [vmem:[%s3766_s27 + $0xe3] sm:$0xff] }
 0x120   : > { %v730_v27 = vpop.f32.mrf.mxu1  ;;  %v1401_v11 = vpop.f32.mrf.mxu3 }
 0x121   : > { %v1471_v60 = vadd.f32 %v1391_v10, %v1139_v25  ;;  %v808_v42 = vadd.f32 %v730_v27, %v4008_v58 }
 0x123   : > { %v1726_v48 = vpop.f32.mrf.mxu0  ;;  %3456 = vmatmul.msk.bf16.gmra.mxu1 %vm314_vm0, %v588_v17  ;;  %3486 = vmatmul.msk.bf16.gmra.mxu2 %vm314_vm0, %v4063_v34  ;;  %v4128_v40 = vadd.f32 %v1723_v20, %v1471_v60  ;;  %v1563_v20 = vld [vmem:[%s3766_s27 + $0xeb] sm:$0xff]  ;;  %v589_v17 = vpack.c.bf16 %v567_v0, %v566_v1 }
 0x125   : > { %3518 = vmatmul.msk.bf16.gmra.mxu3 %vm314_vm0, %v4123_v46 }
 0x126   : > { %3546 = vmatmul.msk.bf16.gmra.mxu0 %vm314_vm0, %v1584_v28  ;;  %v1062_v41 = vpop.f32.mrf.mxu2  ;;  %v1585_v28 = vpack.c.bf16 %v1563_v20, %v1562_v18  ;;  %v568_v18 = vld [vmem:[%s3766_s27 + $0xe1] sm:$0xff]  ;;  %v569_v20 = vld [vmem:[%s3766_s27 + $0xe9] sm:$0xff] }
 0x127   : > { %v1140_v10 = vadd.f32 %v1062_v41, %v808_v42 }
 0x128   : > { %v732_v55 = vpop.f32.mrf.mxu1  ;;  %v1404_v57 = vpop.f32.mrf.mxu3 }
 0x129   : > { %v1472_v49 = vadd.f32 %v1394_v15, %v1140_v10  ;;  %v809_v35 = vadd.f32 %v732_v55, %v4028_v9 }
 0x12b   : > { %v1728_v16 = vpop.f32.mrf.mxu0  ;;  %v4135_v34 = vadd.f32 %v1726_v48, %v1472_v49  ;;  %v4143_v48 = vpack.c.bf16 %v1235_v32, %v1234_v30  ;;  %v1236_v30 = vld [vmem:[%s3766_s27 + $0x112] sm:$0xff]  ;;  %v1237_v32 = vld [vmem:[%s3766_s27 + $0x11a] sm:$0xff] }
 0x12e   : > { %v1064_v58 = vpop.f32.mrf.mxu2 }
 0x12f   : > { %v1141_v25 = vadd.f32 %v1064_v58, %v809_v35  ;;  %v1564_v35 = vld [vmem:[%s3766_s27 + $0xf3] sm:$0xff] }
 0x130   : > { %v735_v27 = vpop.f32.mrf.mxu1  ;;  %v1406_v15 = vpop.f32.mrf.mxu3 }
 0x131   : > { %v1473_v42 = vadd.f32 %v1396_v63, %v1141_v25  ;;  %v810_v41 = vadd.f32 %v735_v27, %v3891_v45 }
 0x133   : > { %v1731_v60 = vpop.f32.mrf.mxu0  ;;  %3457 = vmatmul.msk.bf16.gmra.mxu1 %vm314_vm0, %v589_v17  ;;  %3487 = vmatmul.msk.bf16.gmra.mxu2 %vm314_vm0, %v4083_v33  ;;  %v4148_v9 = vadd.f32 %v1728_v16, %v1473_v42  ;;  %v1565_v16 = vld [vmem:[%s3766_s27 + $0xfb] sm:$0xff]  ;;  %v590_v17 = vpack.c.bf16 %v569_v20, %v568_v18 }
 0x135   : > { %3519 = vmatmul.msk.bf16.gmra.mxu3 %vm314_vm0, %v4143_v48 }
 0x136   : > { %3547 = vmatmul.msk.bf16.gmra.mxu0 %vm314_vm0, %v1585_v28  ;;  %v1067_v10 = vpop.f32.mrf.mxu2  ;;  %v1586_v28 = vpack.c.bf16 %v1565_v16, %v1564_v35  ;;  %v570_v35 = vld [vmem:[%s3766_s27 + $0xf1] sm:$0xff]  ;;  %v571_v16 = vld [vmem:[%s3766_s27 + $0xf9] sm:$0xff] }
 0x137   : > { %v1142_v63 = vadd.f32 %v1067_v10, %v810_v41 }
 0x138   : > { %v737_v55 = vpop.f32.mrf.mxu1  ;;  %v1409_v0 = vpop.f32.mrf.mxu3 }
 0x139   : > { %v1474_v1 = vadd.f32 %v1399_v56, %v1142_v63  ;;  %v811_v58 = vadd.f32 %v737_v55, %v3906_v52 }
 0x13b   : > { %v1733_v49 = vpop.f32.mrf.mxu0  ;;  %v4155_v33 = vadd.f32 %v1731_v60, %v1474_v1  ;;  %v4163_v60 = vpack.c.bf16 %v1237_v32, %v1236_v30  ;;  %v1238_v30 = vld [vmem:[%s3766_s27 + $0x122] sm:$0xff]  ;;  %v1239_v32 = vld [vmem:[%s3766_s27 + $0x12a] sm:$0xff] }
 0x13e   : > { %v1069_v45 = vpop.f32.mrf.mxu2 }
 0x13f   : > { %v1143_v25 = vadd.f32 %v1069_v45, %v811_v58  ;;  %v1566_v58 = vld [vmem:[%s3766_s27 + $0x103] sm:$0xff] }
 0x140   : > { %v740_v27 = vpop.f32.mrf.mxu1  ;;  %v1411_v56 = vpop.f32.mrf.mxu3 }
 0x141   : > { %v1475_v41 = vadd.f32 %v1401_v11, %v1143_v25  ;;  %v812_v10 = vadd.f32 %v740_v27, %v3918_v61 }
 0x143   : > { %v1736_v42 = vpop.f32.mrf.mxu0  ;;  %3458 = vmatmul.msk.bf16.gmra.mxu1 %vm314_vm0, %v590_v17  ;;  %3488 = vmatmul.msk.bf16.gmra.mxu2 %vm314_vm0, %v4103_v44  ;;  %v4168_v52 = vadd.f32 %v1733_v49, %v1475_v41  ;;  %v1567_v49 = vld [vmem:[%s3766_s27 + $0x10b] sm:$0xff]  ;;  %v591_v17 = vpack.c.bf16 %v571_v16, %v570_v35 }
 0x145   : > { %3520 = vmatmul.msk.bf16.gmra.mxu3 %vm314_vm0, %v4163_v60 }
 0x146   : > { %3548 = vmatmul.msk.bf16.gmra.mxu0 %vm314_vm0, %v1586_v28  ;;  %v1072_v63 = vpop.f32.mrf.mxu2  ;;  %v1587_v28 = vpack.c.bf16 %v1567_v49, %v1566_v58  ;;  %v572_v58 = vld [vmem:[%s3766_s27 + $0x101] sm:$0xff]  ;;  %v573_v49 = vld [vmem:[%s3766_s27 + $0x109] sm:$0xff] }
 0x147   : > { %v1144_v11 = vadd.f32 %v1072_v63, %v812_v10 }
 0x148   : > { %v742_v55 = vpop.f32.mrf.mxu1  ;;  %v1414_v20 = vpop.f32.mrf.mxu3 }
 0x149   : > { %v1476_v18 = vadd.f32 %v1404_v57, %v1144_v11  ;;  %v813_v45 = vadd.f32 %v742_v55, %v3935_v5 }
 0x14b   : > { %v1738_v1 = vpop.f32.mrf.mxu0  ;;  %v4175_v44 = vadd.f32 %v1736_v42, %v1476_v18  ;;  %v1257_v42 = vpack.c.bf16 %v1239_v32, %v1238_v30  ;;  %v2532_v30 = vld [vmem:[%s3766_s27 + $0x25] sm:$0xff]  ;;  %v2533_v32 = vld [vmem:[%s3766_s27 + $0x2d] sm:$0xff] }
 0x14e   : > { %v1074_v61 = vpop.f32.mrf.mxu2 }
 0x14f   : > { %v1145_v25 = vadd.f32 %v1074_v61, %v813_v45  ;;  %v1569_v61 = vld [vmem:[%s3766_s27 + $0x11b] sm:$0xff] }
 0x150   : > { %v745_v27 = vpop.f32.mrf.mxu1  ;;  %v1416_v57 = vpop.f32.mrf.mxu3 }
 0x151   : > { %v1477_v10 = vadd.f32 %v1406_v15, %v1145_v25  ;;  %v814_v63 = vadd.f32 %v745_v27, %v3947_v14  ;;  %v592_v14 = vpack.c.bf16 %v573_v49, %v572_v58  ;;  %v574_v49 = vld [vmem:[%s3766_s27 + $0x111] sm:$0xff] }
 0x153   : > { %v1741_v41 = vpop.f32.mrf.mxu0  ;;  %3459 = vmatmul.msk.bf16.gmra.mxu1 %vm314_vm0, %v591_v17  ;;  %3489 = vmatmul.msk.bf16.gmra.mxu2 %vm314_vm0, %v4123_v46  ;;  %v4186_v5 = vadd.f32 %v1738_v1, %v1477_v10  ;;  %v1568_v46 = vld [vmem:[%s3766_s27 + $0x113] sm:$0xff] }
 0x155   : > { %3521 = vmatmul.msk.bf16.gmra.mxu3 %vm314_vm0, %v1257_v42 }
 0x156   : > { %3549 = vmatmul.msk.bf16.gmra.mxu0 %vm314_vm0, %v1587_v28  ;;  %v1077_v11 = vpop.f32.mrf.mxu2  ;;  %v1588_v28 = vpack.c.bf16 %v1569_v61, %v1568_v46  ;;  %v575_v46 = vld [vmem:[%s3766_s27 + $0x119] sm:$0xff] }
 0x157   : > { %v1146_v15 = vadd.f32 %v1077_v11, %v814_v63 }
 0x158   : > { %v747_v55 = vpop.f32.mrf.mxu1  ;;  %v1419_v16 = vpop.f32.mrf.mxu3 }
 0x159   : > { %v1478_v35 = vadd.f32 %v1409_v0, %v1146_v15  ;;  %v815_v1 = vadd.f32 %v747_v55, %v3964_v22 }
 0x15b   : > { %v1743_v18 = vpop.f32.mrf.mxu0  ;;  %v4192_v45 = vadd.f32 %v1741_v41, %v1478_v35  ;;  %v2568_v41 = vpack.c.bf16 %v2533_v32, %v2532_v30  ;;  %v2535_v30 = vld [vmem:[%s3766_s27 + $0x3d] sm:$0xff] }
 0x15e   : > { %v1079_v17 = vpop.f32.mrf.mxu2 }
 0x15f   : > { %v1147_v25 = vadd.f32 %v1079_v17, %v815_v1  ;;  %v1571_v1 = vld [vmem:[%s3766_s27 + $0x12b] sm:$0xff] }
 0x160   : > { %v750_v27 = vpop.f32.mrf.mxu1  ;;  %v1421_v0 = vpop.f32.mrf.mxu3 }
 0x161   : > { %v1479_v42 = vadd.f32 %v1411_v56, %v1147_v25  ;;  %v816_v63 = vadd.f32 %v750_v27, %v3976_v31  ;;  %v593_v31 = vpack.c.bf16 %v575_v46, %v574_v49  ;;  %v1868_v49 = vld [vmem:[%s3766_s27 + $0x14] sm:$0xff]  ;;  %v2200_v46 = vld [vmem:[%s3766_s27 + $0x24] sm:$0xff] }
 0x163   : > { %v1746_v10 = vpop.f32.mrf.mxu0  ;;  %3460 = vmatmul.msk.bf16.gmra.mxu1 %vm314_vm0, %v592_v14  ;;  %3490 = vmatmul.msk.bf16.gmra.mxu2 %vm314_vm0, %v4143_v48  ;;  %v4203_v22 = vadd.f32 %v1743_v18, %v1479_v42  ;;  %v1570_v48 = vld [vmem:[%s3766_s27 + $0x123] sm:$0xff] }
 0x164   : > { %v1589_v27 = vpack.c.bf16 %v1571_v1, %v1570_v48  ;;  %v2201_v1 = vld [vmem:[%s3766_s27 + $0x2c] sm:$0xff] }
 0x165   : > { %3624 = vmatmul.msk.bf16.vlgmr.msra.gmra.mxu3 %vm314_vm0, %v2568_v41 }
 0x166   : > { %3550 = vmatmul.msk.bf16.gmra.mxu0 %vm314_vm0, %v1588_v28  ;;  %v1082_v11 = vpop.f32.mrf.mxu2  ;;  %v2534_v28 = vld [vmem:[%s3766_s27 + $0x35] sm:$0xff] }
 0x167   : > { %v1148_v56 = vadd.f32 %v1082_v11, %v816_v63 }
 0x168   : > { %v752_v15 = vpop.f32.mrf.mxu1  ;;  %v1424_v58 = vpop.f32.mrf.mxu3 }
 0x169   : > { %v1480_v35 = vadd.f32 %v1414_v20, %v1148_v56  ;;  %v817_v18 = vadd.f32 %v752_v15, %v3994_v39 }
 0x16b   : > { %v1748_v55 = vpop.f32.mrf.mxu0  ;;  %v4209_v61 = vadd.f32 %v1746_v10, %v1480_v35  ;;  %v2569_v10 = vpack.c.bf16 %v2535_v30, %v2534_v28  ;;  %v2537_v30 = vld [vmem:[%s3766_s27 + $0x4d] sm:$0xff] }
 0x16e   : > { %v1084_v17 = vpop.f32.mrf.mxu2 }
 0x16f   : > { %v1149_v14 = vadd.f32 %v1084_v17, %v817_v18  ;;  %v2865_v18 = vld [vmem:[%s3766_s27 + $0x2e] sm:$0xff] }
 0x170   : > { %v755_v25 = vpop.f32.mrf.mxu1  ;;  %v1426_v20 = vpop.f32.mrf.mxu3 }
 0x171   : > { %v1481_v42 = vadd.f32 %v1416_v57, %v1149_v14  ;;  %v818_v41 = vadd.f32 %v755_v25, %v4004_v50 }
 0x173   : > { %v1751_v32 = vpop.f32.mrf.mxu0  ;;  %3461 = vmatmul.msk.bf16.gmra.mxu1 %vm314_vm0, %v593_v31  ;;  %3491 = vmatmul.msk.bf16.gmra.mxu2 %vm314_vm0, %v4163_v60  ;;  %v4220_v39 = vadd.f32 %v1748_v55, %v1481_v42  ;;  %v1869_v60 = vld [vmem:[%s3766_s27 + $0x1c] sm:$0xff]  ;;  %v2864_v55 = vld [vmem:[%s3766_s27 + $0x26] sm:$0xff] }
 0x174   : > { %v1904_v31 = vpack.c.bf16 %v1869_v60, %v1868_v49  ;;  %v2900_v28 = vpack.c.bf16 %v2865_v18, %v2864_v55  ;;  %v2203_v55 = vld [vmem:[%s3766_s27 + $0x3c] sm:$0xff] }
 0x175   : > { %3625 = vmatmul.msk.bf16.gmra.mxu3 %vm314_vm0, %v2569_v10  ;;  %v2866_v18 = vld [vmem:[%s3766_s27 + $0x36] sm:$0xff] }
 0x176   : > { %3551 = vmatmul.msk.bf16.gmra.mxu0 %vm314_vm0, %v1589_v27  ;;  %v1087_v63 = vpop.f32.mrf.mxu2  ;;  %v2236_v27 = vpack.c.bf16 %v2201_v1, %v2200_v46  ;;  %v2202_v46 = vld [vmem:[%s3766_s27 + $0x34] sm:$0xff] }
 0x177   : > { %v1150_v57 = vadd.f32 %v1087_v63, %v818_v41 }
 0x178   : > { %v757_v11 = vpop.f32.mrf.mxu1  ;;  %v1429_v35 = vpop.f32.mrf.mxu3 }
 0x179   : > { %v1482_v15 = vadd.f32 %v1419_v16, %v1150_v57  ;;  %v819_v50 = vadd.f32 %v757_v11, %v4026_v3  ;;  %v2536_v16 = vld [vmem:[%s3766_s27 + $0x45] sm:$0xff] }
 0x17b   : > { %v1753_v56 = vpop.f32.mrf.mxu0  ;;  %v4227_v48 = vadd.f32 %v1751_v32, %v1482_v15  ;;  %v2570_v32 = vpack.c.bf16 %v2537_v30, %v2536_v16  ;;  %v2539_v16 = vld [vmem:[%s3766_s27 + $0x5d] sm:$0xff] }
 0x17e   : > { %v1089_v17 = vpop.f32.mrf.mxu2 }
 0x17f   : > { %v1151_v14 = vadd.f32 %v1089_v17, %v819_v50  ;;  %v2867_v50 = vld [vmem:[%s3766_s27 + $0x3e] sm:$0xff] }
 0x180   : > { %v760_v25 = vpop.f32.mrf.mxu1  ;;  %v1431_v41 = vpop.f32.mrf.mxu3 }
 0x181   : > { %v1483_v10 = vadd.f32 %v1421_v0, %v1151_v14  ;;  %v820_v63 = vadd.f32 %v760_v25, %v3902_v51  ;;  %v2237_v14 = vpack.c.bf16 %v2203_v55, %v2202_v46  ;;  %v2901_v25 = vpack.c.bf16 %v2867_v50, %v2866_v18  ;;  %v2205_v55 = vld [vmem:[%s3766_s27 + $0x4c] sm:$0xff] }
 0x182   : > { %v2868_v18 = vld [vmem:[%s3766_s27 + $0x46] sm:$0xff]  ;;  %v2869_v50 = vld [vmem:[%s3766_s27 + $0x4e] sm:$0xff] }
 0x183   : > { %v1756_v42 = vpop.f32.mrf.mxu0  ;;  %3564 = vmatmul.msk.bf16.vlgmr.msra.gmra.mxu1 %vm314_vm0, %v1904_v31  ;;  %3594 = vmatmul.msk.bf16.vlgmr.msra.gmra.mxu2 %vm314_vm0, %v2236_v27  ;;  %v4238_v3 = vadd.f32 %v1753_v56, %v1483_v10 }
 0x185   : > { %3626 = vmatmul.msk.bf16.gmra.mxu3 %vm314_vm0, %v2570_v32 }
 0x186   : > { %3654 = vmatmul.msk.bf16.vlgmr.msra.gmra.mxu0 %vm314_vm0, %v2900_v28  ;;  %v1092_v57 = vpop.f32.mrf.mxu2  ;;  %v2538_v28 = vld [vmem:[%s3766_s27 + $0x55] sm:$0xff] }
 0x187   : > { %v1152_v11 = vadd.f32 %v1092_v57, %v820_v63 }
 0x188   : > { %v762_v0 = vpop.f32.mrf.mxu1  ;;  %v1434_v60 = vpop.f32.mrf.mxu3 }
 0x189   : > { %v1484_v49 = vadd.f32 %v1424_v58, %v1152_v11  ;;  %v821_v56 = vadd.f32 %v762_v0, %v3916_v59 }
 0x18b   : > { %v1758_v15 = vpop.f32.mrf.mxu0  ;;  %v4243_v1 = vadd.f32 %v1756_v42, %v1484_v49  ;;  %v2571_v42 = vpack.c.bf16 %v2539_v16, %v2538_v28  ;;  %v2204_v49 = vld [vmem:[%s3766_s27 + $0x44] sm:$0xff]  ;;  %v2541_v28 = vld [vmem:[%s3766_s27 + $0x6d] sm:$0xff] }
 0x18e   : > { %v1094_v17 = vpop.f32.mrf.mxu2 }
 0x18f   : > { %v1153_v51 = vadd.f32 %v1094_v17, %v821_v56 }
 0x190   : > { %v765_v31 = vpop.f32.mrf.mxu1  ;;  %v1436_v58 = vpop.f32.mrf.mxu3 }
 0x191   : > { %v1485_v10 = vadd.f32 %v1426_v20, %v1153_v51  ;;  %v822_v32 = vadd.f32 %v765_v31, %v3931_v4  ;;  %v2238_v51 = vpack.c.bf16 %v2205_v55, %v2204_v49  ;;  %v2902_v31 = vpack.c.bf16 %v2869_v50, %v2868_v18  ;;  %v2207_v55 = vld [vmem:[%s3766_s27 + $0x5c] sm:$0xff] }
 0x192   : > { %v2870_v18 = vld [vmem:[%s3766_s27 + $0x56] sm:$0xff]  ;;  %v2871_v50 = vld [vmem:[%s3766_s27 + $0x5e] sm:$0xff] }
 0x193   : > { %v1761_v30 = vpop.f32.mrf.mxu0  ;;  %3565 = vmatmul.msk.bf16.gmra.mxu1 %vm314_vm0, %v2236_v27  ;;  %3595 = vmatmul.msk.bf16.gmra.mxu2 %vm314_vm0, %v2237_v14  ;;  %v4254_v59 = vadd.f32 %v1758_v15, %v1485_v10 }
 0x195   : > { %3627 = vmatmul.msk.bf16.gmra.mxu3 %vm314_vm0, %v2571_v42 }
 0x196   : > { %3655 = vmatmul.msk.bf16.gmra.mxu0 %vm314_vm0, %v2901_v25  ;;  %v1097_v63 = vpop.f32.mrf.mxu2  ;;  %v2540_v25 = vld [vmem:[%s3766_s27 + $0x65] sm:$0xff] }
 0x197   : > { %v1154_v57 = vadd.f32 %v1097_v63, %v822_v32 }
 0x198   : > { %v767_v20 = vpop.f32.mrf.mxu1  ;;  %v1439_v0 = vpop.f32.mrf.mxu3 }
 0x199   : > { %v1486_v27 = vadd.f32 %v1429_v35, %v1154_v57  ;;  %v823_v15 = vadd.f32 %v767_v20, %v3945_v12 }
 0x19b   : > { %v1763_v11 = vpop.f32.mrf.mxu0  ;;  %v4259_v46 = vadd.f32 %v1761_v30, %v1486_v27  ;;  %v2572_v30 = vpack.c.bf16 %v2541_v28, %v2540_v25  ;;  %v2206_v27 = vld [vmem:[%s3766_s27 + $0x54] sm:$0xff]  ;;  %v2543_v25 = vld [vmem:[%s3766_s27 + $0x7d] sm:$0xff] }
 0x19e   : > { %v1099_v56 = vpop.f32.mrf.mxu2 }
 0x19f   : > { %v1155_v4 = vadd.f32 %v1099_v56, %v823_v15 }
 0x1a0   : > { %v770_v17 = vpop.f32.mrf.mxu1  ;;  %v1441_v35 = vpop.f32.mrf.mxu3 }
 0x1a1   : > { %v1487_v10 = vadd.f32 %v1431_v41, %v1155_v4  ;;  %v824_v42 = vadd.f32 %v770_v17, %v3960_v21  ;;  %v2239_v4 = vpack.c.bf16 %v2207_v55, %v2206_v27  ;;  %v2903_v17 = vpack.c.bf16 %v2871_v50, %v2870_v18  ;;  %v2209_v55 = vld [vmem:[%s3766_s27 + $0x6c] sm:$0xff] }
 0x1a2   : > { %v2872_v18 = vld [vmem:[%s3766_s27 + $0x66] sm:$0xff]  ;;  %v2873_v50 = vld [vmem:[%s3766_s27 + $0x6e] sm:$0xff] }
 0x1a3   : > { %v1766_v16 = vpop.f32.mrf.mxu0  ;;  %3566 = vmatmul.msk.bf16.gmra.mxu1 %vm314_vm0, %v2237_v14  ;;  %3596 = vmatmul.msk.bf16.gmra.mxu2 %vm314_vm0, %v2238_v51  ;;  %v4270_v12 = vadd.f32 %v1763_v11, %v1487_v10 }
 0x1a5   : > { %3628 = vmatmul.msk.bf16.gmra.mxu3 %vm314_vm0, %v2572_v30 }
 0x1a6   : > { %3656 = vmatmul.msk.bf16.gmra.mxu0 %vm314_vm0, %v2902_v31  ;;  %v1102_v32 = vpop.f32.mrf.mxu2  ;;  %v2542_v31 = vld [vmem:[%s3766_s27 + $0x75] sm:$0xff] }
 0x1a7   : > { %v1156_v63 = vadd.f32 %v1102_v32, %v824_v42 }
 0x1a8   : > { %v772_v41 = vpop.f32.mrf.mxu1  ;;  %v1444_v20 = vpop.f32.mrf.mxu3 }
 0x1a9   : > { %v1488_v14 = vadd.f32 %v1434_v60, %v1156_v63  ;;  %v825_v11 = vadd.f32 %v772_v41, %v3974_v29 }
 0x1ab   : > { %v1768_v57 = vpop.f32.mrf.mxu0  ;;  %v4275_v49 = vadd.f32 %v1766_v16, %v1488_v14  ;;  %v2573_v16 = vpack.c.bf16 %v2543_v25, %v2542_v31  ;;  %v2208_v14 = vld [vmem:[%s3766_s27 + $0x64] sm:$0xff]  ;;  %v2545_v31 = vld [vmem:[%s3766_s27 + $0x8d] sm:$0xff] }
 0x1ae   : > { %v1104_v15 = vpop.f32.mrf.mxu2 }
 0x1af   : > { %v1157_v21 = vadd.f32 %v1104_v15, %v825_v11 }
 0x1b0   : > { %v775_v56 = vpop.f32.mrf.mxu1  ;;  %v1446_v60 = vpop.f32.mrf.mxu3 }
 0x1b1   : > { %v1489_v10 = vadd.f32 %v1436_v58, %v1157_v21  ;;  %v826_v30 = vadd.f32 %v775_v56, %v3990_v38  ;;  %v2240_v21 = vpack.c.bf16 %v2209_v55, %v2208_v14  ;;  %v2904_v56 = vpack.c.bf16 %v2873_v50, %v2872_v18  ;;  %v2211_v55 = vld [vmem:[%s3766_s27 + $0x7c] sm:$0xff] }
 0x1b2   : > { %v2874_v18 = vld [vmem:[%s3766_s27 + $0x76] sm:$0xff]  ;;  %v2875_v50 = vld [vmem:[%s3766_s27 + $0x7e] sm:$0xff] }
 0x1b3   : > { %v1771_v28 = vpop.f32.mrf.mxu0  ;;  %3567 = vmatmul.msk.bf16.gmra.mxu1 %vm314_vm0, %v2238_v51  ;;  %3597 = vmatmul.msk.bf16.gmra.mxu2 %vm314_vm0, %v2239_v4  ;;  %v4286_v29 = vadd.f32 %v1768_v57, %v1489_v10 }
 0x1b5   : > { %3629 = vmatmul.msk.bf16.gmra.mxu3 %vm314_vm0, %v2573_v16 }
 0x1b6   : > { %3657 = vmatmul.msk.bf16.gmra.mxu0 %vm314_vm0, %v2903_v17  ;;  %v1107_v42 = vpop.f32.mrf.mxu2  ;;  %v2544_v17 = vld [vmem:[%s3766_s27 + $0x85] sm:$0xff] }
 0x1b7   : > { %v1158_v32 = vadd.f32 %v1107_v42, %v826_v30 }
 0x1b8   : > { %v777_v58 = vpop.f32.mrf.mxu1  ;;  %v1449_v41 = vpop.f32.mrf.mxu3 }
 0x1b9   : > { %v1490_v51 = vadd.f32 %v1439_v0, %v1158_v32  ;;  %v827_v57 = vadd.f32 %v777_v58, %v4002_v47 }
 0x1bb   : > { %v1773_v63 = vpop.f32.mrf.mxu0  ;;  %v4291_v27 = vadd.f32 %v1771_v28, %v1490_v51  ;;  %v2574_v28 = vpack.c.bf16 %v2545_v31, %v2544_v17  ;;  %v2210_v51 = vld [vmem:[%s3766_s27 + $0x74] sm:$0xff]  ;;  %v2547_v17 = vld [vmem:[%s3766_s27 + $0x9d] sm:$0xff] }
 0x1be   : > { %v1109_v11 = vpop.f32.mrf.mxu2 }
 0x1bf   : > { %v1159_v38 = vadd.f32 %v1109_v11, %v827_v57 }
 0x1c0   : > { %v780_v15 = vpop.f32.mrf.mxu1  ;;  %v1451_v0 = vpop.f32.mrf.mxu3 }
 0x1c1   : > { %v1491_v10 = vadd.f32 %v1441_v35, %v1159_v38  ;;  %v828_v16 = vadd.f32 %v780_v15, %v4022_v8  ;;  %v2241_v38 = vpack.c.bf16 %v2211_v55, %v2210_v51  ;;  %v2905_v15 = vpack.c.bf16 %v2875_v50, %v2874_v18  ;;  %v2213_v55 = vld [vmem:[%s3766_s27 + $0x8c] sm:$0xff] }
 0x1c2   : > { %v2876_v18 = vld [vmem:[%s3766_s27 + $0x86] sm:$0xff]  ;;  %v2877_v50 = vld [vmem:[%s3766_s27 + $0x8e] sm:$0xff] }
 0x1c3   : > { %v1776_v25 = vpop.f32.mrf.mxu0  ;;  %3568 = vmatmul.msk.bf16.gmra.mxu1 %vm314_vm0, %v2239_v4  ;;  %3598 = vmatmul.msk.bf16.gmra.mxu2 %vm314_vm0, %v2240_v21  ;;  %v4302_v47 = vadd.f32 %v1773_v63, %v1491_v10 }
 0x1c5   : > { %3630 = vmatmul.msk.bf16.gmra.mxu3 %vm314_vm0, %v2574_v28 }
 0x1c6   : > { %3658 = vmatmul.msk.bf16.gmra.mxu0 %vm314_vm0, %v2904_v56  ;;  %v1112_v30 = vpop.f32.mrf.mxu2  ;;  %v2546_v56 = vld [vmem:[%s3766_s27 + $0x95] sm:$0xff] }
 0x1c7   : > { %v1160_v42 = vadd.f32 %v1112_v30, %v828_v16 }
 0x1c8   : > { %v782_v35 = vpop.f32.mrf.mxu1  ;;  %v1454_v58 = vpop.f32.mrf.mxu3 }
 0x1c9   : > { %v1492_v4 = vadd.f32 %v1444_v20, %v1160_v42  ;;  %v829_v63 = vadd.f32 %v782_v35, %v4040_v26 }
 0x1cb   : > { %v1778_v32 = vpop.f32.mrf.mxu0  ;;  %v4307_v14 = vadd.f32 %v1776_v25, %v1492_v4  ;;  %v2575_v25 = vpack.c.bf16 %v2547_v17, %v2546_v56  ;;  %v2212_v4 = vld [vmem:[%s3766_s27 + $0x84] sm:$0xff]  ;;  %v2549_v56 = vld [vmem:[%s3766_s27 + $0xad] sm:$0xff] }
 0x1ce   : > { %v1114_v57 = vpop.f32.mrf.mxu2 }
 0x1cf   : > { %v1161_v8 = vadd.f32 %v1114_v57, %v829_v63 }
 0x1d0   : > { %v785_v11 = vpop.f32.mrf.mxu1  ;;  %v1456_v20 = vpop.f32.mrf.mxu3 }
 0x1d1   : > { %v1493_v10 = vadd.f32 %v1446_v60, %v1161_v8  ;;  %v830_v28 = vadd.f32 %v785_v11, %v3910_v54  ;;  %v2242_v8 = vpack.c.bf16 %v2213_v55, %v2212_v4  ;;  %v2906_v11 = vpack.c.bf16 %v2877_v50, %v2876_v18  ;;  %v2215_v55 = vld [vmem:[%s3766_s27 + $0x9c] sm:$0xff] }
 0x1d2   : > { %v2878_v18 = vld [vmem:[%s3766_s27 + $0x96] sm:$0xff]  ;;  %v2879_v50 = vld [vmem:[%s3766_s27 + $0x9e] sm:$0xff] }
 0x1d3   : > { %v1781_v31 = vpop.f32.mrf.mxu0  ;;  %3569 = vmatmul.msk.bf16.gmra.mxu1 %vm314_vm0, %v2240_v21  ;;  %3599 = vmatmul.msk.bf16.gmra.mxu2 %vm314_vm0, %v2241_v38  ;;  %v4318_v26 = vadd.f32 %v1778_v32, %v1493_v10 }
 0x1d5   : > { %3631 = vmatmul.msk.bf16.gmra.mxu3 %vm314_vm0, %v2575_v25 }
 0x1d6   : > { %3659 = vmatmul.msk.bf16.gmra.mxu0 %vm314_vm0, %v2905_v15  ;;  %v1117_v16 = vpop.f32.mrf.mxu2  ;;  %v2548_v15 = vld [vmem:[%s3766_s27 + $0xa5] sm:$0xff] }
 0x1d7   : > { %v1162_v30 = vadd.f32 %v1117_v16, %v830_v28 }
 0x1d8   : > { %v787_v60 = vpop.f32.mrf.mxu1  ;;  %v1459_v35 = vpop.f32.mrf.mxu3 }
 0x1d9   : > { %v1494_v21 = vadd.f32 %v1449_v41, %v1162_v30  ;;  %v831_v32 = vadd.f32 %v787_v60, %v3924_v2 }
 0x1db   : > { %v1783_v42 = vpop.f32.mrf.mxu0  ;;  %v4323_v51 = vadd.f32 %v1781_v31, %v1494_v21  ;;  %v2576_v31 = vpack.c.bf16 %v2549_v56, %v2548_v15  ;;  %v2214_v21 = vld [vmem:[%s3766_s27 + $0x94] sm:$0xff]  ;;  %v2551_v15 = vld [vmem:[%s3766_s27 + $0xbd] sm:$0xff] }
 0x1de   : > { %v1119_v63 = vpop.f32.mrf.mxu2 }
 0x1df   : > { %v1163_v54 = vadd.f32 %v1119_v63, %v831_v32 }
 0x1e0   : > { %v790_v57 = vpop.f32.mrf.mxu1  ;;  %v1461_v41 = vpop.f32.mrf.mxu3 }
 0x1e1   : > { %v1495_v10 = vadd.f32 %v1451_v0, %v1163_v54  ;;  %v832_v25 = vadd.f32 %v790_v57, %v3939_v7  ;;  %v2243_v54 = vpack.c.bf16 %v2215_v55, %v2214_v21  ;;  %v2907_v57 = vpack.c.bf16 %v2879_v50, %v2878_v18  ;;  %v2217_v55 = vld [vmem:[%s3766_s27 + $0xac] sm:$0xff] }
 0x1e2   : > { %v2880_v18 = vld [vmem:[%s3766_s27 + $0xa6] sm:$0xff] }
 0x1e3   : > { %v1786_v17 = vpop.f32.mrf.mxu0  ;;  %3570 = vmatmul.msk.bf16.gmra.mxu1 %vm314_vm0, %v2241_v38  ;;  %3600 = vmatmul.msk.bf16.gmra.mxu2 %vm314_vm0, %v2242_v8  ;;  %v4334_v2 = vadd.f32 %v1783_v42, %v1495_v10 }
 0x1e5   : > { %3632 = vmatmul.msk.bf16.gmra.mxu3 %vm314_vm0, %v2576_v31 }
 0x1e6   : > { %3660 = vmatmul.msk.bf16.gmra.mxu0 %vm314_vm0, %v2906_v11  ;;  %v1122_v28 = vpop.f32.mrf.mxu2  ;;  %v2550_v11 = vld [vmem:[%s3766_s27 + $0xb5] sm:$0xff] }
 0x1e7   : > { %v1164_v16 = vadd.f32 %v1122_v28, %v832_v25 }
 0x1e8   : > { %v792_v0 = vpop.f32.mrf.mxu1  ;;  %v2702_v60 = vpop.f32.mrf.mxu3 }
 0x1e9   : > { %v1496_v38 = vadd.f32 %v1454_v58, %v1164_v16  ;;  %v833_v42 = vadd.f32 %v792_v0, %v3953_v19 }
 0x1eb   : > { %v1788_v30 = vpop.f32.mrf.mxu0  ;;  %v4339_v4 = vadd.f32 %v1786_v17, %v1496_v38  ;;  %v2577_v17 = vpack.c.bf16 %v2551_v15, %v2550_v11  ;;  %v2216_v38 = vld [vmem:[%s3766_s27 + $0xa4] sm:$0xff]  ;;  %v2553_v11 = vld [vmem:[%s3766_s27 + $0xcd] sm:$0xff] }
 0x1ee   : > { %v1124_v32 = vpop.f32.mrf.mxu2 }
 0x1ef   : > { %v1165_v7 = vadd.f32 %v1124_v32, %v833_v42 }
 0x1f0   : > { %v795_v63 = vpop.f32.mrf.mxu1  ;;  %v4347_v58 = vpop.f32.mrf.mxu3 }
 0x1f1   : > { %v1497_v10 = vadd.f32 %v1456_v20, %v1165_v7  ;;  %v834_v31 = vadd.f32 %v795_v63, %v3968_v24  ;;  %v2244_v7 = vpack.c.bf16 %v2217_v55, %v2216_v38  ;;  %v2218_v38 = vld [vmem:[%s3766_s27 + $0xb4] sm:$0xff] }
 0x1f2   : > { %v2882_v55 = vld [vmem:[%s3766_s27 + $0xb6] sm:$0xff] }
 0x1f3   : > { %v1791_v56 = vpop.f32.mrf.mxu0  ;;  %3571 = vmatmul.msk.bf16.gmra.mxu1 %vm314_vm0, %v2242_v8  ;;  %3601 = vmatmul.msk.bf16.gmra.mxu2 %vm314_vm0, %v2243_v54  ;;  %v4352_v19 = vadd.f32 %v1788_v30, %v1497_v10  ;;  %v2881_v30 = vld [vmem:[%s3766_s27 + $0xae] sm:$0xff] }
 0x1f4   : > { %v2908_v63 = vpack.c.bf16 %v2881_v30, %v2880_v18  ;;  %v2883_v18 = vld [vmem:[%s3766_s27 + $0xbe] sm:$0xff] }
 0x1f5   : > { %3633 = vmatmul.msk.bf16.gmra.mxu3 %vm314_vm0, %v2577_v17 }
 0x1f6   : > { %3661 = vmatmul.msk.bf16.gmra.mxu0 %vm314_vm0, %v2907_v57  ;;  %v1127_v25 = vpop.f32.mrf.mxu2  ;;  %v2552_v57 = vld [vmem:[%s3766_s27 + $0xc5] sm:$0xff] }
 0x1f7   : > { %v1166_v20 = vadd.f32 %v1127_v25, %v834_v31 }
 0x1f8   : > { %v797_v28 = vpop.f32.mrf.mxu1  ;;  %v4356_v0 = vpop.f32.mrf.mxu3 }
 0x1f9   : > { %v1498_v8 = vadd.f32 %v1459_v35, %v1166_v20  ;;  %v835_v50 = vadd.f32 %v797_v28, %v3982_v36  ;;  %v4379_v28 = vld [vmem:[%s4628_s2] ss:$0 sm:$0xff] }
 0x1fb   : > { %v1793_v16 = vpop.f32.mrf.mxu0  ;;  %v4359_v21 = vadd.f32 %v1791_v56, %v1498_v8  ;;  %v2578_v56 = vpack.c.bf16 %v2553_v11, %v2552_v57  ;;  %v2909_v57 = vpack.c.bf16 %v2883_v18, %v2882_v55  ;;  %v2554_v11 = vld [vmem:[%s3766_s27 + $0xd5] sm:$0xff]  ;;  %v2220_v18 = vld [vmem:[%s3766_s27 + $0xc4] sm:$0xff] }
 0x1fe   : > { %v1129_v24 = vpop.f32.mrf.mxu2 }
 0x1ff   : > { %v1167_v42 = vadd.f32 %v1129_v24, %v835_v50 }
 0x200   : > { %v2038_v32 = vpop.f32.mrf.mxu1  ;;  %v4367_v35 = vpop.f32.mrf.mxu3 }
 0x201   : > { %v1499_v10 = vadd.f32 %v1461_v41, %v1167_v42  ;;  %v2128_v17 = vadd.f32 %v2038_v32, %v4055_v13  ;;  %v2219_v13 = vld [vmem:[%s3766_s27 + $0xbc] sm:$0xff] }
 0x203   : > { %v3034_v15 = vpop.f32.mrf.mxu0  ;;  %3572 = vmatmul.msk.bf16.gmra.mxu1 %vm314_vm0, %v2243_v54  ;;  %3602 = vmatmul.msk.bf16.gmra.mxu2 %vm314_vm0, %v2244_v7  ;;  %v4372_v36 = vadd.f32 %v1793_v16, %v1499_v10 }
 0x205   : > { %3634 = vmatmul.msk.bf16.gmra.mxu3 %vm314_vm0, %v2578_v56 }
 0x206   : > { %3662 = vmatmul.msk.bf16.gmra.mxu0 %vm314_vm0, %v2908_v63  ;;  %v2370_v31 = vpop.f32.mrf.mxu2  ;;  %v2245_v63 = vpack.c.bf16 %v2219_v13, %v2218_v38 }
 0x207   : > { %v2460_v41 = vadd.f32 %v2370_v31, %v2128_v17 }
 0x208   : > { %v2040_v25 = vpop.f32.mrf.mxu1  ;;  %v4381_v8 = vpop.f32.mrf.mxu3 }
 0x209   : > { %v2792_v54 = vadd.f32 %v2702_v60, %v2460_v41  ;;  %v2129_v50 = vadd.f32 %v2040_v25, %v4068_v53 }
 0x20b   : > { %v3036_v20 = vpop.f32.mrf.mxu0  ;;  %v3124_v16 = vadd.f32 %v3034_v15, %v2792_v54  ;;  %v2555_v15 = vld [vmem:[%s3766_s27 + $0xdd] sm:$0xff] }
 0x20c   : > { %v2579_v17 = vpack.c.bf16 %v2555_v15, %v2554_v11 }
 0x20d   : > { %v3236_v30 = vadd.f32 %v4379_v28, %v3124_v16 }
 0x20e   : > { %v2372_v60 = vpop.f32.mrf.mxu2 }
 0x20f   : > { %v3272_v24 = vmax.f32 %v3236_v30, 0.0  ;;  %v2461_v42 = vadd.f32 %v2372_v60, %v2129_v50  ;;  %v2221_v30 = vld [vmem:[%s3766_s27 + $0xcc] sm:$0xff] }
 0x210   : > { %v2043_v32 = vpop.f32.mrf.mxu1  ;;  %v4399_v53 = vpop.f32.mrf.mxu3  ;;  %v2884_v50 = vld [vmem:[%s3766_s27 + $0xc6] sm:$0xff]  ;;  %v2246_v15 = vpack.c.bf16 %v2221_v30, %v2220_v18  ;;  %v2222_v30 = vld [vmem:[%s3766_s27 + $0xd4] sm:$0xff] }
 0x211   : > { %3308 = vst [vmem:[%s4393_s8] sm:$0xff] %v3272_v24  ;;  %v2793_v56 = vadd.f32 %v4347_v58, %v2461_v42  ;;  %v2130_v25 = vadd.f32 %v2043_v32, %v4075_v37  ;;  %v2885_v37 = vld [vmem:[%s3766_s27 + $0xce] sm:$0xff] }
 0x213   : > { %v3039_v10 = vpop.f32.mrf.mxu0  ;;  %3573 = vmatmul.msk.bf16.gmra.mxu1 %vm314_vm0, %v2244_v7  ;;  %v3125_v31 = vadd.f32 %v3036_v20, %v2793_v56  ;;  %3603 = vmatmul.msk.bf16.gmra.mxu2 %vm314_vm0, %v2245_v63  ;;  %v2910_v56 = vpack.c.bf16 %v2885_v37, %v2884_v50  ;;  %v2223_v50 = vld [vmem:[%s3766_s27 + $0xdc] sm:$0xff] }
 0x214   : > { %v2886_v37 = vld [vmem:[%s3766_s27 + $0xd6] sm:$0xff] }
 0x215   : > { %v3237_v41 = vadd.f32 %v4379_v28, %v3125_v31  ;;  %3635 = vmatmul.msk.bf16.gmra.mxu3 %vm314_vm0, %v2579_v17  ;;  %v2557_v17 = vld [vmem:[%s3766_s27 + $0xed] sm:$0xff] }
 0x216   : > { %3663 = vmatmul.msk.bf16.gmra.mxu0 %vm314_vm0, %v2909_v57  ;;  %v2375_v54 = vpop.f32.mrf.mxu2 }
 0x217   : > { %v3273_v58 = vmax.f32 %v3237_v41, 0.0  ;;  %v2462_v16 = vadd.f32 %v2375_v54, %v2130_v25 }
 0x218   : > { %v2045_v7 = vpop.f32.mrf.mxu1  ;;  %v4409_v13 = vpop.f32.mrf.mxu3 }
 0x219   : > { %3309 = vst [vmem:[%s4393_s8 + $0x8] sm:$0xff] %v3273_v58  ;;  %v2794_v20 = vadd.f32 %v4356_v0, %v2462_v16  ;;  %v2131_v24 = vadd.f32 %v2045_v7, %v4088_v6  ;;  %v2556_v0 = vld [vmem:[%s3766_s27 + $0xe5] sm:$0xff] }
 0x21a   : > { %v2580_v25 = vpack.c.bf16 %v2557_v17, %v2556_v0  ;;  %v2559_v17 = vld [vmem:[%s3766_s27 + $0xfd] sm:$0xff] }
 0x21b   : > { %v3041_v38 = vpop.f32.mrf.mxu0  ;;  %v3126_v55 = vadd.f32 %v3039_v10, %v2794_v20 }
 0x21d   : > { %v3238_v60 = vadd.f32 %v4379_v28, %v3126_v55 }
 0x21e   : > { %v2377_v42 = vpop.f32.mrf.mxu2 }
 0x21f   : > { %v3274_v32 = vmax.f32 %v3238_v60, 0.0  ;;  %v2463_v57 = vadd.f32 %v2377_v42, %v2131_v24 }
 0x220   : > { %v2048_v11 = vpop.f32.mrf.mxu1  ;;  %v4421_v41 = vpop.f32.mrf.mxu3 }
 0x221   : > { %3310 = vst [vmem:[%s4393_s8 + $0x10] sm:$0xff] %v3274_v32  ;;  %v2795_v10 = vadd.f32 %v4367_v35, %v2463_v57  ;;  %v2132_v58 = vadd.f32 %v2048_v11, %v4095_v62  ;;  %v2887_v62 = vld [vmem:[%s3766_s27 + $0xde] sm:$0xff] }
 0x222   : > { %v2911_v0 = vpack.c.bf16 %v2887_v62, %v2886_v37 }
 0x223   : > { %v3044_v31 = vpop.f32.mrf.mxu0  ;;  %3574 = vmatmul.msk.bf16.gmra.mxu1 %vm314_vm0, %v2245_v63  ;;  %v3127_v6 = vadd.f32 %v3041_v38, %v2795_v10  ;;  %3604 = vmatmul.msk.bf16.gmra.mxu2 %vm314_vm0, %v2246_v15 }
 0x225   : > { %v3239_v54 = vadd.f32 %v4379_v28, %v3127_v6  ;;  %3636 = vmatmul.msk.bf16.gmra.mxu3 %vm314_vm0, %v2580_v25 }
 0x226   : > { %3664 = vmatmul.msk.bf16.gmra.mxu0 %vm314_vm0, %v2910_v56  ;;  %v2380_v16 = vpop.f32.mrf.mxu2  ;;  %v2247_v56 = vpack.c.bf16 %v2223_v50, %v2222_v30  ;;  %v2225_v30 = vld [vmem:[%s3766_s27 + $0xec] sm:$0xff] }
 0x227   : > { %v3275_v35 = vmax.f32 %v3239_v54, 0.0  ;;  %v2464_v7 = vadd.f32 %v2380_v16, %v2132_v58  ;;  %v2888_v50 = vld [vmem:[%s3766_s27 + $0xe6] sm:$0xff] }
 0x228   : > { %v2050_v63 = vpop.f32.mrf.mxu1  ;;  %v4431_v55 = vpop.f32.mrf.mxu3 }
 0x229   : > { %3311 = vst [vmem:[%s4393_s8 + $0x18] sm:$0xff] %v3275_v35  ;;  %v2796_v38 = vadd.f32 %v4381_v8, %v2464_v7  ;;  %v2133_v24 = vadd.f32 %v2050_v63, %v4108_v23  ;;  %v2558_v8 = vld [vmem:[%s3766_s27 + $0xf5] sm:$0xff] }
 0x22a   : > { %v2581_v6 = vpack.c.bf16 %v2559_v17, %v2558_v8 }
 0x22b   : > { %v3046_v20 = vpop.f32.mrf.mxu0  ;;  %v3128_v18 = vadd.f32 %v3044_v31, %v2796_v38 }
 0x22d   : > { %v3240_v60 = vadd.f32 %v4379_v28, %v3128_v18  ;;  %v2224_v18 = vld [vmem:[%s3766_s27 + $0xe4] sm:$0xff] }
 0x22e   : > { %v2382_v42 = vpop.f32.mrf.mxu2 }
 0x22f   : > { %v3276_v32 = vmax.f32 %v3240_v60, 0.0  ;;  %v2465_v57 = vadd.f32 %v2382_v42, %v2133_v24 }
 0x230   : > { %v2053_v11 = vpop.f32.mrf.mxu1  ;;  %v4443_v25 = vpop.f32.mrf.mxu3 }
 0x231   : > { %3312 = vst [vmem:[%s4393_s8 + $0x20] sm:$0xff] %v3276_v32  ;;  %v2797_v31 = vadd.f32 %v4399_v53, %v2465_v57  ;;  %v2134_v58 = vadd.f32 %v2053_v11, %v4115_v43  ;;  %v2889_v43 = vld [vmem:[%s3766_s27 + $0xee] sm:$0xff]  ;;  %v2248_v57 = vpack.c.bf16 %v2225_v30, %v2224_v18 }
 0x232   : > { %v2912_v11 = vpack.c.bf16 %v2889_v43, %v2888_v50 }
 0x233   : > { %v3049_v10 = vpop.f32.mrf.mxu0  ;;  %3575 = vmatmul.msk.bf16.gmra.mxu1 %vm314_vm0, %v2246_v15  ;;  %v3129_v23 = vadd.f32 %v3046_v20, %v2797_v31  ;;  %3605 = vmatmul.msk.bf16.gmra.mxu2 %vm314_vm0, %v2247_v56 }
 0x235   : > { %v3241_v54 = vadd.f32 %v4379_v28, %v3129_v23  ;;  %3637 = vmatmul.msk.bf16.gmra.mxu3 %vm314_vm0, %v2581_v6 }
 0x236   : > { %3665 = vmatmul.msk.bf16.gmra.mxu0 %vm314_vm0, %v2911_v0  ;;  %v2385_v16 = vpop.f32.mrf.mxu2  ;;  %v2561_v0 = vld [vmem:[%s3766_s27 + $0x10d] sm:$0xff] }
 0x237   : > { %v3277_v53 = vmax.f32 %v3241_v54, 0.0  ;;  %v2466_v35 = vadd.f32 %v2385_v16, %v2134_v58 }
 0x238   : > { %v2055_v15 = vpop.f32.mrf.mxu1  ;;  %v4453_v20 = vpop.f32.mrf.mxu3 }
 0x239   : > { %3313 = vst [vmem:[%s4393_s8 + $0x28] sm:$0xff] %v3277_v53  ;;  %v2798_v63 = vadd.f32 %v4409_v13, %v2466_v35  ;;  %v2135_v62 = vadd.f32 %v2055_v15, %v4128_v40  ;;  %v2560_v13 = vld [vmem:[%s3766_s27 + $0x105] sm:$0xff] }
 0x23a   : > { %v2582_v31 = vpack.c.bf16 %v2561_v0, %v2560_v13 }
 0x23b   : > { %v3051_v7 = vpop.f32.mrf.mxu0  ;;  %v3130_v38 = vadd.f32 %v3049_v10, %v2798_v63  ;;  %v2227_v63 = vld [vmem:[%s3766_s27 + $0xfc] sm:$0xff] }
 0x23d   : > { %v3242_v37 = vadd.f32 %v4379_v28, %v3130_v38  ;;  %v2890_v38 = vld [vmem:[%s3766_s27 + $0xf6] sm:$0xff] }
 0x23e   : > { %v2387_v60 = vpop.f32.mrf.mxu2 }
 0x23f   : > { %v3278_v24 = vmax.f32 %v3242_v37, 0.0  ;;  %v2467_v42 = vadd.f32 %v2387_v60, %v2135_v62 }
 0x240   : > { %v2058_v32 = vpop.f32.mrf.mxu1  ;;  %v4465_v10 = vpop.f32.mrf.mxu3 }
 0x241   : > { %3314 = vst [vmem:[%s4393_s8 + $0x30] sm:$0xff] %v3278_v24  ;;  %v2799_v17 = vadd.f32 %v4421_v41, %v2467_v42  ;;  %v2136_v23 = vadd.f32 %v2058_v32, %v4135_v34  ;;  %v2891_v34 = vld [vmem:[%s3766_s27 + $0xfe] sm:$0xff] }
 0x242   : > { %v2913_v24 = vpack.c.bf16 %v2891_v34, %v2890_v38  ;;  %v2563_v42 = vld [vmem:[%s3766_s27 + $0x11d] sm:$0xff] }
 0x243   : > { %v3054_v8 = vpop.f32.mrf.mxu0  ;;  %3576 = vmatmul.msk.bf16.gmra.mxu1 %vm314_vm0, %v2247_v56  ;;  %v3131_v40 = vadd.f32 %v3051_v7, %v2799_v17  ;;  %3606 = vmatmul.msk.bf16.gmra.mxu2 %vm314_vm0, %v2248_v57  ;;  %v2226_v7 = vld [vmem:[%s3766_s27 + $0xf4] sm:$0xff] }
 0x244   : > { %v2249_v60 = vpack.c.bf16 %v2227_v63, %v2226_v7 }
 0x245   : > { %v3243_v6 = vadd.f32 %v4379_v28, %v3131_v40  ;;  %3638 = vmatmul.msk.bf16.gmra.mxu3 %vm314_vm0, %v2582_v31 }
 0x246   : > { %3666 = vmatmul.msk.bf16.gmra.mxu0 %vm314_vm0, %v2912_v11  ;;  %v2390_v54 = vpop.f32.mrf.mxu2 }
 0x247   : > { %v3279_v41 = vmax.f32 %v3243_v6, 0.0  ;;  %v2468_v58 = vadd.f32 %v2390_v54, %v2136_v23 }
 0x248   : > { %v2060_v56 = vpop.f32.mrf.mxu1  ;;  %v4475_v35 = vpop.f32.mrf.mxu3 }
 0x249   : > { %3315 = vst [vmem:[%s4393_s8 + $0x38] sm:$0xff] %v3279_v41  ;;  %v2800_v53 = vadd.f32 %v4431_v55, %v2468_v58  ;;  %v2137_v30 = vadd.f32 %v2060_v56, %v4148_v9  ;;  %v2562_v55 = vld [vmem:[%s3766_s27 + $0x115] sm:$0xff]  ;;  %v2228_v58 = vld [vmem:[%s3766_s27 + $0x104] sm:$0xff]  ;;  %v2229_v56 = vld [vmem:[%s3766_s27 + $0x10c] sm:$0xff] }
 0x24a   : > { %v2583_v0 = vpack.c.bf16 %v2563_v42, %v2562_v55 }
 0x24b   : > { %v3056_v16 = vpop.f32.mrf.mxu0  ;;  %v3132_v15 = vadd.f32 %v3054_v8, %v2800_v53 }
 0x24d   : > { %v3244_v18 = vadd.f32 %v4379_v28, %v3132_v15 }
 0x24e   : > { %v2392_v50 = vpop.f32.mrf.mxu2 }
 0x24f   : > { %v3280_v43 = vmax.f32 %v3244_v18, 0.0  ;;  %v2469_v37 = vadd.f32 %v2392_v50, %v2137_v30  ;;  %v2250_v18 = vpack.c.bf16 %v2229_v56, %v2228_v58  ;;  %v2565_v50 = vld [vmem:[%s3766_s27 + $0x12d] sm:$0xff] }
 0x250   : > { %v2063_v62 = vpop.f32.mrf.mxu1  ;;  %v4487_v13 = vpop.f32.mrf.mxu3 }
 0x251   : > { %3316 = vst [vmem:[%s4393_s8 + $0x40] sm:$0xff] %v3280_v43  ;;  %v2801_v11 = vadd.f32 %v4443_v25, %v2469_v37  ;;  %v2138_v17 = vadd.f32 %v2063_v62, %v4155_v33  ;;  %v2893_v33 = vld [vmem:[%s3766_s27 + $0x10e] sm:$0xff] }
 0x253   : > { %v3059_v32 = vpop.f32.mrf.mxu0  ;;  %3577 = vmatmul.msk.bf16.gmra.mxu1 %vm314_vm0, %v2248_v57  ;;  %v3133_v9 = vadd.f32 %v3056_v16, %v2801_v11  ;;  %3607 = vmatmul.msk.bf16.gmra.mxu2 %vm314_vm0, %v2249_v60  ;;  %v2892_v16 = vld [vmem:[%s3766_s27 + $0x106] sm:$0xff] }
 0x254   : > { %v2914_v30 = vpack.c.bf16 %v2893_v33, %v2892_v16 }
 0x255   : > { %v3245_v8 = vadd.f32 %v4379_v28, %v3133_v9  ;;  %3639 = vmatmul.msk.bf16.gmra.mxu3 %vm314_vm0, %v2583_v0 }
 0x256   : > { %3667 = vmatmul.msk.bf16.gmra.mxu0 %vm314_vm0, %v2913_v24  ;;  %v2395_v31 = vpop.f32.mrf.mxu2 }
 0x257   : > { %v3281_v25 = vmax.f32 %v3245_v8, 0.0  ;;  %v2470_v40 = vadd.f32 %v2395_v31, %v2138_v17  ;;  %v2230_v31 = vld [vmem:[%s3766_s27 + $0x114] sm:$0xff] }
 0x258   : > { %v2065_v57 = vpop.f32.mrf.mxu1  ;;  %v4497_v54 = vpop.f32.mrf.mxu3 }
 0x259   : > { %3317 = vst [vmem:[%s4393_s8 + $0x48] sm:$0xff] %v3281_v25  ;;  %v2802_v23 = vadd.f32 %v4453_v20, %v2470_v40  ;;  %v2139_v15 = vadd.f32 %v2065_v57, %v4168_v52  ;;  %v2564_v20 = vld [vmem:[%s3766_s27 + $0x125] sm:$0xff]  ;;  %v2231_v25 = vld [vmem:[%s3766_s27 + $0x11c] sm:$0xff] }
 0x25a   : > { %v2584_v24 = vpack.c.bf16 %v2565_v50, %v2564_v20  ;;  %v2894_v40 = vld [vmem:[%s3766_s27 + $0x116] sm:$0xff]  ;;  %v2251_v16 = vpack.c.bf16 %v2231_v25, %v2230_v31 }
 0x25b   : > { %v3061_v6 = vpop.f32.mrf.mxu0  ;;  %v3134_v41 = vadd.f32 %v3059_v32, %v2802_v23 }
 0x25d   : > { %v3246_v53 = vadd.f32 %v4379_v28, %v3134_v41 }
 0x25e   : > { %v2397_v7 = vpop.f32.mrf.mxu2 }
 0x25f   : > { %v3282_v63 = vmax.f32 %v3246_v53, 0.0  ;;  %v2471_v38 = vadd.f32 %v2397_v7, %v2139_v15  ;;  %v2567_v53 = vld [vmem:[%s3766_s27 + $0x13d] sm:$0xff] }
 0x260   : > { %v2068_v34 = vpop.f32.mrf.mxu1  ;;  %v4509_v62 = vpop.f32.mrf.mxu3 }
 0x261   : > { %3318 = vst [vmem:[%s4393_s8 + $0x50] sm:$0xff] %v3282_v63  ;;  %v2803_v37 = vadd.f32 %v4465_v10, %v2471_v38  ;;  %v2140_v42 = vadd.f32 %v2068_v34, %v4175_v44  ;;  %v2895_v44 = vld [vmem:[%s3766_s27 + $0x11e] sm:$0xff] }
 0x262   : > { %v2915_v33 = vpack.c.bf16 %v2895_v44, %v2894_v40 }
 0x263   : > { %v3064_v43 = vpop.f32.mrf.mxu0  ;;  %3578 = vmatmul.msk.bf16.gmra.mxu1 %vm314_vm0, %v2249_v60  ;;  %v3135_v52 = vadd.f32 %v3061_v6, %v2803_v37  ;;  %3608 = vmatmul.msk.bf16.gmra.mxu2 %vm314_vm0, %v2250_v18 }
 0x265   : > { %v3247_v55 = vadd.f32 %v4379_v28, %v3135_v52  ;;  %3640 = vmatmul.msk.bf16.gmra.mxu3 %vm314_vm0, %v2584_v24 }
 0x266   : > { %3668 = vmatmul.msk.bf16.gmra.mxu0 %vm314_vm0, %v2914_v30  ;;  %v2400_v32 = vpop.f32.mrf.mxu2 }
 0x267   : > { %v3283_v10 = vmax.f32 %v3247_v55, 0.0  ;;  %v2472_v11 = vadd.f32 %v2400_v32, %v2140_v42  ;;  %v2232_v55 = vld [vmem:[%s3766_s27 + $0x124] sm:$0xff]  ;;  %v2233_v42 = vld [vmem:[%s3766_s27 + $0x12c] sm:$0xff] }
 0x268   : > { %v2070_v60 = vpop.f32.mrf.mxu1  ;;  %v4519_v8 = vpop.f32.mrf.mxu3  ;;  %v2896_v32 = vld [vmem:[%s3766_s27 + $0x126] sm:$0xff]  ;;  %v2252_v31 = vpack.c.bf16 %v2233_v42, %v2232_v55 }
 0x269   : > { %3319 = vst [vmem:[%s4393_s8 + $0x58] sm:$0xff] %v3283_v10  ;;  %v2804_v9 = vadd.f32 %v4475_v35, %v2472_v11  ;;  %v2141_v6 = vadd.f32 %v2070_v60, %v4186_v5  ;;  %v2566_v35 = vld [vmem:[%s3766_s27 + $0x135] sm:$0xff] }
 0x26a   : > { %v2585_v38 = vpack.c.bf16 %v2567_v53, %v2566_v35  ;;  %v2897_v10 = vld [vmem:[%s3766_s27 + $0x12e] sm:$0xff] }
 0x26b   : > { %v3066_v0 = vpop.f32.mrf.mxu0  ;;  %v3136_v17 = vadd.f32 %v3064_v43, %v2804_v9  ;;  %v2916_v25 = vpack.c.bf16 %v2897_v10, %v2896_v32  ;;  %v2234_v53 = vld [vmem:[%s3766_s27 + $0x134] sm:$0xff] }
 0x26d   : > { %v3248_v57 = vadd.f32 %v4379_v28, %v3136_v17 }
 0x26e   : > { %v2402_v23 = vpop.f32.mrf.mxu2 }
 0x26f   : > { %v3284_v41 = vmax.f32 %v3248_v57, 0.0  ;;  %v2473_v58 = vadd.f32 %v2402_v23, %v2141_v6 }
 0x270   : > { %v2073_v56 = vpop.f32.mrf.mxu1  ;;  %v4531_v63 = vpop.f32.mrf.mxu3 }
 0x271   : > { %3320 = vst [vmem:[%s4393_s8 + $0x60] sm:$0xff] %v3284_v41  ;;  %v2805_v7 = vadd.f32 %v4487_v13, %v2473_v58  ;;  %v2142_v30 = vadd.f32 %v2073_v56, %v4192_v45 }
 0x273   : > { %v3069_v15 = vpop.f32.mrf.mxu0  ;;  %3579 = vmatmul.msk.bf16.gmra.mxu1 %vm314_vm0, %v2250_v18  ;;  %v3137_v5 = vadd.f32 %v3066_v0, %v2805_v7  ;;  %3609 = vmatmul.msk.bf16.gmra.mxu2 %vm314_vm0, %v2251_v16  ;;  %v2898_v7 = vld [vmem:[%s3766_s27 + $0x136] sm:$0xff] }
 0x275   : > { %v3249_v34 = vadd.f32 %v4379_v28, %v3137_v5  ;;  %3641 = vmatmul.msk.bf16.gmra.mxu3 %vm314_vm0, %v2585_v38  ;;  %v2899_v38 = vld [vmem:[%s3766_s27 + $0x13e] sm:$0xff] }
 0x276   : > { %3669 = vmatmul.msk.bf16.gmra.mxu0 %vm314_vm0, %v2915_v33  ;;  %v2405_v20 = vpop.f32.mrf.mxu2 }
 0x277   : > { %v3285_v13 = vmax.f32 %v3249_v34, 0.0  ;;  %v2474_v50 = vadd.f32 %v2405_v20, %v2142_v30 }
 0x278   : > { %v2075_v18 = vpop.f32.mrf.mxu1  ;;  %v2747_v24 = vpop.f32.mrf.mxu3 }
 0x279   : > { %3321 = vst [vmem:[%s4393_s8 + $0x68] sm:$0xff] %v3285_v13  ;;  %v2806_v37 = vadd.f32 %v4497_v54, %v2474_v50  ;;  %v2143_v45 = vadd.f32 %v2075_v18, %v4203_v22  ;;  %v2917_v18 = vpack.c.bf16 %v2899_v38, %v2898_v7 }
 0x27b   : > { %v3071_v43 = vpop.f32.mrf.mxu0  ;;  %v3138_v52 = vadd.f32 %v3069_v15, %v2806_v37  ;;  %v2235_v15 = vld [vmem:[%s3766_s27 + $0x13c] sm:$0xff] }
 0x27c   : > { %v2253_v50 = vpack.c.bf16 %v2235_v15, %v2234_v53 }
 0x27d   : > { %v3250_v11 = vadd.f32 %v4379_v28, %v3138_v52 }
 0x27e   : > { %v2407_v60 = vpop.f32.mrf.mxu2 }
 0x27f   : > { %v3286_v0 = vmax.f32 %v3250_v11, 0.0  ;;  %v2475_v9 = vadd.f32 %v2407_v60, %v2143_v45 }
 0x280   : > { %v2078_v17 = vpop.f32.mrf.mxu1  ;;  %v2749_v44 = vpop.f32.mrf.mxu3 }
 0x281   : > { %3322 = vst [vmem:[%s4393_s8 + $0x70] sm:$0xff] %v3286_v0  ;;  %v2807_v54 = vadd.f32 %v4509_v62, %v2475_v9  ;;  %v2144_v6 = vadd.f32 %v2078_v17, %v4209_v61 }
 0x283   : > { %v3074_v40 = vpop.f32.mrf.mxu0  ;;  %3580 = vmatmul.msk.bf16.gmra.mxu1 %vm314_vm0, %v2251_v16  ;;  %v3139_v57 = vadd.f32 %v3071_v43, %v2807_v54  ;;  %3610 = vmatmul.msk.bf16.gmra.mxu2 %vm314_vm0, %v2252_v31 }
 0x285   : > { %v3251_v22 = vadd.f32 %v4379_v28, %v3139_v57 }
 0x286   : > { %3670 = vmatmul.msk.bf16.gmra.mxu0 %vm314_vm0, %v2916_v25  ;;  %v2410_v23 = vpop.f32.mrf.mxu2 }
 0x287   : > { %v3287_v41 = vmax.f32 %v3251_v22, 0.0  ;;  %v2476_v58 = vadd.f32 %v2410_v23, %v2144_v6 }
 0x288   : > { %v2080_v62 = vpop.f32.mrf.mxu1  ;;  %v2752_v33 = vpop.f32.mrf.mxu3 }
 0x289   : > { %3323 = vst [vmem:[%s4393_s8 + $0x78] sm:$0xff] %v3287_v41  ;;  %v2808_v16 = vadd.f32 %v4519_v8, %v2476_v58  ;;  %v2145_v34 = vadd.f32 %v2080_v62, %v4220_v39 }
 0x28b   : > { %v3076_v56 = vpop.f32.mrf.mxu0  ;;  %v3140_v35 = vadd.f32 %v3074_v40, %v2808_v16 }
 0x28d   : > { %v3252_v5 = vadd.f32 %v4379_v28, %v3140_v35 }
 0x28e   : > { %v2412_v61 = vpop.f32.mrf.mxu2 }
 0x28f   : > { %v3288_v30 = vmax.f32 %v3252_v5, 0.0  ;;  %v2477_v20 = vadd.f32 %v2412_v61, %v2145_v34 }
 0x290   : > { %v2083_v13 = vpop.f32.mrf.mxu1  ;;  %v2754_v52 = vpop.f32.mrf.mxu3 }
 0x291   : > { %3324 = vst [vmem:[%s4393_s8 + $0x80] sm:$0xff] %v3288_v30  ;;  %v2809_v8 = vadd.f32 %v4531_v63, %v2477_v20  ;;  %v2146_v55 = vadd.f32 %v2083_v13, %v4227_v48 }
 0x293   : > { %v3079_v43 = vpop.f32.mrf.mxu0  ;;  %3581 = vmatmul.msk.bf16.gmra.mxu1 %vm314_vm0, %v2252_v31  ;;  %v3141_v37 = vadd.f32 %v3076_v56, %v2809_v8  ;;  %3611 = vmatmul.msk.bf16.gmra.mxu2 %vm314_vm0, %v2253_v50 }
 0x295   : > { %v3253_v39 = vadd.f32 %v4379_v28, %v3141_v37 }
 0x296   : > { %3671 = vmatmul.msk.bf16.gmra.mxu0 %vm314_vm0, %v2917_v18  ;;  %v2415_v42 = vpop.f32.mrf.mxu2 }
 0x297   : > { %v3289_v32 = vmax.f32 %v3253_v39, 0.0  ;;  %v2478_v10 = vadd.f32 %v2415_v42, %v2146_v55 }
 0x298   : > { %v2085_v11 = vpop.f32.mrf.mxu1  ;;  %v2757_v31 = vpop.f32.mrf.mxu3 }
 0x299   : > { %3325 = vst [vmem:[%s4393_s8 + $0x88] sm:$0xff] %v3289_v32  ;;  %v2810_v63 = vadd.f32 %v2747_v24, %v2478_v10  ;;  %v2147_v9 = vadd.f32 %v2085_v11, %v4238_v3 }
 0x29b   : > { %v3081_v45 = vpop.f32.mrf.mxu0  ;;  %v3142_v60 = vadd.f32 %v3079_v43, %v2810_v63 }
 0x29d   : > { %v3254_v0 = vadd.f32 %v4379_v28, %v3142_v60 }
 0x29e   : > { %v2417_v17 = vpop.f32.mrf.mxu2 }
 0x29f   : > { %v3290_v25 = vmax.f32 %v3254_v0, 0.0  ;;  %v2479_v40 = vadd.f32 %v2417_v17, %v2147_v9 }
 0x2a0   : > { %v2088_v54 = vpop.f32.mrf.mxu1  ;;  %v2759_v56 = vpop.f32.mrf.mxu3 }
 0x2a1   : > { %3326 = vst [vmem:[%s4393_s8 + $0x90] sm:$0xff] %v3290_v25  ;;  %v2811_v57 = vadd.f32 %v2749_v44, %v2479_v40  ;;  %v2148_v23 = vadd.f32 %v2088_v54, %v4243_v1 }
 0x2a3   : > { %v3084_v48 = vpop.f32.mrf.mxu0  ;;  %v3143_v22 = vadd.f32 %v3081_v45, %v2811_v57 }
 0x2a5   : > { %v3255_v6 = vadd.f32 %v4379_v28, %v3143_v22 }
 0x2a6   : > { %v2420_v24 = vpop.f32.mrf.mxu2 }
 0x2a7   : > { %v3291_v41 = vmax.f32 %v3255_v6, 0.0  ;;  %v2480_v58 = vadd.f32 %v2420_v24, %v2148_v23 }
 0x2a8   : > { %v2090_v62 = vpop.f32.mrf.mxu1  ;;  %v2762_v61 = vpop.f32.mrf.mxu3 }
 0x2a9   : > { %3327 = vst [vmem:[%s4393_s8 + $0x98] sm:$0xff] %v3291_v41  ;;  %v2812_v16 = vadd.f32 %v2752_v33, %v2480_v58  ;;  %v2149_v15 = vadd.f32 %v2090_v62, %v4254_v59 }
 0x2ab   : > { %v3086_v3 = vpop.f32.mrf.mxu0  ;;  %v3144_v35 = vadd.f32 %v3084_v48, %v2812_v16 }
 0x2ad   : > { %v3256_v53 = vadd.f32 %v4379_v28, %v3144_v35 }
 0x2ae   : > { %v2422_v44 = vpop.f32.mrf.mxu2 }
 0x2af   : > { %v3292_v7 = vmax.f32 %v3256_v53, 0.0  ;;  %v2481_v38 = vadd.f32 %v2422_v44, %v2149_v15 }
 0x2b0   : > { %v2093_v5 = vpop.f32.mrf.mxu1  ;;  %v2764_v39 = vpop.f32.mrf.mxu3 }
 0x2b1   : > { %3328 = vst [vmem:[%s4393_s8 + $0xa0] sm:$0xff] %v3292_v7  ;;  %v2813_v34 = vadd.f32 %v2754_v52, %v2481_v38  ;;  %v2150_v13 = vadd.f32 %v2093_v5, %v4259_v46 }
 0x2b3   : > { %v3089_v1 = vpop.f32.mrf.mxu0  ;;  %v3145_v30 = vadd.f32 %v3086_v3, %v2813_v34 }
 0x2b5   : > { %v3257_v20 = vadd.f32 %v4379_v28, %v3145_v30 }
 0x2b6   : > { %v2425_v33 = vpop.f32.mrf.mxu2 }
 0x2b7   : > { %v3293_v50 = vmax.f32 %v3257_v20, 0.0  ;;  %v2482_v18 = vadd.f32 %v2425_v33, %v2150_v13 }
 0x2b8   : > { %v2095_v43 = vpop.f32.mrf.mxu1  ;;  %v2767_v17 = vpop.f32.mrf.mxu3 }
 0x2b9   : > { %3329 = vst [vmem:[%s4393_s8 + $0xa8] sm:$0xff] %v3293_v50  ;;  %v2814_v8 = vadd.f32 %v2757_v31, %v2482_v18  ;;  %v2151_v52 = vadd.f32 %v2095_v43, %v4270_v12 }
 0x2bb   : > { %v3091_v59 = vpop.f32.mrf.mxu0  ;;  %v3146_v37 = vadd.f32 %v3089_v1, %v2814_v8 }
 0x2bd   : > { %v3258_v55 = vadd.f32 %v4379_v28, %v3146_v37 }
 0x2be   : > { %v2427_v42 = vpop.f32.mrf.mxu2 }
 0x2bf   : > { %v3294_v32 = vmax.f32 %v3258_v55, 0.0  ;;  %v2483_v10 = vadd.f32 %v2427_v42, %v2151_v52 }
 0x2c0   : > { %v2098_v11 = vpop.f32.mrf.mxu1  ;;  %v2769_v58 = vpop.f32.mrf.mxu3 }
 0x2c1   : > { %3330 = vst [vmem:[%s4393_s8 + $0xb0] sm:$0xff] %v3294_v32  ;;  %v2815_v45 = vadd.f32 %v2759_v56, %v2483_v10  ;;  %v2152_v0 = vadd.f32 %v2098_v11, %v4275_v49 }
 0x2c3   : > { %v3094_v46 = vpop.f32.mrf.mxu0  ;;  %v3147_v63 = vadd.f32 %v3091_v59, %v2815_v45 }
 0x2c5   : > { %v3259_v60 = vadd.f32 %v4379_v28, %v3147_v63 }
 0x2c6   : > { %v2430_v9 = vpop.f32.mrf.mxu2 }
 0x2c7   : > { %v3295_v31 = vmax.f32 %v3259_v60, 0.0  ;;  %v2484_v25 = vadd.f32 %v2430_v9, %v2152_v0 }
 0x2c8   : > { %v2100_v40 = vpop.f32.mrf.mxu1  ;;  %v2772_v38 = vpop.f32.mrf.mxu3 }
 0x2c9   : > { %3331 = vst [vmem:[%s4393_s8 + $0xb8] sm:$0xff] %v3295_v31  ;;  %v2816_v54 = vadd.f32 %v2762_v61, %v2484_v25  ;;  %v2153_v22 = vadd.f32 %v2100_v40, %v4286_v29 }
 0x2cb   : > { %v3096_v12 = vpop.f32.mrf.mxu0  ;;  %v3148_v48 = vadd.f32 %v3094_v46, %v2816_v54 }
 0x2cd   : > { %v3260_v57 = vadd.f32 %v4379_v28, %v3148_v48 }
 0x2ce   : > { %v2432_v6 = vpop.f32.mrf.mxu2 }
 0x2cf   : > { %v3296_v23 = vmax.f32 %v3260_v57, 0.0  ;;  %v2485_v24 = vadd.f32 %v2432_v6, %v2153_v22 }
 0x2d0   : > { %v2103_v41 = vpop.f32.mrf.mxu1  ;;  %v2774_v18 = vpop.f32.mrf.mxu3 }
 0x2d1   : > { %3332 = vst [vmem:[%s4393_s8 + $0xc0] sm:$0xff] %v3296_v23  ;;  %v2817_v62 = vadd.f32 %v2764_v39, %v2485_v24  ;;  %v2154_v16 = vadd.f32 %v2103_v41, %v4291_v27 }
 0x2d3   : > { %v3099_v49 = vpop.f32.mrf.mxu0  ;;  %v3149_v3 = vadd.f32 %v3096_v12, %v2817_v62 }
 0x2d5   : > { %v3261_v56 = vadd.f32 %v4379_v28, %v3149_v3 }
 0x2d6   : > { %v2435_v35 = vpop.f32.mrf.mxu2 }
 0x2d7   : > { %v3297_v53 = vmax.f32 %v3261_v56, 0.0  ;;  %v2486_v15 = vadd.f32 %v2435_v35, %v2154_v16 }
 0x2d8   : > { %v2105_v44 = vpop.f32.mrf.mxu1  ;;  %v2777_v46 = vpop.f32.mrf.mxu3 }
 0x2d9   : > { %3333 = vst [vmem:[%s4393_s8 + $0xc8] sm:$0xff] %v3297_v53  ;;  %v2818_v7 = vadd.f32 %v2767_v17, %v2486_v15  ;;  %v2155_v34 = vadd.f32 %v2105_v44, %v4302_v47 }
 0x2db   : > { %v3101_v29 = vpop.f32.mrf.mxu0  ;;  %v3150_v5 = vadd.f32 %v3099_v49, %v2818_v7 }
 0x2dd   : > { %v3262_v1 = vadd.f32 %v4379_v28, %v3150_v5 }
 0x2de   : > { %v2437_v61 = vpop.f32.mrf.mxu2 }
 0x2df   : > { %v3298_v30 = vmax.f32 %v3262_v1, 0.0  ;;  %v2487_v20 = vadd.f32 %v2437_v61, %v2155_v34 }
 0x2e0   : > { %v2108_v13 = vpop.f32.mrf.mxu1 }
 0x2e1   : > { %3334 = vst [vmem:[%s4393_s8 + $0xd0] sm:$0xff] %v3298_v30  ;;  %v2819_v33 = vadd.f32 %v2769_v58, %v2487_v20  ;;  %v2156_v59 = vadd.f32 %v2108_v13, %v4307_v14 }
 0x2e3   : > { %v3104_v27 = vpop.f32.mrf.mxu0  ;;  %v3151_v50 = vadd.f32 %v3101_v29, %v2819_v33 }
 0x2e5   : > { %v3263_v43 = vadd.f32 %v4379_v28, %v3151_v50 }
 0x2e6   : > { %v2440_v8 = vpop.f32.mrf.mxu2 }
 0x2e7   : > { %v3299_v37 = vmax.f32 %v3263_v43, 0.0  ;;  %v2488_v39 = vadd.f32 %v2440_v8, %v2156_v59 }
 0x2e8   : > { %v2110_v55 = vpop.f32.mrf.mxu1 }
 0x2e9   : > { %3335 = vst [vmem:[%s4393_s8 + $0xd8] sm:$0xff] %v3299_v37  ;;  %v2820_v52 = vadd.f32 %v2772_v38, %v2488_v39  ;;  %v2157_v10 = vadd.f32 %v2110_v55, %v4318_v26  ;;  %v2779_v26 = vpop.f32.mrf.mxu3 }
 0x2eb   : > { %v3106_v47 = vpop.f32.mrf.mxu0  ;;  %v3152_v42 = vadd.f32 %v3104_v27, %v2820_v52 }
 0x2ed   : > { %v3264_v32 = vadd.f32 %v4379_v28, %v3152_v42 }
 0x2ee   : > { %v2442_v11 = vpop.f32.mrf.mxu2 }
 0x2ef   : > { %v3300_v45 = vmax.f32 %v3264_v32, 0.0  ;;  %v2489_v63 = vadd.f32 %v2442_v11, %v2157_v10 }
 0x2f0   : > { %v2113_v60 = vpop.f32.mrf.mxu1 }
 0x2f1   : > { %3336 = vst [vmem:[%s4393_s8 + $0xe0] sm:$0xff] %v3300_v45  ;;  %v2821_v0 = vadd.f32 %v2774_v18, %v2489_v63  ;;  %v2158_v31 = vadd.f32 %v2113_v60, %v4323_v51  ;;  %v2782_v62 = vpop.f32.mrf.mxu3 }
 0x2f3   : > { %v3109_v14 = vpop.f32.mrf.mxu0  ;;  %v3153_v9 = vadd.f32 %v3106_v47, %v2821_v0 }
 0x2f5   : > { %v3265_v17 = vadd.f32 %v4379_v28, %v3153_v9 }
 0x2f6   : > { %v2445_v25 = vpop.f32.mrf.mxu2 }
 0x2f7   : > { %v3301_v40 = vmax.f32 %v3265_v17, 0.0  ;;  %v2490_v12 = vadd.f32 %v2445_v25, %v2158_v31 }
 0x2f8   : > { %v2115_v54 = vpop.f32.mrf.mxu1 }
 0x2f9   : > { %3337 = vst [vmem:[%s4393_s8 + $0xe8] sm:$0xff] %v3301_v40  ;;  %v2822_v48 = vadd.f32 %v2777_v46, %v2490_v12  ;;  %v2159_v23 = vadd.f32 %v2115_v54, %v4334_v2  ;;  %v2784_v38 = vpop.f32.mrf.mxu3 }
 0x2fb   : > { %v3111_v57 = vpop.f32.mrf.mxu0  ;;  %v3154_v22 = vadd.f32 %v3109_v14, %v2822_v48 }
 0x2fd   : > { %v3266_v6 = vadd.f32 %v4379_v28, %v3154_v22 }
 0x2fe   : > { %v2447_v24 = vpop.f32.mrf.mxu2 }
 0x2ff   : > { %v3302_v41 = vmax.f32 %v3266_v6, 0.0  ;;  %v2491_v49 = vadd.f32 %v2447_v24, %v2159_v23 }
 0x300   : > { %v2118_v58 = vpop.f32.mrf.mxu1 }
 0x301   : > { %3338 = vst [vmem:[%s4393_s8 + $0xf0] sm:$0xff] %v3302_v41  ;;  %v2823_v51 = vadd.f32 %v2779_v26, %v2491_v49  ;;  %v2160_v35 = vadd.f32 %v2118_v58, %v4339_v4  ;;  %v2787_v18 = vpop.f32.mrf.mxu3 }
 0x303   : > { %v3155_v3 = vadd.f32 %v3111_v57, %v2823_v51  ;;  %v3114_v56 = vpop.f32.mrf.mxu0 }
 0x305   : > { %v3267_v16 = vadd.f32 %v4379_v28, %v3155_v3 }
 0x306   : > { %v2450_v53 = vpop.f32.mrf.mxu2 }
 0x307   : > { %v3303_v15 = vmax.f32 %v3267_v16, 0.0  ;;  %v2492_v44 = vadd.f32 %v2450_v53, %v2160_v35 }
 0x308   : > { %v2120_v29 = vpop.f32.mrf.mxu1 }
 0x309   : > { %3339 = vst [vmem:[%s4393_s8 + $0xf8] sm:$0xff] %v3303_v15  ;;  %v2824_v2 = vadd.f32 %v2782_v62, %v2492_v44  ;;  %v2161_v1 = vadd.f32 %v2120_v29, %v4352_v19  ;;  %v2789_v11 = vpop.f32.mrf.mxu3 }
 0x30b   : > { %v3156_v7 = vadd.f32 %v3114_v56, %v2824_v2  ;;  %v3116_v34 = vpop.f32.mrf.mxu0 }
 0x30d   : > { %v3268_v5 = vadd.f32 %v4379_v28, %v3156_v7 }
 0x30e   : > { %v2452_v61 = vpop.f32.mrf.mxu2 }
 0x30f   : > { %v3304_v30 = vmax.f32 %v3268_v5, 0.0  ;;  %v2493_v20 = vadd.f32 %v2452_v61, %v2161_v1 }
 0x310   : > { %v2123_v13 = vpop.f32.mrf.mxu1 }
 0x311   : > { %3340 = vst [vmem:[%s4393_s8 + $0x100] sm:$0xff] %v3304_v30  ;;  %v2825_v4 = vadd.f32 %v2784_v38, %v2493_v20  ;;  %v2162_v50 = vadd.f32 %v2123_v13, %v4359_v21 }
 0x313   : > { %v3157_v27 = vadd.f32 %v3116_v34, %v2825_v4  ;;  %v3119_v37 = vpop.f32.mrf.mxu0 }
 0x315   : > { %v3269_v33 = vadd.f32 %v4379_v28, %v3157_v27 }
 0x316   : > { %v2455_v43 = vpop.f32.mrf.mxu2 }
 0x317   : > { %v3305_v59 = vmax.f32 %v3269_v33, 0.0  ;;  %v2494_v8 = vadd.f32 %v2455_v43, %v2162_v50 }
 0x318   : > { %v2125_v39 = vpop.f32.mrf.mxu1 }
 0x319   : > { %3341 = vst [vmem:[%s4393_s8 + $0x108] sm:$0xff] %v3305_v59  ;;  %v2826_v19 = vadd.f32 %v2787_v18, %v2494_v8  ;;  %v2163_v52 = vadd.f32 %v2125_v39, %v4372_v36 }
 0x31b   : > { %v3158_v55 = vadd.f32 %v3119_v37, %v2826_v19  ;;  %v3121_v46 = vpop.f32.mrf.mxu0 }
 0x31d   : > { %v3270_v47 = vadd.f32 %v4379_v28, %v3158_v55 }
 0x31e   : > { %v2457_v42 = vpop.f32.mrf.mxu2 }
 0x31f   : > { %v3306_v32 = vmax.f32 %v3270_v47, 0.0  ;;  %v2495_v10 = vadd.f32 %v2457_v42, %v2163_v52 }
 0x321   : > { %3342 = vst [vmem:[%s4393_s8 + $0x110] sm:$0xff] %v3306_v32  ;;  %v2827_v21 = vadd.f32 %v2789_v11, %v2495_v10 }
 0x323   : > { %v3159_v45 = vadd.f32 %v3121_v46, %v2827_v21 }
 0x325   : > { %v3271_v63 = vadd.f32 %v4379_v28, %v3159_v45 }
 0x327   : > { %v3307_v60 = vmax.f32 %v3271_v63, 0.0 }
 0x329   : > { %3343 = vst [vmem:[%s4393_s8 + $0x118] sm:$0xff] %v3307_v60 }
 0x32a PF: > { %s13_s12 = sadd.s32 1, %s3715_s12  }
 0x32b   : > { %p10_p4 = scmp.ge.s32.totalorder %s13_s12, 4  }
 0x32d   :  { %12 = sbr.rel (!%p10_p4) target bundleno = 1 (0x1), region = 70 }

// kernel: model_forward.16
= control target key start
LH: loop header
LB: loop body
LE: loop exit
PB: predicated region body
PF: predicated region fallthrough
CT: control target
= control target key end

     0   :  { %s739_s12 = smov 0   ;;  %s873_s0 = inlined_call_operand.vmem [shape: bf16[512,128], index: 0, kind: input, shape index: {}]   ;;  %s874_s1 = inlined_call_operand.vmem [shape: bf16[128,128], index: 1, kind: input, shape index: {}]   ;;  %s875_s2 = inlined_call_operand.vmem [shape: f32[1,128], index: 2, kind: input, shape index: {}]   ;;  %s876_s3 = inlined_call_operand.vmem [shape: f32[512,128], index: 3, kind: output, shape index: {}]  }
   0x1 LB: > { %s547_s13 = sadd.s32 4294967295, %s717_s12   ;;  %p551_p0 = scmp.ge.s32.totalorder %s717_s12, 1  ;;  %s717_s12 = sphi %s739_s12, %s13_s12  }
   0x2   : > { %p138_p1 = scmp.lt.s32.totalorder %s717_s12, 3 }
   0x4   : > { %p139_p2 = pnand %p551_p0, %p138_p1 }
   0x5   : > { %s552_s22 = sshll.u32 (!%p139_p2), %s547_s13, 5 }
   0x6   : > { %142 = sbr.rel (%p139_p2) target bundleno = 236 (0xec), region = 32  ;;  %p163_p3 = scmp.lt.s32.totalorder (!%p139_p2), %s552_s22, 63 }
   0xb   : > { %v677_v0 = vld [vmem:[%s874_s1 + $0x38] sm:$0xff]  ;;  %v676_v1 = vld [vmem:[%s874_s1 + $0x30] sm:$0xff]  ;;  %v675_v2 = vld [vmem:[%s874_s1 + $0x28] sm:$0xff]  ;;  %s878_s22 = smov (!%p163_p3, %s552_s22), 63 }
   0xc   : > { %370 = vmatpush.bf16.msra.mxu0 %v677_v0  ;;  %678 = vmatpush.bf16.msra.mxu1 %v677_v0  ;;  %v674_v3 = vld [vmem:[%s874_s1 + $0x20] sm:$0xff]  ;;  %v673_v4 = vld [vmem:[%s874_s1 + $0x18] sm:$0xff]  ;;  %v672_v5 = vld [vmem:[%s874_s1 + $0x10] sm:$0xff]  ;;  %s553_s29 = sshll.u32 %s878_s22, 2  ;;  %s555_s8 = sshll.u32 %s878_s22, 3 }
   0xd   : > { %679 = vmatpush.bf16.msra.mxu2 %v677_v0  ;;  %680 = vmatpush.bf16.msra.mxu3 %v677_v0  ;;  %v671_v6 = vld [vmem:[%s874_s1 + $0x8] sm:$0xff]  ;;  %v670_v7 = vld [vmem:[%s874_s1] sm:$0xff]  ;;  %s777_s7 = scalar_lea.vmem %s873_s0, %s553_s29  ;;  %s804_s14 = scalar_lea.vmem %s876_s3, %s555_s8 }
   0xe   : > { %v654_v8 = vld [vmem:[%s777_s7] sm:$0xff]  ;;  %v655_v12 = vld [vmem:[%s777_s7 + $0x8] sm:$0xff]  ;;  %v656_v16 = vld [vmem:[%s777_s7 + $0x10] sm:$0xff] }
   0xf   : > { %v658_v9 = vld [vmem:[%s777_s7 + $0x20] sm:$0xff]  ;;  %v659_v13 = vld [vmem:[%s777_s7 + $0x28] sm:$0xff]  ;;  %v660_v17 = vld [vmem:[%s777_s7 + $0x30] sm:$0xff] }
  0x10   : > { %371 = vmatpush.bf16.msra.mxu0 %v676_v1  ;;  %681 = vmatpush.bf16.msra.mxu1 %v676_v1  ;;  %v662_v10 = vld [vmem:[%s777_s7 + $0x40] sm:$0xff]  ;;  %v663_v14 = vld [vmem:[%s777_s7 + $0x48] sm:$0xff]  ;;  %v664_v18 = vld [vmem:[%s777_s7 + $0x50] sm:$0xff] }
  0x11   : > { %682 = vmatpush.bf16.msra.mxu2 %v676_v1  ;;  %683 = vmatpush.bf16.msra.mxu3 %v676_v1  ;;  %v666_v11 = vld [vmem:[%s777_s7 + $0x60] sm:$0xff]  ;;  %v667_v15 = vld [vmem:[%s777_s7 + $0x68] sm:$0xff]  ;;  %v668_v19 = vld [vmem:[%s777_s7 + $0x70] sm:$0xff] }
  0x12   : > { %v657_v20 = vld [vmem:[%s777_s7 + $0x18] sm:$0xff]  ;;  %v799_v24 = vld [vmem:[%s875_s2] ss:$0 sm:$0xff] }
  0x13   : > { %v661_v21 = vld [vmem:[%s777_s7 + $0x38] sm:$0xff] }
  0x14   : > { %372 = vmatpush.bf16.msra.mxu0 %v675_v2  ;;  %684 = vmatpush.bf16.msra.mxu1 %v675_v2  ;;  %v665_v22 = vld [vmem:[%s777_s7 + $0x58] sm:$0xff] }
  0x15   : > { %685 = vmatpush.bf16.msra.mxu2 %v675_v2  ;;  %686 = vmatpush.bf16.msra.mxu3 %v675_v2  ;;  %v669_v23 = vld [vmem:[%s777_s7 + $0x78] sm:$0xff] }
  0x18   : > { %373 = vmatpush.bf16.msra.mxu0 %v674_v3  ;;  %687 = vmatpush.bf16.msra.mxu1 %v674_v3 }
  0x19   : > { %688 = vmatpush.bf16.msra.mxu2 %v674_v3  ;;  %689 = vmatpush.bf16.msra.mxu3 %v674_v3 }
  0x1c   : > { %374 = vmatpush.bf16.msra.mxu0 %v673_v4  ;;  %690 = vmatpush.bf16.msra.mxu1 %v673_v4 }
  0x1d   : > { %691 = vmatpush.bf16.msra.mxu2 %v673_v4  ;;  %692 = vmatpush.bf16.msra.mxu3 %v673_v4 }
  0x20   : > { %375 = vmatpush.bf16.msra.mxu0 %v672_v5  ;;  %693 = vmatpush.bf16.msra.mxu1 %v672_v5 }
  0x21   : > { %694 = vmatpush.bf16.msra.mxu2 %v672_v5  ;;  %695 = vmatpush.bf16.msra.mxu3 %v672_v5 }
  0x24   : > { %376 = vmatpush.bf16.msra.mxu0 %v671_v6  ;;  %696 = vmatpush.bf16.msra.mxu1 %v671_v6 }
  0x25   : > { %697 = vmatpush.bf16.msra.mxu2 %v671_v6  ;;  %698 = vmatpush.bf16.msra.mxu3 %v671_v6 }
  0x28   : > { %377 = vmatpush.bf16.msra.mxu0 %v670_v7  ;;  %699 = vmatpush.bf16.msra.mxu1 %v670_v7 }
  0x29   : > { %700 = vmatpush.bf16.msra.mxu2 %v670_v7  ;;  %701 = vmatpush.bf16.msra.mxu3 %v670_v7 }
  0x2b   : > { %378 = vmatmul.bf16.vlgmr.msra.gmra.mxu0 %v654_v8  ;;  %398 = vmatmul.bf16.vlgmr.msra.gmra.mxu1 %v658_v9 }
  0x2c   : > { %418 = vmatmul.bf16.vlgmr.msra.gmra.mxu2 %v662_v10  ;;  %438 = vmatmul.bf16.vlgmr.msra.gmra.mxu3 %v666_v11 }
  0x3b   : > { %383 = vmatmul.bf16.gmra.mxu0 %v655_v12  ;;  %403 = vmatmul.bf16.gmra.mxu1 %v659_v13 }
  0x3c   : > { %423 = vmatmul.bf16.gmra.mxu2 %v663_v14  ;;  %443 = vmatmul.bf16.gmra.mxu3 %v667_v15 }
  0x4b   : > { %388 = vmatmul.bf16.gmra.mxu0 %v656_v16  ;;  %408 = vmatmul.bf16.gmra.mxu1 %v660_v17 }
  0x4c   : > { %428 = vmatmul.bf16.gmra.mxu2 %v664_v18  ;;  %448 = vmatmul.bf16.gmra.mxu3 %v668_v19 }
  0x5b   : > { %393 = vmatmul.bf16.gmra.mxu0 %v657_v20  ;;  %413 = vmatmul.bf16.gmra.mxu1 %v661_v21 }
  0x5c   : > { %433 = vmatmul.bf16.gmra.mxu2 %v665_v22  ;;  %453 = vmatmul.bf16.gmra.mxu3 %v669_v23 }
  0xa8   : > { %v379_v25 = vpop.f32.mrf.mxu0  ;;  %v399_v26 = vpop.f32.mrf.mxu1 }
  0xa9   : > { %v380_v27 = vadd.f32 %v799_v24, %v379_v25  ;;  %v400_v28 = vadd.f32 %v799_v24, %v399_v26 }
  0xab   : > { %459 = vst [vmem:[%s804_s14] sm:$0xff] %v380_v27 }
  0xac   : > { %467 = vst [vmem:[%s804_s14 + $0x40] sm:$0xff] %v400_v28 }
  0xaf   : > { %v419_v29 = vpop.f32.mrf.mxu2  ;;  %v439_v30 = vpop.f32.mrf.mxu3 }
  0xb0   : > { %v420_v31 = vadd.f32 %v799_v24, %v419_v29  ;;  %v440_v32 = vadd.f32 %v799_v24, %v439_v30  ;;  %v381_v33 = vpop.f32.mrf.mxu0  ;;  %v401_v34 = vpop.f32.mrf.mxu1 }
  0xb1   : > { %v382_v35 = vadd.f32 %v799_v24, %v381_v33  ;;  %v402_v36 = vadd.f32 %v799_v24, %v401_v34 }
  0xb2   : > { %475 = vst [vmem:[%s804_s14 + $0x80] sm:$0xff] %v420_v31 }
  0xb3   : > { %483 = vst [vmem:[%s804_s14 + $0xc0] sm:$0xff] %v440_v32 }
  0xb4   : > { %460 = vst [vmem:[%s804_s14 + $0x8] sm:$0xff] %v382_v35 }
  0xb5   : > { %468 = vst [vmem:[%s804_s14 + $0x48] sm:$0xff] %v402_v36 }
  0xb7   : > { %v421_v37 = vpop.f32.mrf.mxu2  ;;  %v441_v38 = vpop.f32.mrf.mxu3 }
  0xb8   : > { %v422_v39 = vadd.f32 %v799_v24, %v421_v37  ;;  %v442_v40 = vadd.f32 %v799_v24, %v441_v38  ;;  %v384_v41 = vpop.f32.mrf.mxu0  ;;  %v404_v42 = vpop.f32.mrf.mxu1 }
  0xb9   : > { %v385_v43 = vadd.f32 %v799_v24, %v384_v41  ;;  %v405_v44 = vadd.f32 %v799_v24, %v404_v42 }
  0xba   : > { %476 = vst [vmem:[%s804_s14 + $0x88] sm:$0xff] %v422_v39 }
  0xbb   : > { %484 = vst [vmem:[%s804_s14 + $0xc8] sm:$0xff] %v442_v40 }
  0xbc   : > { %461 = vst [vmem:[%s804_s14 + $0x10] sm:$0xff] %v385_v43 }
  0xbd   : > { %469 = vst [vmem:[%s804_s14 + $0x50] sm:$0xff] %v405_v44 }
  0xbf   : > { %v424_v45 = vpop.f32.mrf.mxu2  ;;  %v444_v46 = vpop.f32.mrf.mxu3 }
  0xc0   : > { %v425_v47 = vadd.f32 %v799_v24, %v424_v45  ;;  %v445_v48 = vadd.f32 %v799_v24, %v444_v46  ;;  %v386_v49 = vpop.f32.mrf.mxu0  ;;  %v406_v50 = vpop.f32.mrf.mxu1 }
  0xc1   : > { %v387_v51 = vadd.f32 %v799_v24, %v386_v49  ;;  %v407_v52 = vadd.f32 %v799_v24, %v406_v50 }
  0xc2   : > { %477 = vst [vmem:[%s804_s14 + $0x90] sm:$0xff] %v425_v47 }
  0xc3   : > { %485 = vst [vmem:[%s804_s14 + $0xd0] sm:$0xff] %v445_v48 }
  0xc4   : > { %462 = vst [vmem:[%s804_s14 + $0x18] sm:$0xff] %v387_v51 }
  0xc5   : > { %470 = vst [vmem:[%s804_s14 + $0x58] sm:$0xff] %v407_v52 }
  0xc7   : > { %v426_v53 = vpop.f32.mrf.mxu2  ;;  %v446_v54 = vpop.f32.mrf.mxu3 }
  0xc8   : > { %v427_v55 = vadd.f32 %v799_v24, %v426_v53  ;;  %v447_v56 = vadd.f32 %v799_v24, %v446_v54  ;;  %v389_v57 = vpop.f32.mrf.mxu0  ;;  %v409_v58 = vpop.f32.mrf.mxu1 }
  0xc9   : > { %v390_v59 = vadd.f32 %v799_v24, %v389_v57  ;;  %v410_v60 = vadd.f32 %v799_v24, %v409_v58 }
  0xca   : > { %478 = vst [vmem:[%s804_s14 + $0x98] sm:$0xff] %v427_v55 }
  0xcb   : > { %486 = vst [vmem:[%s804_s14 + $0xd8] sm:$0xff] %v447_v56 }
  0xcc   : > { %463 = vst [vmem:[%s804_s14 + $0x20] sm:$0xff] %v390_v59 }
  0xcd   : > { %471 = vst [vmem:[%s804_s14 + $0x60] sm:$0xff] %v410_v60 }
  0xcf   : > { %v429_v61 = vpop.f32.mrf.mxu2  ;;  %v449_v62 = vpop.f32.mrf.mxu3 }
  0xd0   : > { %v430_v63 = vadd.f32 %v799_v24, %v429_v61  ;;  %v450_v0 = vadd.f32 %v799_v24, %v449_v62  ;;  %v391_v1 = vpop.f32.mrf.mxu0  ;;  %v411_v2 = vpop.f32.mrf.mxu1 }
  0xd1   : > { %v392_v3 = vadd.f32 %v799_v24, %v391_v1  ;;  %v412_v4 = vadd.f32 %v799_v24, %v411_v2 }
  0xd2   : > { %479 = vst [vmem:[%s804_s14 + $0xa0] sm:$0xff] %v430_v63 }
  0xd3   : > { %487 = vst [vmem:[%s804_s14 + $0xe0] sm:$0xff] %v450_v0 }
  0xd4   : > { %464 = vst [vmem:[%s804_s14 + $0x28] sm:$0xff] %v392_v3 }
  0xd5   : > { %472 = vst [vmem:[%s804_s14 + $0x68] sm:$0xff] %v412_v4 }
  0xd7   : > { %v431_v5 = vpop.f32.mrf.mxu2  ;;  %v451_v6 = vpop.f32.mrf.mxu3 }
  0xd8   : > { %v432_v7 = vadd.f32 %v799_v24, %v431_v5  ;;  %v452_v8 = vadd.f32 %v799_v24, %v451_v6  ;;  %v394_v9 = vpop.f32.mrf.mxu0  ;;  %v414_v10 = vpop.f32.mrf.mxu1 }
  0xd9   : > { %v395_v11 = vadd.f32 %v799_v24, %v394_v9  ;;  %v415_v12 = vadd.f32 %v799_v24, %v414_v10 }
  0xda   : > { %480 = vst [vmem:[%s804_s14 + $0xa8] sm:$0xff] %v432_v7 }
  0xdb   : > { %488 = vst [vmem:[%s804_s14 + $0xe8] sm:$0xff] %v452_v8 }
  0xdc   : > { %465 = vst [vmem:[%s804_s14 + $0x30] sm:$0xff] %v395_v11 }
  0xdd   : > { %473 = vst [vmem:[%s804_s14 + $0x70] sm:$0xff] %v415_v12 }
  0xdf   : > { %v434_v13 = vpop.f32.mrf.mxu2  ;;  %v454_v14 = vpop.f32.mrf.mxu3 }
  0xe0   : > { %v435_v15 = vadd.f32 %v799_v24, %v434_v13  ;;  %v455_v16 = vadd.f32 %v799_v24, %v454_v14  ;;  %v396_v17 = vpop.f32.mrf.mxu0  ;;  %v416_v18 = vpop.f32.mrf.mxu1 }
  0xe1   : > { %v397_v19 = vadd.f32 %v799_v24, %v396_v17  ;;  %v417_v20 = vadd.f32 %v799_v24, %v416_v18 }
  0xe2   : > { %481 = vst [vmem:[%s804_s14 + $0xb0] sm:$0xff] %v435_v15 }
  0xe3   : > { %489 = vst [vmem:[%s804_s14 + $0xf0] sm:$0xff] %v455_v16 }
  0xe4   : > { %466 = vst [vmem:[%s804_s14 + $0x38] sm:$0xff] %v397_v19 }
  0xe5   : > { %474 = vst [vmem:[%s804_s14 + $0x78] sm:$0xff] %v417_v20 }
  0xe7   : > { %v436_v21 = vpop.f32.mrf.mxu2  ;;  %v456_v22 = vpop.f32.mrf.mxu3 }
  0xe8   : > { %v437_v23 = vadd.f32 %v799_v24, %v436_v21  ;;  %v457_v25 = vadd.f32 %v799_v24, %v456_v22 }
  0xea   : > { %482 = vst [vmem:[%s804_s14 + $0xb8] sm:$0xff] %v437_v23 }
  0xeb   : > { %490 = vst [vmem:[%s804_s14 + $0xf8] sm:$0xff] %v457_v25 }
  0xec PF: > { %s13_s12 = sadd.s32 1, %s717_s12  }
  0xed   : > { %p10_p4 = scmp.ge.s32.totalorder %s13_s12, 4  }
  0xef   :  { %12 = sbr.rel (!%p10_p4) target bundleno = 1 (0x1), region = 62 }

// kernel: model_forward.15
= control target key start
LH: loop header
LB: loop body
LE: loop exit
PB: predicated region body
PF: predicated region fallthrough
CT: control target
= control target key end

     0   :  { %s3897_s12 = smov 0   ;;  %s4858_s0 = inlined_call_operand.vmem [shape: f32[2,332,43], index: 0, kind: input, shape index: {}]   ;;  %s4859_s1 = inlined_call_operand.vmem [shape: bf16[9,43,128], index: 1, kind: input, shape index: {}]   ;;  %s4860_s2 = inlined_call_operand.vmem [shape: f32[1,128], index: 2, kind: input, shape index: {}]   ;;  %s4861_s3 = inlined_call_operand.vmem [shape: f32[2,288,128], index: 3, kind: output, shape index: {}]  }
   0x1 LB: > { %s3493_s13 = sadd.s32 4294967295, %s3874_s12   ;;  %p3497_p0 = scmp.ge.s32.totalorder %s3874_s12, 1  ;;  %s3874_s12 = sphi %s3897_s12, %s13_s12  }
   0x2   : > { %p137_p1 = scmp.lt.s32.totalorder %s3874_s12, 3 }
   0x4   : > { %p138_p2 = pnand %p3497_p0, %p137_p1 }
   0x5   : > { %p161_p3 = scmp.lt.s32.totalorder (!%p138_p2), %s3493_s13, 1 }
   0x6   : > { %141 = sbr.rel (%p138_p2) target bundleno = 819 (0x333), region = 32 }
   0xb   : > { %v3510_v0 = vld [vmem:[%s4859_s1 + $0x10] sm:$0xf]  ;;  %v3822_v1 = vld [vmem:[%s4859_s1 + $0x10] sm:$0x30]  ;;  %vm376_vm0 = vcmask 1044480   ;;  %vm377_vm1 = vcmask 1045504  }
   0xc   : > { %v3511_v2 = vor.u32 %v3822_v1, %v3510_v0  ;;  %v3876_v3 = vmov 65535   ;;  %s4863_s13 = smov (!%p161_p3, %s3493_s13), 1  ;;  %v3582_v6 = vld [vmem:[%s4859_s1 + $0x40] sm:$0xf]  ;;  %v3828_v7 = vld [vmem:[%s4859_s1 + $0x40] sm:$0x30] }
   0xd   : > { %v378_v4 = vsel %vm376_vm0, 4294967295, %v3876_v3  ;;  %v3546_v9 = vld [vmem:[%s4859_s1 + $0x28] sm:$0xf]  ;;  %v3825_v10 = vld [vmem:[%s4859_s1 + $0x28] sm:$0x30]  ;;  %s3856_s28 = smul.u32 336, %s4863_s13  ;;  %v3583_v14 = vor.u32 %v3828_v7, %v3582_v6 }
   0xe   : > { %v3911_v5 = vsel %vm377_vm1, %v378_v4, 0  ;;  %v3654_v11 = vld [vmem:[%s4859_s1 + $0x70] sm:$0xf]  ;;  %v3834_v12 = vld [vmem:[%s4859_s1 + $0x70] sm:$0x30]  ;;  %v3821_v13 = vld [vmem:[%s4859_s1 + $0x8] sm:$0xff]  ;;  %v3547_v15 = vor.u32 %v3825_v10, %v3546_v9 }
   0xf   : > { %v381_v8 = vand.u32 %v3511_v2, %v3911_v5  ;;  %s3941_s8 = scalar_lea.vmem %s4858_s0, %s3856_s28  ;;  %v3655_v16 = vor.u32 %v3834_v12, %v3654_v11  ;;  %v3820_v17 = vld [vmem:[%s4859_s1] sm:$0xff]  ;;  %v1065_v22 = vand.u32 %v3583_v14, %v3911_v5  ;;  %vm321_vm2 = vcmask 351232   ;;  %v3827_v32 = vld [vmem:[%s4859_s1 + $0x38] sm:$0xff]  ;;  %v3833_v37 = vld [vmem:[%s4859_s1 + $0x68] sm:$0xff]  ;;  %s3857_s19 = smul.u32 288, %s4863_s13 }
  0x10   : > { %v218_v18 = vld [vmem:[%s3941_s8 + $0x50] sm:$0xff]  ;;  %v219_v19 = vld [vmem:[%s3941_s8 + $0x58] sm:$0xff]  ;;  %v228_v20 = vld [vmem:[%s3941_s8 + $0xa0] sm:$0xff]  ;;  %v723_v25 = vand.u32 %v3547_v15, %v3911_v5 }
  0x11   : > { %3847 = vmatpush.bf16.msra.mxu1 %v381_v8  ;;  %3848 = vmatpush.bf16.msra.mxu2 %v381_v8  ;;  %v229_v21 = vld [vmem:[%s3941_s8 + $0xa8] sm:$0xff]  ;;  %v208_v23 = vld [vmem:[%s3941_s8] sm:$0xff]  ;;  %v1749_v26 = vand.u32 %v3655_v16, %v3911_v5  ;;  %v249_v27 = vpack.c.bf16 %v219_v19, %v218_v18  ;;  %v238_v30 = vld [vmem:[%s3941_s8 + $0xf0] sm:$0xff]  ;;  %s4629_s22 = scalar_lea.vmem %s4861_s3, %s3857_s19 }
  0x12   : > { %388 = vmatpush.bf16.msra.mxu0 %v381_v8  ;;  %3849 = vmatpush.bf16.msra.mxu3 %v381_v8  ;;  %v209_v24 = vld [vmem:[%s3941_s8 + $0x8] sm:$0xff]  ;;  %v254_v28 = vpack.c.bf16 %v229_v21, %v228_v20  ;;  %v239_v31 = vld [vmem:[%s3941_s8 + $0xf8] sm:$0xff]  ;;  %v3824_v33 = vld [vmem:[%s4859_s1 + $0x20] sm:$0xff] }
  0x13   : > { %v244_v29 = vpack.c.bf16 %v209_v24, %v208_v23  ;;  %v259_v34 = vpack.c.bf16 %v239_v31, %v238_v30  ;;  %v3618_v35 = vld [vmem:[%s4859_s1 + $0x58] sm:$0xf]  ;;  %v3831_v36 = vld [vmem:[%s4859_s1 + $0x58] sm:$0x30]  ;;  %v220_v40 = vld [vmem:[%s3941_s8 + $0x60] sm:$0xff] }
  0x14   : > { %v3619_v38 = vor.u32 %v3831_v36, %v3618_v35  ;;  %v221_v41 = vld [vmem:[%s3941_s8 + $0x68] sm:$0xff]  ;;  %v230_v42 = vld [vmem:[%s3941_s8 + $0xb0] sm:$0xff]  ;;  %v231_v43 = vld [vmem:[%s3941_s8 + $0xb8] sm:$0xff] }
  0x15   : > { %3850 = vmatpush.bf16.msra.mxu1 %v3821_v13  ;;  %3851 = vmatpush.bf16.msra.mxu2 %v3821_v13  ;;  %v210_v44 = vld [vmem:[%s3941_s8 + $0x10] sm:$0xff]  ;;  %v211_v45 = vld [vmem:[%s3941_s8 + $0x18] sm:$0xff]  ;;  %v250_v46 = vpack.c.bf16 %v221_v41, %v220_v40  ;;  %v255_v47 = vpack.c.bf16 %v231_v43, %v230_v42  ;;  %v240_v49 = vld [vmem:[%s3941_s8 + $0x100] sm:$0xff] }
  0x16   : > { %389 = vmatpush.bf16.msra.mxu0 %v3821_v13  ;;  %3852 = vmatpush.bf16.msra.mxu3 %v3821_v13  ;;  %v1407_v39 = vand.u32 %v3619_v38, %v3911_v5  ;;  %v245_v48 = vpack.c.bf16 %v211_v45, %v210_v44  ;;  %v241_v50 = vld [vmem:[%s3941_s8 + $0x108] sm:$0xff]  ;;  %v3830_v52 = vld [vmem:[%s4859_s1 + $0x50] sm:$0xff]  ;;  %v3823_v54 = vld [vmem:[%s4859_s1 + $0x18] sm:$0xff] }
  0x17   : > { %v260_v51 = vpack.c.bf16 %v241_v50, %v240_v49  ;;  %v3826_v53 = vld [vmem:[%s4859_s1 + $0x30] sm:$0xff]  ;;  %v223_v56 = vld [vmem:[%s3941_s8 + $0x78] sm:$0xff]  ;;  %v232_v57 = vld [vmem:[%s3941_s8 + $0xc0] sm:$0xff] }
  0x18   : > { %v222_v55 = vld [vmem:[%s3941_s8 + $0x70] sm:$0xff]  ;;  %v233_v58 = vld [vmem:[%s3941_s8 + $0xc8] sm:$0xff]  ;;  %v212_v59 = vld [vmem:[%s3941_s8 + $0x20] sm:$0xff] }
  0x19   : > { %3853 = vmatpush.bf16.msra.mxu1 %v3820_v17  ;;  %3854 = vmatpush.bf16.msra.mxu2 %v3820_v17  ;;  %v213_v60 = vld [vmem:[%s3941_s8 + $0x28] sm:$0xff]  ;;  %v251_v61 = vpack.c.bf16 %v223_v56, %v222_v55  ;;  %v256_v62 = vpack.c.bf16 %v233_v58, %v232_v57  ;;  %v242_v0 = vld [vmem:[%s3941_s8 + $0x110] sm:$0xff]  ;;  %v243_v1 = vld [vmem:[%s3941_s8 + $0x118] sm:$0xff] }
  0x1a   : > { %390 = vmatpush.bf16.msra.mxu0 %v3820_v17  ;;  %3855 = vmatpush.bf16.msra.mxu3 %v3820_v17  ;;  %v246_v63 = vpack.c.bf16 %v213_v60, %v212_v59  ;;  %v261_v2 = vpack.c.bf16 %v243_v1, %v242_v0  ;;  %v3832_v3 = vld [vmem:[%s4859_s1 + $0x60] sm:$0xff]  ;;  %v3829_v4 = vld [vmem:[%s4859_s1 + $0x48] sm:$0xff]  ;;  %v234_v8 = vld [vmem:[%s3941_s8 + $0xd0] sm:$0xff] }
  0x1b   : > { %v224_v6 = vld [vmem:[%s3941_s8 + $0x80] sm:$0xff]  ;;  %v225_v7 = vld [vmem:[%s3941_s8 + $0x88] sm:$0xff]  ;;  %v235_v9 = vld [vmem:[%s3941_s8 + $0xd8] sm:$0xff] }
  0x1c   : > { %3517 = vmatmul.msk.bf16.vlgmr.msra.gmra.mxu1 %vm321_vm2, %v249_v27  ;;  %3522 = vmatmul.msk.bf16.vlgmr.msra.gmra.mxu2 %vm321_vm2, %v254_v28  ;;  %v214_v10 = vld [vmem:[%s3941_s8 + $0x30] sm:$0xff]  ;;  %v215_v11 = vld [vmem:[%s3941_s8 + $0x38] sm:$0xff]  ;;  %v252_v12 = vpack.c.bf16 %v225_v7, %v224_v6  ;;  %v257_v13 = vpack.c.bf16 %v235_v9, %v234_v8  ;;  %v3726_v18 = vld [vmem:[%s4859_s1 + $0xa0] sm:$0xf] }
  0x1d   : > { %1072 = vmatpush.bf16.msrb.mxu2 %v1065_v22  ;;  %730 = vmatpush.bf16.msrb.mxu1 %v723_v25  ;;  %v247_v14 = vpack.c.bf16 %v215_v11, %v214_v10  ;;  %v1238_v15 = vld [vmem:[%s3941_s8 + $0x12] sm:$0xff]  ;;  %v1239_v16 = vld [vmem:[%s3941_s8 + $0x1a] sm:$0xff]  ;;  %v3840_v19 = vld [vmem:[%s4859_s1 + $0xa0] sm:$0x30] }
  0x1e   : > { %1756 = vmatpush.bf16.msrb.mxu0 %v1749_v26  ;;  %3527 = vmatmul.msk.bf16.vlgmr.msra.gmra.mxu3 %vm321_vm2, %v259_v34  ;;  %v4026_v17 = vpack.c.bf16 %v1239_v16, %v1238_v15  ;;  %v3727_v20 = vor.u32 %v3840_v19, %v3726_v18  ;;  %v3762_v21 = vld [vmem:[%s4859_s1 + $0xb8] sm:$0xf]  ;;  %v3843_v22 = vld [vmem:[%s4859_s1 + $0xb8] sm:$0x30]  ;;  %v3690_v23 = vld [vmem:[%s4859_s1 + $0x88] sm:$0xf] }
  0x1f   : > { %3512 = vmatmul.msk.bf16.vlgmr.msra.gmra.mxu0 %vm321_vm2, %v244_v29  ;;  %1414 = vmatpush.bf16.msrb.mxu3 %v1407_v39  ;;  %v3763_v24 = vor.u32 %v3843_v22, %v3762_v21  ;;  %v3837_v25 = vld [vmem:[%s4859_s1 + $0x88] sm:$0x30]  ;;  %v3798_v28 = vld [vmem:[%s4859_s1 + $0xd0] sm:$0xf]  ;;  %v3846_v29 = vld [vmem:[%s4859_s1 + $0xd0] sm:$0x30] }
  0x20   : > { %v2433_v26 = vand.u32 %v3727_v20, %v3911_v5  ;;  %v3691_v27 = vor.u32 %v3837_v25, %v3690_v23  ;;  %v3799_v31 = vor.u32 %v3846_v29, %v3798_v28  ;;  %v226_v34 = vld [vmem:[%s3941_s8 + $0x90] sm:$0xff]  ;;  %v227_v35 = vld [vmem:[%s3941_s8 + $0x98] sm:$0xff]  ;;  %v236_v36 = vld [vmem:[%s3941_s8 + $0xe0] sm:$0xff] }
  0x21   : > { %1073 = vmatpush.bf16.msrb.mxu2 %v3827_v32  ;;  %731 = vmatpush.bf16.msrb.mxu1 %v3824_v33  ;;  %v2775_v30 = vand.u32 %v3763_v24, %v3911_v5  ;;  %v216_v38 = vld [vmem:[%s3941_s8 + $0x40] sm:$0xff]  ;;  %v217_v39 = vld [vmem:[%s3941_s8 + $0x48] sm:$0xff]  ;;  %v253_v40 = vpack.c.bf16 %v227_v35, %v226_v34  ;;  %v1580_v49 = vld [vmem:[%s3941_s8 + $0x13] sm:$0xff] }
  0x22   : > { %1757 = vmatpush.bf16.msrb.mxu0 %v3833_v37  ;;  %v2091_v32 = vand.u32 %v3691_v27, %v3911_v5  ;;  %v3117_v33 = vand.u32 %v3799_v31, %v3911_v5  ;;  %v237_v37 = vld [vmem:[%s3941_s8 + $0xe8] sm:$0xff]  ;;  %v248_v42 = vpack.c.bf16 %v217_v39, %v216_v38  ;;  %v1581_v50 = vld [vmem:[%s3941_s8 + $0x1b] sm:$0xff]  ;;  %v556_v57 = vld [vmem:[%s3941_s8 + $0x11] sm:$0xff] }
  0x23   : > { %1415 = vmatpush.bf16.msrb.mxu3 %v3830_v52  ;;  %v258_v41 = vpack.c.bf16 %v237_v37, %v236_v36  ;;  %v1240_v43 = vld [vmem:[%s3941_s8 + $0x22] sm:$0xff]  ;;  %v1241_v5 = vld [vmem:[%s3941_s8 + $0x2a] sm:$0xff]  ;;  %v1243_v55 = vld [vmem:[%s3941_s8 + $0x3a] sm:$0xff] }
  0x24   : > { %v1275_v44 = vpack.c.bf16 %v1241_v5, %v1240_v43  ;;  %v554_v45 = vld [vmem:[%s3941_s8 + $0x1] sm:$0xff]  ;;  %v557_v58 = vld [vmem:[%s3941_s8 + $0x19] sm:$0xff]  ;;  %v1583_v60 = vld [vmem:[%s3941_s8 + $0x2b] sm:$0xff] }
  0x25   : > { %1074 = vmatpush.bf16.msrb.mxu2 %v3826_v53  ;;  %732 = vmatpush.bf16.msrb.mxu1 %v3823_v54  ;;  %v1616_v53 = vpack.c.bf16 %v1581_v50, %v1580_v49  ;;  %v1242_v54 = vld [vmem:[%s3941_s8 + $0x32] sm:$0xff]  ;;  %v1582_v59 = vld [vmem:[%s3941_s8 + $0x23] sm:$0xff]  ;;  %v1585_v6 = vld [vmem:[%s3941_s8 + $0x3b] sm:$0xff] }
  0x26   : > { %1758 = vmatpush.bf16.msrb.mxu0 %v3832_v3  ;;  %v1276_v56 = vpack.c.bf16 %v1243_v55, %v1242_v54  ;;  %v1245_v0 = vld [vmem:[%s3941_s8 + $0x4a] sm:$0xff]  ;;  %v1246_v9 = vld [vmem:[%s3941_s8 + $0x52] sm:$0xff]  ;;  %v1247_v10 = vld [vmem:[%s3941_s8 + $0x5a] sm:$0xff] }
  0x27   : > { %1416 = vmatpush.bf16.msrb.mxu3 %v3829_v4  ;;  %v559_v3 = vld [vmem:[%s3941_s8 + $0x29] sm:$0xff]  ;;  %v1584_v4 = vld [vmem:[%s3941_s8 + $0x33] sm:$0xff]  ;;  %v4102_v11 = vpack.c.bf16 %v1247_v10, %v1246_v9  ;;  %v562_v27 = vld [vmem:[%s3941_s8 + $0x41] sm:$0xff] }
  0x28   : > { %v1618_v8 = vpack.c.bf16 %v1585_v6, %v1584_v4  ;;  %v1587_v15 = vld [vmem:[%s3941_s8 + $0x4b] sm:$0xff]  ;;  %v1248_v19 = vld [vmem:[%s3941_s8 + $0x62] sm:$0xff]  ;;  %v1588_v29 = vld [vmem:[%s3941_s8 + $0x53] sm:$0xff] }
  0x29   : > { %2440 = vmatpush.bf16.msra.mxu2 %v2433_v26  ;;  %2098 = vmatpush.bf16.msra.mxu1 %v2091_v32  ;;  %v1249_v20 = vld [vmem:[%s3941_s8 + $0x6a] sm:$0xff]  ;;  %v1250_v35 = vld [vmem:[%s3941_s8 + $0x72] sm:$0xff]  ;;  %v1251_v36 = vld [vmem:[%s3941_s8 + $0x7a] sm:$0xff] }
  0x2a   : > { %3124 = vmatpush.bf16.msra.mxu0 %v3117_v33  ;;  %v4119_v22 = vpack.c.bf16 %v1249_v20, %v1248_v19  ;;  %v563_v28 = vld [vmem:[%s3941_s8 + $0x49] sm:$0xff]  ;;  %v4148_v39 = vpack.c.bf16 %v1251_v36, %v1250_v35  ;;  %v3836_v43 = vld [vmem:[%s4859_s1 + $0x80] sm:$0xff]  ;;  %v1254_v9 = vld [vmem:[%s3941_s8 + $0x92] sm:$0xff] }
  0x2b   : > { %2782 = vmatpush.bf16.msra.mxu3 %v2775_v30  ;;  %v1589_v30 = vld [vmem:[%s3941_s8 + $0x5b] sm:$0xff]  ;;  %v594_v32 = vpack.c.bf16 %v563_v28, %v562_v27  ;;  %v1590_v49 = vld [vmem:[%s3941_s8 + $0x63] sm:$0xff]  ;;  %v1591_v50 = vld [vmem:[%s3941_s8 + $0x6b] sm:$0xff] }
  0x2c   : > { %3518 = vmatmul.msk.bf16.gmra.mxu1 %vm321_vm2, %v250_v46  ;;  %3523 = vmatmul.msk.bf16.gmra.mxu2 %vm321_vm2, %v255_v47  ;;  %v555_v46 = vld [vmem:[%s3941_s8 + $0x9] sm:$0xff]  ;;  %v1620_v34 = vpack.c.bf16 %v1589_v30, %v1588_v29  ;;  %v1621_v54 = vpack.c.bf16 %v1591_v50, %v1590_v49  ;;  %v1255_v10 = vld [vmem:[%s3941_s8 + $0x9a] sm:$0xff]  ;;  %v568_v19 = vld [vmem:[%s3941_s8 + $0x71] sm:$0xff] }
  0x2d   : > { %v896_v47 = vld [vmem:[%s3941_s8 + $0x2] sm:$0xff]  ;;  %2099 = vmatpush.bf16.msra.mxu1 %v3836_v43  ;;  %v569_v20 = vld [vmem:[%s3941_s8 + $0x79] sm:$0xff]  ;;  %v1257_v35 = vld [vmem:[%s3941_s8 + $0xaa] sm:$0xff] }
  0x2e   : > { %3528 = vmatmul.msk.bf16.gmra.mxu3 %vm321_vm2, %v260_v51  ;;  %v590_v51 = vpack.c.bf16 %v555_v46, %v554_v45  ;;  %v3845_v45 = vld [vmem:[%s4859_s1 + $0xc8] sm:$0xff]  ;;  %v597_v29 = vpack.c.bf16 %v569_v20, %v568_v19 }
  0x2f   : > { %3513 = vmatmul.msk.bf16.gmra.mxu0 %vm321_vm2, %v245_v48  ;;  %v897_v48 = vld [vmem:[%s3941_s8 + $0xa] sm:$0xff]  ;;  %v1252_v55 = vld [vmem:[%s3941_s8 + $0x82] sm:$0xff] }
  0x30   : > { %v932_v52 = vpack.c.bf16 %v897_v48, %v896_v47  ;;  %3125 = vmatpush.bf16.msra.mxu0 %v3845_v45  ;;  %v564_v47 = vld [vmem:[%s3941_s8 + $0x51] sm:$0xff]  ;;  %v565_v48 = vld [vmem:[%s3941_s8 + $0x59] sm:$0xff]  ;;  %v1594_v27 = vld [vmem:[%s3941_s8 + $0x83] sm:$0xff] }
  0x31   : > { %v570_v49 = vld [vmem:[%s3941_s8 + $0x81] sm:$0xff]  ;;  %v571_v50 = vld [vmem:[%s3941_s8 + $0x89] sm:$0xff] }
  0x3c   : > { %3519 = vmatmul.msk.bf16.gmra.mxu1 %vm321_vm2, %v251_v61  ;;  %3524 = vmatmul.msk.bf16.gmra.mxu2 %vm321_vm2, %v256_v62  ;;  %v591_v61 = vpack.c.bf16 %v557_v58, %v556_v57  ;;  %v1617_v62 = vpack.c.bf16 %v1583_v60, %v1582_v59 }
  0x3e   : > { %3529 = vmatmul.msk.bf16.gmra.mxu3 %vm321_vm2, %v261_v2  ;;  %v558_v2 = vld [vmem:[%s3941_s8 + $0x21] sm:$0xff] }
  0x3f   : > { %3514 = vmatmul.msk.bf16.gmra.mxu0 %vm321_vm2, %v246_v63  ;;  %v1244_v63 = vld [vmem:[%s3941_s8 + $0x42] sm:$0xff]  ;;  %v592_v7 = vpack.c.bf16 %v559_v3, %v558_v2  ;;  %v1592_v2 = vld [vmem:[%s3941_s8 + $0x73] sm:$0xff] }
  0x40   : > { %v1277_v1 = vpack.c.bf16 %v1245_v0, %v1244_v63  ;;  %v566_v0 = vld [vmem:[%s3941_s8 + $0x61] sm:$0xff] }
  0x41   : > { %v1593_v3 = vld [vmem:[%s3941_s8 + $0x7b] sm:$0xff] }
  0x4c   : > { %3520 = vmatmul.msk.bf16.gmra.mxu1 %vm321_vm2, %v252_v12  ;;  %3525 = vmatmul.msk.bf16.gmra.mxu2 %vm321_vm2, %v257_v13  ;;  %v560_v12 = vld [vmem:[%s3941_s8 + $0x31] sm:$0xff]  ;;  %v561_v13 = vld [vmem:[%s3941_s8 + $0x39] sm:$0xff] }
  0x4d   : > { %v593_v16 = vpack.c.bf16 %v561_v13, %v560_v12  ;;  %v4217_v13 = vpack.c.bf16 %v1255_v10, %v1254_v9 }
  0x4e   : > { %3620 = vmatmul.msk.bf16.vlgmr.msrb.gmra.mxu3 %vm321_vm2, %v4026_v17 }
  0x4f   : > { %3515 = vmatmul.msk.bf16.gmra.mxu0 %vm321_vm2, %v247_v14  ;;  %v1586_v14 = vld [vmem:[%s3941_s8 + $0x43] sm:$0xff] }
  0x50   : > { %v1619_v18 = vpack.c.bf16 %v1587_v15, %v1586_v14 }
  0x5c   : > { %3521 = vmatmul.msk.bf16.gmra.mxu1 %vm321_vm2, %v253_v40  ;;  %3526 = vmatmul.msk.bf16.gmra.mxu2 %vm321_vm2, %v258_v41  ;;  %v3839_v40 = vld [vmem:[%s4859_s1 + $0x98] sm:$0xff]  ;;  %v3842_v41 = vld [vmem:[%s4859_s1 + $0xb0] sm:$0xff] }
  0x5d   : > { %2441 = vmatpush.bf16.msra.mxu2 %v3839_v40  ;;  %2783 = vmatpush.bf16.msra.mxu3 %v3842_v41 }
  0x5e   : > { %3621 = vmatmul.msk.bf16.gmra.mxu3 %vm321_vm2, %v1275_v44 }
  0x5f   : > { %3516 = vmatmul.msk.bf16.gmra.mxu0 %vm321_vm2, %v248_v42 }
  0x6c   : > { %3548 = vmatmul.msk.bf16.vlgmr.msrb.gmra.mxu1 %vm321_vm2, %v590_v51  ;;  %3584 = vmatmul.msk.bf16.vlgmr.msrb.gmra.mxu2 %vm321_vm2, %v932_v52  ;;  %v595_v52 = vpack.c.bf16 %v565_v48, %v564_v47 }
  0x6e   : > { %3622 = vmatmul.msk.bf16.gmra.mxu3 %vm321_vm2, %v1276_v56 }
  0x6f   : > { %3656 = vmatmul.msk.bf16.vlgmr.msrb.gmra.mxu0 %vm321_vm2, %v1616_v53 }
  0x7c   : > { %3549 = vmatmul.msk.bf16.gmra.mxu1 %vm321_vm2, %v591_v61  ;;  %3585 = vmatmul.msk.bf16.gmra.mxu2 %vm321_vm2, %v4026_v17 }
  0x7e   : > { %3623 = vmatmul.msk.bf16.gmra.mxu3 %vm321_vm2, %v1277_v1 }
  0x7f   : > { %3657 = vmatmul.msk.bf16.gmra.mxu0 %vm321_vm2, %v1617_v62 }
  0x8c   : > { %3550 = vmatmul.msk.bf16.gmra.mxu1 %vm321_vm2, %v592_v7  ;;  %3586 = vmatmul.msk.bf16.gmra.mxu2 %vm321_vm2, %v1275_v44 }
  0x8e   : > { %3624 = vmatmul.msk.bf16.gmra.mxu3 %vm321_vm2, %v4102_v11 }
  0x8f   : > { %3658 = vmatmul.msk.bf16.gmra.mxu0 %vm321_vm2, %v1618_v8  ;;  %v1622_v8 = vpack.c.bf16 %v1593_v3, %v1592_v2  ;;  %v1259_v2 = vld [vmem:[%s3941_s8 + $0xba] sm:$0xff] }
  0x99   : > { %v4111_v17 = vpop.f32.mrf.mxu1 }
  0x9c   : > { %v4115_v21 = vpop.f32.mrf.mxu0  ;;  %3551 = vmatmul.msk.bf16.gmra.mxu1 %vm321_vm2, %v593_v16  ;;  %3587 = vmatmul.msk.bf16.gmra.mxu2 %vm321_vm2, %v1276_v56  ;;  %v1253_v56 = vld [vmem:[%s3941_s8 + $0x8a] sm:$0xff] }
  0x9d   : > { %v1281_v59 = vpack.c.bf16 %v1253_v56, %v1252_v55  ;;  %v598_v55 = vpack.c.bf16 %v571_v50, %v570_v49  ;;  %v1598_v49 = vld [vmem:[%s3941_s8 + $0xa3] sm:$0xff]  ;;  %v1599_v50 = vld [vmem:[%s3941_s8 + $0xab] sm:$0xff] }
  0x9e   : > { %3625 = vmatmul.msk.bf16.gmra.mxu3 %vm321_vm2, %v4119_v22 }
  0x9f   : > { %3659 = vmatmul.msk.bf16.gmra.mxu0 %vm321_vm2, %v1619_v18  ;;  %v4122_v23 = vpop.f32.mrf.mxu2 }
  0xa1   : > { %v4126_v24 = vpop.f32.mrf.mxu1  ;;  %v4130_v26 = vpop.f32.mrf.mxu3 }
  0xa4   : > { %v4128_v25 = vpop.f32.mrf.mxu0 }
  0xa7   : > { %v4136_v31 = vpop.f32.mrf.mxu2 }
  0xa9   : > { %v4138_v33 = vpop.f32.mrf.mxu1  ;;  %v4144_v38 = vpop.f32.mrf.mxu3 }
  0xac   : > { %v4142_v37 = vpop.f32.mrf.mxu0  ;;  %3552 = vmatmul.msk.bf16.gmra.mxu1 %vm321_vm2, %v594_v32  ;;  %3588 = vmatmul.msk.bf16.gmra.mxu2 %vm321_vm2, %v1277_v1  ;;  %v567_v1 = vld [vmem:[%s3941_s8 + $0x69] sm:$0xff] }
  0xad   : > { %v596_v6 = vpack.c.bf16 %v567_v1, %v566_v0  ;;  %v1258_v1 = vld [vmem:[%s3941_s8 + $0xb2] sm:$0xff] }
  0xae   : > { %3626 = vmatmul.msk.bf16.gmra.mxu3 %vm321_vm2, %v4148_v39 }
  0xaf   : > { %3660 = vmatmul.msk.bf16.gmra.mxu0 %vm321_vm2, %v1620_v34  ;;  %v4157_v42 = vpop.f32.mrf.mxu2  ;;  %v1256_v34 = vld [vmem:[%s3941_s8 + $0xa2] sm:$0xff] }
  0xb0   : > { %v4243_v41 = vpack.c.bf16 %v1257_v35, %v1256_v34  ;;  %v573_v34 = vld [vmem:[%s3941_s8 + $0x99] sm:$0xff] }
  0xb1   : > { %v4164_v5 = vpop.f32.mrf.mxu1  ;;  %v4171_v46 = vpop.f32.mrf.mxu3 }
  0xb4   : > { %v4166_v44 = vpop.f32.mrf.mxu0 }
  0xb7   : > { %v4177_v51 = vpop.f32.mrf.mxu2 }
  0xb9   : > { %v4179_v53 = vpop.f32.mrf.mxu1  ;;  %v4185_v58 = vpop.f32.mrf.mxu3 }
  0xbc   : > { %v4183_v57 = vpop.f32.mrf.mxu0  ;;  %3553 = vmatmul.msk.bf16.gmra.mxu1 %vm321_vm2, %v595_v52  ;;  %3589 = vmatmul.msk.bf16.gmra.mxu2 %vm321_vm2, %v4102_v11  ;;  %v1596_v52 = vld [vmem:[%s3941_s8 + $0x93] sm:$0xff] }
  0xbe   : > { %3627 = vmatmul.msk.bf16.gmra.mxu3 %vm321_vm2, %v1281_v59 }
  0xbf   : > { %3661 = vmatmul.msk.bf16.gmra.mxu0 %vm321_vm2, %v1621_v54  ;;  %v4191_v60 = vpop.f32.mrf.mxu2 }
  0xc1   : > { %v4194_v61 = vpop.f32.mrf.mxu1  ;;  %v4198_v63 = vpop.f32.mrf.mxu3 }
  0xc4   : > { %v4196_v62 = vpop.f32.mrf.mxu0 }
  0xc7   : > { %v4204_v4 = vpop.f32.mrf.mxu2 }
  0xc9   : > { %v4206_v7 = vpop.f32.mrf.mxu1  ;;  %v4212_v12 = vpop.f32.mrf.mxu3 }
  0xcc   : > { %v4210_v11 = vpop.f32.mrf.mxu0  ;;  %3554 = vmatmul.msk.bf16.gmra.mxu1 %vm321_vm2, %v596_v6  ;;  %3590 = vmatmul.msk.bf16.gmra.mxu2 %vm321_vm2, %v4119_v22  ;;  %v1595_v22 = vld [vmem:[%s3941_s8 + $0x8b] sm:$0xff] }
  0xcd   : > { %v1623_v32 = vpack.c.bf16 %v1595_v22, %v1594_v27 }
  0xce   : > { %3628 = vmatmul.msk.bf16.gmra.mxu3 %vm321_vm2, %v4217_v13 }
  0xcf   : > { %3662 = vmatmul.msk.bf16.gmra.mxu0 %vm321_vm2, %v1622_v8  ;;  %v4220_v14 = vpop.f32.mrf.mxu2  ;;  %v4264_v8 = vpack.c.bf16 %v1259_v2, %v1258_v1  ;;  %v1261_v1 = vld [vmem:[%s3941_s8 + $0xca] sm:$0xff] }
  0xd1   : > { %v4224_v15 = vpop.f32.mrf.mxu1  ;;  %v1418_v18 = vpop.f32.mrf.mxu3 }
  0xd4   : > { %v4226_v16 = vpop.f32.mrf.mxu0 }
  0xd7   : > { %v4232_v28 = vpop.f32.mrf.mxu2 }
  0xd9   : > { %v4234_v30 = vpop.f32.mrf.mxu1  ;;  %v1420_v40 = vpop.f32.mrf.mxu3 }
  0xdc   : > { %v4238_v36 = vpop.f32.mrf.mxu0  ;;  %3555 = vmatmul.msk.bf16.gmra.mxu1 %vm321_vm2, %v597_v29  ;;  %3591 = vmatmul.msk.bf16.gmra.mxu2 %vm321_vm2, %v4148_v39  ;;  %v1597_v39 = vld [vmem:[%s3941_s8 + $0x9b] sm:$0xff] }
  0xdd   : > { %v1624_v0 = vpack.c.bf16 %v1597_v39, %v1596_v52 }
  0xde   : > { %3629 = vmatmul.msk.bf16.gmra.mxu3 %vm321_vm2, %v4243_v41 }
  0xdf   : > { %3663 = vmatmul.msk.bf16.gmra.mxu0 %vm321_vm2, %v1623_v32  ;;  %v4246_v43 = vpop.f32.mrf.mxu2 }
  0xe1   : > { %v4250_v45 = vpop.f32.mrf.mxu1  ;;  %v1423_v48 = vpop.f32.mrf.mxu3 }
  0xe4   : > { %v4252_v47 = vpop.f32.mrf.mxu0 }
  0xe7   : > { %v4258_v54 = vpop.f32.mrf.mxu2 }
  0xe9   : > { %v734_v56 = vpop.f32.mrf.mxu1  ;;  %v1425_v6 = vpop.f32.mrf.mxu3 }
  0xea   : > { %v824_v9 = vadd.f32 %v734_v56, %v4115_v21  ;;  %v1625_v56 = vpack.c.bf16 %v1599_v50, %v1598_v49  ;;  %v1600_v50 = vld [vmem:[%s3941_s8 + $0xb3] sm:$0xff] }
  0xec   : > { %v1760_v3 = vpop.f32.mrf.mxu0  ;;  %3556 = vmatmul.msk.bf16.gmra.mxu1 %vm321_vm2, %v598_v55  ;;  %3592 = vmatmul.msk.bf16.gmra.mxu2 %vm321_vm2, %v1281_v59  ;;  %v572_v59 = vld [vmem:[%s3941_s8 + $0x91] sm:$0xff] }
  0xed   : > { %v599_v39 = vpack.c.bf16 %v573_v34, %v572_v59 }
  0xee   : > { %3630 = vmatmul.msk.bf16.gmra.mxu3 %vm321_vm2, %v4264_v8 }
  0xef   : > { %3664 = vmatmul.msk.bf16.gmra.mxu0 %vm321_vm2, %v1624_v0  ;;  %v1076_v10 = vpop.f32.mrf.mxu2  ;;  %v1260_v0 = vld [vmem:[%s3941_s8 + $0xc2] sm:$0xff] }
  0xf0   : > { %v1166_v19 = vadd.f32 %v1076_v10, %v824_v9 }
  0xf1   : > { %v736_v20 = vpop.f32.mrf.mxu1  ;;  %v1428_v29 = vpop.f32.mrf.mxu3 }
  0xf2   : > { %v1508_v27 = vadd.f32 %v1418_v18, %v1166_v19  ;;  %v825_v35 = vadd.f32 %v736_v20, %v4128_v25  ;;  %v4284_v25 = vpack.c.bf16 %v1261_v1, %v1260_v0  ;;  %v1262_v0 = vld [vmem:[%s3941_s8 + $0xd2] sm:$0xff]  ;;  %v1263_v1 = vld [vmem:[%s3941_s8 + $0xda] sm:$0xff] }
  0xf4   : > { %v1762_v22 = vpop.f32.mrf.mxu0  ;;  %v4270_v32 = vadd.f32 %v1760_v3, %v1508_v27 }
  0xf7   : > { %v1078_v21 = vpop.f32.mrf.mxu2 }
  0xf8   : > { %v1167_v52 = vadd.f32 %v1078_v21, %v825_v35  ;;  %v575_v35 = vld [vmem:[%s3941_s8 + $0xa9] sm:$0xff] }
  0xf9   : > { %v739_v55 = vpop.f32.mrf.mxu1  ;;  %v4279_v18 = vpop.f32.mrf.mxu3 }
  0xfa   : > { %v1509_v2 = vadd.f32 %v1420_v40, %v1167_v52  ;;  %v826_v40 = vadd.f32 %v739_v55, %v4142_v37  ;;  %v1601_v37 = vld [vmem:[%s3941_s8 + $0xbb] sm:$0xff] }
  0xfc   : > { %v1765_v9 = vpop.f32.mrf.mxu0  ;;  %3557 = vmatmul.msk.bf16.gmra.mxu1 %vm321_vm2, %v599_v39  ;;  %3593 = vmatmul.msk.bf16.gmra.mxu2 %vm321_vm2, %v4217_v13  ;;  %v4286_v3 = vadd.f32 %v1762_v22, %v1509_v2  ;;  %v574_v22 = vld [vmem:[%s3941_s8 + $0xa1] sm:$0xff] }
  0xfd   : > { %v600_v39 = vpack.c.bf16 %v575_v35, %v574_v22  ;;  %v3835_v35 = vld [vmem:[%s4859_s1 + $0x78] sm:$0xff] }
  0xfe   : > { %3631 = vmatmul.msk.bf16.gmra.mxu3 %vm321_vm2, %v4284_v25  ;;  %2100 = vmatpush.bf16.msra.mxu1 %v3835_v35 }
  0xff   : > { %3665 = vmatmul.msk.bf16.gmra.mxu0 %vm321_vm2, %v1625_v56  ;;  %v1081_v10 = vpop.f32.mrf.mxu2  ;;  %v1626_v56 = vpack.c.bf16 %v1601_v37, %v1600_v50  ;;  %v576_v37 = vld [vmem:[%s3941_s8 + $0xb1] sm:$0xff] }
 0x100   : > { %v1168_v19 = vadd.f32 %v1081_v10, %v826_v40 }
 0x101   : > { %v741_v20 = vpop.f32.mrf.mxu1  ;;  %v4292_v59 = vpop.f32.mrf.mxu3 }
 0x102   : > { %v1510_v27 = vadd.f32 %v1423_v48, %v1168_v19  ;;  %v827_v49 = vadd.f32 %v741_v20, %v4166_v44  ;;  %v3838_v44 = vld [vmem:[%s4859_s1 + $0x90] sm:$0xff] }
 0x103   : > { %2442 = vmatpush.bf16.msra.mxu2 %v3838_v44  ;;  %v1264_v44 = vld [vmem:[%s3941_s8 + $0xe2] sm:$0xff] }
 0x104   : > { %v1767_v13 = vpop.f32.mrf.mxu0  ;;  %v4294_v34 = vadd.f32 %v1765_v9, %v1510_v27  ;;  %v4308_v9 = vpack.c.bf16 %v1263_v1, %v1262_v0 }
 0x107   : > { %v1083_v21 = vpop.f32.mrf.mxu2 }
 0x108   : > { %v1169_v52 = vadd.f32 %v1083_v21, %v827_v49  ;;  %v577_v21 = vld [vmem:[%s3941_s8 + $0xb9] sm:$0xff] }
 0x109   : > { %v744_v55 = vpop.f32.mrf.mxu1  ;;  %v4303_v40 = vpop.f32.mrf.mxu3  ;;  %v601_v0 = vpack.c.bf16 %v577_v21, %v576_v37 }
 0x10a   : > { %v1511_v2 = vadd.f32 %v1425_v6, %v1169_v52  ;;  %v3841_v6 = vld [vmem:[%s4859_s1 + $0xa8] sm:$0xff]  ;;  %v828_v19 = vadd.f32 %v744_v55, %v4183_v57  ;;  %v3844_v57 = vld [vmem:[%s4859_s1 + $0xc0] sm:$0xff] }
 0x10b   : > { %2784 = vmatpush.bf16.msra.mxu3 %v3841_v6  ;;  %3126 = vmatpush.bf16.msra.mxu0 %v3844_v57  ;;  %v1602_v52 = vld [vmem:[%s3941_s8 + $0xc3] sm:$0xff] }
 0x10c   : > { %v1770_v48 = vpop.f32.mrf.mxu0  ;;  %3558 = vmatmul.msk.bf16.gmra.mxu1 %vm321_vm2, %v600_v39  ;;  %3594 = vmatmul.msk.bf16.gmra.mxu2 %vm321_vm2, %v4243_v41  ;;  %v4313_v10 = vadd.f32 %v1767_v13, %v1511_v2  ;;  %v1603_v39 = vld [vmem:[%s3941_s8 + $0xcb] sm:$0xff] }
 0x10d   : > { %v1627_v2 = vpack.c.bf16 %v1603_v39, %v1602_v52  ;;  %v1265_v6 = vld [vmem:[%s3941_s8 + $0xea] sm:$0xff]  ;;  %v1604_v39 = vld [vmem:[%s3941_s8 + $0xd3] sm:$0xff] }
 0x10e   : > { %3632 = vmatmul.msk.bf16.gmra.mxu3 %vm321_vm2, %v4308_v9 }
 0x10f   : > { %3666 = vmatmul.msk.bf16.gmra.mxu0 %vm321_vm2, %v1626_v56  ;;  %v1086_v41 = vpop.f32.mrf.mxu2 }
 0x110   : > { %v1170_v20 = vadd.f32 %v1086_v41, %v828_v19 }
 0x111   : > { %v746_v27 = vpop.f32.mrf.mxu1  ;;  %v1438_v49 = vpop.f32.mrf.mxu3 }
 0x112   : > { %v1512_v13 = vadd.f32 %v1428_v29, %v1170_v20  ;;  %v829_v29 = vadd.f32 %v746_v27, %v4196_v62  ;;  %v4341_v62 = vpack.c.bf16 %v1265_v6, %v1264_v44  ;;  %v1266_v44 = vld [vmem:[%s3941_s8 + $0xf2] sm:$0xff]  ;;  %v1267_v6 = vld [vmem:[%s3941_s8 + $0xfa] sm:$0xff] }
 0x114   : > { %v1772_v22 = vpop.f32.mrf.mxu0  ;;  %v4328_v50 = vadd.f32 %v1770_v48, %v1512_v13 }
 0x117   : > { %v1088_v55 = vpop.f32.mrf.mxu2 }
 0x118   : > { %v1171_v56 = vadd.f32 %v1088_v55, %v829_v29  ;;  %v579_v29 = vld [vmem:[%s3941_s8 + $0xc9] sm:$0xff] }
 0x119   : > { %v749_v1 = vpop.f32.mrf.mxu1  ;;  %v1440_v48 = vpop.f32.mrf.mxu3 }
 0x11a   : > { %v1513_v19 = vadd.f32 %v4279_v18, %v1171_v56  ;;  %v830_v27 = vadd.f32 %v749_v1, %v4210_v11  ;;  %v1605_v11 = vld [vmem:[%s3941_s8 + $0xdb] sm:$0xff] }
 0x11c   : > { %v1775_v41 = vpop.f32.mrf.mxu0  ;;  %3559 = vmatmul.msk.bf16.gmra.mxu1 %vm321_vm2, %v601_v0  ;;  %3595 = vmatmul.msk.bf16.gmra.mxu2 %vm321_vm2, %v4264_v8  ;;  %v4343_v20 = vadd.f32 %v1772_v22, %v1513_v19  ;;  %v578_v22 = vld [vmem:[%s3941_s8 + $0xc1] sm:$0xff] }
 0x11d   : > { %v602_v0 = vpack.c.bf16 %v579_v29, %v578_v22 }
 0x11e   : > { %3633 = vmatmul.msk.bf16.gmra.mxu3 %vm321_vm2, %v4341_v62 }
 0x11f   : > { %3667 = vmatmul.msk.bf16.gmra.mxu0 %vm321_vm2, %v1627_v2  ;;  %v1091_v18 = vpop.f32.mrf.mxu2  ;;  %v1628_v2 = vpack.c.bf16 %v1605_v11, %v1604_v39  ;;  %v1606_v11 = vld [vmem:[%s3941_s8 + $0xe3] sm:$0xff] }
 0x120   : > { %v1172_v13 = vadd.f32 %v1091_v18, %v830_v27 }
 0x121   : > { %v751_v35 = vpop.f32.mrf.mxu1  ;;  %v1443_v37 = vpop.f32.mrf.mxu3 }
 0x122   : > { %v1514_v8 = vadd.f32 %v4292_v59, %v1172_v13  ;;  %v831_v52 = vadd.f32 %v751_v35, %v4226_v16  ;;  %v4363_v16 = vpack.c.bf16 %v1267_v6, %v1266_v44  ;;  %v1268_v44 = vld [vmem:[%s3941_s8 + $0x102] sm:$0xff]  ;;  %v1269_v6 = vld [vmem:[%s3941_s8 + $0x10a] sm:$0xff] }
 0x124   : > { %v1777_v57 = vpop.f32.mrf.mxu0  ;;  %v4350_v21 = vadd.f32 %v1775_v41, %v1514_v8 }
 0x127   : > { %v1093_v55 = vpop.f32.mrf.mxu2 }
 0x128   : > { %v1173_v56 = vadd.f32 %v1093_v55, %v831_v52  ;;  %v580_v52 = vld [vmem:[%s3941_s8 + $0xd1] sm:$0xff] }
 0x129   : > { %v754_v1 = vpop.f32.mrf.mxu1  ;;  %v1445_v27 = vpop.f32.mrf.mxu3  ;;  %v1607_v55 = vld [vmem:[%s3941_s8 + $0xeb] sm:$0xff] }
 0x12a   : > { %v1515_v19 = vadd.f32 %v4303_v40, %v1173_v56  ;;  %v832_v18 = vadd.f32 %v754_v1, %v4238_v36 }
 0x12c   : > { %v1780_v59 = vpop.f32.mrf.mxu0  ;;  %3560 = vmatmul.msk.bf16.gmra.mxu1 %vm321_vm2, %v602_v0  ;;  %3596 = vmatmul.msk.bf16.gmra.mxu2 %vm321_vm2, %v4284_v25  ;;  %v4365_v41 = vadd.f32 %v1777_v57, %v1515_v19  ;;  %v581_v57 = vld [vmem:[%s3941_s8 + $0xd9] sm:$0xff] }
 0x12d   : > { %v603_v0 = vpack.c.bf16 %v581_v57, %v580_v52 }
 0x12e   : > { %3634 = vmatmul.msk.bf16.gmra.mxu3 %vm321_vm2, %v4363_v16 }
 0x12f   : > { %3668 = vmatmul.msk.bf16.gmra.mxu0 %vm321_vm2, %v1628_v2  ;;  %v1096_v40 = vpop.f32.mrf.mxu2  ;;  %v1629_v2 = vpack.c.bf16 %v1607_v55, %v1606_v11  ;;  %v1608_v55 = vld [vmem:[%s3941_s8 + $0xf3] sm:$0xff] }
 0x130   : > { %v1174_v13 = vadd.f32 %v1096_v40, %v832_v18 }
 0x131   : > { %v756_v35 = vpop.f32.mrf.mxu1  ;;  %v1448_v22 = vpop.f32.mrf.mxu3 }
 0x132   : > { %v1516_v8 = vadd.f32 %v1438_v49, %v1174_v13  ;;  %v833_v39 = vadd.f32 %v756_v35, %v4252_v47  ;;  %v4383_v47 = vpack.c.bf16 %v1269_v6, %v1268_v44  ;;  %v1270_v44 = vld [vmem:[%s3941_s8 + $0x112] sm:$0xff]  ;;  %v1271_v6 = vld [vmem:[%s3941_s8 + $0x11a] sm:$0xff] }
 0x134   : > { %v1782_v25 = vpop.f32.mrf.mxu0  ;;  %v4371_v29 = vadd.f32 %v1780_v59, %v1516_v8 }
 0x137   : > { %v1098_v36 = vpop.f32.mrf.mxu2 }
 0x138   : > { %v1175_v56 = vadd.f32 %v1098_v36, %v833_v39  ;;  %v582_v39 = vld [vmem:[%s3941_s8 + $0xe1] sm:$0xff] }
 0x139   : > { %v759_v1 = vpop.f32.mrf.mxu1  ;;  %v1450_v49 = vpop.f32.mrf.mxu3  ;;  %v1609_v36 = vld [vmem:[%s3941_s8 + $0xfb] sm:$0xff] }
 0x13a   : > { %v1517_v19 = vadd.f32 %v1440_v48, %v1175_v56  ;;  %v834_v40 = vadd.f32 %v759_v1, %v4111_v17 }
 0x13c   : > { %v1785_v18 = vpop.f32.mrf.mxu0  ;;  %3561 = vmatmul.msk.bf16.gmra.mxu1 %vm321_vm2, %v603_v0  ;;  %3597 = vmatmul.msk.bf16.gmra.mxu2 %vm321_vm2, %v4308_v9  ;;  %v4385_v59 = vadd.f32 %v1782_v25, %v1517_v19  ;;  %v583_v25 = vld [vmem:[%s3941_s8 + $0xe9] sm:$0xff] }
 0x13d   : > { %v604_v0 = vpack.c.bf16 %v583_v25, %v582_v39 }
 0x13e   : > { %3635 = vmatmul.msk.bf16.gmra.mxu3 %vm321_vm2, %v4383_v47 }
 0x13f   : > { %3669 = vmatmul.msk.bf16.gmra.mxu0 %vm321_vm2, %v1629_v2  ;;  %v1101_v48 = vpop.f32.mrf.mxu2  ;;  %v1630_v2 = vpack.c.bf16 %v1609_v36, %v1608_v55  ;;  %v1610_v36 = vld [vmem:[%s3941_s8 + $0x103] sm:$0xff] }
 0x140   : > { %v1176_v13 = vadd.f32 %v1101_v48, %v834_v40 }
 0x141   : > { %v761_v35 = vpop.f32.mrf.mxu1  ;;  %v1453_v52 = vpop.f32.mrf.mxu3 }
 0x142   : > { %v1518_v8 = vadd.f32 %v1443_v37, %v1176_v13  ;;  %v835_v11 = vadd.f32 %v761_v35, %v4126_v24  ;;  %v4403_v24 = vpack.c.bf16 %v1271_v6, %v1270_v44  ;;  %v1272_v44 = vld [vmem:[%s3941_s8 + $0x122] sm:$0xff]  ;;  %v1273_v6 = vld [vmem:[%s3941_s8 + $0x12a] sm:$0xff] }
 0x144   : > { %v1787_v9 = vpop.f32.mrf.mxu0  ;;  %v4391_v57 = vadd.f32 %v1785_v18, %v1518_v8 }
 0x147   : > { %v1103_v17 = vpop.f32.mrf.mxu2 }
 0x148   : > { %v1177_v56 = vadd.f32 %v1103_v17, %v835_v11  ;;  %v584_v11 = vld [vmem:[%s3941_s8 + $0xf1] sm:$0xff] }
 0x149   : > { %v764_v1 = vpop.f32.mrf.mxu1  ;;  %v1455_v37 = vpop.f32.mrf.mxu3  ;;  %v1611_v17 = vld [vmem:[%s3941_s8 + $0x10b] sm:$0xff] }
 0x14a   : > { %v1519_v19 = vadd.f32 %v1445_v27, %v1177_v56  ;;  %v836_v48 = vadd.f32 %v764_v1, %v4138_v33 }
 0x14c   : > { %v1790_v40 = vpop.f32.mrf.mxu0  ;;  %3562 = vmatmul.msk.bf16.gmra.mxu1 %vm321_vm2, %v604_v0  ;;  %3598 = vmatmul.msk.bf16.gmra.mxu2 %vm321_vm2, %v4341_v62  ;;  %v4405_v18 = vadd.f32 %v1787_v9, %v1519_v19  ;;  %v585_v9 = vld [vmem:[%s3941_s8 + $0xf9] sm:$0xff] }
 0x14d   : > { %v605_v0 = vpack.c.bf16 %v585_v9, %v584_v11 }
 0x14e   : > { %3636 = vmatmul.msk.bf16.gmra.mxu3 %vm321_vm2, %v4403_v24 }
 0x14f   : > { %3670 = vmatmul.msk.bf16.gmra.mxu0 %vm321_vm2, %v1630_v2  ;;  %v1106_v27 = vpop.f32.mrf.mxu2  ;;  %v1631_v2 = vpack.c.bf16 %v1611_v17, %v1610_v36  ;;  %v587_v36 = vld [vmem:[%s3941_s8 + $0x109] sm:$0xff]  ;;  %v1612_v17 = vld [vmem:[%s3941_s8 + $0x113] sm:$0xff] }
 0x150   : > { %v1178_v13 = vadd.f32 %v1106_v27, %v836_v48 }
 0x151   : > { %v766_v35 = vpop.f32.mrf.mxu1  ;;  %v1458_v39 = vpop.f32.mrf.mxu3 }
 0x152   : > { %v1520_v8 = vadd.f32 %v1448_v22, %v1178_v13  ;;  %v837_v55 = vadd.f32 %v766_v35, %v4164_v5  ;;  %v1291_v5 = vpack.c.bf16 %v1273_v6, %v1272_v44  ;;  %v2606_v44 = vld [vmem:[%s3941_s8 + $0x25] sm:$0xff]  ;;  %v2607_v6 = vld [vmem:[%s3941_s8 + $0x2d] sm:$0xff] }
 0x154   : > { %v1792_v62 = vpop.f32.mrf.mxu0  ;;  %v4411_v25 = vadd.f32 %v1790_v40, %v1520_v8 }
 0x157   : > { %v1108_v33 = vpop.f32.mrf.mxu2 }
 0x158   : > { %v1179_v56 = vadd.f32 %v1108_v33, %v837_v55  ;;  %v586_v55 = vld [vmem:[%s3941_s8 + $0x101] sm:$0xff] }
 0x159   : > { %v769_v1 = vpop.f32.mrf.mxu1  ;;  %v1460_v22 = vpop.f32.mrf.mxu3  ;;  %v1613_v33 = vld [vmem:[%s3941_s8 + $0x11b] sm:$0xff] }
 0x15a   : > { %v1521_v19 = vadd.f32 %v1450_v49, %v1179_v56  ;;  %v838_v27 = vadd.f32 %v769_v1, %v4179_v53 }
 0x15c   : > { %v1795_v48 = vpop.f32.mrf.mxu0  ;;  %3563 = vmatmul.msk.bf16.gmra.mxu1 %vm321_vm2, %v605_v0  ;;  %3599 = vmatmul.msk.bf16.gmra.mxu2 %vm321_vm2, %v4363_v16  ;;  %v4423_v40 = vadd.f32 %v1792_v62, %v1521_v19  ;;  %v606_v0 = vpack.c.bf16 %v587_v36, %v586_v55  ;;  %v588_v36 = vld [vmem:[%s3941_s8 + $0x111] sm:$0xff] }
 0x15e   : > { %3637 = vmatmul.msk.bf16.gmra.mxu3 %vm321_vm2, %v1291_v5 }
 0x15f   : > { %3671 = vmatmul.msk.bf16.gmra.mxu0 %vm321_vm2, %v1631_v2  ;;  %v1111_v13 = vpop.f32.mrf.mxu2  ;;  %v1632_v2 = vpack.c.bf16 %v1613_v33, %v1612_v17  ;;  %v1614_v17 = vld [vmem:[%s3941_s8 + $0x123] sm:$0xff]  ;;  %v1615_v33 = vld [vmem:[%s3941_s8 + $0x12b] sm:$0xff] }
 0x160   : > { %v1180_v49 = vadd.f32 %v1111_v13, %v838_v27 }
 0x161   : > { %v771_v35 = vpop.f32.mrf.mxu1  ;;  %v1463_v9 = vpop.f32.mrf.mxu3 }
 0x162   : > { %v1522_v8 = vadd.f32 %v1453_v52, %v1180_v49  ;;  %v839_v62 = vadd.f32 %v771_v35, %v4194_v61  ;;  %v2642_v61 = vpack.c.bf16 %v2607_v6, %v2606_v44  ;;  %v2609_v44 = vld [vmem:[%s3941_s8 + $0x3d] sm:$0xff] }
 0x164   : > { %v1797_v11 = vpop.f32.mrf.mxu0  ;;  %v4428_v16 = vadd.f32 %v1795_v48, %v1522_v8 }
 0x167   : > { %v1113_v56 = vpop.f32.mrf.mxu2 }
 0x168   : > { %v1181_v53 = vadd.f32 %v1113_v56, %v839_v62  ;;  %v589_v62 = vld [vmem:[%s3941_s8 + $0x119] sm:$0xff] }
 0x169   : > { %v774_v1 = vpop.f32.mrf.mxu1  ;;  %v1465_v52 = vpop.f32.mrf.mxu3 }
 0x16a   : > { %v1523_v19 = vadd.f32 %v1455_v37, %v1181_v53  ;;  %v840_v27 = vadd.f32 %v774_v1, %v4206_v7  ;;  %v607_v53 = vpack.c.bf16 %v589_v62, %v588_v36  ;;  %v1633_v1 = vpack.c.bf16 %v1615_v33, %v1614_v17  ;;  %v2264_v62 = vld [vmem:[%s3941_s8 + $0x24] sm:$0xff] }
 0x16b   : > { %v2948_v33 = vld [vmem:[%s3941_s8 + $0x26] sm:$0xff] }
 0x16c   : > { %v1800_v5 = vpop.f32.mrf.mxu0  ;;  %3564 = vmatmul.msk.bf16.gmra.mxu1 %vm321_vm2, %v606_v0  ;;  %3600 = vmatmul.msk.bf16.gmra.mxu2 %vm321_vm2, %v4383_v47  ;;  %v4440_v48 = vadd.f32 %v1797_v11, %v1523_v19 }
 0x16e   : > { %3764 = vmatmul.msk.bf16.vlgmr.msra.gmra.mxu3 %vm321_vm2, %v2642_v61 }
 0x16f   : > { %3672 = vmatmul.msk.bf16.gmra.mxu0 %vm321_vm2, %v1632_v2  ;;  %v1116_v13 = vpop.f32.mrf.mxu2  ;;  %v2608_v2 = vld [vmem:[%s3941_s8 + $0x35] sm:$0xff] }
 0x170   : > { %v1182_v37 = vadd.f32 %v1116_v13, %v840_v27 }
 0x171   : > { %v776_v49 = vpop.f32.mrf.mxu1  ;;  %v1468_v55 = vpop.f32.mrf.mxu3 }
 0x172   : > { %v1524_v35 = vadd.f32 %v1458_v39, %v1182_v37  ;;  %v841_v11 = vadd.f32 %v776_v49, %v4224_v15  ;;  %v2643_v15 = vpack.c.bf16 %v2609_v44, %v2608_v2  ;;  %v2610_v2 = vld [vmem:[%s3941_s8 + $0x45] sm:$0xff]  ;;  %v2611_v44 = vld [vmem:[%s3941_s8 + $0x4d] sm:$0xff] }
 0x174   : > { %v1802_v8 = vpop.f32.mrf.mxu0  ;;  %v4445_v47 = vadd.f32 %v1800_v5, %v1524_v35 }
 0x177   : > { %v1118_v56 = vpop.f32.mrf.mxu2 }
 0x178   : > { %v1183_v7 = vadd.f32 %v1118_v56, %v841_v11  ;;  %v2265_v11 = vld [vmem:[%s3941_s8 + $0x2c] sm:$0xff] }
 0x179   : > { %v779_v0 = vpop.f32.mrf.mxu1  ;;  %v1470_v19 = vpop.f32.mrf.mxu3 }
 0x17a   : > { %v1525_v6 = vadd.f32 %v1460_v22, %v1183_v7  ;;  %v842_v22 = vadd.f32 %v779_v0, %v4234_v30  ;;  %v2949_v30 = vld [vmem:[%s3941_s8 + $0x2e] sm:$0xff]  ;;  %v2300_v0 = vpack.c.bf16 %v2265_v11, %v2264_v62 }
 0x17b   : > { %v2266_v11 = vld [vmem:[%s3941_s8 + $0x34] sm:$0xff] }
 0x17c   : > { %v1805_v39 = vpop.f32.mrf.mxu0  ;;  %3565 = vmatmul.msk.bf16.gmra.mxu1 %vm321_vm2, %v607_v53  ;;  %3601 = vmatmul.msk.bf16.gmra.mxu2 %vm321_vm2, %v4403_v24  ;;  %v4457_v5 = vadd.f32 %v1802_v8, %v1525_v6  ;;  %v1922_v24 = vld [vmem:[%s3941_s8 + $0x14] sm:$0xff]  ;;  %v1923_v8 = vld [vmem:[%s3941_s8 + $0x1c] sm:$0xff] }
 0x17d   : > { %v1958_v53 = vpack.c.bf16 %v1923_v8, %v1922_v24 }
 0x17e   : > { %3765 = vmatmul.msk.bf16.gmra.mxu3 %vm321_vm2, %v2643_v15 }
 0x17f   : > { %3673 = vmatmul.msk.bf16.gmra.mxu0 %vm321_vm2, %v1633_v1  ;;  %v1121_v61 = vpop.f32.mrf.mxu2 }
 0x180   : > { %v1184_v27 = vadd.f32 %v1121_v61, %v842_v22 }
 0x181   : > { %v781_v13 = vpop.f32.mrf.mxu1  ;;  %v1473_v35 = vpop.f32.mrf.mxu3 }
 0x182   : > { %v1526_v37 = vadd.f32 %v1463_v9, %v1184_v27  ;;  %v843_v17 = vadd.f32 %v781_v13, %v4250_v45  ;;  %v2984_v9 = vpack.c.bf16 %v2949_v30, %v2948_v33  ;;  %v2644_v45 = vpack.c.bf16 %v2611_v44, %v2610_v2  ;;  %v2950_v33 = vld [vmem:[%s3941_s8 + $0x36] sm:$0xff]  ;;  %v2951_v30 = vld [vmem:[%s3941_s8 + $0x3e] sm:$0xff] }
 0x183   : > { %v2613_v2 = vld [vmem:[%s3941_s8 + $0x5d] sm:$0xff] }
 0x184   : > { %v1807_v49 = vpop.f32.mrf.mxu0  ;;  %v4463_v36 = vadd.f32 %v1805_v39, %v1526_v37 }
 0x187   : > { %v1123_v56 = vpop.f32.mrf.mxu2 }
 0x188   : > { %v1185_v7 = vadd.f32 %v1123_v56, %v843_v17  ;;  %v2267_v17 = vld [vmem:[%s3941_s8 + $0x3c] sm:$0xff] }
 0x189   : > { %v784_v1 = vpop.f32.mrf.mxu1  ;;  %v1475_v39 = vpop.f32.mrf.mxu3 }
 0x18a   : > { %v1527_v6 = vadd.f32 %v1465_v52, %v1185_v7  ;;  %v844_v61 = vadd.f32 %v784_v1, %v4122_v23  ;;  %v2301_v7 = vpack.c.bf16 %v2267_v17, %v2266_v11  ;;  %v2985_v1 = vpack.c.bf16 %v2951_v30, %v2950_v33  ;;  %v2268_v11 = vld [vmem:[%s3941_s8 + $0x44] sm:$0xff]  ;;  %v2269_v17 = vld [vmem:[%s3941_s8 + $0x4c] sm:$0xff] }
 0x18b   : > { %v2953_v33 = vld [vmem:[%s3941_s8 + $0x4e] sm:$0xff] }
 0x18c   : > { %v1810_v15 = vpop.f32.mrf.mxu0  ;;  %3692 = vmatmul.msk.bf16.vlgmr.msra.gmra.mxu1 %vm321_vm2, %v1958_v53  ;;  %3728 = vmatmul.msk.bf16.vlgmr.msra.gmra.mxu2 %vm321_vm2, %v2300_v0  ;;  %v4475_v22 = vadd.f32 %v1807_v49, %v1527_v6 }
 0x18e   : > { %3766 = vmatmul.msk.bf16.gmra.mxu3 %vm321_vm2, %v2644_v45 }
 0x18f   : > { %3800 = vmatmul.msk.bf16.vlgmr.msra.gmra.mxu0 %vm321_vm2, %v2984_v9  ;;  %v1126_v27 = vpop.f32.mrf.mxu2  ;;  %v2612_v9 = vld [vmem:[%s3941_s8 + $0x55] sm:$0xff] }
 0x190   : > { %v1186_v13 = vadd.f32 %v1126_v27, %v844_v61 }
 0x191   : > { %v786_v52 = vpop.f32.mrf.mxu1  ;;  %v1478_v8 = vpop.f32.mrf.mxu3 }
 0x192   : > { %v1528_v37 = vadd.f32 %v1468_v55, %v1186_v13  ;;  %v845_v49 = vadd.f32 %v786_v52, %v4136_v31  ;;  %v2645_v31 = vpack.c.bf16 %v2613_v2, %v2612_v9  ;;  %v2615_v9 = vld [vmem:[%s3941_s8 + $0x6d] sm:$0xff] }
 0x194   : > { %v1812_v24 = vpop.f32.mrf.mxu0  ;;  %v4480_v62 = vadd.f32 %v1810_v15, %v1528_v37 }
 0x197   : > { %v1128_v56 = vpop.f32.mrf.mxu2 }
 0x198   : > { %v1187_v23 = vadd.f32 %v1128_v56, %v845_v49  ;;  %v2952_v49 = vld [vmem:[%s3941_s8 + $0x46] sm:$0xff]  ;;  %v2302_v56 = vpack.c.bf16 %v2269_v17, %v2268_v11  ;;  %v2270_v11 = vld [vmem:[%s3941_s8 + $0x54] sm:$0xff]  ;;  %v2271_v17 = vld [vmem:[%s3941_s8 + $0x5c] sm:$0xff] }
 0x199   : > { %v789_v53 = vpop.f32.mrf.mxu1  ;;  %v1480_v55 = vpop.f32.mrf.mxu3 }
 0x19a   : > { %v1529_v44 = vadd.f32 %v1470_v19, %v1187_v23  ;;  %v846_v45 = vadd.f32 %v789_v53, %v4157_v42  ;;  %v2986_v53 = vpack.c.bf16 %v2953_v33, %v2952_v49  ;;  %v2955_v49 = vld [vmem:[%s3941_s8 + $0x5e] sm:$0xff] }
 0x19c   : > { %v1815_v6 = vpop.f32.mrf.mxu0  ;;  %3693 = vmatmul.msk.bf16.gmra.mxu1 %vm321_vm2, %v2300_v0  ;;  %3729 = vmatmul.msk.bf16.gmra.mxu2 %vm321_vm2, %v2301_v7  ;;  %v4491_v15 = vadd.f32 %v1812_v24, %v1529_v44 }
 0x19e   : > { %3767 = vmatmul.msk.bf16.gmra.mxu3 %vm321_vm2, %v2645_v31 }
 0x19f   : > { %3801 = vmatmul.msk.bf16.gmra.mxu0 %vm321_vm2, %v2985_v1  ;;  %v1131_v61 = vpop.f32.mrf.mxu2  ;;  %v2614_v1 = vld [vmem:[%s3941_s8 + $0x65] sm:$0xff] }
 0x1a0   : > { %v1188_v27 = vadd.f32 %v1131_v61, %v846_v45 }
 0x1a1   : > { %v791_v19 = vpop.f32.mrf.mxu1  ;;  %v1483_v52 = vpop.f32.mrf.mxu3 }
 0x1a2   : > { %v1530_v13 = vadd.f32 %v1473_v35, %v1188_v27  ;;  %v847_v24 = vadd.f32 %v791_v19, %v4177_v51  ;;  %v2646_v51 = vpack.c.bf16 %v2615_v9, %v2614_v1  ;;  %v2617_v1 = vld [vmem:[%s3941_s8 + $0x7d] sm:$0xff] }
 0x1a4   : > { %v1817_v0 = vpop.f32.mrf.mxu0  ;;  %v4496_v37 = vadd.f32 %v1815_v6, %v1530_v13 }
 0x1a7   : > { %v1133_v30 = vpop.f32.mrf.mxu2 }
 0x1a8   : > { %v1189_v42 = vadd.f32 %v1133_v30, %v847_v24  ;;  %v2954_v24 = vld [vmem:[%s3941_s8 + $0x56] sm:$0xff]  ;;  %v2303_v30 = vpack.c.bf16 %v2271_v17, %v2270_v11  ;;  %v2272_v11 = vld [vmem:[%s3941_s8 + $0x64] sm:$0xff]  ;;  %v2273_v17 = vld [vmem:[%s3941_s8 + $0x6c] sm:$0xff] }
 0x1a9   : > { %v794_v23 = vpop.f32.mrf.mxu1  ;;  %v1485_v35 = vpop.f32.mrf.mxu3 }
 0x1aa   : > { %v1531_v2 = vadd.f32 %v1475_v39, %v1189_v42  ;;  %v848_v31 = vadd.f32 %v794_v23, %v4191_v60  ;;  %v2987_v23 = vpack.c.bf16 %v2955_v49, %v2954_v24  ;;  %v2957_v24 = vld [vmem:[%s3941_s8 + $0x6e] sm:$0xff] }
 0x1ac   : > { %v1820_v44 = vpop.f32.mrf.mxu0  ;;  %3694 = vmatmul.msk.bf16.gmra.mxu1 %vm321_vm2, %v2301_v7  ;;  %3730 = vmatmul.msk.bf16.gmra.mxu2 %vm321_vm2, %v2302_v56  ;;  %v4507_v6 = vadd.f32 %v1817_v0, %v1531_v2 }
 0x1ae   : > { %3768 = vmatmul.msk.bf16.gmra.mxu3 %vm321_vm2, %v2646_v51 }
 0x1af   : > { %3802 = vmatmul.msk.bf16.gmra.mxu0 %vm321_vm2, %v2986_v53  ;;  %v1136_v45 = vpop.f32.mrf.mxu2  ;;  %v2616_v53 = vld [vmem:[%s3941_s8 + $0x75] sm:$0xff] }
 0x1b0   : > { %v1190_v61 = vadd.f32 %v1136_v45, %v848_v31 }
 0x1b1   : > { %v796_v39 = vpop.f32.mrf.mxu1  ;;  %v1488_v19 = vpop.f32.mrf.mxu3 }
 0x1b2   : > { %v1532_v27 = vadd.f32 %v1478_v8, %v1190_v61  ;;  %v849_v0 = vadd.f32 %v796_v39, %v4204_v4  ;;  %v2647_v4 = vpack.c.bf16 %v2617_v1, %v2616_v53  ;;  %v2619_v53 = vld [vmem:[%s3941_s8 + $0x8d] sm:$0xff] }
 0x1b4   : > { %v1822_v7 = vpop.f32.mrf.mxu0  ;;  %v4512_v13 = vadd.f32 %v1820_v44, %v1532_v27 }
 0x1b7   : > { %v1138_v33 = vpop.f32.mrf.mxu2 }
 0x1b8   : > { %v1191_v60 = vadd.f32 %v1138_v33, %v849_v0  ;;  %v2956_v0 = vld [vmem:[%s3941_s8 + $0x66] sm:$0xff]  ;;  %v2304_v33 = vpack.c.bf16 %v2273_v17, %v2272_v11  ;;  %v2274_v11 = vld [vmem:[%s3941_s8 + $0x74] sm:$0xff]  ;;  %v2275_v17 = vld [vmem:[%s3941_s8 + $0x7c] sm:$0xff] }
 0x1b9   : > { %v799_v42 = vpop.f32.mrf.mxu1  ;;  %v1490_v8 = vpop.f32.mrf.mxu3 }
 0x1ba   : > { %v1533_v9 = vadd.f32 %v1480_v55, %v1191_v60  ;;  %v850_v51 = vadd.f32 %v799_v42, %v4220_v14  ;;  %v2988_v42 = vpack.c.bf16 %v2957_v24, %v2956_v0  ;;  %v2959_v0 = vld [vmem:[%s3941_s8 + $0x7e] sm:$0xff] }
 0x1bc   : > { %v1825_v2 = vpop.f32.mrf.mxu0  ;;  %3695 = vmatmul.msk.bf16.gmra.mxu1 %vm321_vm2, %v2302_v56  ;;  %3731 = vmatmul.msk.bf16.gmra.mxu2 %vm321_vm2, %v2303_v30  ;;  %v4523_v44 = vadd.f32 %v1822_v7, %v1533_v9 }
 0x1be   : > { %3769 = vmatmul.msk.bf16.gmra.mxu3 %vm321_vm2, %v2647_v4 }
 0x1bf   : > { %3803 = vmatmul.msk.bf16.gmra.mxu0 %vm321_vm2, %v2987_v23  ;;  %v1141_v31 = vpop.f32.mrf.mxu2  ;;  %v2618_v23 = vld [vmem:[%s3941_s8 + $0x85] sm:$0xff] }
 0x1c0   : > { %v1192_v45 = vadd.f32 %v1141_v31, %v850_v51 }
 0x1c1   : > { %v801_v55 = vpop.f32.mrf.mxu1  ;;  %v1493_v39 = vpop.f32.mrf.mxu3 }
 0x1c2   : > { %v1534_v61 = vadd.f32 %v1483_v52, %v1192_v45  ;;  %v851_v7 = vadd.f32 %v801_v55, %v4232_v28  ;;  %v2648_v28 = vpack.c.bf16 %v2619_v53, %v2618_v23  ;;  %v2621_v23 = vld [vmem:[%s3941_s8 + $0x9d] sm:$0xff] }
 0x1c4   : > { %v1827_v56 = vpop.f32.mrf.mxu0  ;;  %v4528_v27 = vadd.f32 %v1825_v2, %v1534_v61 }
 0x1c7   : > { %v1143_v49 = vpop.f32.mrf.mxu2 }
 0x1c8   : > { %v1193_v14 = vadd.f32 %v1143_v49, %v851_v7  ;;  %v2958_v7 = vld [vmem:[%s3941_s8 + $0x76] sm:$0xff]  ;;  %v2305_v49 = vpack.c.bf16 %v2275_v17, %v2274_v11  ;;  %v2276_v11 = vld [vmem:[%s3941_s8 + $0x84] sm:$0xff]  ;;  %v2277_v17 = vld [vmem:[%s3941_s8 + $0x8c] sm:$0xff] }
 0x1c9   : > { %v804_v60 = vpop.f32.mrf.mxu1  ;;  %v1495_v52 = vpop.f32.mrf.mxu3 }
 0x1ca   : > { %v1535_v1 = vadd.f32 %v1485_v35, %v1193_v14  ;;  %v852_v4 = vadd.f32 %v804_v60, %v4246_v43  ;;  %v2989_v60 = vpack.c.bf16 %v2959_v0, %v2958_v7  ;;  %v2961_v7 = vld [vmem:[%s3941_s8 + $0x8e] sm:$0xff] }
 0x1cc   : > { %v1830_v9 = vpop.f32.mrf.mxu0  ;;  %3696 = vmatmul.msk.bf16.gmra.mxu1 %vm321_vm2, %v2303_v30  ;;  %3732 = vmatmul.msk.bf16.gmra.mxu2 %vm321_vm2, %v2304_v33  ;;  %v4539_v2 = vadd.f32 %v1827_v56, %v1535_v1 }
 0x1ce   : > { %3770 = vmatmul.msk.bf16.gmra.mxu3 %vm321_vm2, %v2648_v28 }
 0x1cf   : > { %3804 = vmatmul.msk.bf16.gmra.mxu0 %vm321_vm2, %v2988_v42  ;;  %v1146_v51 = vpop.f32.mrf.mxu2  ;;  %v2620_v42 = vld [vmem:[%s3941_s8 + $0x95] sm:$0xff] }
 0x1d0   : > { %v1194_v31 = vadd.f32 %v1146_v51, %v852_v4 }
 0x1d1   : > { %v806_v35 = vpop.f32.mrf.mxu1  ;;  %v1498_v55 = vpop.f32.mrf.mxu3 }
 0x1d2   : > { %v1536_v45 = vadd.f32 %v1488_v19, %v1194_v31  ;;  %v853_v56 = vadd.f32 %v806_v35, %v4258_v54  ;;  %v2649_v54 = vpack.c.bf16 %v2621_v23, %v2620_v42  ;;  %v2623_v42 = vld [vmem:[%s3941_s8 + $0xad] sm:$0xff] }
 0x1d4   : > { %v1832_v30 = vpop.f32.mrf.mxu0  ;;  %v4544_v61 = vadd.f32 %v1830_v9, %v1536_v45 }
 0x1d7   : > { %v1148_v24 = vpop.f32.mrf.mxu2 }
 0x1d8   : > { %v1195_v43 = vadd.f32 %v1148_v24, %v853_v56  ;;  %v2960_v56 = vld [vmem:[%s3941_s8 + $0x86] sm:$0xff]  ;;  %v2306_v24 = vpack.c.bf16 %v2277_v17, %v2276_v11  ;;  %v2278_v11 = vld [vmem:[%s3941_s8 + $0x94] sm:$0xff]  ;;  %v2279_v17 = vld [vmem:[%s3941_s8 + $0x9c] sm:$0xff] }
 0x1d9   : > { %v809_v14 = vpop.f32.mrf.mxu1  ;;  %v1500_v19 = vpop.f32.mrf.mxu3 }
 0x1da   : > { %v1537_v53 = vadd.f32 %v1490_v8, %v1195_v43  ;;  %v854_v28 = vadd.f32 %v809_v14, %v4130_v26  ;;  %v2990_v14 = vpack.c.bf16 %v2961_v7, %v2960_v56  ;;  %v2963_v56 = vld [vmem:[%s3941_s8 + $0x9e] sm:$0xff] }
 0x1dc   : > { %v1835_v1 = vpop.f32.mrf.mxu0  ;;  %3697 = vmatmul.msk.bf16.gmra.mxu1 %vm321_vm2, %v2304_v33  ;;  %3733 = vmatmul.msk.bf16.gmra.mxu2 %vm321_vm2, %v2305_v49  ;;  %v4555_v9 = vadd.f32 %v1832_v30, %v1537_v53 }
 0x1de   : > { %3771 = vmatmul.msk.bf16.gmra.mxu3 %vm321_vm2, %v2649_v54 }
 0x1df   : > { %3805 = vmatmul.msk.bf16.gmra.mxu0 %vm321_vm2, %v2989_v60  ;;  %v1151_v4 = vpop.f32.mrf.mxu2  ;;  %v2622_v60 = vld [vmem:[%s3941_s8 + $0xa5] sm:$0xff] }
 0x1e0   : > { %v1196_v51 = vadd.f32 %v1151_v4, %v854_v28 }
 0x1e1   : > { %v811_v8 = vpop.f32.mrf.mxu1  ;;  %v1503_v35 = vpop.f32.mrf.mxu3 }
 0x1e2   : > { %v1538_v31 = vadd.f32 %v1493_v39, %v1196_v51  ;;  %v855_v30 = vadd.f32 %v811_v8, %v4144_v38  ;;  %v2650_v38 = vpack.c.bf16 %v2623_v42, %v2622_v60  ;;  %v2625_v60 = vld [vmem:[%s3941_s8 + $0xbd] sm:$0xff] }
 0x1e4   : > { %v1837_v33 = vpop.f32.mrf.mxu0  ;;  %v4560_v45 = vadd.f32 %v1835_v1, %v1538_v31 }
 0x1e7   : > { %v1153_v0 = vpop.f32.mrf.mxu2 }
 0x1e8   : > { %v1197_v26 = vadd.f32 %v1153_v0, %v855_v30  ;;  %v2962_v30 = vld [vmem:[%s3941_s8 + $0x96] sm:$0xff]  ;;  %v2307_v0 = vpack.c.bf16 %v2279_v17, %v2278_v11  ;;  %v2280_v11 = vld [vmem:[%s3941_s8 + $0xa4] sm:$0xff] }
 0x1e9   : > { %v814_v43 = vpop.f32.mrf.mxu1  ;;  %v1505_v39 = vpop.f32.mrf.mxu3 }
 0x1ea   : > { %v1539_v23 = vadd.f32 %v1495_v52, %v1197_v26  ;;  %v856_v54 = vadd.f32 %v814_v43, %v4171_v46  ;;  %v2991_v43 = vpack.c.bf16 %v2963_v56, %v2962_v30  ;;  %v2965_v30 = vld [vmem:[%s3941_s8 + $0xae] sm:$0xff] }
 0x1ec   : > { %v1840_v53 = vpop.f32.mrf.mxu0  ;;  %3698 = vmatmul.msk.bf16.gmra.mxu1 %vm321_vm2, %v2305_v49  ;;  %3734 = vmatmul.msk.bf16.gmra.mxu2 %vm321_vm2, %v2306_v24  ;;  %v4571_v1 = vadd.f32 %v1837_v33, %v1539_v23 }
 0x1ee   : > { %3772 = vmatmul.msk.bf16.gmra.mxu3 %vm321_vm2, %v2650_v38 }
 0x1ef   : > { %3806 = vmatmul.msk.bf16.gmra.mxu0 %vm321_vm2, %v2990_v14  ;;  %v1156_v28 = vpop.f32.mrf.mxu2  ;;  %v2624_v14 = vld [vmem:[%s3941_s8 + $0xb5] sm:$0xff] }
 0x1f0   : > { %v1198_v4 = vadd.f32 %v1156_v28, %v856_v54 }
 0x1f1   : > { %v816_v52 = vpop.f32.mrf.mxu1  ;;  %v2786_v8 = vpop.f32.mrf.mxu3 }
 0x1f2   : > { %v1540_v51 = vadd.f32 %v1498_v55, %v1198_v4  ;;  %v857_v33 = vadd.f32 %v816_v52, %v4185_v58  ;;  %v2651_v58 = vpack.c.bf16 %v2625_v60, %v2624_v14  ;;  %v2627_v14 = vld [vmem:[%s3941_s8 + $0xcd] sm:$0xff] }
 0x1f4   : > { %v1842_v49 = vpop.f32.mrf.mxu0  ;;  %v4576_v31 = vadd.f32 %v1840_v53, %v1540_v51 }
 0x1f7   : > { %v1158_v7 = vpop.f32.mrf.mxu2 }
 0x1f8   : > { %v1199_v46 = vadd.f32 %v1158_v7, %v857_v33  ;;  %v2964_v33 = vld [vmem:[%s3941_s8 + $0xa6] sm:$0xff] }
 0x1f9   : > { %v819_v26 = vpop.f32.mrf.mxu1  ;;  %v2788_v55 = vpop.f32.mrf.mxu3 }
 0x1fa   : > { %v1541_v42 = vadd.f32 %v1500_v19, %v1199_v46  ;;  %v858_v38 = vadd.f32 %v819_v26, %v4198_v63  ;;  %v2992_v26 = vpack.c.bf16 %v2965_v30, %v2964_v33  ;;  %v2966_v33 = vld [vmem:[%s3941_s8 + $0xb6] sm:$0xff] }
 0x1fc   : > { %v1845_v23 = vpop.f32.mrf.mxu0  ;;  %3699 = vmatmul.msk.bf16.gmra.mxu1 %vm321_vm2, %v2306_v24  ;;  %3735 = vmatmul.msk.bf16.gmra.mxu2 %vm321_vm2, %v2307_v0  ;;  %v4587_v53 = vadd.f32 %v1842_v49, %v1541_v42  ;;  %v2281_v49 = vld [vmem:[%s3941_s8 + $0xac] sm:$0xff] }
 0x1fd   : > { %v2308_v7 = vpack.c.bf16 %v2281_v49, %v2280_v11  ;;  %v2283_v11 = vld [vmem:[%s3941_s8 + $0xbc] sm:$0xff] }
 0x1fe   : > { %3773 = vmatmul.msk.bf16.gmra.mxu3 %vm321_vm2, %v2651_v58 }
 0x1ff   : > { %3807 = vmatmul.msk.bf16.gmra.mxu0 %vm321_vm2, %v2991_v43  ;;  %v1161_v54 = vpop.f32.mrf.mxu2  ;;  %v2626_v43 = vld [vmem:[%s3941_s8 + $0xc5] sm:$0xff] }
 0x200   : > { %v1200_v28 = vadd.f32 %v1161_v54, %v858_v38 }
 0x201   : > { %v821_v19 = vpop.f32.mrf.mxu1  ;;  %v4592_v52 = vpop.f32.mrf.mxu3 }
 0x202   : > { %v1542_v4 = vadd.f32 %v1503_v35, %v1200_v28  ;;  %v859_v17 = vadd.f32 %v821_v19, %v4212_v12  ;;  %v2652_v12 = vpack.c.bf16 %v2627_v14, %v2626_v43  ;;  %v2628_v14 = vld [vmem:[%s3941_s8 + $0xd5] sm:$0xff] }
 0x204   : > { %v1847_v24 = vpop.f32.mrf.mxu0  ;;  %v4594_v51 = vadd.f32 %v1845_v23, %v1542_v4 }
 0x207   : > { %v1163_v63 = vpop.f32.mrf.mxu2 }
 0x208   : > { %v1201_v56 = vadd.f32 %v1163_v63, %v859_v17 }
 0x209   : > { %v2102_v46 = vpop.f32.mrf.mxu1  ;;  %v4603_v42 = vpop.f32.mrf.mxu3 }
 0x20a   : > { %v1543_v60 = vadd.f32 %v1505_v39, %v1201_v56  ;;  %v2192_v58 = vadd.f32 %v2102_v46, %v4270_v32  ;;  %v2282_v32 = vld [vmem:[%s3941_s8 + $0xb4] sm:$0xff] }
 0x20b   : > { %v2309_v46 = vpack.c.bf16 %v2283_v11, %v2282_v32 }
 0x20c   : > { %v3128_v35 = vpop.f32.mrf.mxu0  ;;  %3700 = vmatmul.msk.bf16.gmra.mxu1 %vm321_vm2, %v2307_v0  ;;  %3736 = vmatmul.msk.bf16.gmra.mxu2 %vm321_vm2, %v2308_v7  ;;  %v4607_v23 = vadd.f32 %v1847_v24, %v1543_v60  ;;  %v4615_v0 = vld [vmem:[%s4860_s2] ss:$0 sm:$0xff] }
 0x20d   : > { %v2629_v60 = vld [vmem:[%s3941_s8 + $0xdd] sm:$0xff] }
 0x20e   : > { %3774 = vmatmul.msk.bf16.gmra.mxu3 %vm321_vm2, %v2652_v12 }
 0x20f   : > { %3808 = vmatmul.msk.bf16.gmra.mxu0 %vm321_vm2, %v2992_v26  ;;  %v2444_v39 = vpop.f32.mrf.mxu2 }
 0x210   : > { %v2534_v38 = vadd.f32 %v2444_v39, %v2192_v58  ;;  %v2653_v39 = vpack.c.bf16 %v2629_v60, %v2628_v14 }
 0x211   : > { %v2104_v54 = vpop.f32.mrf.mxu1  ;;  %v4618_v4 = vpop.f32.mrf.mxu3 }
 0x212   : > { %v2876_v28 = vadd.f32 %v2786_v8, %v2534_v38  ;;  %v2193_v17 = vadd.f32 %v2104_v54, %v4286_v3  ;;  %v2967_v8 = vld [vmem:[%s3941_s8 + $0xbe] sm:$0xff] }
 0x213   : > { %v2993_v43 = vpack.c.bf16 %v2967_v8, %v2966_v33  ;;  %v2285_v33 = vld [vmem:[%s3941_s8 + $0xcc] sm:$0xff] }
 0x214   : > { %v3130_v19 = vpop.f32.mrf.mxu0  ;;  %v3218_v24 = vadd.f32 %v3128_v35, %v2876_v28 }
 0x216   : > { %v3330_v49 = vadd.f32 %v4615_v0, %v3218_v24 }
 0x217   : > { %v2446_v30 = vpop.f32.mrf.mxu2 }
 0x218   : > { %v3366_v63 = vmax.f32 %v3330_v49, 0.0  ;;  %v2535_v56 = vadd.f32 %v2446_v30, %v2193_v17  ;;  %v2284_v17 = vld [vmem:[%s3941_s8 + $0xc4] sm:$0xff] }
 0x219   : > { %v2107_v26 = vpop.f32.mrf.mxu1  ;;  %v4634_v12 = vpop.f32.mrf.mxu3  ;;  %v2968_v30 = vld [vmem:[%s3941_s8 + $0xc6] sm:$0xff]  ;;  %v2310_v14 = vpack.c.bf16 %v2285_v33, %v2284_v17  ;;  %v2286_v33 = vld [vmem:[%s3941_s8 + $0xd4] sm:$0xff] }
 0x21a   : > { %3402 = vst [vmem:[%s4629_s22] sm:$0xff] %v3366_v63  ;;  %v2877_v35 = vadd.f32 %v2788_v55, %v2535_v56  ;;  %v2194_v54 = vadd.f32 %v2107_v26, %v4294_v34  ;;  %v2969_v63 = vld [vmem:[%s3941_s8 + $0xce] sm:$0xff] }
 0x21b   : > { %v2994_v60 = vpack.c.bf16 %v2969_v63, %v2968_v30  ;;  %v2970_v30 = vld [vmem:[%s3941_s8 + $0xd6] sm:$0xff]  ;;  %v2971_v63 = vld [vmem:[%s3941_s8 + $0xde] sm:$0xff] }
 0x21c   : > { %v3133_v3 = vpop.f32.mrf.mxu0  ;;  %v3219_v58 = vadd.f32 %v3130_v19, %v2877_v35  ;;  %3701 = vmatmul.msk.bf16.gmra.mxu1 %vm321_vm2, %v2308_v7  ;;  %3737 = vmatmul.msk.bf16.gmra.mxu2 %vm321_vm2, %v2309_v46  ;;  %v2630_v35 = vld [vmem:[%s3941_s8 + $0xe5] sm:$0xff] }
 0x21e   : > { %v3331_v38 = vadd.f32 %v4615_v0, %v3219_v58  ;;  %3775 = vmatmul.msk.bf16.gmra.mxu3 %vm321_vm2, %v2653_v39  ;;  %v2631_v58 = vld [vmem:[%s3941_s8 + $0xed] sm:$0xff] }
 0x21f   : > { %3809 = vmatmul.msk.bf16.gmra.mxu0 %vm321_vm2, %v2993_v43  ;;  %v2449_v55 = vpop.f32.mrf.mxu2 }
 0x220   : > { %v3367_v28 = vmax.f32 %v3331_v38, 0.0  ;;  %v2536_v24 = vadd.f32 %v2449_v55, %v2194_v54 }
 0x221   : > { %v2109_v19 = vpop.f32.mrf.mxu1  ;;  %v4644_v11 = vpop.f32.mrf.mxu3 }
 0x222   : > { %3403 = vst [vmem:[%s4629_s22 + $0x8] sm:$0xff] %v3367_v28  ;;  %v2878_v7 = vadd.f32 %v4592_v52, %v2536_v24  ;;  %v2195_v8 = vadd.f32 %v2109_v19, %v4313_v10  ;;  %v2654_v10 = vpack.c.bf16 %v2631_v58, %v2630_v35  ;;  %v2632_v35 = vld [vmem:[%s3941_s8 + $0xf5] sm:$0xff]  ;;  %v2633_v58 = vld [vmem:[%s3941_s8 + $0xfd] sm:$0xff] }
 0x224   : > { %v3135_v32 = vpop.f32.mrf.mxu0  ;;  %v3220_v49 = vadd.f32 %v3133_v3, %v2878_v7 }
 0x226   : > { %v3332_v34 = vadd.f32 %v4615_v0, %v3220_v49 }
 0x227   : > { %v2451_v56 = vpop.f32.mrf.mxu2 }
 0x228   : > { %v3368_v26 = vmax.f32 %v3332_v34, 0.0  ;;  %v2537_v43 = vadd.f32 %v2451_v56, %v2195_v8  ;;  %v2287_v34 = vld [vmem:[%s3941_s8 + $0xdc] sm:$0xff] }
 0x229   : > { %v2112_v52 = vpop.f32.mrf.mxu1  ;;  %v4656_v38 = vpop.f32.mrf.mxu3 }
 0x22a   : > { %3404 = vst [vmem:[%s4629_s22 + $0x10] sm:$0xff] %v3368_v26  ;;  %v2879_v3 = vadd.f32 %v4603_v42, %v2537_v43  ;;  %v2196_v28 = vadd.f32 %v2112_v52, %v4328_v50  ;;  %v2311_v52 = vpack.c.bf16 %v2287_v34, %v2286_v33  ;;  %v2289_v33 = vld [vmem:[%s3941_s8 + $0xec] sm:$0xff] }
 0x22c   : > { %v3138_v39 = vpop.f32.mrf.mxu0  ;;  %v3221_v54 = vadd.f32 %v3135_v32, %v2879_v3  ;;  %3702 = vmatmul.msk.bf16.gmra.mxu1 %vm321_vm2, %v2309_v46  ;;  %3738 = vmatmul.msk.bf16.gmra.mxu2 %vm321_vm2, %v2310_v14 }
 0x22e   : > { %v3333_v55 = vadd.f32 %v4615_v0, %v3221_v54  ;;  %3776 = vmatmul.msk.bf16.gmra.mxu3 %vm321_vm2, %v2654_v10 }
 0x22f   : > { %3810 = vmatmul.msk.bf16.gmra.mxu0 %vm321_vm2, %v2994_v60  ;;  %v2454_v42 = vpop.f32.mrf.mxu2  ;;  %v2995_v60 = vpack.c.bf16 %v2971_v63, %v2970_v30 }
 0x230   : > { %v3369_v24 = vmax.f32 %v3333_v55, 0.0  ;;  %v2538_v19 = vadd.f32 %v2454_v42, %v2196_v28 }
 0x231   : > { %v2114_v7 = vpop.f32.mrf.mxu1  ;;  %v4666_v49 = vpop.f32.mrf.mxu3 }
 0x232   : > { %3405 = vst [vmem:[%s4629_s22 + $0x18] sm:$0xff] %v3369_v24  ;;  %v2880_v46 = vadd.f32 %v4618_v4, %v2538_v19  ;;  %v2197_v8 = vadd.f32 %v2114_v7, %v4343_v20  ;;  %v2655_v20 = vpack.c.bf16 %v2633_v58, %v2632_v35 }
 0x234   : > { %v3140_v32 = vpop.f32.mrf.mxu0  ;;  %v3222_v17 = vadd.f32 %v3138_v39, %v2880_v46 }
 0x236   : > { %v3334_v50 = vadd.f32 %v4615_v0, %v3222_v17  ;;  %v2288_v17 = vld [vmem:[%s3941_s8 + $0xe4] sm:$0xff] }
 0x237   : > { %v2456_v56 = vpop.f32.mrf.mxu2 }
 0x238   : > { %v3370_v26 = vmax.f32 %v3334_v50, 0.0  ;;  %v2539_v43 = vadd.f32 %v2456_v56, %v2197_v8  ;;  %v2972_v50 = vld [vmem:[%s3941_s8 + $0xe6] sm:$0xff]  ;;  %v2973_v8 = vld [vmem:[%s3941_s8 + $0xee] sm:$0xff] }
 0x239   : > { %v2117_v4 = vpop.f32.mrf.mxu1  ;;  %v4678_v54 = vpop.f32.mrf.mxu3 }
 0x23a   : > { %3406 = vst [vmem:[%s4629_s22 + $0x20] sm:$0xff] %v3370_v26  ;;  %v2881_v3 = vadd.f32 %v4634_v12, %v2539_v43  ;;  %v2198_v28 = vadd.f32 %v2117_v4, %v4350_v21  ;;  %v2312_v26 = vpack.c.bf16 %v2289_v33, %v2288_v17  ;;  %v2996_v43 = vpack.c.bf16 %v2973_v8, %v2972_v50  ;;  %v2634_v4 = vld [vmem:[%s3941_s8 + $0x105] sm:$0xff]  ;;  %v2974_v17 = vld [vmem:[%s3941_s8 + $0xf6] sm:$0xff] }
 0x23b   : > { %v2975_v33 = vld [vmem:[%s3941_s8 + $0xfe] sm:$0xff] }
 0x23c   : > { %v3143_v39 = vpop.f32.mrf.mxu0  ;;  %v3223_v10 = vadd.f32 %v3140_v32, %v2881_v3  ;;  %3703 = vmatmul.msk.bf16.gmra.mxu1 %vm321_vm2, %v2310_v14  ;;  %3739 = vmatmul.msk.bf16.gmra.mxu2 %vm321_vm2, %v2311_v52 }
 0x23e   : > { %v3335_v55 = vadd.f32 %v4615_v0, %v3223_v10  ;;  %3777 = vmatmul.msk.bf16.gmra.mxu3 %vm321_vm2, %v2655_v20 }
 0x23f   : > { %3811 = vmatmul.msk.bf16.gmra.mxu0 %vm321_vm2, %v2995_v60  ;;  %v2459_v12 = vpop.f32.mrf.mxu2  ;;  %v2635_v60 = vld [vmem:[%s3941_s8 + $0x10d] sm:$0xff] }
 0x240   : > { %v3371_v42 = vmax.f32 %v3335_v55, 0.0  ;;  %v2540_v24 = vadd.f32 %v2459_v12, %v2198_v28 }
 0x241   : > { %v2119_v19 = vpop.f32.mrf.mxu1  ;;  %v4688_v46 = vpop.f32.mrf.mxu3 }
 0x242   : > { %3407 = vst [vmem:[%s4629_s22 + $0x28] sm:$0xff] %v3371_v42  ;;  %v2882_v14 = vadd.f32 %v4644_v11, %v2540_v24  ;;  %v2199_v34 = vadd.f32 %v2119_v19, %v4365_v41  ;;  %v2656_v41 = vpack.c.bf16 %v2635_v60, %v2634_v4 }
 0x244   : > { %v3145_v7 = vpop.f32.mrf.mxu0  ;;  %v3224_v32 = vadd.f32 %v3143_v39, %v2882_v14  ;;  %v2290_v14 = vld [vmem:[%s3941_s8 + $0xf4] sm:$0xff] }
 0x246   : > { %v3336_v21 = vadd.f32 %v4615_v0, %v3224_v32 }
 0x247   : > { %v2461_v30 = vpop.f32.mrf.mxu2 }
 0x248   : > { %v3372_v63 = vmax.f32 %v3336_v21, 0.0  ;;  %v2541_v56 = vadd.f32 %v2461_v30, %v2199_v34  ;;  %v2997_v30 = vpack.c.bf16 %v2975_v33, %v2974_v17  ;;  %v2638_v33 = vld [vmem:[%s3941_s8 + $0x125] sm:$0xff] }
 0x249   : > { %v2122_v11 = vpop.f32.mrf.mxu1  ;;  %v4700_v3 = vpop.f32.mrf.mxu3 }
 0x24a   : > { %3408 = vst [vmem:[%s4629_s22 + $0x30] sm:$0xff] %v3372_v63  ;;  %v2883_v35 = vadd.f32 %v4656_v38, %v2541_v56  ;;  %v2200_v20 = vadd.f32 %v2122_v11, %v4371_v29  ;;  %v2636_v63 = vld [vmem:[%s3941_s8 + $0x115] sm:$0xff]  ;;  %v2637_v56 = vld [vmem:[%s3941_s8 + $0x11d] sm:$0xff] }
 0x24c   : > { %v3148_v58 = vpop.f32.mrf.mxu0  ;;  %v3225_v39 = vadd.f32 %v3145_v7, %v2883_v35  ;;  %3704 = vmatmul.msk.bf16.gmra.mxu1 %vm321_vm2, %v2311_v52  ;;  %3740 = vmatmul.msk.bf16.gmra.mxu2 %vm321_vm2, %v2312_v26  ;;  %v2291_v7 = vld [vmem:[%s3941_s8 + $0xfc] sm:$0xff] }
 0x24d   : > { %v2313_v8 = vpack.c.bf16 %v2291_v7, %v2290_v14 }
 0x24e   : > { %v3337_v10 = vadd.f32 %v4615_v0, %v3225_v39  ;;  %3778 = vmatmul.msk.bf16.gmra.mxu3 %vm321_vm2, %v2656_v41 }
 0x24f   : > { %3812 = vmatmul.msk.bf16.gmra.mxu0 %vm321_vm2, %v2996_v43  ;;  %v2464_v38 = vpop.f32.mrf.mxu2 }
 0x250   : > { %v3373_v55 = vmax.f32 %v3337_v10, 0.0  ;;  %v2542_v28 = vadd.f32 %v2464_v38, %v2200_v20 }
 0x251   : > { %v2124_v12 = vpop.f32.mrf.mxu1  ;;  %v4710_v24 = vpop.f32.mrf.mxu3 }
 0x252   : > { %3409 = vst [vmem:[%s4629_s22 + $0x38] sm:$0xff] %v3373_v55  ;;  %v2884_v52 = vadd.f32 %v4666_v49, %v2542_v28  ;;  %v2201_v32 = vadd.f32 %v2124_v12, %v4385_v59  ;;  %v2657_v59 = vpack.c.bf16 %v2637_v56, %v2636_v63  ;;  %v2292_v28 = vld [vmem:[%s3941_s8 + $0x104] sm:$0xff]  ;;  %v2293_v12 = vld [vmem:[%s3941_s8 + $0x10c] sm:$0xff] }
 0x254   : > { %v3150_v42 = vpop.f32.mrf.mxu0  ;;  %v3226_v19 = vadd.f32 %v3148_v58, %v2884_v52 }
 0x256   : > { %v3338_v29 = vadd.f32 %v4615_v0, %v3226_v19  ;;  %v2977_v19 = vld [vmem:[%s3941_s8 + $0x10e] sm:$0xff] }
 0x257   : > { %v2466_v21 = vpop.f32.mrf.mxu2 }
 0x258   : > { %v3374_v34 = vmax.f32 %v3338_v29, 0.0  ;;  %v2543_v50 = vadd.f32 %v2466_v21, %v2201_v32  ;;  %v2314_v32 = vpack.c.bf16 %v2293_v12, %v2292_v28  ;;  %v2639_v21 = vld [vmem:[%s3941_s8 + $0x12d] sm:$0xff] }
 0x259   : > { %v2127_v49 = vpop.f32.mrf.mxu1  ;;  %v4722_v4 = vpop.f32.mrf.mxu3 }
 0x25a   : > { %3410 = vst [vmem:[%s4629_s22 + $0x40] sm:$0xff] %v3374_v34  ;;  %v2885_v11 = vadd.f32 %v4678_v54, %v2543_v50  ;;  %v2202_v58 = vadd.f32 %v2127_v49, %v4391_v57 }
 0x25c   : > { %v3153_v43 = vpop.f32.mrf.mxu0  ;;  %v3227_v60 = vadd.f32 %v3150_v42, %v2885_v11  ;;  %3705 = vmatmul.msk.bf16.gmra.mxu1 %vm321_vm2, %v2312_v26  ;;  %3741 = vmatmul.msk.bf16.gmra.mxu2 %vm321_vm2, %v2313_v8  ;;  %v2976_v42 = vld [vmem:[%s3941_s8 + $0x106] sm:$0xff] }
 0x25d   : > { %v2998_v17 = vpack.c.bf16 %v2977_v19, %v2976_v42  ;;  %v2641_v42 = vld [vmem:[%s3941_s8 + $0x13d] sm:$0xff] }
 0x25e   : > { %v3339_v35 = vadd.f32 %v4615_v0, %v3227_v60  ;;  %3779 = vmatmul.msk.bf16.gmra.mxu3 %vm321_vm2, %v2657_v59 }
 0x25f   : > { %3813 = vmatmul.msk.bf16.gmra.mxu0 %vm321_vm2, %v2997_v30  ;;  %v2469_v54 = vpop.f32.mrf.mxu2 }
 0x260   : > { %v3375_v39 = vmax.f32 %v3339_v35, 0.0  ;;  %v2544_v41 = vadd.f32 %v2469_v54, %v2202_v58  ;;  %v2294_v54 = vld [vmem:[%s3941_s8 + $0x114] sm:$0xff] }
 0x261   : > { %v2129_v10 = vpop.f32.mrf.mxu1  ;;  %v4732_v38 = vpop.f32.mrf.mxu3 }
 0x262   : > { %3411 = vst [vmem:[%s4629_s22 + $0x48] sm:$0xff] %v3375_v39  ;;  %v2886_v26 = vadd.f32 %v4688_v46, %v2544_v41  ;;  %v2203_v52 = vadd.f32 %v2129_v10, %v4405_v18  ;;  %v2658_v18 = vpack.c.bf16 %v2639_v21, %v2638_v33  ;;  %v2295_v39 = vld [vmem:[%s3941_s8 + $0x11c] sm:$0xff] }
 0x263   : > { %v2978_v10 = vld [vmem:[%s3941_s8 + $0x116] sm:$0xff]  ;;  %v2315_v12 = vpack.c.bf16 %v2295_v39, %v2294_v54 }
 0x264   : > { %v3155_v20 = vpop.f32.mrf.mxu0  ;;  %v3228_v55 = vadd.f32 %v3153_v43, %v2886_v26  ;;  %v2979_v26 = vld [vmem:[%s3941_s8 + $0x11e] sm:$0xff] }
 0x266   : > { %v3340_v57 = vadd.f32 %v4615_v0, %v3228_v55 }
 0x267   : > { %v2471_v14 = vpop.f32.mrf.mxu2 }
 0x268   : > { %v3376_v7 = vmax.f32 %v3340_v57, 0.0  ;;  %v2545_v29 = vadd.f32 %v2471_v14, %v2203_v52  ;;  %v2999_v57 = vpack.c.bf16 %v2979_v26, %v2978_v10  ;;  %v2640_v52 = vld [vmem:[%s3941_s8 + $0x135] sm:$0xff] }
 0x269   : > { %v2132_v46 = vpop.f32.mrf.mxu1  ;;  %v4744_v49 = vpop.f32.mrf.mxu3 }
 0x26a   : > { %3412 = vst [vmem:[%s4629_s22 + $0x50] sm:$0xff] %v3376_v7  ;;  %v2887_v34 = vadd.f32 %v4700_v3, %v2545_v29  ;;  %v2204_v56 = vadd.f32 %v2132_v46, %v4411_v25 }
 0x26c   : > { %v3158_v50 = vpop.f32.mrf.mxu0  ;;  %v3229_v30 = vadd.f32 %v3155_v20, %v2887_v34  ;;  %3706 = vmatmul.msk.bf16.gmra.mxu1 %vm321_vm2, %v2313_v8  ;;  %3742 = vmatmul.msk.bf16.gmra.mxu2 %vm321_vm2, %v2314_v32 }
 0x26e   : > { %v3341_v63 = vadd.f32 %v4615_v0, %v3229_v30  ;;  %3780 = vmatmul.msk.bf16.gmra.mxu3 %vm321_vm2, %v2658_v18 }
 0x26f   : > { %3814 = vmatmul.msk.bf16.gmra.mxu0 %vm321_vm2, %v2998_v17  ;;  %v2474_v3 = vpop.f32.mrf.mxu2 }
 0x270   : > { %v3377_v11 = vmax.f32 %v3341_v63, 0.0  ;;  %v2546_v43 = vadd.f32 %v2474_v3, %v2204_v56  ;;  %v2296_v63 = vld [vmem:[%s3941_s8 + $0x124] sm:$0xff]  ;;  %v2297_v56 = vld [vmem:[%s3941_s8 + $0x12c] sm:$0xff] }
 0x271   : > { %v2134_v60 = vpop.f32.mrf.mxu1  ;;  %v4754_v35 = vpop.f32.mrf.mxu3 }
 0x272   : > { %3413 = vst [vmem:[%s4629_s22 + $0x58] sm:$0xff] %v3377_v11  ;;  %v2888_v8 = vadd.f32 %v4710_v24, %v2546_v43  ;;  %v2205_v41 = vadd.f32 %v2134_v60, %v4423_v40  ;;  %v2659_v40 = vpack.c.bf16 %v2641_v42, %v2640_v52  ;;  %v2980_v11 = vld [vmem:[%s3941_s8 + $0x126] sm:$0xff]  ;;  %v2981_v43 = vld [vmem:[%s3941_s8 + $0x12e] sm:$0xff] }
 0x273   : > { %v3000_v39 = vpack.c.bf16 %v2981_v43, %v2980_v11  ;;  %v2298_v42 = vld [vmem:[%s3941_s8 + $0x134] sm:$0xff] }
 0x274   : > { %v3160_v59 = vpop.f32.mrf.mxu0  ;;  %v3230_v58 = vadd.f32 %v3158_v50, %v2888_v8 }
 0x276   : > { %v3342_v25 = vadd.f32 %v4615_v0, %v3230_v58  ;;  %v2316_v58 = vpack.c.bf16 %v2297_v56, %v2296_v63 }
 0x277   : > { %v2476_v20 = vpop.f32.mrf.mxu2 }
 0x278   : > { %v3378_v55 = vmax.f32 %v3342_v25, 0.0  ;;  %v2547_v28 = vadd.f32 %v2476_v20, %v2205_v41 }
 0x279   : > { %v2137_v24 = vpop.f32.mrf.mxu1  ;;  %v2828_v7 = vpop.f32.mrf.mxu3 }
 0x27a   : > { %3414 = vst [vmem:[%s4629_s22 + $0x60] sm:$0xff] %v3378_v55  ;;  %v2889_v19 = vadd.f32 %v4722_v4, %v2547_v28  ;;  %v2206_v17 = vadd.f32 %v2137_v24, %v4428_v16 }
 0x27c   : > { %v3163_v14 = vpop.f32.mrf.mxu0  ;;  %v3231_v29 = vadd.f32 %v3160_v59, %v2889_v19  ;;  %3707 = vmatmul.msk.bf16.gmra.mxu1 %vm321_vm2, %v2314_v32  ;;  %3743 = vmatmul.msk.bf16.gmra.mxu2 %vm321_vm2, %v2315_v12  ;;  %v2299_v19 = vld [vmem:[%s3941_s8 + $0x13c] sm:$0xff] }
 0x27e   : > { %v3343_v46 = vadd.f32 %v4615_v0, %v3231_v29  ;;  %3781 = vmatmul.msk.bf16.gmra.mxu3 %vm321_vm2, %v2659_v40  ;;  %v2982_v40 = vld [vmem:[%s3941_s8 + $0x136] sm:$0xff] }
 0x27f   : > { %3815 = vmatmul.msk.bf16.gmra.mxu0 %vm321_vm2, %v2999_v57  ;;  %v2479_v33 = vpop.f32.mrf.mxu2 }
 0x280   : > { %v3379_v4 = vmax.f32 %v3343_v46, 0.0  ;;  %v2548_v21 = vadd.f32 %v2479_v33, %v2206_v17  ;;  %v2983_v46 = vld [vmem:[%s3941_s8 + $0x13e] sm:$0xff] }
 0x281   : > { %v2139_v34 = vpop.f32.mrf.mxu1  ;;  %v2831_v30 = vpop.f32.mrf.mxu3 }
 0x282   : > { %3415 = vst [vmem:[%s4629_s22 + $0x68] sm:$0xff] %v3379_v4  ;;  %v2890_v32 = vadd.f32 %v4732_v38, %v2548_v21  ;;  %v2207_v16 = vadd.f32 %v2139_v34, %v4440_v48  ;;  %v2317_v4 = vpack.c.bf16 %v2299_v19, %v2298_v42  ;;  %v3001_v34 = vpack.c.bf16 %v2983_v46, %v2982_v40 }
 0x284   : > { %v3165_v50 = vpop.f32.mrf.mxu0  ;;  %v3232_v18 = vadd.f32 %v3163_v14, %v2890_v32 }
 0x286   : > { %v3344_v3 = vadd.f32 %v4615_v0, %v3232_v18 }
 0x287   : > { %v2481_v60 = vpop.f32.mrf.mxu2 }
 0x288   : > { %v3380_v8 = vmax.f32 %v3344_v3, 0.0  ;;  %v2549_v59 = vadd.f32 %v2481_v60, %v2207_v16 }
 0x289   : > { %v2142_v54 = vpop.f32.mrf.mxu1  ;;  %v2833_v41 = vpop.f32.mrf.mxu3 }
 0x28a   : > { %3416 = vst [vmem:[%s4629_s22 + $0x70] sm:$0xff] %v3380_v8  ;;  %v2891_v38 = vadd.f32 %v4744_v49, %v2549_v59  ;;  %v2208_v26 = vadd.f32 %v2142_v54, %v4445_v47 }
 0x28c   : > { %v3168_v25 = vpop.f32.mrf.mxu0  ;;  %v3233_v10 = vadd.f32 %v3165_v50, %v2891_v38  ;;  %3708 = vmatmul.msk.bf16.gmra.mxu1 %vm321_vm2, %v2315_v12  ;;  %3744 = vmatmul.msk.bf16.gmra.mxu2 %vm321_vm2, %v2316_v58 }
 0x28e   : > { %v3345_v48 = vadd.f32 %v4615_v0, %v3233_v10 }
 0x28f   : > { %3816 = vmatmul.msk.bf16.gmra.mxu0 %vm321_vm2, %v3000_v39  ;;  %v2484_v20 = vpop.f32.mrf.mxu2 }
 0x290   : > { %v3381_v55 = vmax.f32 %v3345_v48, 0.0  ;;  %v2550_v49 = vadd.f32 %v2484_v20, %v2208_v26 }
 0x291   : > { %v2144_v28 = vpop.f32.mrf.mxu1  ;;  %v2836_v12 = vpop.f32.mrf.mxu3 }
 0x292   : > { %3417 = vst [vmem:[%s4629_s22 + $0x78] sm:$0xff] %v3381_v55  ;;  %v2892_v24 = vadd.f32 %v4754_v35, %v2550_v49  ;;  %v2209_v29 = vadd.f32 %v2144_v28, %v4457_v5 }
 0x294   : > { %v3170_v57 = vpop.f32.mrf.mxu0  ;;  %v3234_v52 = vadd.f32 %v3168_v25, %v2892_v24 }
 0x296   : > { %v3346_v14 = vadd.f32 %v4615_v0, %v3234_v52 }
 0x297   : > { %v2486_v47 = vpop.f32.mrf.mxu2 }
 0x298   : > { %v3382_v17 = vmax.f32 %v3346_v14, 0.0  ;;  %v2551_v33 = vadd.f32 %v2486_v47, %v2209_v29 }
 0x299   : > { %v2147_v21 = vpop.f32.mrf.mxu1  ;;  %v2838_v5 = vpop.f32.mrf.mxu3 }
 0x29a   : > { %3418 = vst [vmem:[%s4629_s22 + $0x80] sm:$0xff] %v3382_v17  ;;  %v2893_v35 = vadd.f32 %v2828_v7, %v2551_v33  ;;  %v2210_v63 = vadd.f32 %v2147_v21, %v4463_v36 }
 0x29c   : > { %v3173_v32 = vpop.f32.mrf.mxu0  ;;  %v3235_v50 = vadd.f32 %v3170_v57, %v2893_v35  ;;  %3709 = vmatmul.msk.bf16.gmra.mxu1 %vm321_vm2, %v2316_v58  ;;  %3745 = vmatmul.msk.bf16.gmra.mxu2 %vm321_vm2, %v2317_v4 }
 0x29e   : > { %v3347_v18 = vadd.f32 %v4615_v0, %v3235_v50 }
 0x29f   : > { %3817 = vmatmul.msk.bf16.gmra.mxu0 %vm321_vm2, %v3001_v34  ;;  %v2489_v56 = vpop.f32.mrf.mxu2 }
 0x2a0   : > { %v3383_v3 = vmax.f32 %v3347_v18, 0.0  ;;  %v2552_v16 = vadd.f32 %v2489_v56, %v2210_v63 }
 0x2a1   : > { %v2149_v11 = vpop.f32.mrf.mxu1  ;;  %v2841_v54 = vpop.f32.mrf.mxu3 }
 0x2a2   : > { %3419 = vst [vmem:[%s4629_s22 + $0x88] sm:$0xff] %v3383_v3  ;;  %v2894_v7 = vadd.f32 %v2831_v30, %v2552_v16  ;;  %v2211_v59 = vadd.f32 %v2149_v11, %v4475_v22 }
 0x2a4   : > { %v3175_v43 = vpop.f32.mrf.mxu0  ;;  %v3236_v60 = vadd.f32 %v3173_v32, %v2894_v7 }
 0x2a6   : > { %v3348_v8 = vadd.f32 %v4615_v0, %v3236_v60 }
 0x2a7   : > { %v2491_v58 = vpop.f32.mrf.mxu2 }
 0x2a8   : > { %v3384_v39 = vmax.f32 %v3348_v8, 0.0  ;;  %v2553_v38 = vadd.f32 %v2491_v58, %v2211_v59 }
 0x2a9   : > { %v2152_v25 = vpop.f32.mrf.mxu1  ;;  %v2843_v22 = vpop.f32.mrf.mxu3 }
 0x2aa   : > { %3420 = vst [vmem:[%s4629_s22 + $0x90] sm:$0xff] %v3384_v39  ;;  %v2895_v36 = vadd.f32 %v2833_v41, %v2553_v38  ;;  %v2212_v30 = vadd.f32 %v2152_v25, %v4480_v62 }
 0x2ac   : > { %v3178_v10 = vpop.f32.mrf.mxu0  ;;  %v3237_v48 = vadd.f32 %v3175_v43, %v2895_v36 }
 0x2ae   : > { %v3349_v26 = vadd.f32 %v4615_v0, %v3237_v48 }
 0x2af   : > { %v2494_v20 = vpop.f32.mrf.mxu2 }
 0x2b0   : > { %v3385_v55 = vmax.f32 %v3349_v26, 0.0  ;;  %v2554_v49 = vadd.f32 %v2494_v20, %v2212_v30 }
 0x2b1   : > { %v2154_v28 = vpop.f32.mrf.mxu1  ;;  %v2846_v47 = vpop.f32.mrf.mxu3 }
 0x2b2   : > { %3421 = vst [vmem:[%s4629_s22 + $0x98] sm:$0xff] %v3385_v55  ;;  %v2896_v24 = vadd.f32 %v2836_v12, %v2554_v49  ;;  %v2213_v41 = vadd.f32 %v2154_v28, %v4491_v15 }
 0x2b4   : > { %v3180_v57 = vpop.f32.mrf.mxu0  ;;  %v3238_v52 = vadd.f32 %v3178_v10, %v2896_v24 }
 0x2b6   : > { %v3350_v42 = vadd.f32 %v4615_v0, %v3238_v52 }
 0x2b7   : > { %v2496_v19 = vpop.f32.mrf.mxu2 }
 0x2b8   : > { %v3386_v14 = vmax.f32 %v3350_v42, 0.0  ;;  %v2555_v29 = vadd.f32 %v2496_v19, %v2213_v41 }
 0x2b9   : > { %v2157_v40 = vpop.f32.mrf.mxu1  ;;  %v2848_v18 = vpop.f32.mrf.mxu3 }
 0x2ba   : > { %3422 = vst [vmem:[%s4629_s22 + $0xa0] sm:$0xff] %v3386_v14  ;;  %v2897_v62 = vadd.f32 %v2838_v5, %v2555_v29  ;;  %v2214_v12 = vadd.f32 %v2157_v40, %v4496_v37 }
 0x2bc   : > { %v3183_v46 = vpop.f32.mrf.mxu0  ;;  %v3239_v17 = vadd.f32 %v3180_v57, %v2897_v62 }
 0x2be   : > { %v3351_v33 = vadd.f32 %v4615_v0, %v3239_v17 }
 0x2bf   : > { %v2499_v4 = vpop.f32.mrf.mxu2 }
 0x2c0   : > { %v3387_v21 = vmax.f32 %v3351_v33, 0.0  ;;  %v2556_v34 = vadd.f32 %v2499_v4, %v2214_v12 }
 0x2c1   : > { %v2159_v35 = vpop.f32.mrf.mxu1  ;;  %v2851_v58 = vpop.f32.mrf.mxu3 }
 0x2c2   : > { %3423 = vst [vmem:[%s4629_s22 + $0xa8] sm:$0xff] %v3387_v21  ;;  %v2898_v15 = vadd.f32 %v2841_v54, %v2556_v34  ;;  %v2215_v5 = vadd.f32 %v2159_v35, %v4507_v6 }
 0x2c4   : > { %v3185_v32 = vpop.f32.mrf.mxu0  ;;  %v3240_v50 = vadd.f32 %v3183_v46, %v2898_v15 }
 0x2c6   : > { %v3352_v63 = vadd.f32 %v4615_v0, %v3240_v50 }
 0x2c7   : > { %v2501_v56 = vpop.f32.mrf.mxu2 }
 0x2c8   : > { %v3388_v3 = vmax.f32 %v3352_v63, 0.0  ;;  %v2557_v16 = vadd.f32 %v2501_v56, %v2215_v5 }
 0x2c9   : > { %v2162_v11 = vpop.f32.mrf.mxu1 }
 0x2ca   : > { %3424 = vst [vmem:[%s4629_s22 + $0xb0] sm:$0xff] %v3388_v3  ;;  %v2899_v37 = vadd.f32 %v2843_v22, %v2557_v16  ;;  %v2216_v8 = vadd.f32 %v2162_v11, %v4512_v13  ;;  %v2853_v13 = vpop.f32.mrf.mxu3 }
 0x2cc   : > { %v3188_v7 = vpop.f32.mrf.mxu0  ;;  %v3241_v43 = vadd.f32 %v3185_v32, %v2899_v37 }
 0x2ce   : > { %v3353_v60 = vadd.f32 %v4615_v0, %v3241_v43 }
 0x2cf   : > { %v2504_v59 = vpop.f32.mrf.mxu2 }
 0x2d0   : > { %v3389_v54 = vmax.f32 %v3353_v60, 0.0  ;;  %v2558_v39 = vadd.f32 %v2504_v59, %v2216_v8 }
 0x2d1   : > { %v2164_v38 = vpop.f32.mrf.mxu1 }
 0x2d2   : > { %3425 = vst [vmem:[%s4629_s22 + $0xb8] sm:$0xff] %v3389_v54  ;;  %v2900_v6 = vadd.f32 %v2846_v47, %v2558_v39  ;;  %v2217_v48 = vadd.f32 %v2164_v38, %v4523_v44  ;;  %v2856_v29 = vpop.f32.mrf.mxu3 }
 0x2d4   : > { %v3190_v25 = vpop.f32.mrf.mxu0  ;;  %v3242_v36 = vadd.f32 %v3188_v7, %v2900_v6 }
 0x2d6   : > { %v3354_v10 = vadd.f32 %v4615_v0, %v3242_v36 }
 0x2d7   : > { %v2506_v26 = vpop.f32.mrf.mxu2 }
 0x2d8   : > { %v3390_v30 = vmax.f32 %v3354_v10, 0.0  ;;  %v2559_v20 = vadd.f32 %v2506_v26, %v2217_v48 }
 0x2d9   : > { %v2167_v55 = vpop.f32.mrf.mxu1 }
 0x2da   : > { %3426 = vst [vmem:[%s4629_s22 + $0xc0] sm:$0xff] %v3390_v30  ;;  %v2901_v49 = vadd.f32 %v2848_v18, %v2559_v20  ;;  %v2218_v57 = vadd.f32 %v2167_v55, %v4528_v27  ;;  %v2858_v34 = vpop.f32.mrf.mxu3 }
 0x2dc   : > { %v3193_v28 = vpop.f32.mrf.mxu0  ;;  %v3243_v22 = vadd.f32 %v3190_v25, %v2901_v49 }
 0x2de   : > { %v3355_v24 = vadd.f32 %v4615_v0, %v3243_v22 }
 0x2df   : > { %v2509_v52 = vpop.f32.mrf.mxu2 }
 0x2e0   : > { %v3391_v42 = vmax.f32 %v3355_v24, 0.0  ;;  %v2560_v41 = vadd.f32 %v2509_v52, %v2218_v57 }
 0x2e1   : > { %v2169_v19 = vpop.f32.mrf.mxu1 }
 0x2e2   : > { %3427 = vst [vmem:[%s4629_s22 + $0xc8] sm:$0xff] %v3391_v42  ;;  %v2902_v44 = vadd.f32 %v2851_v58, %v2560_v41  ;;  %v2219_v46 = vadd.f32 %v2169_v19, %v4539_v2  ;;  %v2861_v37 = vpop.f32.mrf.mxu3 }
 0x2e4   : > { %v3195_v14 = vpop.f32.mrf.mxu0  ;;  %v3244_v40 = vadd.f32 %v3193_v28, %v2902_v44 }
 0x2e6   : > { %v3356_v62 = vadd.f32 %v4615_v0, %v3244_v40 }
 0x2e7   : > { %v2511_v47 = vpop.f32.mrf.mxu2 }
 0x2e8   : > { %v3392_v17 = vmax.f32 %v3356_v62, 0.0  ;;  %v2561_v33 = vadd.f32 %v2511_v47, %v2219_v46 }
 0x2e9   : > { %v2172_v12 = vpop.f32.mrf.mxu1 }
 0x2ea   : > { %3428 = vst [vmem:[%s4629_s22 + $0xd0] sm:$0xff] %v3392_v17  ;;  %v2903_v27 = vadd.f32 %v2853_v13, %v2561_v33  ;;  %v2220_v15 = vadd.f32 %v2172_v12, %v4544_v61 }
 0x2ec   : > { %v3198_v4 = vpop.f32.mrf.mxu0  ;;  %v3245_v21 = vadd.f32 %v3195_v14, %v2903_v27 }
 0x2ee   : > { %v3357_v35 = vadd.f32 %v4615_v0, %v3245_v21 }
 0x2ef   : > { %v2514_v32 = vpop.f32.mrf.mxu2 }
 0x2f0   : > { %v3393_v50 = vmax.f32 %v3357_v35, 0.0  ;;  %v2562_v18 = vadd.f32 %v2514_v32, %v2220_v15 }
 0x2f1   : > { %v2174_v63 = vpop.f32.mrf.mxu1 }
 0x2f2   : > { %3429 = vst [vmem:[%s4629_s22 + $0xd8] sm:$0xff] %v3393_v50  ;;  %v2904_v2 = vadd.f32 %v2856_v29, %v2562_v18  ;;  %v2221_v16 = vadd.f32 %v2174_v63, %v4555_v9  ;;  %v2863_v9 = vpop.f32.mrf.mxu3 }
 0x2f4   : > { %v3200_v5 = vpop.f32.mrf.mxu0  ;;  %v3246_v56 = vadd.f32 %v3198_v4, %v2904_v2 }
 0x2f6   : > { %v3358_v3 = vadd.f32 %v4615_v0, %v3246_v56 }
 0x2f7   : > { %v2516_v11 = vpop.f32.mrf.mxu2 }
 0x2f8   : > { %v3394_v7 = vmax.f32 %v3358_v3, 0.0  ;;  %v2563_v43 = vadd.f32 %v2516_v11, %v2221_v16 }
 0x2f9   : > { %v2177_v60 = vpop.f32.mrf.mxu1 }
 0x2fa   : > { %3430 = vst [vmem:[%s4629_s22 + $0xe0] sm:$0xff] %v3394_v7  ;;  %v2905_v61 = vadd.f32 %v2858_v34, %v2563_v43  ;;  %v2222_v54 = vadd.f32 %v2177_v60, %v4560_v45  ;;  %v2866_v28 = vpop.f32.mrf.mxu3 }
 0x2fc   : > { %v3203_v8 = vpop.f32.mrf.mxu0  ;;  %v3247_v59 = vadd.f32 %v3200_v5, %v2905_v61 }
 0x2fe   : > { %v3359_v58 = vadd.f32 %v4615_v0, %v3247_v59 }
 0x2ff   : > { %v2519_v39 = vpop.f32.mrf.mxu2 }
 0x300   : > { %v3395_v38 = vmax.f32 %v3359_v58, 0.0  ;;  %v2564_v6 = vadd.f32 %v2519_v39, %v2222_v54 }
 0x301   : > { %v2179_v25 = vpop.f32.mrf.mxu1 }
 0x302   : > { %3431 = vst [vmem:[%s4629_s22 + $0xe8] sm:$0xff] %v3395_v38  ;;  %v2906_v36 = vadd.f32 %v2861_v37, %v2564_v6  ;;  %v2223_v30 = vadd.f32 %v2179_v25, %v4571_v1  ;;  %v2868_v29 = vpop.f32.mrf.mxu3 }
 0x304   : > { %v3205_v10 = vpop.f32.mrf.mxu0  ;;  %v3248_v48 = vadd.f32 %v3203_v8, %v2906_v36 }
 0x306   : > { %v3360_v26 = vadd.f32 %v4615_v0, %v3248_v48 }
 0x307   : > { %v2521_v20 = vpop.f32.mrf.mxu2 }
 0x308   : > { %v3396_v55 = vmax.f32 %v3360_v26, 0.0  ;;  %v2565_v13 = vadd.f32 %v2521_v20, %v2223_v30 }
 0x309   : > { %v2182_v49 = vpop.f32.mrf.mxu1 }
 0x30a   : > { %3432 = vst [vmem:[%s4629_s22 + $0xf0] sm:$0xff] %v3396_v55  ;;  %v2907_v45 = vadd.f32 %v2863_v9, %v2565_v13  ;;  %v2224_v52 = vadd.f32 %v2182_v49, %v4576_v31  ;;  %v2871_v34 = vpop.f32.mrf.mxu3 }
 0x30c   : > { %v3249_v22 = vadd.f32 %v3205_v10, %v2907_v45  ;;  %v3208_v24 = vpop.f32.mrf.mxu0 }
 0x30e   : > { %v3361_v57 = vadd.f32 %v4615_v0, %v3249_v22 }
 0x30f   : > { %v2524_v42 = vpop.f32.mrf.mxu2 }
 0x310   : > { %v3397_v41 = vmax.f32 %v3361_v57, 0.0  ;;  %v2566_v19 = vadd.f32 %v2524_v42, %v2224_v52 }
 0x311   : > { %v2184_v44 = vpop.f32.mrf.mxu1 }
 0x312   : > { %3433 = vst [vmem:[%s4629_s22 + $0xf8] sm:$0xff] %v3397_v41  ;;  %v2908_v1 = vadd.f32 %v2866_v28, %v2566_v19  ;;  %v2225_v62 = vadd.f32 %v2184_v44, %v4587_v53  ;;  %v2873_v11 = vpop.f32.mrf.mxu3 }
 0x314   : > { %v3250_v14 = vadd.f32 %v3208_v24, %v2908_v1  ;;  %v3210_v46 = vpop.f32.mrf.mxu0 }
 0x316   : > { %v3362_v40 = vadd.f32 %v4615_v0, %v3250_v14 }
 0x317   : > { %v2526_v47 = vpop.f32.mrf.mxu2 }
 0x318   : > { %v3398_v17 = vmax.f32 %v3362_v40, 0.0  ;;  %v2567_v33 = vadd.f32 %v2526_v47, %v2225_v62 }
 0x319   : > { %v2187_v12 = vpop.f32.mrf.mxu1 }
 0x31a   : > { %3434 = vst [vmem:[%s4629_s22 + $0x100] sm:$0xff] %v3398_v17  ;;  %v2909_v31 = vadd.f32 %v2868_v29, %v2567_v33  ;;  %v2226_v21 = vadd.f32 %v2187_v12, %v4594_v51 }
 0x31c   : > { %v3251_v27 = vadd.f32 %v3210_v46, %v2909_v31  ;;  %v3213_v50 = vpop.f32.mrf.mxu0 }
 0x31e   : > { %v3363_v4 = vadd.f32 %v4615_v0, %v3251_v27 }
 0x31f   : > { %v2529_v35 = vpop.f32.mrf.mxu2 }
 0x320   : > { %v3399_v15 = vmax.f32 %v3363_v4, 0.0  ;;  %v2568_v32 = vadd.f32 %v2529_v35, %v2226_v21 }
 0x321   : > { %v2189_v18 = vpop.f32.mrf.mxu1 }
 0x322   : > { %3435 = vst [vmem:[%s4629_s22 + $0x108] sm:$0xff] %v3399_v15  ;;  %v2910_v53 = vadd.f32 %v2871_v34, %v2568_v32  ;;  %v2227_v5 = vadd.f32 %v2189_v18, %v4607_v23 }
 0x324   : > { %v3252_v63 = vadd.f32 %v3213_v50, %v2910_v53  ;;  %v3215_v37 = vpop.f32.mrf.mxu0 }
 0x326   : > { %v3364_v2 = vadd.f32 %v4615_v0, %v3252_v63 }
 0x327   : > { %v2531_v56 = vpop.f32.mrf.mxu2 }
 0x328   : > { %v3400_v3 = vmax.f32 %v3364_v2, 0.0  ;;  %v2569_v16 = vadd.f32 %v2531_v56, %v2227_v5 }
 0x32a   : > { %3436 = vst [vmem:[%s4629_s22 + $0x110] sm:$0xff] %v3400_v3  ;;  %v2911_v51 = vadd.f32 %v2873_v11, %v2569_v16 }
 0x32c   : > { %v3253_v7 = vadd.f32 %v3215_v37, %v2911_v51 }
 0x32e   : > { %v3365_v43 = vadd.f32 %v4615_v0, %v3253_v7 }
 0x330   : > { %v3401_v60 = vmax.f32 %v3365_v43, 0.0 }
 0x332   : > { %3437 = vst [vmem:[%s4629_s22 + $0x118] sm:$0xff] %v3401_v60 }
 0x333 PF: > { %s13_s12 = sadd.s32 1, %s3874_s12  }
 0x334   : > { %p10_p4 = scmp.ge.s32.totalorder %s13_s12, 4  }
 0x336   :  { %12 = sbr.rel (!%p10_p4) target bundleno = 1 (0x1), region = 70 }

</bundles_post_ra>
